<compile_context>
chip_gen: v6e
topology: v6e:2x2x1
jax: 0.10.0
libtpu: 0.0.40
codegen_flags: <defaults>
</compile_context>

<pallas_src>
import functools

import jax
import jax.numpy as jnp
from jax.experimental import pallas as pl
from jax.experimental.pallas import tpu as pltpu


# --------------------------------------------------------------------------------------
# Small synthetic darknet cfg (replaces parse_model_config(cfg); same dict-of-strings form)
# --------------------------------------------------------------------------------------
ANCHORS = "10,13,16,30,33,23,30,61,62,45,59,119"

MODULE_CFG = [
    {"type": "convolutional", "filters": "8",  "size": "3", "stride": "1", "batch_normalize": "1", "activation": "leaky"},
    {"type": "convolutional", "filters": "16", "size": "3", "stride": "2", "batch_normalize": "1", "activation": "leaky"},
    {"type": "convolutional", "filters": "8",  "size": "1", "stride": "1", "batch_normalize": "1", "activation": "leaky"},
    {"type": "convolutional", "filters": "16", "size": "3", "stride": "1", "batch_normalize": "1", "activation": "leaky"},
    {"type": "shortcut", "from": "-3"},
    {"type": "convolutional", "filters": "32", "size": "3", "stride": "2", "batch_normalize": "1", "activation": "leaky"},
    {"type": "convolutional", "filters": "24", "size": "1", "stride": "1", "batch_normalize": "0", "activation": "linear"},
    {"type": "yolo", "mask": "0,1,2", "anchors": ANCHORS, "classes": "3", "ignore_thresh": "0.7"},
    {"type": "route", "layers": "-3"},
    {"type": "convolutional", "filters": "8",  "size": "1", "stride": "1", "batch_normalize": "1", "activation": "leaky"},
    {"type": "upsample", "stride": "2"},
    {"type": "route", "layers": "-1,-7"},
    {"type": "convolutional", "filters": "24", "size": "1", "stride": "1", "batch_normalize": "0", "activation": "linear"},
    {"type": "yolo", "mask": "3,4,5", "anchors": ANCHORS, "classes": "3", "ignore_thresh": "0.7"},
]

PARAM = {"batch": "2", "in_channels": "4", "in_width": "16", "in_height": "16", "classes": "3"}

BN_EPS = 1e-5
LEAKY_SLOPE = 0.01  # nn.LeakyReLU() default (matches the PyTorch reference)
LANE = 128          # TPU lane width; all HBM-resident channel dims are padded to this


def _round_up(x, m):
    return (x + m - 1) // m * m


def _pad_axis(a, axis, target):
    extra = target - a.shape[axis]
    if extra <= 0:
        return a
    widths = [(0, 0)] * a.ndim
    widths[axis] = (0, extra)
    return jnp.pad(a, widths)


@functools.lru_cache(maxsize=None)
def _vmem_limit_bytes():
    # Raise the VMEM budget on 128 MiB parts (v5e/v6e), stay tighter on 64 MiB v7x.
    try:
        cap = int(pltpu.get_tpu_info().vmem_capacity_bytes)
    except Exception:
        cap = 64 * 1024 * 1024
    return min(96 * 1024 * 1024, (cap * 3) // 4)


@functools.lru_cache(maxsize=None)
def _mxu_prefers_256():
    # v6e/v7x have 256-wide MXUs; v5e's 128x128 MXU gains nothing from 256-wide N tiles
    # and would just double the output / scratch VMEM pressure.
    try:
        version = str(pltpu.get_tpu_info().chip_version).lower()
        return not any(tag in version for tag in ("v5", "5e", "5p"))
    except Exception:
        return False


def _pick_cout_tile(cout_pad):
    if cout_pad % 256 == 0 and _mxu_prefers_256():
        return 256
    return 128


# --------------------------------------------------------------------------------------
# Pallas conv kernel: fused conv + folded-BN affine + activation (+ optional residual)
# --------------------------------------------------------------------------------------
def _conv_kernel(x_ref, w_ref, scale_ref, shift_ref, *refs,
                 stride, kh_taps, kw_taps, out_hw, cin_pad, act, has_residual):
    """One (batch, Cout-tile) output slab; grid = (batch, cout_tiles), no reduction axis.

      x_ref     (1, s*s, Hps, Wps, Cin_pad)  bf16  stride-phase view of the padded input
      w_ref     (KH*KW*Cin_pad, tile_co)     bf16  im2col-ordered weight matrix
      scale_ref (1, tile_co) f32, shift_ref (1, tile_co) f32  folded bias + BatchNorm
      res_ref   (1, Ho, Wo, tile_co) bf16   (only when has_residual)
      o_ref     (1, Ho, Wo, tile_co) bf16   lane-dense (tile_co is a multiple of 128)
      patch_ref (Ho, Wo, KH*KW*Cin_pad) bf16 VMEM scratch (only when KH*KW > 1)
    """
    if has_residual:
        res_ref, rest = refs[0], refs[1:]
    else:
        res_ref, rest = None, refs
    o_ref = rest[0]
    patch_ref = rest[1] if len(rest) > 1 else None

    Ho, Wo = out_hw
    s = stride
    n_taps = kh_taps * kw_taps
    tile_co = w_ref.shape[1]

    def tap_window(kh, kw):
        # Static slice of the (kh%s, kw%s) stride-phase slab; every tap window is a
        # contiguous (Ho, Wo, Cin_pad) block -- no strided loads.
        phase = (kh % s) * s + (kw % s)
        return x_ref[0, phase, pl.ds(kh // s, Ho), pl.ds(kw // s, Wo), :]

    if n_taps == 1:
        patch = tap_window(0, 0).reshape(Ho * Wo, cin_pad)
    else:
        # In-VMEM im2col: one lane-aligned (Cin_pad % 128 == 0) write per tap, then a
        # single leading-dim collapse; no per-tap reshape feeding the MXU.
        for kh in range(kh_taps):
            for kw in range(kw_taps):
                t = kh * kw_taps + kw
                patch_ref[:, :, t * cin_pad:(t + 1) * cin_pad] = tap_window(kh, kw)
        patch = patch_ref[...].reshape(Ho * Wo, n_taps * cin_pad)

    # Single MXU matmul over the whole KH*KW*Cin contraction, f32 accumulation.
    acc = jnp.dot(patch, w_ref[...], preferred_element_type=jnp.float32)

    # Folded conv-bias + BatchNorm affine, activation, optional fused residual add.
    y = acc * scale_ref[...] + shift_ref[...]
    if act == "leaky":
        y = jnp.maximum(y, LEAKY_SLOPE * y)          # mul+max (no cmp/select)
    elif act == "relu":
        y = jnp.maximum(y, 0.0)
    y = y.reshape(Ho, Wo, tile_co)
    if has_residual:
        y = y + res_ref[0].astype(jnp.float32)       # fused shortcut add
    o_ref[0] = y.astype(o_ref.dtype)


def pallas_conv(x, w, bias, bn, act, stride, pad, residual=None):
    """Conv2d(+BatchNorm)(+activation)(+optional fused residual add).

    x: (B, H, W, Cin_pad) bf16 NHWC, channels zero-padded to a multiple of 128 (real
    input channels = w.shape[1] live in the leading lanes).  Returns a lane-dense
    (B, Ho, Wo, Cout_pad) bf16 slab whose padded output channels are exactly zero.
    """
    B, H, W, Cin_pad = x.shape
    Cout, Cin, KH, KW = w.shape
    s = stride
    Ho = (H + 2 * pad - KH) // s + 1
    Wo = (W + 2 * pad - KW) // s + 1
    Cout_pad = _round_up(Cout, LANE)

    # Spatial zero-pad (channels stay trailing / lane-dense), rounded up to the stride.
    Hp = _round_up(max(H + 2 * pad, s * (Ho - 1) + KH), s)
    Wp = _round_up(max(W + 2 * pad, s * (Wo - 1) + KW), s)
    xp = jnp.pad(x.astype(jnp.bfloat16),
                 ((0, 0), (pad, Hp - H - pad), (pad, Wp - W - pad), (0, 0)))

    # Stride-phase (space-to-depth) view: every tap window becomes a contiguous slice.
    Hps, Wps = Hp // s, Wp // s
    xph = xp.reshape(B, Hps, s, Wps, s, Cin_pad).transpose(0, 2, 4, 1, 3, 5)
    xph = xph.reshape(B, s * s, Hps, Wps, Cin_pad)       # phase = h_phase*s + w_phase

    # PyTorch (Cout, Cin, KH, KW) -> im2col-ordered (KH*KW*Cin_pad, Cout_pad), bf16.
    # Zero-padded weight columns guarantee padded output channels stay exactly zero.
    wt = jnp.transpose(w, (2, 3, 1, 0))                  # (KH, KW, Cin, Cout)
    wt = _pad_axis(_pad_axis(wt, 2, Cin_pad), 3, Cout_pad)
    wt = wt.reshape(KH * KW * Cin_pad, Cout_pad).astype(jnp.bfloat16)

    # Fold conv bias + inference-mode BatchNorm into one per-channel f32 affine.
    if bn is not None:
        gamma, beta, mean, var = bn
        scale = gamma / jnp.sqrt(var + BN_EPS)
        shift = beta - mean * scale + bias * scale
    else:
        scale = jnp.ones((Cout,), jnp.float32)
        shift = bias.astype(jnp.float32)
    scale = _pad_axis(scale.reshape(1, Cout), 1, Cout_pad)
    shift = _pad_axis(shift.reshape(1, Cout), 1, Cout_pad)

    tile_co = _pick_cout_tile(Cout_pad)
    n_co = Cout_pad // tile_co

    kernel = functools.partial(
        _conv_kernel, stride=s, kh_taps=KH, kw_taps=KW, out_hw=(Ho, Wo),
        cin_pad=Cin_pad, act=act, has_residual=residual is not None)

    in_specs = [
        # Whole per-batch phase view; grid has no reduction axis so it is loaded once
        # per (batch, Cout-tile) step -- no stride-2 re-fetch across kernel rows.
        pl.BlockSpec((1, s * s, Hps, Wps, Cin_pad), lambda b, co: (b, 0, 0, 0, 0)),
        # Whole im2col weight matrix for this Cout tile (weights are tiny).
        pl.BlockSpec((KH * KW * Cin_pad, tile_co), lambda b, co: (0, co)),
        pl.BlockSpec((1, tile_co), lambda b, co: (0, co)),
        pl.BlockSpec((1, tile_co), lambda b, co: (0, co)),
    ]
    inputs = [xph, wt, scale, shift]
    if residual is not None:
        in_specs.append(pl.BlockSpec((1, Ho, Wo, tile_co), lambda b, co: (b, 0, 0, co)))
        inputs.append(residual.astype(jnp.bfloat16))

    scratch_shapes = []
    if KH * KW > 1:
        scratch_shapes.append(pltpu.VMEM((Ho, Wo, KH * KW * Cin_pad), jnp.bfloat16))

    flops = 2 * B * Ho * Wo * KH * KW * Cin_pad * Cout_pad
    bytes_accessed = (n_co * xph.size * 2                # activation slab per grid step
                      + B * wt.size * 2                  # weight tile per batch step
                      + B * Ho * Wo * Cout_pad * 2       # output
                      + B * n_co * 2 * Cout_pad * 4)     # scale + shift
    if residual is not None:
        bytes_accessed += B * Ho * Wo * Cout_pad * 2

    # TODO(synk): at real Darknet resolutions (e.g. 416^2) an additional parallel
    # output-row (Ho) grid axis with an input halo is needed to fit v7x's 64 MiB VMEM;
    # at these feature-map sizes the full-spatial working set is < 2 MiB, so it is omitted.
    return pl.pallas_call(
        kernel,
        out_shape=jax.ShapeDtypeStruct((B, Ho, Wo, Cout_pad), jnp.bfloat16),
        grid=(B, n_co),
        in_specs=in_specs,
        out_specs=pl.BlockSpec((1, Ho, Wo, tile_co), lambda b, co: (b, 0, 0, co)),
        scratch_shapes=scratch_shapes,
        compiler_params=pltpu.CompilerParams(
            dimension_semantics=("parallel", "parallel"),
            vmem_limit_bytes=_vmem_limit_bytes()),
        cost_estimate=pl.CostEstimate(
            flops=flops, transcendentals=0, bytes_accessed=bytes_accessed),
    )(*inputs)


# --------------------------------------------------------------------------------------
# Layout-glue layers (plain JAX; fused by XLA under jit)
# --------------------------------------------------------------------------------------
def upsample_nearest(x, scale):
    # nn.Upsample(scale_factor=scale, mode='nearest') on NHWC (padded lanes stay zero).
    return jnp.repeat(jnp.repeat(x, scale, axis=1), scale, axis=2)


def yolo_forward(x, n_classes, n_anchors):
    # NHWC equivalent of: view(-1, A, box, H, W).permute(0, 1, 3, 4, 2)
    B, H, W, C = x.shape
    box_attr = n_classes + 5
    x = x.reshape(B, H, W, n_anchors, box_attr)
    return jnp.transpose(x, (0, 3, 1, 2, 4)).astype(jnp.float32)


# --------------------------------------------------------------------------------------
# Shortcut-fusion planning (fuse residual add into the preceding conv when safe)
# --------------------------------------------------------------------------------------
def _layer_refs(cfg, j):
    """Absolute layer indices referenced by layer j via route/shortcut indices."""
    info = cfg[j]
    if info["type"] == "route":
        rs = [int(v) for v in info["layers"].split(",")]
    elif info["type"] == "shortcut":
        rs = [int(info["from"])]
    else:
        return []
    return [r if r >= 0 else j + r for r in rs]


def _plan_shortcut_fusion(cfg):
    """Shortcut layer indices whose residual add can be fused into the preceding conv."""
    fused = set()
    for j, info in enumerate(cfg):
        if info["type"] != "shortcut" or j == 0 or cfg[j - 1]["type"] != "convolutional":
            continue
        res_idx = _layer_refs(cfg, j)[0]
        if res_idx >= j - 1:                  # residual must predate the conv itself
            continue
        conv_idx = j - 1                      # fusing changes layer_result[conv_idx] ...
        if any(conv_idx in _layer_refs(cfg, k) for k in range(len(cfg)) if k != j):
            continue                          # ... so only fuse if nothing else reads it
        fused.add(j)
    return fused


# --------------------------------------------------------------------------------------
# Darknet53 (JAX/Pallas)
# --------------------------------------------------------------------------------------
class Darknet53Pallas:
    def __init__(self, cfg, param, key):
        self.module_cfg = cfg
        self.in_channels = int(param["in_channels"])
        self.n_classes = int(param["classes"])
        self.params = self._init_params(key)
        self.fused_shortcuts = _plan_shortcut_fusion(cfg)

    def _init_params(self, key):
        params = []
        in_channels = [self.in_channels]
        for info in self.module_cfg:
            t = info["type"]
            if t == "convolutional":
                cin = in_channels[-1]
                cout = int(info["filters"])
                k = int(info["size"])
                key, wk, bk = jax.random.split(key, 3)
                fan_in = cin * k * k
                bound = (6.0 / fan_in) ** 0.5  # kaiming-uniform style, deterministic
                w = jax.random.uniform(wk, (cout, cin, k, k), jnp.float32, -bound, bound)
                b = jax.random.uniform(bk, (cout,), jnp.float32, -0.1, 0.1)
                if info["batch_normalize"] == "1":
                    bn = (jnp.ones((cout,), jnp.float32),   # gamma
                          jnp.zeros((cout,), jnp.float32),  # beta
                          jnp.zeros((cout,), jnp.float32),  # running mean
                          jnp.ones((cout,), jnp.float32))   # running var
                else:
                    bn = None
                params.append({"w": w, "b": b, "bn": bn})
                in_channels.append(cout)
            elif t == "shortcut":
                params.append(None)
                in_channels.append(in_channels[-1])
            elif t == "route":
                params.append(None)
                layers = [int(y) for y in info["layers"].split(",")]
                if len(layers) == 1:
                    in_channels.append(in_channels[layers[0]])
                else:
                    in_channels.append(in_channels[layers[0]] + in_channels[layers[1]])
            elif t == "upsample":
                params.append(None)
                in_channels.append(in_channels[-1])
            elif t == "yolo":
                params.append(None)
                in_channels.append(in_channels[-1])
        return params

    def forward(self, x_nchw):
        # NCHW (PyTorch interface) -> NHWC with channels zero-padded to a lane multiple
        # so every conv reads/writes lane-dense 128-wide slabs (padding lanes stay 0,
        # real channels are sliced out only at route-concats and yolo heads).
        x = jnp.transpose(x_nchw, (0, 2, 3, 1)).astype(jnp.bfloat16)
        real_c = self.in_channels
        x = _pad_axis(x, 3, _round_up(real_c, LANE))

        yolo_result = []
        layer_result = []       # padded NHWC slabs (or yolo outputs)
        layer_channels = []     # real (unpadded) channel count of each entry
        fused_now = set()

        for idx, (info, p) in enumerate(zip(self.module_cfg, self.params)):
            t = info["type"]
            if t == "convolutional":
                size = int(info["size"])
                stride = int(info["stride"])
                pad = (size - 1) // 2
                residual = None
                if (idx + 1) in self.fused_shortcuts:
                    frm = int(self.module_cfg[idx + 1]["from"])
                    res_idx = (idx + 1) + frm if frm < 0 else frm
                    cand = layer_result[res_idx]
                    if cand.shape[-1] == _round_up(int(info["filters"]), LANE):
                        residual = cand
                        fused_now.add(idx + 1)
                x = pallas_conv(x, p["w"], p["b"], p["bn"], info["activation"],
                                stride, pad, residual=residual)
                real_c = int(info["filters"])
                layer_result.append(x)
                layer_channels.append(real_c)
            elif t == "shortcut":
                if idx not in fused_now:
                    x = x + layer_result[int(info["from"])]   # plain add; XLA fuses it
                layer_result.append(x)
                layer_channels.append(real_c)
            elif t == "yolo":
                n_anchors = len(info["mask"].split(","))
                yolo_x = yolo_forward(x[..., :real_c], self.n_classes, n_anchors)
                layer_result.append(yolo_x)
                layer_channels.append(real_c)
                yolo_result.append(yolo_x)
            elif t == "upsample":
                x = upsample_nearest(x, int(info["stride"]))
                layer_result.append(x)
                layer_channels.append(real_c)
            elif t == "route":
                layers = [int(y) for y in info["layers"].split(",")]
                if len(layers) == 1:
                    x = layer_result[layers[0]]
                    real_c = layer_channels[layers[0]]
                else:
                    parts = [layer_result[l][..., :layer_channels[l]] for l in layers]
                    real_c = sum(layer_channels[l] for l in layers)
                    x = _pad_axis(jnp.concatenate(parts, axis=-1), 3,
                                  _round_up(real_c, LANE))
                layer_result.append(x)
                layer_channels.append(real_c)
        return yolo_result


# --------------------------------------------------------------------------------------
if __name__ == "__main__":
    key = jax.random.PRNGKey(0)
    key, xkey, pkey = jax.random.split(key, 3)

    batch = int(PARAM["batch"])
    cin = int(PARAM["in_channels"])
    H = int(PARAM["in_height"])
    W = int(PARAM["in_width"])

    x = jax.random.normal(xkey, (batch, cin, H, W), jnp.float32)

    model = Darknet53Pallas(MODULE_CFG, PARAM, pkey)
    fwd = jax.jit(model.forward)
    outs = fwd(x)
    outs = [jax.block_until_ready(o) for o in outs]

    # Sanity: two yolo heads, (B, n_anchors, lh, lw, n_classes + 5)
    assert outs[0].shape == (batch, 3, 4, 4, 8), outs[0].shape
    assert outs[1].shape == (batch, 3, 8, 8, 8), outs[1].shape
    assert all(bool(jnp.all(jnp.isfinite(o))) for o in outs)

    # TODO(synk): BatchNorm is folded in inference mode (running stats); training-mode
    # batch statistics are not implemented in the kernel path.
    print("KERNEL_OK")
</pallas_src>

<mosaic_0001>
module attributes {stable_mosaic.version = 11 : i64} {
  func.func @_conv_kernel(%arg0: i32, %arg1: i32, %arg2: memref<1x1x18x18x128xbf16, #tpu.memory_space<vmem>>, %arg3: memref<1152x128xbf16, #tpu.memory_space<vmem>>, %arg4: memref<1x128xf32, #tpu.memory_space<vmem>>, %arg5: memref<1x128xf32, #tpu.memory_space<vmem>>, %arg6: memref<1x16x16x128xbf16, #tpu.memory_space<vmem>>, %arg7: memref<16x16x1152xbf16, #tpu.memory_space<vmem>>) attributes {dimension_semantics = [#tpu.dimension_semantics<parallel>, #tpu.dimension_semantics<parallel>], iteration_bounds = array<i64: 2, 1>, scalar_prefetch = 0 : i64, scratch_operands = 1 : i64, tpu.core_type = #tpu.core_type<tc>, window_params = [{transform_indices = @transform_0, window_bounds = array<i64: 1, 1, 18, 18, 128>}, {transform_indices = @transform_1, window_bounds = array<i64: 1152, 128>}, {transform_indices = @transform_2, window_bounds = array<i64: 1, 128>}, {transform_indices = @transform_3, window_bounds = array<i64: 1, 128>}, {transform_indices = @transform_4, window_bounds = array<i64: 1, 16, 16, 128>}]} {
    %c0 = arith.constant 0 : index
    %c0_0 = arith.constant 0 : index
    %c0_1 = arith.constant 0 : index
    %c0_2 = arith.constant 0 : index
    %c0_3 = arith.constant 0 : index
    %0 = vector.load %arg2[%c0, %c0_0, %c0_1, %c0_2, %c0_3] : memref<1x1x18x18x128xbf16, #tpu.memory_space<vmem>>, vector<1x1x16x16x128xbf16>
    %1 = vector.shape_cast %0 : vector<1x1x16x16x128xbf16> to vector<16x16x128xbf16>
    %c0_4 = arith.constant 0 : index
    %c0_5 = arith.constant 0 : index
    %c0_6 = arith.constant 0 : index
    %2 = vector.load %arg7[%c0_4, %c0_5, %c0_6] : memref<16x16x1152xbf16, #tpu.memory_space<vmem>>, vector<16x16x128xbf16>
    tpu.vector_store %arg7[%c0_4, %c0_5, %c0_6], %1 {strides = array<i32>} : memref<16x16x1152xbf16, #tpu.memory_space<vmem>>, vector<16x16x128xbf16>,
    %c0_7 = arith.constant 0 : index
    %c0_8 = arith.constant 0 : index
    %c0_9 = arith.constant 0 : index
    %c1 = arith.constant 1 : index
    %c0_10 = arith.constant 0 : index
    %3 = vector.load %arg2[%c0_7, %c0_8, %c0_9, %c1, %c0_10] : memref<1x1x18x18x128xbf16, #tpu.memory_space<vmem>>, vector<1x1x16x16x128xbf16>
    %4 = vector.shape_cast %3 : vector<1x1x16x16x128xbf16> to vector<16x16x128xbf16>
    %c0_11 = arith.constant 0 : index
    %c0_12 = arith.constant 0 : index
    %c128 = arith.constant 128 : index
    %5 = vector.load %arg7[%c0_11, %c0_12, %c128] : memref<16x16x1152xbf16, #tpu.memory_space<vmem>>, vector<16x16x128xbf16>
    tpu.vector_store %arg7[%c0_11, %c0_12, %c128], %4 {strides = array<i32>} : memref<16x16x1152xbf16, #tpu.memory_space<vmem>>, vector<16x16x128xbf16>,
    %c0_13 = arith.constant 0 : index
    %c0_14 = arith.constant 0 : index
    %c0_15 = arith.constant 0 : index
    %c2 = arith.constant 2 : index
    %c0_16 = arith.constant 0 : index
    %6 = vector.load %arg2[%c0_13, %c0_14, %c0_15, %c2, %c0_16] : memref<1x1x18x18x128xbf16, #tpu.memory_space<vmem>>, vector<1x1x16x16x128xbf16>
    %7 = vector.shape_cast %6 : vector<1x1x16x16x128xbf16> to vector<16x16x128xbf16>
    %c0_17 = arith.constant 0 : index
    %c0_18 = arith.constant 0 : index
    %c256 = arith.constant 256 : index
    %8 = vector.load %arg7[%c0_17, %c0_18, %c256] : memref<16x16x1152xbf16, #tpu.memory_space<vmem>>, vector<16x16x128xbf16>
    tpu.vector_store %arg7[%c0_17, %c0_18, %c256], %7 {strides = array<i32>} : memref<16x16x1152xbf16, #tpu.memory_space<vmem>>, vector<16x16x128xbf16>,
    %c0_19 = arith.constant 0 : index
    %c0_20 = arith.constant 0 : index
    %c1_21 = arith.constant 1 : index
    %c0_22 = arith.constant 0 : index
    %c0_23 = arith.constant 0 : index
    %9 = vector.load %arg2[%c0_19, %c0_20, %c1_21, %c0_22, %c0_23] : memref<1x1x18x18x128xbf16, #tpu.memory_space<vmem>>, vector<1x1x16x16x128xbf16>
    %10 = vector.shape_cast %9 : vector<1x1x16x16x128xbf16> to vector<16x16x128xbf16>
    %c0_24 = arith.constant 0 : index
    %c0_25 = arith.constant 0 : index
    %c384 = arith.constant 384 : index
    %11 = vector.load %arg7[%c0_24, %c0_25, %c384] : memref<16x16x1152xbf16, #tpu.memory_space<vmem>>, vector<16x16x128xbf16>
    tpu.vector_store %arg7[%c0_24, %c0_25, %c384], %10 {strides = array<i32>} : memref<16x16x1152xbf16, #tpu.memory_space<vmem>>, vector<16x16x128xbf16>,
    %c0_26 = arith.constant 0 : index
    %c0_27 = arith.constant 0 : index
    %c1_28 = arith.constant 1 : index
    %c1_29 = arith.constant 1 : index
    %c0_30 = arith.constant 0 : index
    %12 = vector.load %arg2[%c0_26, %c0_27, %c1_28, %c1_29, %c0_30] : memref<1x1x18x18x128xbf16, #tpu.memory_space<vmem>>, vector<1x1x16x16x128xbf16>
    %13 = vector.shape_cast %12 : vector<1x1x16x16x128xbf16> to vector<16x16x128xbf16>
    %c0_31 = arith.constant 0 : index
    %c0_32 = arith.constant 0 : index
    %c512 = arith.constant 512 : index
    %14 = vector.load %arg7[%c0_31, %c0_32, %c512] : memref<16x16x1152xbf16, #tpu.memory_space<vmem>>, vector<16x16x128xbf16>
    tpu.vector_store %arg7[%c0_31, %c0_32, %c512], %13 {strides = array<i32>} : memref<16x16x1152xbf16, #tpu.memory_space<vmem>>, vector<16x16x128xbf16>,
    %c0_33 = arith.constant 0 : index
    %c0_34 = arith.constant 0 : index
    %c1_35 = arith.constant 1 : index
    %c2_36 = arith.constant 2 : index
    %c0_37 = arith.constant 0 : index
    %15 = vector.load %arg2[%c0_33, %c0_34, %c1_35, %c2_36, %c0_37] : memref<1x1x18x18x128xbf16, #tpu.memory_space<vmem>>, vector<1x1x16x16x128xbf16>
    %16 = vector.shape_cast %15 : vector<1x1x16x16x128xbf16> to vector<16x16x128xbf16>
    %c0_38 = arith.constant 0 : index
    %c0_39 = arith.constant 0 : index
    %c640 = arith.constant 640 : index
    %17 = vector.load %arg7[%c0_38, %c0_39, %c640] : memref<16x16x1152xbf16, #tpu.memory_space<vmem>>, vector<16x16x128xbf16>
    tpu.vector_store %arg7[%c0_38, %c0_39, %c640], %16 {strides = array<i32>} : memref<16x16x1152xbf16, #tpu.memory_space<vmem>>, vector<16x16x128xbf16>,
    %c0_40 = arith.constant 0 : index
    %c0_41 = arith.constant 0 : index
    %c2_42 = arith.constant 2 : index
    %c0_43 = arith.constant 0 : index
    %c0_44 = arith.constant 0 : index
    %18 = vector.load %arg2[%c0_40, %c0_41, %c2_42, %c0_43, %c0_44] : memref<1x1x18x18x128xbf16, #tpu.memory_space<vmem>>, vector<1x1x16x16x128xbf16>
    %19 = vector.shape_cast %18 : vector<1x1x16x16x128xbf16> to vector<16x16x128xbf16>
    %c0_45 = arith.constant 0 : index
    %c0_46 = arith.constant 0 : index
    %c768 = arith.constant 768 : index
    %20 = vector.load %arg7[%c0_45, %c0_46, %c768] : memref<16x16x1152xbf16, #tpu.memory_space<vmem>>, vector<16x16x128xbf16>
    tpu.vector_store %arg7[%c0_45, %c0_46, %c768], %19 {strides = array<i32>} : memref<16x16x1152xbf16, #tpu.memory_space<vmem>>, vector<16x16x128xbf16>,
    %c0_47 = arith.constant 0 : index
    %c0_48 = arith.constant 0 : index
    %c2_49 = arith.constant 2 : index
    %c1_50 = arith.constant 1 : index
    %c0_51 = arith.constant 0 : index
    %21 = vector.load %arg2[%c0_47, %c0_48, %c2_49, %c1_50, %c0_51] : memref<1x1x18x18x128xbf16, #tpu.memory_space<vmem>>, vector<1x1x16x16x128xbf16>
    %22 = vector.shape_cast %21 : vector<1x1x16x16x128xbf16> to vector<16x16x128xbf16>
    %c0_52 = arith.constant 0 : index
    %c0_53 = arith.constant 0 : index
    %c896 = arith.constant 896 : index
    %23 = vector.load %arg7[%c0_52, %c0_53, %c896] : memref<16x16x1152xbf16, #tpu.memory_space<vmem>>, vector<16x16x128xbf16>
    tpu.vector_store %arg7[%c0_52, %c0_53, %c896], %22 {strides = array<i32>} : memref<16x16x1152xbf16, #tpu.memory_space<vmem>>, vector<16x16x128xbf16>,
    %c0_54 = arith.constant 0 : index
    %c0_55 = arith.constant 0 : index
    %c2_56 = arith.constant 2 : index
    %c2_57 = arith.constant 2 : index
    %c0_58 = arith.constant 0 : index
    %24 = vector.load %arg2[%c0_54, %c0_55, %c2_56, %c2_57, %c0_58] : memref<1x1x18x18x128xbf16, #tpu.memory_space<vmem>>, vector<1x1x16x16x128xbf16>
    %25 = vector.shape_cast %24 : vector<1x1x16x16x128xbf16> to vector<16x16x128xbf16>
    %c0_59 = arith.constant 0 : index
    %c0_60 = arith.constant 0 : index
    %c1024 = arith.constant 1024 : index
    %26 = vector.load %arg7[%c0_59, %c0_60, %c1024] : memref<16x16x1152xbf16, #tpu.memory_space<vmem>>, vector<16x16x128xbf16>
    tpu.vector_store %arg7[%c0_59, %c0_60, %c1024], %25 {strides = array<i32>} : memref<16x16x1152xbf16, #tpu.memory_space<vmem>>, vector<16x16x128xbf16>,
    %c0_61 = arith.constant 0 : index
    %c0_62 = arith.constant 0 : index
    %c0_63 = arith.constant 0 : index
    %27 = vector.load %arg7[%c0_61, %c0_62, %c0_63] : memref<16x16x1152xbf16, #tpu.memory_space<vmem>>, vector<16x16x1152xbf16>
    %28 = vector.shape_cast %27 : vector<16x16x1152xbf16> to vector<256x1152xbf16>
    %c0_64 = arith.constant 0 : index
    %c0_65 = arith.constant 0 : index
    %29 = vector.load %arg3[%c0_64, %c0_65] : memref<1152x128xbf16, #tpu.memory_space<vmem>>, vector<1152x128xbf16>
    %cst = arith.constant dense<0.000000e+00> : vector<256x128xf32>
    %30 = tpu.matmul %28, %29, %cst {dimension_numbers = #tpu.dot_dimension_numbers<[1], [0], [0], [1], [0, 0, 1, 1], [], []>} : vector<256x1152xbf16>, vector<1152x128xbf16>, vector<256x128xf32> -> vector<256x128xf32>
    %c0_66 = arith.constant 0 : index
    %c0_67 = arith.constant 0 : index
    %31 = vector.load %arg4[%c0_66, %c0_67] : memref<1x128xf32, #tpu.memory_space<vmem>>, vector<1x128xf32>
    %32 = vector.broadcast %31 : vector<1x128xf32> to vector<256x128xf32>
    %33 = arith.mulf %30, %32 : vector<256x128xf32>
    %c0_68 = arith.constant 0 : index
    %c0_69 = arith.constant 0 : index
    %34 = vector.load %arg5[%c0_68, %c0_69] : memref<1x128xf32, #tpu.memory_space<vmem>>, vector<1x128xf32>
    %35 = vector.broadcast %34 : vector<1x128xf32> to vector<256x128xf32>
    %36 = arith.addf %33, %35 : vector<256x128xf32>
    %cst_70 = arith.constant 0.00999999977 : f32
    %37 = vector.broadcast %cst_70 : f32 to vector<256x128xf32>
    %38 = arith.mulf %37, %36 : vector<256x128xf32>
    %39 = arith.maximumf %36, %38 : vector<256x128xf32>
    %40 = vector.shape_cast %39 : vector<256x128xf32> to vector<16x16x128xf32>
    %41 = arith.truncf %40 : vector<16x16x128xf32> to vector<16x16x128xbf16>
    %c0_71 = arith.constant 0 : index
    %c0_72 = arith.constant 0 : index
    %c0_73 = arith.constant 0 : index
    %c0_74 = arith.constant 0 : index
    %42 = vector.load %arg6[%c0_71, %c0_72, %c0_73, %c0_74] : memref<1x16x16x128xbf16, #tpu.memory_space<vmem>>, vector<1x16x16x128xbf16>
    %43 = vector.shape_cast %42 : vector<1x16x16x128xbf16> to vector<16x16x128xbf16>
    %44 = vector.shape_cast %41 : vector<16x16x128xbf16> to vector<1x16x16x128xbf16>
    tpu.vector_store %arg6[%c0_71, %c0_72, %c0_73, %c0_74], %44 {strides = array<i32>} : memref<1x16x16x128xbf16, #tpu.memory_space<vmem>>, vector<1x16x16x128xbf16>,
    return
  }
  func.func @transform_0(%arg0: i32, %arg1: i32) -> (i32, i32, i32, i32, i32) {
    %c0_i32 = arith.constant 0 : i32
    %c0_i32_0 = arith.constant 0 : i32
    %c0_i32_1 = arith.constant 0 : i32
    %c0_i32_2 = arith.constant 0 : i32
    %c0_i32_3 = arith.constant 0 : i32
    return %arg0, %c0_i32, %c0_i32_0, %c0_i32_1, %c0_i32_2 : i32, i32, i32, i32, i32
  }
  func.func @transform_1(%arg0: i32, %arg1: i32) -> (i32, i32) {
    %c0_i32 = arith.constant 0 : i32
    %c0_i32_0 = arith.constant 0 : i32
    return %c0_i32, %arg1 : i32, i32
  }
  func.func @transform_2(%arg0: i32, %arg1: i32) -> (i32, i32) {
    %c0_i32 = arith.constant 0 : i32
    %c0_i32_0 = arith.constant 0 : i32
    return %c0_i32, %arg1 : i32, i32
  }
  func.func @transform_3(%arg0: i32, %arg1: i32) -> (i32, i32) {
    %c0_i32 = arith.constant 0 : i32
    %c0_i32_0 = arith.constant 0 : i32
    return %c0_i32, %arg1 : i32, i32
  }
  func.func @transform_4(%arg0: i32, %arg1: i32) -> (i32, i32, i32, i32) {
    %c0_i32 = arith.constant 0 : i32
    %c0_i32_0 = arith.constant 0 : i32
    %c0_i32_1 = arith.constant 0 : i32
    return %arg0, %c0_i32, %c0_i32_0, %arg1 : i32, i32, i32, i32
  }
}

module attributes {stable_mosaic.version = 11 : i64} {
  func.func @_conv_kernel(%arg0: i32, %arg1: i32, %arg2: memref<1x4x9x9x128xbf16, #tpu.memory_space<vmem>>, %arg3: memref<1152x128xbf16, #tpu.memory_space<vmem>>, %arg4: memref<1x128xf32, #tpu.memory_space<vmem>>, %arg5: memref<1x128xf32, #tpu.memory_space<vmem>>, %arg6: memref<1x8x8x128xbf16, #tpu.memory_space<vmem>>, %arg7: memref<8x8x1152xbf16, #tpu.memory_space<vmem>>) attributes {dimension_semantics = [#tpu.dimension_semantics<parallel>, #tpu.dimension_semantics<parallel>], iteration_bounds = array<i64: 2, 1>, scalar_prefetch = 0 : i64, scratch_operands = 1 : i64, tpu.core_type = #tpu.core_type<tc>, window_params = [{transform_indices = @transform_0, window_bounds = array<i64: 1, 4, 9, 9, 128>}, {transform_indices = @transform_1, window_bounds = array<i64: 1152, 128>}, {transform_indices = @transform_2, window_bounds = array<i64: 1, 128>}, {transform_indices = @transform_3, window_bounds = array<i64: 1, 128>}, {transform_indices = @transform_4, window_bounds = array<i64: 1, 8, 8, 128>}]} {
    %c0 = arith.constant 0 : index
    %c0_0 = arith.constant 0 : index
    %c0_1 = arith.constant 0 : index
    %c0_2 = arith.constant 0 : index
    %c0_3 = arith.constant 0 : index
    %0 = vector.load %arg2[%c0, %c0_0, %c0_1, %c0_2, %c0_3] : memref<1x4x9x9x128xbf16, #tpu.memory_space<vmem>>, vector<1x1x8x8x128xbf16>
    %1 = vector.shape_cast %0 : vector<1x1x8x8x128xbf16> to vector<8x8x128xbf16>
    %c0_4 = arith.constant 0 : index
    %c0_5 = arith.constant 0 : index
    %c0_6 = arith.constant 0 : index
    %2 = vector.load %arg7[%c0_4, %c0_5, %c0_6] : memref<8x8x1152xbf16, #tpu.memory_space<vmem>>, vector<8x8x128xbf16>
    tpu.vector_store %arg7[%c0_4, %c0_5, %c0_6], %1 {strides = array<i32>} : memref<8x8x1152xbf16, #tpu.memory_space<vmem>>, vector<8x8x128xbf16>,
    %c0_7 = arith.constant 0 : index
    %c1 = arith.constant 1 : index
    %c0_8 = arith.constant 0 : index
    %c0_9 = arith.constant 0 : index
    %c0_10 = arith.constant 0 : index
    %3 = vector.load %arg2[%c0_7, %c1, %c0_8, %c0_9, %c0_10] : memref<1x4x9x9x128xbf16, #tpu.memory_space<vmem>>, vector<1x1x8x8x128xbf16>
    %4 = vector.shape_cast %3 : vector<1x1x8x8x128xbf16> to vector<8x8x128xbf16>
    %c0_11 = arith.constant 0 : index
    %c0_12 = arith.constant 0 : index
    %c128 = arith.constant 128 : index
    %5 = vector.load %arg7[%c0_11, %c0_12, %c128] : memref<8x8x1152xbf16, #tpu.memory_space<vmem>>, vector<8x8x128xbf16>
    tpu.vector_store %arg7[%c0_11, %c0_12, %c128], %4 {strides = array<i32>} : memref<8x8x1152xbf16, #tpu.memory_space<vmem>>, vector<8x8x128xbf16>,
    %c0_13 = arith.constant 0 : index
    %c0_14 = arith.constant 0 : index
    %c0_15 = arith.constant 0 : index
    %c1_16 = arith.constant 1 : index
    %c0_17 = arith.constant 0 : index
    %6 = vector.load %arg2[%c0_13, %c0_14, %c0_15, %c1_16, %c0_17] : memref<1x4x9x9x128xbf16, #tpu.memory_space<vmem>>, vector<1x1x8x8x128xbf16>
    %7 = vector.shape_cast %6 : vector<1x1x8x8x128xbf16> to vector<8x8x128xbf16>
    %c0_18 = arith.constant 0 : index
    %c0_19 = arith.constant 0 : index
    %c256 = arith.constant 256 : index
    %8 = vector.load %arg7[%c0_18, %c0_19, %c256] : memref<8x8x1152xbf16, #tpu.memory_space<vmem>>, vector<8x8x128xbf16>
    tpu.vector_store %arg7[%c0_18, %c0_19, %c256], %7 {strides = array<i32>} : memref<8x8x1152xbf16, #tpu.memory_space<vmem>>, vector<8x8x128xbf16>,
    %c0_20 = arith.constant 0 : index
    %c2 = arith.constant 2 : index
    %c0_21 = arith.constant 0 : index
    %c0_22 = arith.constant 0 : index
    %c0_23 = arith.constant 0 : index
    %9 = vector.load %arg2[%c0_20, %c2, %c0_21, %c0_22, %c0_23] : memref<1x4x9x9x128xbf16, #tpu.memory_space<vmem>>, vector<1x1x8x8x128xbf16>
    %10 = vector.shape_cast %9 : vector<1x1x8x8x128xbf16> to vector<8x8x128xbf16>
    %c0_24 = arith.constant 0 : index
    %c0_25 = arith.constant 0 : index
    %c384 = arith.constant 384 : index
    %11 = vector.load %arg7[%c0_24, %c0_25, %c384] : memref<8x8x1152xbf16, #tpu.memory_space<vmem>>, vector<8x8x128xbf16>
    tpu.vector_store %arg7[%c0_24, %c0_25, %c384], %10 {strides = array<i32>} : memref<8x8x1152xbf16, #tpu.memory_space<vmem>>, vector<8x8x128xbf16>,
    %c0_26 = arith.constant 0 : index
    %c3 = arith.constant 3 : index
    %c0_27 = arith.constant 0 : index
    %c0_28 = arith.constant 0 : index
    %c0_29 = arith.constant 0 : index
    %12 = vector.load %arg2[%c0_26, %c3, %c0_27, %c0_28, %c0_29] : memref<1x4x9x9x128xbf16, #tpu.memory_space<vmem>>, vector<1x1x8x8x128xbf16>
    %13 = vector.shape_cast %12 : vector<1x1x8x8x128xbf16> to vector<8x8x128xbf16>
    %c0_30 = arith.constant 0 : index
    %c0_31 = arith.constant 0 : index
    %c512 = arith.constant 512 : index
    %14 = vector.load %arg7[%c0_30, %c0_31, %c512] : memref<8x8x1152xbf16, #tpu.memory_space<vmem>>, vector<8x8x128xbf16>
    tpu.vector_store %arg7[%c0_30, %c0_31, %c512], %13 {strides = array<i32>} : memref<8x8x1152xbf16, #tpu.memory_space<vmem>>, vector<8x8x128xbf16>,
    %c0_32 = arith.constant 0 : index
    %c2_33 = arith.constant 2 : index
    %c0_34 = arith.constant 0 : index
    %c1_35 = arith.constant 1 : index
    %c0_36 = arith.constant 0 : index
    %15 = vector.load %arg2[%c0_32, %c2_33, %c0_34, %c1_35, %c0_36] : memref<1x4x9x9x128xbf16, #tpu.memory_space<vmem>>, vector<1x1x8x8x128xbf16>
    %16 = vector.shape_cast %15 : vector<1x1x8x8x128xbf16> to vector<8x8x128xbf16>
    %c0_37 = arith.constant 0 : index
    %c0_38 = arith.constant 0 : index
    %c640 = arith.constant 640 : index
    %17 = vector.load %arg7[%c0_37, %c0_38, %c640] : memref<8x8x1152xbf16, #tpu.memory_space<vmem>>, vector<8x8x128xbf16>
    tpu.vector_store %arg7[%c0_37, %c0_38, %c640], %16 {strides = array<i32>} : memref<8x8x1152xbf16, #tpu.memory_space<vmem>>, vector<8x8x128xbf16>,
    %c0_39 = arith.constant 0 : index
    %c0_40 = arith.constant 0 : index
    %c1_41 = arith.constant 1 : index
    %c0_42 = arith.constant 0 : index
    %c0_43 = arith.constant 0 : index
    %18 = vector.load %arg2[%c0_39, %c0_40, %c1_41, %c0_42, %c0_43] : memref<1x4x9x9x128xbf16, #tpu.memory_space<vmem>>, vector<1x1x8x8x128xbf16>
    %19 = vector.shape_cast %18 : vector<1x1x8x8x128xbf16> to vector<8x8x128xbf16>
    %c0_44 = arith.constant 0 : index
    %c0_45 = arith.constant 0 : index
    %c768 = arith.constant 768 : index
    %20 = vector.load %arg7[%c0_44, %c0_45, %c768] : memref<8x8x1152xbf16, #tpu.memory_space<vmem>>, vector<8x8x128xbf16>
    tpu.vector_store %arg7[%c0_44, %c0_45, %c768], %19 {strides = array<i32>} : memref<8x8x1152xbf16, #tpu.memory_space<vmem>>, vector<8x8x128xbf16>,
    %c0_46 = arith.constant 0 : index
    %c1_47 = arith.constant 1 : index
    %c1_48 = arith.constant 1 : index
    %c0_49 = arith.constant 0 : index
    %c0_50 = arith.constant 0 : index
    %21 = vector.load %arg2[%c0_46, %c1_47, %c1_48, %c0_49, %c0_50] : memref<1x4x9x9x128xbf16, #tpu.memory_space<vmem>>, vector<1x1x8x8x128xbf16>
    %22 = vector.shape_cast %21 : vector<1x1x8x8x128xbf16> to vector<8x8x128xbf16>
    %c0_51 = arith.constant 0 : index
    %c0_52 = arith.constant 0 : index
    %c896 = arith.constant 896 : index
    %23 = vector.load %arg7[%c0_51, %c0_52, %c896] : memref<8x8x1152xbf16, #tpu.memory_space<vmem>>, vector<8x8x128xbf16>
    tpu.vector_store %arg7[%c0_51, %c0_52, %c896], %22 {strides = array<i32>} : memref<8x8x1152xbf16, #tpu.memory_space<vmem>>, vector<8x8x128xbf16>,
    %c0_53 = arith.constant 0 : index
    %c0_54 = arith.constant 0 : index
    %c1_55 = arith.constant 1 : index
    %c1_56 = arith.constant 1 : index
    %c0_57 = arith.constant 0 : index
    %24 = vector.load %arg2[%c0_53, %c0_54, %c1_55, %c1_56, %c0_57] : memref<1x4x9x9x128xbf16, #tpu.memory_space<vmem>>, vector<1x1x8x8x128xbf16>
    %25 = vector.shape_cast %24 : vector<1x1x8x8x128xbf16> to vector<8x8x128xbf16>
    %c0_58 = arith.constant 0 : index
    %c0_59 = arith.constant 0 : index
    %c1024 = arith.constant 1024 : index
    %26 = vector.load %arg7[%c0_58, %c0_59, %c1024] : memref<8x8x1152xbf16, #tpu.memory_space<vmem>>, vector<8x8x128xbf16>
    tpu.vector_store %arg7[%c0_58, %c0_59, %c1024], %25 {strides = array<i32>} : memref<8x8x1152xbf16, #tpu.memory_space<vmem>>, vector<8x8x128xbf16>,
    %c0_60 = arith.constant 0 : index
    %c0_61 = arith.constant 0 : index
    %c0_62 = arith.constant 0 : index
    %27 = vector.load %arg7[%c0_60, %c0_61, %c0_62] : memref<8x8x1152xbf16, #tpu.memory_space<vmem>>, vector<8x8x1152xbf16>
    %28 = vector.shape_cast %27 : vector<8x8x1152xbf16> to vector<64x1152xbf16>
    %c0_63 = arith.constant 0 : index
    %c0_64 = arith.constant 0 : index
    %29 = vector.load %arg3[%c0_63, %c0_64] : memref<1152x128xbf16, #tpu.memory_space<vmem>>, vector<1152x128xbf16>
    %cst = arith.constant dense<0.000000e+00> : vector<64x128xf32>
    %30 = tpu.matmul %28, %29, %cst {dimension_numbers = #tpu.dot_dimension_numbers<[1], [0], [0], [1], [0, 0, 1, 1], [], []>} : vector<64x1152xbf16>, vector<1152x128xbf16>, vector<64x128xf32> -> vector<64x128xf32>
    %c0_65 = arith.constant 0 : index
    %c0_66 = arith.constant 0 : index
    %31 = vector.load %arg4[%c0_65, %c0_66] : memref<1x128xf32, #tpu.memory_space<vmem>>, vector<1x128xf32>
    %32 = vector.broadcast %31 : vector<1x128xf32> to vector<64x128xf32>
    %33 = arith.mulf %30, %32 : vector<64x128xf32>
    %c0_67 = arith.constant 0 : index
    %c0_68 = arith.constant 0 : index
    %34 = vector.load %arg5[%c0_67, %c0_68] : memref<1x128xf32, #tpu.memory_space<vmem>>, vector<1x128xf32>
    %35 = vector.broadcast %34 : vector<1x128xf32> to vector<64x128xf32>
    %36 = arith.addf %33, %35 : vector<64x128xf32>
    %cst_69 = arith.constant 0.00999999977 : f32
    %37 = vector.broadcast %cst_69 : f32 to vector<64x128xf32>
    %38 = arith.mulf %37, %36 : vector<64x128xf32>
    %39 = arith.maximumf %36, %38 : vector<64x128xf32>
    %40 = vector.shape_cast %39 : vector<64x128xf32> to vector<8x8x128xf32>
    %41 = arith.truncf %40 : vector<8x8x128xf32> to vector<8x8x128xbf16>
    %c0_70 = arith.constant 0 : index
    %c0_71 = arith.constant 0 : index
    %c0_72 = arith.constant 0 : index
    %c0_73 = arith.constant 0 : index
    %42 = vector.load %arg6[%c0_70, %c0_71, %c0_72, %c0_73] : memref<1x8x8x128xbf16, #tpu.memory_space<vmem>>, vector<1x8x8x128xbf16>
    %43 = vector.shape_cast %42 : vector<1x8x8x128xbf16> to vector<8x8x128xbf16>
    %44 = vector.shape_cast %41 : vector<8x8x128xbf16> to vector<1x8x8x128xbf16>
    tpu.vector_store %arg6[%c0_70, %c0_71, %c0_72, %c0_73], %44 {strides = array<i32>} : memref<1x8x8x128xbf16, #tpu.memory_space<vmem>>, vector<1x8x8x128xbf16>,
    return
  }
  func.func @transform_0(%arg0: i32, %arg1: i32) -> (i32, i32, i32, i32, i32) {
    %c0_i32 = arith.constant 0 : i32
    %c0_i32_0 = arith.constant 0 : i32
    %c0_i32_1 = arith.constant 0 : i32
    %c0_i32_2 = arith.constant 0 : i32
    %c0_i32_3 = arith.constant 0 : i32
    return %arg0, %c0_i32, %c0_i32_0, %c0_i32_1, %c0_i32_2 : i32, i32, i32, i32, i32
  }
  func.func @transform_1(%arg0: i32, %arg1: i32) -> (i32, i32) {
    %c0_i32 = arith.constant 0 : i32
    %c0_i32_0 = arith.constant 0 : i32
    return %c0_i32, %arg1 : i32, i32
  }
  func.func @transform_2(%arg0: i32, %arg1: i32) -> (i32, i32) {
    %c0_i32 = arith.constant 0 : i32
    %c0_i32_0 = arith.constant 0 : i32
    return %c0_i32, %arg1 : i32, i32
  }
  func.func @transform_3(%arg0: i32, %arg1: i32) -> (i32, i32) {
    %c0_i32 = arith.constant 0 : i32
    %c0_i32_0 = arith.constant 0 : i32
    return %c0_i32, %arg1 : i32, i32
  }
  func.func @transform_4(%arg0: i32, %arg1: i32) -> (i32, i32, i32, i32) {
    %c0_i32 = arith.constant 0 : i32
    %c0_i32_0 = arith.constant 0 : i32
    %c0_i32_1 = arith.constant 0 : i32
    return %arg0, %c0_i32, %c0_i32_0, %arg1 : i32, i32, i32, i32
  }
}

module attributes {stable_mosaic.version = 11 : i64} {
  func.func @_conv_kernel(%arg0: i32, %arg1: i32, %arg2: memref<1x1x10x10x128xbf16, #tpu.memory_space<vmem>>, %arg3: memref<1152x128xbf16, #tpu.memory_space<vmem>>, %arg4: memref<1x128xf32, #tpu.memory_space<vmem>>, %arg5: memref<1x128xf32, #tpu.memory_space<vmem>>, %arg6: memref<1x8x8x128xbf16, #tpu.memory_space<vmem>>, %arg7: memref<1x8x8x128xbf16, #tpu.memory_space<vmem>>, %arg8: memref<8x8x1152xbf16, #tpu.memory_space<vmem>>) attributes {dimension_semantics = [#tpu.dimension_semantics<parallel>, #tpu.dimension_semantics<parallel>], iteration_bounds = array<i64: 2, 1>, scalar_prefetch = 0 : i64, scratch_operands = 1 : i64, tpu.core_type = #tpu.core_type<tc>, window_params = [{transform_indices = @transform_0, window_bounds = array<i64: 1, 1, 10, 10, 128>}, {transform_indices = @transform_1, window_bounds = array<i64: 1152, 128>}, {transform_indices = @transform_2, window_bounds = array<i64: 1, 128>}, {transform_indices = @transform_3, window_bounds = array<i64: 1, 128>}, {transform_indices = @transform_4, window_bounds = array<i64: 1, 8, 8, 128>}, {transform_indices = @transform_5, window_bounds = array<i64: 1, 8, 8, 128>}]} {
    %c0 = arith.constant 0 : index
    %c0_0 = arith.constant 0 : index
    %c0_1 = arith.constant 0 : index
    %c0_2 = arith.constant 0 : index
    %c0_3 = arith.constant 0 : index
    %0 = vector.load %arg2[%c0, %c0_0, %c0_1, %c0_2, %c0_3] : memref<1x1x10x10x128xbf16, #tpu.memory_space<vmem>>, vector<1x1x8x8x128xbf16>
    %1 = vector.shape_cast %0 : vector<1x1x8x8x128xbf16> to vector<8x8x128xbf16>
    %c0_4 = arith.constant 0 : index
    %c0_5 = arith.constant 0 : index
    %c0_6 = arith.constant 0 : index
    %2 = vector.load %arg8[%c0_4, %c0_5, %c0_6] : memref<8x8x1152xbf16, #tpu.memory_space<vmem>>, vector<8x8x128xbf16>
    tpu.vector_store %arg8[%c0_4, %c0_5, %c0_6], %1 {strides = array<i32>} : memref<8x8x1152xbf16, #tpu.memory_space<vmem>>, vector<8x8x128xbf16>,
    %c0_7 = arith.constant 0 : index
    %c0_8 = arith.constant 0 : index
    %c0_9 = arith.constant 0 : index
    %c1 = arith.constant 1 : index
    %c0_10 = arith.constant 0 : index
    %3 = vector.load %arg2[%c0_7, %c0_8, %c0_9, %c1, %c0_10] : memref<1x1x10x10x128xbf16, #tpu.memory_space<vmem>>, vector<1x1x8x8x128xbf16>
    %4 = vector.shape_cast %3 : vector<1x1x8x8x128xbf16> to vector<8x8x128xbf16>
    %c0_11 = arith.constant 0 : index
    %c0_12 = arith.constant 0 : index
    %c128 = arith.constant 128 : index
    %5 = vector.load %arg8[%c0_11, %c0_12, %c128] : memref<8x8x1152xbf16, #tpu.memory_space<vmem>>, vector<8x8x128xbf16>
    tpu.vector_store %arg8[%c0_11, %c0_12, %c128], %4 {strides = array<i32>} : memref<8x8x1152xbf16, #tpu.memory_space<vmem>>, vector<8x8x128xbf16>,
    %c0_13 = arith.constant 0 : index
    %c0_14 = arith.constant 0 : index
    %c0_15 = arith.constant 0 : index
    %c2 = arith.constant 2 : index
    %c0_16 = arith.constant 0 : index
    %6 = vector.load %arg2[%c0_13, %c0_14, %c0_15, %c2, %c0_16] : memref<1x1x10x10x128xbf16, #tpu.memory_space<vmem>>, vector<1x1x8x8x128xbf16>
    %7 = vector.shape_cast %6 : vector<1x1x8x8x128xbf16> to vector<8x8x128xbf16>
    %c0_17 = arith.constant 0 : index
    %c0_18 = arith.constant 0 : index
    %c256 = arith.constant 256 : index
    %8 = vector.load %arg8[%c0_17, %c0_18, %c256] : memref<8x8x1152xbf16, #tpu.memory_space<vmem>>, vector<8x8x128xbf16>
    tpu.vector_store %arg8[%c0_17, %c0_18, %c256], %7 {strides = array<i32>} : memref<8x8x1152xbf16, #tpu.memory_space<vmem>>, vector<8x8x128xbf16>,
    %c0_19 = arith.constant 0 : index
    %c0_20 = arith.constant 0 : index
    %c1_21 = arith.constant 1 : index
    %c0_22 = arith.constant 0 : index
    %c0_23 = arith.constant 0 : index
    %9 = vector.load %arg2[%c0_19, %c0_20, %c1_21, %c0_22, %c0_23] : memref<1x1x10x10x128xbf16, #tpu.memory_space<vmem>>, vector<1x1x8x8x128xbf16>
    %10 = vector.shape_cast %9 : vector<1x1x8x8x128xbf16> to vector<8x8x128xbf16>
    %c0_24 = arith.constant 0 : index
    %c0_25 = arith.constant 0 : index
    %c384 = arith.constant 384 : index
    %11 = vector.load %arg8[%c0_24, %c0_25, %c384] : memref<8x8x1152xbf16, #tpu.memory_space<vmem>>, vector<8x8x128xbf16>
    tpu.vector_store %arg8[%c0_24, %c0_25, %c384], %10 {strides = array<i32>} : memref<8x8x1152xbf16, #tpu.memory_space<vmem>>, vector<8x8x128xbf16>,
    %c0_26 = arith.constant 0 : index
    %c0_27 = arith.constant 0 : index
    %c1_28 = arith.constant 1 : index
    %c1_29 = arith.constant 1 : index
    %c0_30 = arith.constant 0 : index
    %12 = vector.load %arg2[%c0_26, %c0_27, %c1_28, %c1_29, %c0_30] : memref<1x1x10x10x128xbf16, #tpu.memory_space<vmem>>, vector<1x1x8x8x128xbf16>
    %13 = vector.shape_cast %12 : vector<1x1x8x8x128xbf16> to vector<8x8x128xbf16>
    %c0_31 = arith.constant 0 : index
    %c0_32 = arith.constant 0 : index
    %c512 = arith.constant 512 : index
    %14 = vector.load %arg8[%c0_31, %c0_32, %c512] : memref<8x8x1152xbf16, #tpu.memory_space<vmem>>, vector<8x8x128xbf16>
    tpu.vector_store %arg8[%c0_31, %c0_32, %c512], %13 {strides = array<i32>} : memref<8x8x1152xbf16, #tpu.memory_space<vmem>>, vector<8x8x128xbf16>,
    %c0_33 = arith.constant 0 : index
    %c0_34 = arith.constant 0 : index
    %c1_35 = arith.constant 1 : index
    %c2_36 = arith.constant 2 : index
    %c0_37 = arith.constant 0 : index
    %15 = vector.load %arg2[%c0_33, %c0_34, %c1_35, %c2_36, %c0_37] : memref<1x1x10x10x128xbf16, #tpu.memory_space<vmem>>, vector<1x1x8x8x128xbf16>
    %16 = vector.shape_cast %15 : vector<1x1x8x8x128xbf16> to vector<8x8x128xbf16>
    %c0_38 = arith.constant 0 : index
    %c0_39 = arith.constant 0 : index
    %c640 = arith.constant 640 : index
    %17 = vector.load %arg8[%c0_38, %c0_39, %c640] : memref<8x8x1152xbf16, #tpu.memory_space<vmem>>, vector<8x8x128xbf16>
    tpu.vector_store %arg8[%c0_38, %c0_39, %c640], %16 {strides = array<i32>} : memref<8x8x1152xbf16, #tpu.memory_space<vmem>>, vector<8x8x128xbf16>,
    %c0_40 = arith.constant 0 : index
    %c0_41 = arith.constant 0 : index
    %c2_42 = arith.constant 2 : index
    %c0_43 = arith.constant 0 : index
    %c0_44 = arith.constant 0 : index
    %18 = vector.load %arg2[%c0_40, %c0_41, %c2_42, %c0_43, %c0_44] : memref<1x1x10x10x128xbf16, #tpu.memory_space<vmem>>, vector<1x1x8x8x128xbf16>
    %19 = vector.shape_cast %18 : vector<1x1x8x8x128xbf16> to vector<8x8x128xbf16>
    %c0_45 = arith.constant 0 : index
    %c0_46 = arith.constant 0 : index
    %c768 = arith.constant 768 : index
    %20 = vector.load %arg8[%c0_45, %c0_46, %c768] : memref<8x8x1152xbf16, #tpu.memory_space<vmem>>, vector<8x8x128xbf16>
    tpu.vector_store %arg8[%c0_45, %c0_46, %c768], %19 {strides = array<i32>} : memref<8x8x1152xbf16, #tpu.memory_space<vmem>>, vector<8x8x128xbf16>,
    %c0_47 = arith.constant 0 : index
    %c0_48 = arith.constant 0 : index
    %c2_49 = arith.constant 2 : index
    %c1_50 = arith.constant 1 : index
    %c0_51 = arith.constant 0 : index
    %21 = vector.load %arg2[%c0_47, %c0_48, %c2_49, %c1_50, %c0_51] : memref<1x1x10x10x128xbf16, #tpu.memory_space<vmem>>, vector<1x1x8x8x128xbf16>
    %22 = vector.shape_cast %21 : vector<1x1x8x8x128xbf16> to vector<8x8x128xbf16>
    %c0_52 = arith.constant 0 : index
    %c0_53 = arith.constant 0 : index
    %c896 = arith.constant 896 : index
    %23 = vector.load %arg8[%c0_52, %c0_53, %c896] : memref<8x8x1152xbf16, #tpu.memory_space<vmem>>, vector<8x8x128xbf16>
    tpu.vector_store %arg8[%c0_52, %c0_53, %c896], %22 {strides = array<i32>} : memref<8x8x1152xbf16, #tpu.memory_space<vmem>>, vector<8x8x128xbf16>,
    %c0_54 = arith.constant 0 : index
    %c0_55 = arith.constant 0 : index
    %c2_56 = arith.constant 2 : index
    %c2_57 = arith.constant 2 : index
    %c0_58 = arith.constant 0 : index
    %24 = vector.load %arg2[%c0_54, %c0_55, %c2_56, %c2_57, %c0_58] : memref<1x1x10x10x128xbf16, #tpu.memory_space<vmem>>, vector<1x1x8x8x128xbf16>
    %25 = vector.shape_cast %24 : vector<1x1x8x8x128xbf16> to vector<8x8x128xbf16>
    %c0_59 = arith.constant 0 : index
    %c0_60 = arith.constant 0 : index
    %c1024 = arith.constant 1024 : index
    %26 = vector.load %arg8[%c0_59, %c0_60, %c1024] : memref<8x8x1152xbf16, #tpu.memory_space<vmem>>, vector<8x8x128xbf16>
    tpu.vector_store %arg8[%c0_59, %c0_60, %c1024], %25 {strides = array<i32>} : memref<8x8x1152xbf16, #tpu.memory_space<vmem>>, vector<8x8x128xbf16>,
    %c0_61 = arith.constant 0 : index
    %c0_62 = arith.constant 0 : index
    %c0_63 = arith.constant 0 : index
    %27 = vector.load %arg8[%c0_61, %c0_62, %c0_63] : memref<8x8x1152xbf16, #tpu.memory_space<vmem>>, vector<8x8x1152xbf16>
    %28 = vector.shape_cast %27 : vector<8x8x1152xbf16> to vector<64x1152xbf16>
    %c0_64 = arith.constant 0 : index
    %c0_65 = arith.constant 0 : index
    %29 = vector.load %arg3[%c0_64, %c0_65] : memref<1152x128xbf16, #tpu.memory_space<vmem>>, vector<1152x128xbf16>
    %cst = arith.constant dense<0.000000e+00> : vector<64x128xf32>
    %30 = tpu.matmul %28, %29, %cst {dimension_numbers = #tpu.dot_dimension_numbers<[1], [0], [0], [1], [0, 0, 1, 1], [], []>} : vector<64x1152xbf16>, vector<1152x128xbf16>, vector<64x128xf32> -> vector<64x128xf32>
    %c0_66 = arith.constant 0 : index
    %c0_67 = arith.constant 0 : index
    %31 = vector.load %arg4[%c0_66, %c0_67] : memref<1x128xf32, #tpu.memory_space<vmem>>, vector<1x128xf32>
    %32 = vector.broadcast %31 : vector<1x128xf32> to vector<64x128xf32>
    %33 = arith.mulf %30, %32 : vector<64x128xf32>
    %c0_68 = arith.constant 0 : index
    %c0_69 = arith.constant 0 : index
    %34 = vector.load %arg5[%c0_68, %c0_69] : memref<1x128xf32, #tpu.memory_space<vmem>>, vector<1x128xf32>
    %35 = vector.broadcast %34 : vector<1x128xf32> to vector<64x128xf32>
    %36 = arith.addf %33, %35 : vector<64x128xf32>
    %cst_70 = arith.constant 0.00999999977 : f32
    %37 = vector.broadcast %cst_70 : f32 to vector<64x128xf32>
    %38 = arith.mulf %37, %36 : vector<64x128xf32>
    %39 = arith.maximumf %36, %38 : vector<64x128xf32>
    %40 = vector.shape_cast %39 : vector<64x128xf32> to vector<8x8x128xf32>
    %c0_71 = arith.constant 0 : index
    %c0_72 = arith.constant 0 : index
    %c0_73 = arith.constant 0 : index
    %c0_74 = arith.constant 0 : index
    %41 = vector.load %arg6[%c0_71, %c0_72, %c0_73, %c0_74] : memref<1x8x8x128xbf16, #tpu.memory_space<vmem>>, vector<1x8x8x128xbf16>
    %42 = vector.shape_cast %41 : vector<1x8x8x128xbf16> to vector<8x8x128xbf16>
    %43 = arith.extf %42 : vector<8x8x128xbf16> to vector<8x8x128xf32>
    %44 = arith.addf %40, %43 : vector<8x8x128xf32>
    %45 = arith.truncf %44 : vector<8x8x128xf32> to vector<8x8x128xbf16>
    %c0_75 = arith.constant 0 : index
    %c0_76 = arith.constant 0 : index
    %c0_77 = arith.constant 0 : index
    %c0_78 = arith.constant 0 : index
    %46 = vector.load %arg7[%c0_75, %c0_76, %c0_77, %c0_78] : memref<1x8x8x128xbf16, #tpu.memory_space<vmem>>, vector<1x8x8x128xbf16>
    %47 = vector.shape_cast %46 : vector<1x8x8x128xbf16> to vector<8x8x128xbf16>
    %48 = vector.shape_cast %45 : vector<8x8x128xbf16> to vector<1x8x8x128xbf16>
    tpu.vector_store %arg7[%c0_75, %c0_76, %c0_77, %c0_78], %48 {strides = array<i32>} : memref<1x8x8x128xbf16, #tpu.memory_space<vmem>>, vector<1x8x8x128xbf16>,
    return
  }
  func.func @transform_0(%arg0: i32, %arg1: i32) -> (i32, i32, i32, i32, i32) {
    %c0_i32 = arith.constant 0 : i32
    %c0_i32_0 = arith.constant 0 : i32
    %c0_i32_1 = arith.constant 0 : i32
    %c0_i32_2 = arith.constant 0 : i32
    %c0_i32_3 = arith.constant 0 : i32
    return %arg0, %c0_i32, %c0_i32_0, %c0_i32_1, %c0_i32_2 : i32, i32, i32, i32, i32
  }
  func.func @transform_1(%arg0: i32, %arg1: i32) -> (i32, i32) {
    %c0_i32 = arith.constant 0 : i32
    %c0_i32_0 = arith.constant 0 : i32
    return %c0_i32, %arg1 : i32, i32
  }
  func.func @transform_2(%arg0: i32, %arg1: i32) -> (i32, i32) {
    %c0_i32 = arith.constant 0 : i32
    %c0_i32_0 = arith.constant 0 : i32
    return %c0_i32, %arg1 : i32, i32
  }
  func.func @transform_3(%arg0: i32, %arg1: i32) -> (i32, i32) {
    %c0_i32 = arith.constant 0 : i32
    %c0_i32_0 = arith.constant 0 : i32
    return %c0_i32, %arg1 : i32, i32
  }
  func.func @transform_4(%arg0: i32, %arg1: i32) -> (i32, i32, i32, i32) {
    %c0_i32 = arith.constant 0 : i32
    %c0_i32_0 = arith.constant 0 : i32
    %c0_i32_1 = arith.constant 0 : i32
    return %arg0, %c0_i32, %c0_i32_0, %arg1 : i32, i32, i32, i32
  }
  func.func @transform_5(%arg0: i32, %arg1: i32) -> (i32, i32, i32, i32) {
    %c0_i32 = arith.constant 0 : i32
    %c0_i32_0 = arith.constant 0 : i32
    %c0_i32_1 = arith.constant 0 : i32
    return %arg0, %c0_i32, %c0_i32_0, %arg1 : i32, i32, i32, i32
  }
}

module attributes {stable_mosaic.version = 11 : i64} {
  func.func @_conv_kernel(%arg0: i32, %arg1: i32, %arg2: memref<1x1x8x8x128xbf16, #tpu.memory_space<vmem>>, %arg3: memref<128x128xbf16, #tpu.memory_space<vmem>>, %arg4: memref<1x128xf32, #tpu.memory_space<vmem>>, %arg5: memref<1x128xf32, #tpu.memory_space<vmem>>, %arg6: memref<1x8x8x128xbf16, #tpu.memory_space<vmem>>) attributes {dimension_semantics = [#tpu.dimension_semantics<parallel>, #tpu.dimension_semantics<parallel>], iteration_bounds = array<i64: 2, 1>, scalar_prefetch = 0 : i64, scratch_operands = 0 : i64, tpu.core_type = #tpu.core_type<tc>, window_params = [{transform_indices = @transform_0, window_bounds = array<i64: 1, 1, 8, 8, 128>}, {transform_indices = @transform_1, window_bounds = array<i64: 128, 128>}, {transform_indices = @transform_2, window_bounds = array<i64: 1, 128>}, {transform_indices = @transform_3, window_bounds = array<i64: 1, 128>}, {transform_indices = @transform_4, window_bounds = array<i64: 1, 8, 8, 128>}]} {
    %c0 = arith.constant 0 : index
    %c0_0 = arith.constant 0 : index
    %c0_1 = arith.constant 0 : index
    %c0_2 = arith.constant 0 : index
    %c0_3 = arith.constant 0 : index
    %0 = vector.load %arg2[%c0, %c0_0, %c0_1, %c0_2, %c0_3] : memref<1x1x8x8x128xbf16, #tpu.memory_space<vmem>>, vector<1x1x8x8x128xbf16>
    %1 = vector.shape_cast %0 : vector<1x1x8x8x128xbf16> to vector<8x8x128xbf16>
    %2 = vector.shape_cast %1 : vector<8x8x128xbf16> to vector<64x128xbf16>
    %c0_4 = arith.constant 0 : index
    %c0_5 = arith.constant 0 : index
    %3 = vector.load %arg3[%c0_4, %c0_5] : memref<128x128xbf16, #tpu.memory_space<vmem>>, vector<128x128xbf16>
    %cst = arith.constant dense<0.000000e+00> : vector<64x128xf32>
    %4 = tpu.matmul %2, %3, %cst {dimension_numbers = #tpu.dot_dimension_numbers<[1], [0], [0], [1], [0, 0, 1, 1], [], []>} : vector<64x128xbf16>, vector<128x128xbf16>, vector<64x128xf32> -> vector<64x128xf32>
    %c0_6 = arith.constant 0 : index
    %c0_7 = arith.constant 0 : index
    %5 = vector.load %arg4[%c0_6, %c0_7] : memref<1x128xf32, #tpu.memory_space<vmem>>, vector<1x128xf32>
    %6 = vector.broadcast %5 : vector<1x128xf32> to vector<64x128xf32>
    %7 = arith.mulf %4, %6 : vector<64x128xf32>
    %c0_8 = arith.constant 0 : index
    %c0_9 = arith.constant 0 : index
    %8 = vector.load %arg5[%c0_8, %c0_9] : memref<1x128xf32, #tpu.memory_space<vmem>>, vector<1x128xf32>
    %9 = vector.broadcast %8 : vector<1x128xf32> to vector<64x128xf32>
    %10 = arith.addf %7, %9 : vector<64x128xf32>
    %cst_10 = arith.constant 0.00999999977 : f32
    %11 = vector.broadcast %cst_10 : f32 to vector<64x128xf32>
    %12 = arith.mulf %11, %10 : vector<64x128xf32>
    %13 = arith.maximumf %10, %12 : vector<64x128xf32>
    %14 = vector.shape_cast %13 : vector<64x128xf32> to vector<8x8x128xf32>
    %15 = arith.truncf %14 : vector<8x8x128xf32> to vector<8x8x128xbf16>
    %c0_11 = arith.constant 0 : index
    %c0_12 = arith.constant 0 : index
    %c0_13 = arith.constant 0 : index
    %c0_14 = arith.constant 0 : index
    %16 = vector.load %arg6[%c0_11, %c0_12, %c0_13, %c0_14] : memref<1x8x8x128xbf16, #tpu.memory_space<vmem>>, vector<1x8x8x128xbf16>
    %17 = vector.shape_cast %16 : vector<1x8x8x128xbf16> to vector<8x8x128xbf16>
    %18 = vector.shape_cast %15 : vector<8x8x128xbf16> to vector<1x8x8x128xbf16>
    tpu.vector_store %arg6[%c0_11, %c0_12, %c0_13, %c0_14], %18 {strides = array<i32>} : memref<1x8x8x128xbf16, #tpu.memory_space<vmem>>, vector<1x8x8x128xbf16>,
    return
  }
  func.func @transform_0(%arg0: i32, %arg1: i32) -> (i32, i32, i32, i32, i32) {
    %c0_i32 = arith.constant 0 : i32
    %c0_i32_0 = arith.constant 0 : i32
    %c0_i32_1 = arith.constant 0 : i32
    %c0_i32_2 = arith.constant 0 : i32
    %c0_i32_3 = arith.constant 0 : i32
    return %arg0, %c0_i32, %c0_i32_0, %c0_i32_1, %c0_i32_2 : i32, i32, i32, i32, i32
  }
  func.func @transform_1(%arg0: i32, %arg1: i32) -> (i32, i32) {
    %c0_i32 = arith.constant 0 : i32
    %c0_i32_0 = arith.constant 0 : i32
    return %c0_i32, %arg1 : i32, i32
  }
  func.func @transform_2(%arg0: i32, %arg1: i32) -> (i32, i32) {
    %c0_i32 = arith.constant 0 : i32
    %c0_i32_0 = arith.constant 0 : i32
    return %c0_i32, %arg1 : i32, i32
  }
  func.func @transform_3(%arg0: i32, %arg1: i32) -> (i32, i32) {
    %c0_i32 = arith.constant 0 : i32
    %c0_i32_0 = arith.constant 0 : i32
    return %c0_i32, %arg1 : i32, i32
  }
  func.func @transform_4(%arg0: i32, %arg1: i32) -> (i32, i32, i32, i32) {
    %c0_i32 = arith.constant 0 : i32
    %c0_i32_0 = arith.constant 0 : i32
    %c0_i32_1 = arith.constant 0 : i32
    return %arg0, %c0_i32, %c0_i32_0, %arg1 : i32, i32, i32, i32
  }
}

module attributes {stable_mosaic.version = 11 : i64} {
  func.func @_conv_kernel(%arg0: i32, %arg1: i32, %arg2: memref<1x1x4x4x128xbf16, #tpu.memory_space<vmem>>, %arg3: memref<128x128xbf16, #tpu.memory_space<vmem>>, %arg4: memref<1x128xf32, #tpu.memory_space<vmem>>, %arg5: memref<1x128xf32, #tpu.memory_space<vmem>>, %arg6: memref<1x4x4x128xbf16, #tpu.memory_space<vmem>>) attributes {dimension_semantics = [#tpu.dimension_semantics<parallel>, #tpu.dimension_semantics<parallel>], iteration_bounds = array<i64: 2, 1>, scalar_prefetch = 0 : i64, scratch_operands = 0 : i64, tpu.core_type = #tpu.core_type<tc>, window_params = [{transform_indices = @transform_0, window_bounds = array<i64: 1, 1, 4, 4, 128>}, {transform_indices = @transform_1, window_bounds = array<i64: 128, 128>}, {transform_indices = @transform_2, window_bounds = array<i64: 1, 128>}, {transform_indices = @transform_3, window_bounds = array<i64: 1, 128>}, {transform_indices = @transform_4, window_bounds = array<i64: 1, 4, 4, 128>}]} {
    %c0 = arith.constant 0 : index
    %c0_0 = arith.constant 0 : index
    %c0_1 = arith.constant 0 : index
    %c0_2 = arith.constant 0 : index
    %c0_3 = arith.constant 0 : index
    %0 = vector.load %arg2[%c0, %c0_0, %c0_1, %c0_2, %c0_3] : memref<1x1x4x4x128xbf16, #tpu.memory_space<vmem>>, vector<1x1x4x4x128xbf16>
    %1 = vector.shape_cast %0 : vector<1x1x4x4x128xbf16> to vector<4x4x128xbf16>
    %2 = vector.shape_cast %1 : vector<4x4x128xbf16> to vector<16x128xbf16>
    %c0_4 = arith.constant 0 : index
    %c0_5 = arith.constant 0 : index
    %3 = vector.load %arg3[%c0_4, %c0_5] : memref<128x128xbf16, #tpu.memory_space<vmem>>, vector<128x128xbf16>
    %cst = arith.constant dense<0.000000e+00> : vector<16x128xf32>
    %4 = tpu.matmul %2, %3, %cst {dimension_numbers = #tpu.dot_dimension_numbers<[1], [0], [0], [1], [0, 0, 1, 1], [], []>} : vector<16x128xbf16>, vector<128x128xbf16>, vector<16x128xf32> -> vector<16x128xf32>
    %c0_6 = arith.constant 0 : index
    %c0_7 = arith.constant 0 : index
    %5 = vector.load %arg4[%c0_6, %c0_7] : memref<1x128xf32, #tpu.memory_space<vmem>>, vector<1x128xf32>
    %6 = vector.broadcast %5 : vector<1x128xf32> to vector<16x128xf32>
    %7 = arith.mulf %4, %6 : vector<16x128xf32>
    %c0_8 = arith.constant 0 : index
    %c0_9 = arith.constant 0 : index
    %8 = vector.load %arg5[%c0_8, %c0_9] : memref<1x128xf32, #tpu.memory_space<vmem>>, vector<1x128xf32>
    %9 = vector.broadcast %8 : vector<1x128xf32> to vector<16x128xf32>
    %10 = arith.addf %7, %9 : vector<16x128xf32>
    %cst_10 = arith.constant 0.00999999977 : f32
    %11 = vector.broadcast %cst_10 : f32 to vector<16x128xf32>
    %12 = arith.mulf %11, %10 : vector<16x128xf32>
    %13 = arith.maximumf %10, %12 : vector<16x128xf32>
    %14 = vector.shape_cast %13 : vector<16x128xf32> to vector<4x4x128xf32>
    %15 = arith.truncf %14 : vector<4x4x128xf32> to vector<4x4x128xbf16>
    %c0_11 = arith.constant 0 : index
    %c0_12 = arith.constant 0 : index
    %c0_13 = arith.constant 0 : index
    %c0_14 = arith.constant 0 : index
    %16 = vector.load %arg6[%c0_11, %c0_12, %c0_13, %c0_14] : memref<1x4x4x128xbf16, #tpu.memory_space<vmem>>, vector<1x4x4x128xbf16>
    %17 = vector.shape_cast %16 : vector<1x4x4x128xbf16> to vector<4x4x128xbf16>
    %18 = vector.shape_cast %15 : vector<4x4x128xbf16> to vector<1x4x4x128xbf16>
    tpu.vector_store %arg6[%c0_11, %c0_12, %c0_13, %c0_14], %18 {strides = array<i32>} : memref<1x4x4x128xbf16, #tpu.memory_space<vmem>>, vector<1x4x4x128xbf16>,
    return
  }
  func.func @transform_0(%arg0: i32, %arg1: i32) -> (i32, i32, i32, i32, i32) {
    %c0_i32 = arith.constant 0 : i32
    %c0_i32_0 = arith.constant 0 : i32
    %c0_i32_1 = arith.constant 0 : i32
    %c0_i32_2 = arith.constant 0 : i32
    %c0_i32_3 = arith.constant 0 : i32
    return %arg0, %c0_i32, %c0_i32_0, %c0_i32_1, %c0_i32_2 : i32, i32, i32, i32, i32
  }
  func.func @transform_1(%arg0: i32, %arg1: i32) -> (i32, i32) {
    %c0_i32 = arith.constant 0 : i32
    %c0_i32_0 = arith.constant 0 : i32
    return %c0_i32, %arg1 : i32, i32
  }
  func.func @transform_2(%arg0: i32, %arg1: i32) -> (i32, i32) {
    %c0_i32 = arith.constant 0 : i32
    %c0_i32_0 = arith.constant 0 : i32
    return %c0_i32, %arg1 : i32, i32
  }
  func.func @transform_3(%arg0: i32, %arg1: i32) -> (i32, i32) {
    %c0_i32 = arith.constant 0 : i32
    %c0_i32_0 = arith.constant 0 : i32
    return %c0_i32, %arg1 : i32, i32
  }
  func.func @transform_4(%arg0: i32, %arg1: i32) -> (i32, i32, i32, i32) {
    %c0_i32 = arith.constant 0 : i32
    %c0_i32_0 = arith.constant 0 : i32
    %c0_i32_1 = arith.constant 0 : i32
    return %arg0, %c0_i32, %c0_i32_0, %arg1 : i32, i32, i32, i32
  }
}

module attributes {stable_mosaic.version = 11 : i64} {
  func.func @_conv_kernel(%arg0: i32, %arg1: i32, %arg2: memref<1x4x5x5x128xbf16, #tpu.memory_space<vmem>>, %arg3: memref<1152x128xbf16, #tpu.memory_space<vmem>>, %arg4: memref<1x128xf32, #tpu.memory_space<vmem>>, %arg5: memref<1x128xf32, #tpu.memory_space<vmem>>, %arg6: memref<1x4x4x128xbf16, #tpu.memory_space<vmem>>, %arg7: memref<4x4x1152xbf16, #tpu.memory_space<vmem>>) attributes {dimension_semantics = [#tpu.dimension_semantics<parallel>, #tpu.dimension_semantics<parallel>], iteration_bounds = array<i64: 2, 1>, scalar_prefetch = 0 : i64, scratch_operands = 1 : i64, tpu.core_type = #tpu.core_type<tc>, window_params = [{transform_indices = @transform_0, window_bounds = array<i64: 1, 4, 5, 5, 128>}, {transform_indices = @transform_1, window_bounds = array<i64: 1152, 128>}, {transform_indices = @transform_2, window_bounds = array<i64: 1, 128>}, {transform_indices = @transform_3, window_bounds = array<i64: 1, 128>}, {transform_indices = @transform_4, window_bounds = array<i64: 1, 4, 4, 128>}]} {
    %c0 = arith.constant 0 : index
    %c0_0 = arith.constant 0 : index
    %c0_1 = arith.constant 0 : index
    %c0_2 = arith.constant 0 : index
    %c0_3 = arith.constant 0 : index
    %0 = vector.load %arg2[%c0, %c0_0, %c0_1, %c0_2, %c0_3] : memref<1x4x5x5x128xbf16, #tpu.memory_space<vmem>>, vector<1x1x4x4x128xbf16>
    %1 = vector.shape_cast %0 : vector<1x1x4x4x128xbf16> to vector<4x4x128xbf16>
    %c0_4 = arith.constant 0 : index
    %c0_5 = arith.constant 0 : index
    %c0_6 = arith.constant 0 : index
    %2 = vector.load %arg7[%c0_4, %c0_5, %c0_6] : memref<4x4x1152xbf16, #tpu.memory_space<vmem>>, vector<4x4x128xbf16>
    tpu.vector_store %arg7[%c0_4, %c0_5, %c0_6], %1 {strides = array<i32>} : memref<4x4x1152xbf16, #tpu.memory_space<vmem>>, vector<4x4x128xbf16>,
    %c0_7 = arith.constant 0 : index
    %c1 = arith.constant 1 : index
    %c0_8 = arith.constant 0 : index
    %c0_9 = arith.constant 0 : index
    %c0_10 = arith.constant 0 : index
    %3 = vector.load %arg2[%c0_7, %c1, %c0_8, %c0_9, %c0_10] : memref<1x4x5x5x128xbf16, #tpu.memory_space<vmem>>, vector<1x1x4x4x128xbf16>
    %4 = vector.shape_cast %3 : vector<1x1x4x4x128xbf16> to vector<4x4x128xbf16>
    %c0_11 = arith.constant 0 : index
    %c0_12 = arith.constant 0 : index
    %c128 = arith.constant 128 : index
    %5 = vector.load %arg7[%c0_11, %c0_12, %c128] : memref<4x4x1152xbf16, #tpu.memory_space<vmem>>, vector<4x4x128xbf16>
    tpu.vector_store %arg7[%c0_11, %c0_12, %c128], %4 {strides = array<i32>} : memref<4x4x1152xbf16, #tpu.memory_space<vmem>>, vector<4x4x128xbf16>,
    %c0_13 = arith.constant 0 : index
    %c0_14 = arith.constant 0 : index
    %c0_15 = arith.constant 0 : index
    %c1_16 = arith.constant 1 : index
    %c0_17 = arith.constant 0 : index
    %6 = vector.load %arg2[%c0_13, %c0_14, %c0_15, %c1_16, %c0_17] : memref<1x4x5x5x128xbf16, #tpu.memory_space<vmem>>, vector<1x1x4x4x128xbf16>
    %7 = vector.shape_cast %6 : vector<1x1x4x4x128xbf16> to vector<4x4x128xbf16>
    %c0_18 = arith.constant 0 : index
    %c0_19 = arith.constant 0 : index
    %c256 = arith.constant 256 : index
    %8 = vector.load %arg7[%c0_18, %c0_19, %c256] : memref<4x4x1152xbf16, #tpu.memory_space<vmem>>, vector<4x4x128xbf16>
    tpu.vector_store %arg7[%c0_18, %c0_19, %c256], %7 {strides = array<i32>} : memref<4x4x1152xbf16, #tpu.memory_space<vmem>>, vector<4x4x128xbf16>,
    %c0_20 = arith.constant 0 : index
    %c2 = arith.constant 2 : index
    %c0_21 = arith.constant 0 : index
    %c0_22 = arith.constant 0 : index
    %c0_23 = arith.constant 0 : index
    %9 = vector.load %arg2[%c0_20, %c2, %c0_21, %c0_22, %c0_23] : memref<1x4x5x5x128xbf16, #tpu.memory_space<vmem>>, vector<1x1x4x4x128xbf16>
    %10 = vector.shape_cast %9 : vector<1x1x4x4x128xbf16> to vector<4x4x128xbf16>
    %c0_24 = arith.constant 0 : index
    %c0_25 = arith.constant 0 : index
    %c384 = arith.constant 384 : index
    %11 = vector.load %arg7[%c0_24, %c0_25, %c384] : memref<4x4x1152xbf16, #tpu.memory_space<vmem>>, vector<4x4x128xbf16>
    tpu.vector_store %arg7[%c0_24, %c0_25, %c384], %10 {strides = array<i32>} : memref<4x4x1152xbf16, #tpu.memory_space<vmem>>, vector<4x4x128xbf16>,
    %c0_26 = arith.constant 0 : index
    %c3 = arith.constant 3 : index
    %c0_27 = arith.constant 0 : index
    %c0_28 = arith.constant 0 : index
    %c0_29 = arith.constant 0 : index
    %12 = vector.load %arg2[%c0_26, %c3, %c0_27, %c0_28, %c0_29] : memref<1x4x5x5x128xbf16, #tpu.memory_space<vmem>>, vector<1x1x4x4x128xbf16>
    %13 = vector.shape_cast %12 : vector<1x1x4x4x128xbf16> to vector<4x4x128xbf16>
    %c0_30 = arith.constant 0 : index
    %c0_31 = arith.constant 0 : index
    %c512 = arith.constant 512 : index
    %14 = vector.load %arg7[%c0_30, %c0_31, %c512] : memref<4x4x1152xbf16, #tpu.memory_space<vmem>>, vector<4x4x128xbf16>
    tpu.vector_store %arg7[%c0_30, %c0_31, %c512], %13 {strides = array<i32>} : memref<4x4x1152xbf16, #tpu.memory_space<vmem>>, vector<4x4x128xbf16>,
    %c0_32 = arith.constant 0 : index
    %c2_33 = arith.constant 2 : index
    %c0_34 = arith.constant 0 : index
    %c1_35 = arith.constant 1 : index
    %c0_36 = arith.constant 0 : index
    %15 = vector.load %arg2[%c0_32, %c2_33, %c0_34, %c1_35, %c0_36] : memref<1x4x5x5x128xbf16, #tpu.memory_space<vmem>>, vector<1x1x4x4x128xbf16>
    %16 = vector.shape_cast %15 : vector<1x1x4x4x128xbf16> to vector<4x4x128xbf16>
    %c0_37 = arith.constant 0 : index
    %c0_38 = arith.constant 0 : index
    %c640 = arith.constant 640 : index
    %17 = vector.load %arg7[%c0_37, %c0_38, %c640] : memref<4x4x1152xbf16, #tpu.memory_space<vmem>>, vector<4x4x128xbf16>
    tpu.vector_store %arg7[%c0_37, %c0_38, %c640], %16 {strides = array<i32>} : memref<4x4x1152xbf16, #tpu.memory_space<vmem>>, vector<4x4x128xbf16>,
    %c0_39 = arith.constant 0 : index
    %c0_40 = arith.constant 0 : index
    %c1_41 = arith.constant 1 : index
    %c0_42 = arith.constant 0 : index
    %c0_43 = arith.constant 0 : index
    %18 = vector.load %arg2[%c0_39, %c0_40, %c1_41, %c0_42, %c0_43] : memref<1x4x5x5x128xbf16, #tpu.memory_space<vmem>>, vector<1x1x4x4x128xbf16>
    %19 = vector.shape_cast %18 : vector<1x1x4x4x128xbf16> to vector<4x4x128xbf16>
    %c0_44 = arith.constant 0 : index
    %c0_45 = arith.constant 0 : index
    %c768 = arith.constant 768 : index
    %20 = vector.load %arg7[%c0_44, %c0_45, %c768] : memref<4x4x1152xbf16, #tpu.memory_space<vmem>>, vector<4x4x128xbf16>
    tpu.vector_store %arg7[%c0_44, %c0_45, %c768], %19 {strides = array<i32>} : memref<4x4x1152xbf16, #tpu.memory_space<vmem>>, vector<4x4x128xbf16>,
    %c0_46 = arith.constant 0 : index
    %c1_47 = arith.constant 1 : index
    %c1_48 = arith.constant 1 : index
    %c0_49 = arith.constant 0 : index
    %c0_50 = arith.constant 0 : index
    %21 = vector.load %arg2[%c0_46, %c1_47, %c1_48, %c0_49, %c0_50] : memref<1x4x5x5x128xbf16, #tpu.memory_space<vmem>>, vector<1x1x4x4x128xbf16>
    %22 = vector.shape_cast %21 : vector<1x1x4x4x128xbf16> to vector<4x4x128xbf16>
    %c0_51 = arith.constant 0 : index
    %c0_52 = arith.constant 0 : index
    %c896 = arith.constant 896 : index
    %23 = vector.load %arg7[%c0_51, %c0_52, %c896] : memref<4x4x1152xbf16, #tpu.memory_space<vmem>>, vector<4x4x128xbf16>
    tpu.vector_store %arg7[%c0_51, %c0_52, %c896], %22 {strides = array<i32>} : memref<4x4x1152xbf16, #tpu.memory_space<vmem>>, vector<4x4x128xbf16>,
    %c0_53 = arith.constant 0 : index
    %c0_54 = arith.constant 0 : index
    %c1_55 = arith.constant 1 : index
    %c1_56 = arith.constant 1 : index
    %c0_57 = arith.constant 0 : index
    %24 = vector.load %arg2[%c0_53, %c0_54, %c1_55, %c1_56, %c0_57] : memref<1x4x5x5x128xbf16, #tpu.memory_space<vmem>>, vector<1x1x4x4x128xbf16>
    %25 = vector.shape_cast %24 : vector<1x1x4x4x128xbf16> to vector<4x4x128xbf16>
    %c0_58 = arith.constant 0 : index
    %c0_59 = arith.constant 0 : index
    %c1024 = arith.constant 1024 : index
    %26 = vector.load %arg7[%c0_58, %c0_59, %c1024] : memref<4x4x1152xbf16, #tpu.memory_space<vmem>>, vector<4x4x128xbf16>
    tpu.vector_store %arg7[%c0_58, %c0_59, %c1024], %25 {strides = array<i32>} : memref<4x4x1152xbf16, #tpu.memory_space<vmem>>, vector<4x4x128xbf16>,
    %c0_60 = arith.constant 0 : index
    %c0_61 = arith.constant 0 : index
    %c0_62 = arith.constant 0 : index
    %27 = vector.load %arg7[%c0_60, %c0_61, %c0_62] : memref<4x4x1152xbf16, #tpu.memory_space<vmem>>, vector<4x4x1152xbf16>
    %28 = vector.shape_cast %27 : vector<4x4x1152xbf16> to vector<16x1152xbf16>
    %c0_63 = arith.constant 0 : index
    %c0_64 = arith.constant 0 : index
    %29 = vector.load %arg3[%c0_63, %c0_64] : memref<1152x128xbf16, #tpu.memory_space<vmem>>, vector<1152x128xbf16>
    %cst = arith.constant dense<0.000000e+00> : vector<16x128xf32>
    %30 = tpu.matmul %28, %29, %cst {dimension_numbers = #tpu.dot_dimension_numbers<[1], [0], [0], [1], [0, 0, 1, 1], [], []>} : vector<16x1152xbf16>, vector<1152x128xbf16>, vector<16x128xf32> -> vector<16x128xf32>
    %c0_65 = arith.constant 0 : index
    %c0_66 = arith.constant 0 : index
    %31 = vector.load %arg4[%c0_65, %c0_66] : memref<1x128xf32, #tpu.memory_space<vmem>>, vector<1x128xf32>
    %32 = vector.broadcast %31 : vector<1x128xf32> to vector<16x128xf32>
    %33 = arith.mulf %30, %32 : vector<16x128xf32>
    %c0_67 = arith.constant 0 : index
    %c0_68 = arith.constant 0 : index
    %34 = vector.load %arg5[%c0_67, %c0_68] : memref<1x128xf32, #tpu.memory_space<vmem>>, vector<1x128xf32>
    %35 = vector.broadcast %34 : vector<1x128xf32> to vector<16x128xf32>
    %36 = arith.addf %33, %35 : vector<16x128xf32>
    %cst_69 = arith.constant 0.00999999977 : f32
    %37 = vector.broadcast %cst_69 : f32 to vector<16x128xf32>
    %38 = arith.mulf %37, %36 : vector<16x128xf32>
    %39 = arith.maximumf %36, %38 : vector<16x128xf32>
    %40 = vector.shape_cast %39 : vector<16x128xf32> to vector<4x4x128xf32>
    %41 = arith.truncf %40 : vector<4x4x128xf32> to vector<4x4x128xbf16>
    %c0_70 = arith.constant 0 : index
    %c0_71 = arith.constant 0 : index
    %c0_72 = arith.constant 0 : index
    %c0_73 = arith.constant 0 : index
    %42 = vector.load %arg6[%c0_70, %c0_71, %c0_72, %c0_73] : memref<1x4x4x128xbf16, #tpu.memory_space<vmem>>, vector<1x4x4x128xbf16>
    %43 = vector.shape_cast %42 : vector<1x4x4x128xbf16> to vector<4x4x128xbf16>
    %44 = vector.shape_cast %41 : vector<4x4x128xbf16> to vector<1x4x4x128xbf16>
    tpu.vector_store %arg6[%c0_70, %c0_71, %c0_72, %c0_73], %44 {strides = array<i32>} : memref<1x4x4x128xbf16, #tpu.memory_space<vmem>>, vector<1x4x4x128xbf16>,
    return
  }
  func.func @transform_0(%arg0: i32, %arg1: i32) -> (i32, i32, i32, i32, i32) {
    %c0_i32 = arith.constant 0 : i32
    %c0_i32_0 = arith.constant 0 : i32
    %c0_i32_1 = arith.constant 0 : i32
    %c0_i32_2 = arith.constant 0 : i32
    %c0_i32_3 = arith.constant 0 : i32
    return %arg0, %c0_i32, %c0_i32_0, %c0_i32_1, %c0_i32_2 : i32, i32, i32, i32, i32
  }
  func.func @transform_1(%arg0: i32, %arg1: i32) -> (i32, i32) {
    %c0_i32 = arith.constant 0 : i32
    %c0_i32_0 = arith.constant 0 : i32
    return %c0_i32, %arg1 : i32, i32
  }
  func.func @transform_2(%arg0: i32, %arg1: i32) -> (i32, i32) {
    %c0_i32 = arith.constant 0 : i32
    %c0_i32_0 = arith.constant 0 : i32
    return %c0_i32, %arg1 : i32, i32
  }
  func.func @transform_3(%arg0: i32, %arg1: i32) -> (i32, i32) {
    %c0_i32 = arith.constant 0 : i32
    %c0_i32_0 = arith.constant 0 : i32
    return %c0_i32, %arg1 : i32, i32
  }
  func.func @transform_4(%arg0: i32, %arg1: i32) -> (i32, i32, i32, i32) {
    %c0_i32 = arith.constant 0 : i32
    %c0_i32_0 = arith.constant 0 : i32
    %c0_i32_1 = arith.constant 0 : i32
    return %arg0, %c0_i32, %c0_i32_0, %arg1 : i32, i32, i32, i32
  }
}

module attributes {stable_mosaic.version = 11 : i64} {
  func.func @_conv_kernel(%arg0: i32, %arg1: i32, %arg2: memref<1x1x8x8x128xbf16, #tpu.memory_space<vmem>>, %arg3: memref<128x128xbf16, #tpu.memory_space<vmem>>, %arg4: memref<1x128xf32, #tpu.memory_space<vmem>>, %arg5: memref<1x128xf32, #tpu.memory_space<vmem>>, %arg6: memref<1x8x8x128xbf16, #tpu.memory_space<vmem>>) attributes {dimension_semantics = [#tpu.dimension_semantics<parallel>, #tpu.dimension_semantics<parallel>], iteration_bounds = array<i64: 2, 1>, scalar_prefetch = 0 : i64, scratch_operands = 0 : i64, tpu.core_type = #tpu.core_type<tc>, window_params = [{transform_indices = @transform_0, window_bounds = array<i64: 1, 1, 8, 8, 128>}, {transform_indices = @transform_1, window_bounds = array<i64: 128, 128>}, {transform_indices = @transform_2, window_bounds = array<i64: 1, 128>}, {transform_indices = @transform_3, window_bounds = array<i64: 1, 128>}, {transform_indices = @transform_4, window_bounds = array<i64: 1, 8, 8, 128>}]} {
    %c0 = arith.constant 0 : index
    %c0_0 = arith.constant 0 : index
    %c0_1 = arith.constant 0 : index
    %c0_2 = arith.constant 0 : index
    %c0_3 = arith.constant 0 : index
    %0 = vector.load %arg2[%c0, %c0_0, %c0_1, %c0_2, %c0_3] : memref<1x1x8x8x128xbf16, #tpu.memory_space<vmem>>, vector<1x1x8x8x128xbf16>
    %1 = vector.shape_cast %0 : vector<1x1x8x8x128xbf16> to vector<8x8x128xbf16>
    %2 = vector.shape_cast %1 : vector<8x8x128xbf16> to vector<64x128xbf16>
    %c0_4 = arith.constant 0 : index
    %c0_5 = arith.constant 0 : index
    %3 = vector.load %arg3[%c0_4, %c0_5] : memref<128x128xbf16, #tpu.memory_space<vmem>>, vector<128x128xbf16>
    %cst = arith.constant dense<0.000000e+00> : vector<64x128xf32>
    %4 = tpu.matmul %2, %3, %cst {dimension_numbers = #tpu.dot_dimension_numbers<[1], [0], [0], [1], [0, 0, 1, 1], [], []>} : vector<64x128xbf16>, vector<128x128xbf16>, vector<64x128xf32> -> vector<64x128xf32>
    %c0_6 = arith.constant 0 : index
    %c0_7 = arith.constant 0 : index
    %5 = vector.load %arg4[%c0_6, %c0_7] : memref<1x128xf32, #tpu.memory_space<vmem>>, vector<1x128xf32>
    %6 = vector.broadcast %5 : vector<1x128xf32> to vector<64x128xf32>
    %7 = arith.mulf %4, %6 : vector<64x128xf32>
    %c0_8 = arith.constant 0 : index
    %c0_9 = arith.constant 0 : index
    %8 = vector.load %arg5[%c0_8, %c0_9] : memref<1x128xf32, #tpu.memory_space<vmem>>, vector<1x128xf32>
    %9 = vector.broadcast %8 : vector<1x128xf32> to vector<64x128xf32>
    %10 = arith.addf %7, %9 : vector<64x128xf32>
    %11 = vector.shape_cast %10 : vector<64x128xf32> to vector<8x8x128xf32>
    %12 = arith.truncf %11 : vector<8x8x128xf32> to vector<8x8x128xbf16>
    %c0_10 = arith.constant 0 : index
    %c0_11 = arith.constant 0 : index
    %c0_12 = arith.constant 0 : index
    %c0_13 = arith.constant 0 : index
    %13 = vector.load %arg6[%c0_10, %c0_11, %c0_12, %c0_13] : memref<1x8x8x128xbf16, #tpu.memory_space<vmem>>, vector<1x8x8x128xbf16>
    %14 = vector.shape_cast %13 : vector<1x8x8x128xbf16> to vector<8x8x128xbf16>
    %15 = vector.shape_cast %12 : vector<8x8x128xbf16> to vector<1x8x8x128xbf16>
    tpu.vector_store %arg6[%c0_10, %c0_11, %c0_12, %c0_13], %15 {strides = array<i32>} : memref<1x8x8x128xbf16, #tpu.memory_space<vmem>>, vector<1x8x8x128xbf16>,
    return
  }
  func.func @transform_0(%arg0: i32, %arg1: i32) -> (i32, i32, i32, i32, i32) {
    %c0_i32 = arith.constant 0 : i32
    %c0_i32_0 = arith.constant 0 : i32
    %c0_i32_1 = arith.constant 0 : i32
    %c0_i32_2 = arith.constant 0 : i32
    %c0_i32_3 = arith.constant 0 : i32
    return %arg0, %c0_i32, %c0_i32_0, %c0_i32_1, %c0_i32_2 : i32, i32, i32, i32, i32
  }
  func.func @transform_1(%arg0: i32, %arg1: i32) -> (i32, i32) {
    %c0_i32 = arith.constant 0 : i32
    %c0_i32_0 = arith.constant 0 : i32
    return %c0_i32, %arg1 : i32, i32
  }
  func.func @transform_2(%arg0: i32, %arg1: i32) -> (i32, i32) {
    %c0_i32 = arith.constant 0 : i32
    %c0_i32_0 = arith.constant 0 : i32
    return %c0_i32, %arg1 : i32, i32
  }
  func.func @transform_3(%arg0: i32, %arg1: i32) -> (i32, i32) {
    %c0_i32 = arith.constant 0 : i32
    %c0_i32_0 = arith.constant 0 : i32
    return %c0_i32, %arg1 : i32, i32
  }
  func.func @transform_4(%arg0: i32, %arg1: i32) -> (i32, i32, i32, i32) {
    %c0_i32 = arith.constant 0 : i32
    %c0_i32_0 = arith.constant 0 : i32
    %c0_i32_1 = arith.constant 0 : i32
    return %arg0, %c0_i32, %c0_i32_0, %arg1 : i32, i32, i32, i32
  }
}

module attributes {stable_mosaic.version = 11 : i64} {
  func.func @_conv_kernel(%arg0: i32, %arg1: i32, %arg2: memref<1x1x4x4x128xbf16, #tpu.memory_space<vmem>>, %arg3: memref<128x128xbf16, #tpu.memory_space<vmem>>, %arg4: memref<1x128xf32, #tpu.memory_space<vmem>>, %arg5: memref<1x128xf32, #tpu.memory_space<vmem>>, %arg6: memref<1x4x4x128xbf16, #tpu.memory_space<vmem>>) attributes {dimension_semantics = [#tpu.dimension_semantics<parallel>, #tpu.dimension_semantics<parallel>], iteration_bounds = array<i64: 2, 1>, scalar_prefetch = 0 : i64, scratch_operands = 0 : i64, tpu.core_type = #tpu.core_type<tc>, window_params = [{transform_indices = @transform_0, window_bounds = array<i64: 1, 1, 4, 4, 128>}, {transform_indices = @transform_1, window_bounds = array<i64: 128, 128>}, {transform_indices = @transform_2, window_bounds = array<i64: 1, 128>}, {transform_indices = @transform_3, window_bounds = array<i64: 1, 128>}, {transform_indices = @transform_4, window_bounds = array<i64: 1, 4, 4, 128>}]} {
    %c0 = arith.constant 0 : index
    %c0_0 = arith.constant 0 : index
    %c0_1 = arith.constant 0 : index
    %c0_2 = arith.constant 0 : index
    %c0_3 = arith.constant 0 : index
    %0 = vector.load %arg2[%c0, %c0_0, %c0_1, %c0_2, %c0_3] : memref<1x1x4x4x128xbf16, #tpu.memory_space<vmem>>, vector<1x1x4x4x128xbf16>
    %1 = vector.shape_cast %0 : vector<1x1x4x4x128xbf16> to vector<4x4x128xbf16>
    %2 = vector.shape_cast %1 : vector<4x4x128xbf16> to vector<16x128xbf16>
    %c0_4 = arith.constant 0 : index
    %c0_5 = arith.constant 0 : index
    %3 = vector.load %arg3[%c0_4, %c0_5] : memref<128x128xbf16, #tpu.memory_space<vmem>>, vector<128x128xbf16>
    %cst = arith.constant dense<0.000000e+00> : vector<16x128xf32>
    %4 = tpu.matmul %2, %3, %cst {dimension_numbers = #tpu.dot_dimension_numbers<[1], [0], [0], [1], [0, 0, 1, 1], [], []>} : vector<16x128xbf16>, vector<128x128xbf16>, vector<16x128xf32> -> vector<16x128xf32>
    %c0_6 = arith.constant 0 : index
    %c0_7 = arith.constant 0 : index
    %5 = vector.load %arg4[%c0_6, %c0_7] : memref<1x128xf32, #tpu.memory_space<vmem>>, vector<1x128xf32>
    %6 = vector.broadcast %5 : vector<1x128xf32> to vector<16x128xf32>
    %7 = arith.mulf %4, %6 : vector<16x128xf32>
    %c0_8 = arith.constant 0 : index
    %c0_9 = arith.constant 0 : index
    %8 = vector.load %arg5[%c0_8, %c0_9] : memref<1x128xf32, #tpu.memory_space<vmem>>, vector<1x128xf32>
    %9 = vector.broadcast %8 : vector<1x128xf32> to vector<16x128xf32>
    %10 = arith.addf %7, %9 : vector<16x128xf32>
    %11 = vector.shape_cast %10 : vector<16x128xf32> to vector<4x4x128xf32>
    %12 = arith.truncf %11 : vector<4x4x128xf32> to vector<4x4x128xbf16>
    %c0_10 = arith.constant 0 : index
    %c0_11 = arith.constant 0 : index
    %c0_12 = arith.constant 0 : index
    %c0_13 = arith.constant 0 : index
    %13 = vector.load %arg6[%c0_10, %c0_11, %c0_12, %c0_13] : memref<1x4x4x128xbf16, #tpu.memory_space<vmem>>, vector<1x4x4x128xbf16>
    %14 = vector.shape_cast %13 : vector<1x4x4x128xbf16> to vector<4x4x128xbf16>
    %15 = vector.shape_cast %12 : vector<4x4x128xbf16> to vector<1x4x4x128xbf16>
    tpu.vector_store %arg6[%c0_10, %c0_11, %c0_12, %c0_13], %15 {strides = array<i32>} : memref<1x4x4x128xbf16, #tpu.memory_space<vmem>>, vector<1x4x4x128xbf16>,
    return
  }
  func.func @transform_0(%arg0: i32, %arg1: i32) -> (i32, i32, i32, i32, i32) {
    %c0_i32 = arith.constant 0 : i32
    %c0_i32_0 = arith.constant 0 : i32
    %c0_i32_1 = arith.constant 0 : i32
    %c0_i32_2 = arith.constant 0 : i32
    %c0_i32_3 = arith.constant 0 : i32
    return %arg0, %c0_i32, %c0_i32_0, %c0_i32_1, %c0_i32_2 : i32, i32, i32, i32, i32
  }
  func.func @transform_1(%arg0: i32, %arg1: i32) -> (i32, i32) {
    %c0_i32 = arith.constant 0 : i32
    %c0_i32_0 = arith.constant 0 : i32
    return %c0_i32, %arg1 : i32, i32
  }
  func.func @transform_2(%arg0: i32, %arg1: i32) -> (i32, i32) {
    %c0_i32 = arith.constant 0 : i32
    %c0_i32_0 = arith.constant 0 : i32
    return %c0_i32, %arg1 : i32, i32
  }
  func.func @transform_3(%arg0: i32, %arg1: i32) -> (i32, i32) {
    %c0_i32 = arith.constant 0 : i32
    %c0_i32_0 = arith.constant 0 : i32
    return %c0_i32, %arg1 : i32, i32
  }
  func.func @transform_4(%arg0: i32, %arg1: i32) -> (i32, i32, i32, i32) {
    %c0_i32 = arith.constant 0 : i32
    %c0_i32_0 = arith.constant 0 : i32
    %c0_i32_1 = arith.constant 0 : i32
    return %arg0, %c0_i32, %c0_i32_0, %arg1 : i32, i32, i32, i32
  }
}

</mosaic_0001>

<bundles_post_ra>
// kernel: forward.10
= control target key start
LH: loop header
LB: loop body
LE: loop exit
PB: predicated region body
PF: predicated region fallthrough
CT: control target
= control target key end

     0   :  { %s794_s15 = smov 0   ;;  %s796_s16 = smov 0   ;;  %s870_s0 = inlined_call_operand.vmem [shape: bf16[2,1,8,8,128], index: 0, kind: input, shape index: {}]   ;;  %s871_s1 = inlined_call_operand.vmem [shape: bf16[128,128], index: 1, kind: input, shape index: {}]   ;;  %s872_s2 = inlined_call_operand.vmem [shape: f32[1,128], index: 2, kind: input, shape index: {}]   ;;  %s873_s3 = inlined_call_operand.vmem [shape: f32[1,128], index: 3, kind: input, shape index: {}]   ;;  %s874_s4 = inlined_call_operand.vmem [shape: bf16[2,8,8,128], index: 4, kind: output, shape index: {}]  }
   0x1   :  { %s798_s17 = smov 0  }
   0x2 LB: > { %s26_s18 = sadd.s32 1, %s763_s16  ;;  %p611_p0 = scmp.ge.s32.totalorder %s767_s17, 1  ;;  %s767_s17 = sphi %s798_s17, %s14_s17   ;;  %s763_s16 = sphi %s796_s16, %s876_s16   ;;  %s759_s15 = sphi %s794_s15, %s875_s15  }
   0x3   : > { %p28_p1 = scmp.ge.s32.totalorder %s26_s18, 2  ;;  %p201_p2 = scmp.lt.s32.totalorder %s767_s17, 3 }
   0x5   : > { %s878_s18 = smov (%p28_p1, %s26_s18), 0  ;;  %p202_p3 = pnand %p611_p0, %p201_p2 }
   0x6   : > { %p240_p4 = scmp.lt.s32.totalorder (!%p202_p3), %s759_s15, 1 }
   0x7   : > { %205 = sbr.rel (%p202_p3) target bundleno = 255 (0xff), region = 36 }
   0xc   : > { %v733_v0 = vld [vmem:[%s871_s1 + $0x38] sm:$0xff]   ;;  %v734_v1 = vld [vmem:[%s871_s1 + $0x30] sm:$0xff]   ;;  %s880_s15 = smov (!%p240_p4, %s759_s15), 1  ;;  %v735_v2 = vld [vmem:[%s871_s1 + $0x28] sm:$0xff]  }
   0xd   : > { %669 = vmatprep.subr.bf16.mxu0 %v733_v0  ;;  %693 = vmatprep.subr.bf16.mxu1 %v733_v0  ;;  %s632_s25 = sshll.u32 %s880_s15, 5  ;;  %v736_v3 = vld [vmem:[%s871_s1 + $0x20] sm:$0xff]   ;;  %v737_v6 = vld [vmem:[%s871_s1 + $0x18] sm:$0xff]   ;;  %v738_v7 = vld [vmem:[%s871_s1 + $0x10] sm:$0xff]  }
   0xe   : > { %670 = vmatpush3.bf16.msra.mxu0 %v733_v0  ;;  %701 = vmatpush3.bf16.msra.mxu1 %v733_v0  ;;  %s829_s28 = scalar_lea.vmem %s870_s0, %s632_s25  ;;  %v739_v8 = vld [vmem:[%s871_s1 + $0x8] sm:$0xff]   ;;  %v740_v9 = vld [vmem:[%s871_s1] sm:$0xff]   ;;  %s262_s23 = scalar_lea.vmem %s874_s4, %s632_s25 }
   0xf   : > { %671 = vmatprep.subr.bf16.mxu0 %v734_v1  ;;  %694 = vmatprep.subr.bf16.mxu1 %v734_v1  ;;  %v741_v4 = vld [vmem:[%s829_s28] sm:$0xff]   ;;  %v742_v5 = vld [vmem:[%s829_s28 + $0x10] sm:$0xff]   ;;  %v743_v10 = vld [vmem:[%s829_s28 + $0x8] sm:$0xff]  }
  0x10   : > { %685 = vmatprep.mubr.bf16.mxu0 %v741_v4  ;;  %689 = vmatprep.mubr.bf16.mxu1 %v742_v5  ;;  %v744_v11 = vld [vmem:[%s829_s28 + $0x18] sm:$0xff]   ;;  %v628_v12 = vld [vmem:[%s872_s2] ss:$0 sm:$0xff] }
  0x11   : > { %v629_v14 = vld [vmem:[%s873_s3] ss:$0 sm:$0xff] }
  0x12   : > { %672 = vmatpush3.bf16.msra.mxu0 %v734_v1  ;;  %702 = vmatpush3.bf16.msra.mxu1 %v734_v1 }
  0x13   : > { %673 = vmatprep.subr.bf16.mxu0 %v735_v2  ;;  %695 = vmatprep.subr.bf16.mxu1 %v735_v2 }
  0x16   : > { %674 = vmatpush3.bf16.msra.mxu0 %v735_v2  ;;  %703 = vmatpush3.bf16.msra.mxu1 %v735_v2 }
  0x17   : > { %675 = vmatprep.subr.bf16.mxu0 %v736_v3  ;;  %696 = vmatprep.subr.bf16.mxu1 %v736_v3 }
  0x1a   : > { %676 = vmatpush3.bf16.msra.mxu0 %v736_v3  ;;  %704 = vmatpush3.bf16.msra.mxu1 %v736_v3 }
  0x1b   : > { %677 = vmatprep.subr.bf16.mxu0 %v737_v6  ;;  %697 = vmatprep.subr.bf16.mxu1 %v737_v6 }
  0x1e   : > { %678 = vmatpush3.bf16.msra.mxu0 %v737_v6  ;;  %705 = vmatpush3.bf16.msra.mxu1 %v737_v6 }
  0x1f   : > { %679 = vmatprep.subr.bf16.mxu0 %v738_v7  ;;  %698 = vmatprep.subr.bf16.mxu1 %v738_v7 }
  0x22   : > { %680 = vmatpush3.bf16.msra.mxu0 %v738_v7  ;;  %706 = vmatpush3.bf16.msra.mxu1 %v738_v7 }
  0x23   : > { %681 = vmatprep.subr.bf16.mxu0 %v739_v8  ;;  %699 = vmatprep.subr.bf16.mxu1 %v739_v8 }
  0x26   : > { %682 = vmatpush3.bf16.msra.mxu0 %v739_v8  ;;  %707 = vmatpush3.bf16.msra.mxu1 %v739_v8 }
  0x27   : > { %683 = vmatprep.subr.bf16.mxu0 %v740_v9  ;;  %700 = vmatprep.subr.bf16.mxu1 %v740_v9 }
  0x2a   : > { %684 = vmatpush3.bf16.msra.mxu0 %v740_v9  ;;  %708 = vmatpush3.bf16.msra.mxu1 %v740_v9 }
  0x2d   : > { %686 = vmatmul.mubr.bf16.vlgmr.msra.gmra.mxu0 %v743_v10  ;;  %690 = vmatmul.mubr.bf16.vlgmr.msra.gmra.mxu1 %v744_v11 }
  0xed   : > { %v687_v13 = vpop.f32.mrf.mxu0  ;;  %v691_v15 = vpop.f32.mrf.mxu1 }
  0xee   : > { %v434_v16 = vmul.f32 %v687_v13, %v628_v12  ;;  %v438_v17 = vmul.f32 %v691_v15, %v628_v12 }
  0xef   : > { %v394_v18 = vpop.f32.mrf.mxu0  ;;  %v410_v19 = vpop.f32.mrf.mxu1 }
  0xf0   : > { %v449_v20 = vadd.f32 %v629_v14, %v434_v16  ;;  %v453_v21 = vadd.f32 %v629_v14, %v438_v17  ;;  %v432_v22 = vmul.f32 %v628_v12, %v394_v18  ;;  %v436_v23 = vmul.f32 %v628_v12, %v410_v19 }
  0xf1   : > { %v688_v24 = vpop.f32.mrf.mxu0  ;;  %v692_v25 = vpop.f32.mrf.mxu1 }
  0xf2   : > { %v447_v26 = vadd.f32 %v629_v14, %v432_v22  ;;  %v451_v27 = vadd.f32 %v629_v14, %v436_v23  ;;  %v435_v28 = vmul.f32 %v688_v24, %v628_v12  ;;  %v439_v29 = vmul.f32 %v692_v25, %v628_v12 }
  0xf3   : > { %v397_v30 = vpop.f32.mrf.mxu0  ;;  %v413_v31 = vpop.f32.mrf.mxu1  ;;  %v457_v32 = vmul.f32 0.01, %v449_v20  ;;  %v461_v33 = vmul.f32 0.01, %v453_v21 }
  0xf4   : > { %v450_v34 = vadd.f32 %v629_v14, %v435_v28  ;;  %v454_v35 = vadd.f32 %v629_v14, %v439_v29  ;;  %v433_v36 = vmul.f32 %v628_v12, %v397_v30  ;;  %v437_v37 = vmul.f32 %v628_v12, %v413_v31 }
  0xf5   : > { %v455_v38 = vmul.f32 0.01, %v447_v26  ;;  %v459_v39 = vmul.f32 0.01, %v451_v27  ;;  %v465_v44 = vmax.f32 %v449_v20, %v457_v32  ;;  %v469_v45 = vmax.f32 %v453_v21, %v461_v33 }
  0xf6   : > { %v458_v40 = vmul.f32 0.01, %v450_v34  ;;  %v462_v41 = vmul.f32 0.01, %v454_v35  ;;  %v448_v42 = vadd.f32 %v629_v14, %v433_v36  ;;  %v452_v43 = vadd.f32 %v629_v14, %v437_v37 }
  0xf7   : > { %v463_v50 = vmax.f32 %v447_v26, %v455_v38  ;;  %v467_v51 = vmax.f32 %v451_v27, %v459_v39 }
  0xf8   : > { %v466_v46 = vmax.f32 %v450_v34, %v458_v40  ;;  %v470_v47 = vmax.f32 %v454_v35, %v462_v41  ;;  %v456_v48 = vmul.f32 0.01, %v448_v42  ;;  %v460_v49 = vmul.f32 0.01, %v452_v43 }
  0xfa   : > { %v642_v52 = vpack.c.bf16 %v466_v46, %v465_v44  ;;  %v652_v53 = vpack.c.bf16 %v470_v47, %v469_v45  ;;  %v464_v54 = vmax.f32 %v448_v42, %v456_v48  ;;  %v468_v55 = vmax.f32 %v452_v43, %v460_v49 }
  0xfc   : > { %654 = vst [vmem:[%s262_s23 + $0x8] sm:$0xff] %v642_v52   ;;  %656 = vst [vmem:[%s262_s23 + $0x18] sm:$0xff] %v652_v53   ;;  %v637_v56 = vpack.c.bf16 %v464_v54, %v463_v50  ;;  %v647_v57 = vpack.c.bf16 %v468_v55, %v467_v51 }
  0xfe   : > { %638 = vst [vmem:[%s262_s23] sm:$0xff] %v637_v56   ;;  %655 = vst [vmem:[%s262_s23 + $0x10] sm:$0xff] %v647_v57  }
  0xff PF: > { %s14_s17 = sadd.s32 1, %s767_s17   ;;  %s875_s15 = smov %s763_s16 }
 0x100   : > { %p11_p5 = scmp.ge.s32.totalorder %s14_s17, 4   ;;  %s876_s16 = smov %s878_s18 }
 0x102   :  { %13 = sbr.rel (!%p11_p5) target bundleno = 2 (0x2), region = 75 }

// kernel: forward.9
= control target key start
LH: loop header
LB: loop body
LE: loop exit
PB: predicated region body
PF: predicated region fallthrough
CT: control target
= control target key end

     0   :  { %s2727_s15 = smov 0   ;;  %s2729_s16 = smov 0   ;;  %s3235_s0 = inlined_call_operand.vmem [shape: bf16[2,4,9,9,128], index: 0, kind: input, shape index: {}]   ;;  %s3236_s1 = inlined_call_operand.vmem [shape: bf16[1152,128], index: 1, kind: input, shape index: {}]   ;;  %s3237_s2 = inlined_call_operand.vmem [shape: f32[1,128], index: 2, kind: input, shape index: {}]   ;;  %s3238_s3 = inlined_call_operand.vmem [shape: f32[1,128], index: 3, kind: input, shape index: {}]   ;;  %s3239_s4 = inlined_call_operand.vmem [shape: bf16[2,8,8,128], index: 4, kind: output, shape index: {}]  }
   0x1   :  { %s2731_s17 = smov 0  }
   0x2 LB: > { %s26_s18 = sadd.s32 1, %s2696_s16  ;;  %p2111_p0 = scmp.ge.s32.totalorder %s2700_s17, 1  ;;  %s2700_s17 = sphi %s2731_s17, %s14_s17   ;;  %s2696_s16 = sphi %s2729_s16, %s3269_s16   ;;  %s2692_s15 = sphi %s2727_s15, %s3268_s15  }
   0x3   : > { %p28_p1 = scmp.ge.s32.totalorder %s26_s18, 2  ;;  %p201_p2 = scmp.lt.s32.totalorder %s2700_s17, 3 }
   0x5   : > { %s3271_s18 = smov (%p28_p1, %s26_s18), 0  ;;  %p202_p3 = pnand %p2111_p0, %p201_p2 }
   0x7   : > { %205 = sbr.rel (%p202_p3) target bundleno = 352 (0x160), region = 36 }
   0xc   : > { %v2560_v0 = vld [vmem:[%s3236_s1 + $0x78] sm:$0xff]   ;;  %v2564_v4 = vld [vmem:[%s3236_s1 + $0x70] sm:$0xff]   ;;  %v2568_v8 = vld [vmem:[%s3236_s1 + $0x68] sm:$0xff]   ;;  %p240_p4 = scmp.lt.s32.totalorder %s2692_s15, 1  ;;  %vm313_vm0 = vsmask.f32 3328 }
   0xd   : > { %v2561_v1 = vld [vmem:[%s3236_s1 + $0xf8] sm:$0xff]   ;;  %2323 = vmatprep.subr.bf16.mxu0 %v2560_v0  ;;  %v2565_v5 = vld [vmem:[%s3236_s1 + $0xf0] sm:$0xff]   ;;  %v2569_v9 = vld [vmem:[%s3236_s1 + $0xe8] sm:$0xff]   ;;  %vm314_vm1 = vsmask.f32 7440 }
   0xe   : > { %v2562_v2 = vld [vmem:[%s3236_s1 + $0x38] sm:$0xff]   ;;  %2363 = vmatprep.subr.bf16.mxu1 %v2561_v1  ;;  %v2566_v6 = vld [vmem:[%s3236_s1 + $0x30] sm:$0xff]   ;;  %v2570_v10 = vld [vmem:[%s3236_s1 + $0x28] sm:$0xff]   ;;  %s3273_s15 = smov (!%p240_p4, %s2692_s15), 1 }
   0xf   : > { %v2563_v3 = vld [vmem:[%s3236_s1 + $0xb8] sm:$0xff]   ;;  %2324 = vmatpush3.bf16.msra.mxu0 %v2562_v2  ;;  %v2567_v7 = vld [vmem:[%s3236_s1 + $0xb0] sm:$0xff]   ;;  %v2571_v11 = vld [vmem:[%s3236_s1 + $0xa8] sm:$0xff]   ;;  %s2535_s29 = smul.u32 288, %s3273_s15  ;;  %s2299_s20 = sshll.u32 %s3273_s15, 5 }
  0x10   : > { %2364 = vmatpush3.bf16.msra.mxu1 %v2563_v3  ;;  %2325 = vmatprep.subr.bf16.mxu0 %v2564_v4  ;;  %v2572_v12 = vld [vmem:[%s3236_s1 + $0x60] sm:$0xff]   ;;  %v2576_v16 = vld [vmem:[%s3236_s1 + $0x58] sm:$0xff]   ;;  %v2580_v20 = vld [vmem:[%s3236_s1 + $0x50] sm:$0xff]   ;;  %s262_s23 = scalar_lea.vmem %s3239_s4, %s2299_s20 }
  0x11   : > { %2365 = vmatprep.subr.bf16.mxu1 %v2565_v5  ;;  %v2573_v13 = vld [vmem:[%s3236_s1 + $0xe0] sm:$0xff]   ;;  %v2577_v17 = vld [vmem:[%s3236_s1 + $0xd8] sm:$0xff]   ;;  %v2581_v21 = vld [vmem:[%s3236_s1 + $0xd0] sm:$0xff]   ;;  %s2848_s14 = scalar_lea.vmem %s3235_s0, %s2535_s29 }
  0x12   : > { %v2574_v14 = vld [vmem:[%s3236_s1 + $0x20] sm:$0xff]   ;;  %v2578_v18 = vld [vmem:[%s3236_s1 + $0x18] sm:$0xff]   ;;  %v2582_v22 = vld [vmem:[%s3236_s1 + $0x10] sm:$0xff]  }
  0x13   : > { %2326 = vmatpush3.bf16.msra.mxu0 %v2566_v6  ;;  %v2575_v15 = vld [vmem:[%s3236_s1 + $0xa0] sm:$0xff]   ;;  %v2579_v19 = vld [vmem:[%s3236_s1 + $0x98] sm:$0xff]   ;;  %v2583_v23 = vld [vmem:[%s3236_s1 + $0x90] sm:$0xff]  }
  0x14   : > { %2366 = vmatpush3.bf16.msra.mxu1 %v2567_v7  ;;  %2327 = vmatprep.subr.bf16.mxu0 %v2568_v8  ;;  %v2584_v24 = vld [vmem:[%s3236_s1 + $0x48] sm:$0xff]   ;;  %v2588_v28 = vld [vmem:[%s3236_s1 + $0x40] sm:$0xff]   ;;  %v2116_v35 = vld [vmem:[%s2848_s14 + $0x50] sm:$0xf] }
  0x15   : > { %2367 = vmatprep.subr.bf16.mxu1 %v2569_v9  ;;  %v2585_v25 = vld [vmem:[%s3236_s1 + $0xc8] sm:$0xff]   ;;  %v2589_v29 = vld [vmem:[%s3236_s1 + $0xc0] sm:$0xff]   ;;  %290 = vst [vmem:[#allocation2 + $0x28] sm:$0xf] %v2116_v35  ;;  %v2598_v43 = vld [vmem:[%s3236_s1 + $0x178] sm:$0xff]  }
  0x16   : > { %v2586_v26 = vld [vmem:[%s3236_s1 + $0x8] sm:$0xff]   ;;  %v2590_v30 = vld [vmem:[%s3236_s1] sm:$0xff]   ;;  %v2123_v47 = vld [vmem:[%s2848_s14 + $0x90] sm:$0xf] }
  0x17   : > { %2328 = vmatpush3.bf16.msra.mxu0 %v2570_v10  ;;  %v2587_v27 = vld [vmem:[%s3236_s1 + $0x88] sm:$0xff]   ;;  %v2591_v31 = vld [vmem:[%s3236_s1 + $0x80] sm:$0xff]   ;;  %v2599_v48 = vld [vmem:[%s3236_s1 + $0x1f8] sm:$0xff]   ;;  %453 = vst [vmem:[#allocation2 + $0xc] sm:$0xf] %v2123_v47 }
  0x18   : > { %2368 = vmatpush3.bf16.msra.mxu1 %v2571_v11  ;;  %2329 = vmatprep.subr.bf16.mxu0 %v2572_v12  ;;  %v264_v32 = vld [vmem:[%s2848_s14] sm:$0xf]  ;;  %v265_v33 = vld [vmem:[%s2848_s14 + $0x8] sm:$0xf]  ;;  %v298_v37 = vld [vmem:[%s2848_s14 + $0x4] sm:$0x1] }
  0x19   : > { %2369 = vmatprep.subr.bf16.mxu1 %v2573_v13  ;;  %v2115_v34 = vld [vmem:[%s2848_s14 + $0x48] sm:$0xf]  ;;  %272 = vst [vmem:[#allocation2] sm:$0xf] %v264_v32  ;;  %273 = vst [vmem:[#allocation2 + $0x24] sm:$0xf] %v265_v33 }
  0x1a   : > { %289 = vst [vmem:[#allocation2 + $0x4] sm:$0xf] %v2115_v34  ;;  %v297_v36 = vld [vmem:[%s2848_s14] sm:$0xf]  ;;  %v299_v38 = vld [vmem:[%s2848_s14 + $0x8] sm:$0xf]  ;;  %vm2871_vm2 = vmor %vm313_vm0, %vm314_vm1 }
  0x1b   : > { %2330 = vmatpush3.bf16.msra.mxu0 %v2574_v14  ;;  %v300_v39 = vld [vmem:[%s2848_s14 + $0xc] sm:$0x1]  ;;  %v317_v40 = vshrl.u32 %v297_v36, 16  ;;  %v320_v41 = vshll.u32 %v297_v36, 16  ;;  %v326_v42 = vshll.u32 %v298_v37, 16  ;;  %v331_v44 = vshrl.u32 %v299_v38, 16 }
  0x1c   : > { %2370 = vmatpush3.bf16.msra.mxu1 %v2575_v15  ;;  %2331 = vmatprep.subr.bf16.mxu0 %v2576_v16  ;;  %v334_v45 = vshll.u32 %v299_v38, 16  ;;  %v340_v46 = vshll.u32 %v300_v39, 16  ;;  %v2124_v51 = vld [vmem:[%s2848_s14 + $0x98] sm:$0xf]  ;;  %v2602_v0 = vld [vmem:[%s3236_s1 + $0x170] sm:$0xff]   ;;  %v2616_v47 = vld [vmem:[%s3236_s1 + $0x1e0] sm:$0xff]  }
  0x1d   : > { %2371 = vmatprep.subr.bf16.mxu1 %v2577_v17  ;;  %v319_v49 = vrot.slane %v317_v40, 4  ;;  %v322_v50 = vrot.slane %v320_v41, 5  ;;  %v328_v53 = vrot.slane %v326_v42, 5  ;;  %v333_v54 = vrot.slane %v331_v44, 4  ;;  %454 = vst [vmem:[#allocation2 + $0x30] sm:$0xf] %v2124_v51 }
  0x1e   : > { %v336_v55 = vrot.slane %v334_v45, 5  ;;  %v2600_v57 = vld [vmem:[%s3236_s1 + $0x138] sm:$0xff]   ;;  %v342_v59 = vrot.slane %v340_v46, 5  ;;  %v2604_v3 = vld [vmem:[%s3236_s1 + $0x130] sm:$0xff]   ;;  %v2118_v7 = vld [vmem:[%s2848_s14 + $0x60] sm:$0xf] }
  0x1f   : > { %2332 = vmatpush3.bf16.msra.mxu0 %v2578_v18  ;;  %v323_v56 = vor.u32 %v322_v50, %v319_v49  ;;  %v266_v4 = vld [vmem:[%s2848_s14 + $0x10] sm:$0xf]  ;;  %v267_v5 = vld [vmem:[%s2848_s14 + $0x18] sm:$0xf]  ;;  %292 = vst [vmem:[#allocation2 + $0x70] sm:$0xf] %v2118_v7 }
  0x20   : > { %2372 = vmatpush3.bf16.msra.mxu1 %v2579_v19  ;;  %2333 = vmatprep.subr.bf16.mxu0 %v2580_v20  ;;  %v337_v58 = vor.u32 %v336_v55, %v333_v54  ;;  %v2592_v60 = vld [vmem:[#allocation2] ss:$36 sps:$4 sm:$0xff]   ;;  %274 = vst [vmem:[#allocation2 + $0x48] sm:$0xf] %v266_v4  ;;  %v2117_v6 = vld [vmem:[%s2848_s14 + $0x58] sm:$0xf] }
  0x21   : > { %2373 = vmatprep.subr.bf16.mxu1 %v2581_v21  ;;  %v2594_v61 = vld [vmem:[#allocation2 + $0x4] ss:$36 sps:$4 sm:$0xff]   ;;  %v324_v62 = vrot.slane %v323_v56, 4  ;;  %275 = vst [vmem:[#allocation2 + $0x6c] sm:$0xf] %v267_v5  ;;  %v2601_v16 = vld [vmem:[%s3236_s1 + $0x1b8] sm:$0xff]  }
  0x22   : > { %v338_v63 = vrot.slane %v337_v58, 4  ;;  %1632 = vmatprep.mubr.bf16.mxu0 %v2594_v61  ;;  %291 = vst [vmem:[#allocation2 + $0x4c] sm:$0xf] %v2117_v6  ;;  %v301_v8 = vld [vmem:[%s2848_s14 + $0x10] sm:$0xf]  ;;  %v2613_v40 = vld [vmem:[%s3236_s1 + $0x128] sm:$0xff]  }
  0x23   : > { %2334 = vmatpush3.bf16.msra.mxu0 %v2582_v22  ;;  %v329_v1 = vsel %vm2871_vm2, %v324_v62, %v328_v53  ;;  %v302_v9 = vld [vmem:[%s2848_s14 + $0x14] sm:$0x1]  ;;  %v303_v10 = vld [vmem:[%s2848_s14 + $0x18] sm:$0xf]  ;;  %v304_v11 = vld [vmem:[%s2848_s14 + $0x1c] sm:$0x1] }
  0x24   : > { %2374 = vmatpush3.bf16.msra.mxu1 %v2583_v23  ;;  %2335 = vmatprep.subr.bf16.mxu0 %v2584_v24  ;;  %v343_v2 = vsel %vm2871_vm2, %v338_v63, %v342_v59  ;;  %436 = vst [vmem:[#allocation2 + $0x8] sm:$0xf] %v329_v1  ;;  %v345_v12 = vshrl.u32 %v301_v8, 16  ;;  %v348_v13 = vshll.u32 %v301_v8, 16  ;;  %v354_v14 = vshll.u32 %v302_v9, 16  ;;  %v2603_v21 = vld [vmem:[%s3236_s1 + $0x1f0] sm:$0xff]  }
  0x25   : > { %2375 = vmatprep.subr.bf16.mxu1 %v2585_v25  ;;  %437 = vst [vmem:[#allocation2 + $0x2c] sm:$0xf] %v343_v2  ;;  %v359_v15 = vshrl.u32 %v303_v10, 16  ;;  %v362_v17 = vshll.u32 %v303_v10, 16  ;;  %v368_v18 = vshll.u32 %v304_v11, 16  ;;  %v2611_v25 = vld [vmem:[%s3236_s1 + $0x168] sm:$0xff]  }
  0x26   : > { %v2125_v19 = vld [vmem:[%s2848_s14 + $0xa0] sm:$0xf]  ;;  %v2126_v20 = vld [vmem:[%s2848_s14 + $0xa8] sm:$0xf]  ;;  %v347_v22 = vrot.slane %v345_v12, 4  ;;  %v350_v23 = vrot.slane %v348_v13, 5 }
  0x27   : > { %2336 = vmatpush3.bf16.msra.mxu0 %v2586_v26  ;;  %v361_v24 = vrot.slane %v359_v15, 4  ;;  %455 = vst [vmem:[#allocation2 + $0x54] sm:$0xf] %v2125_v19  ;;  %456 = vst [vmem:[#allocation2 + $0x78] sm:$0xf] %v2126_v20  ;;  %v2605_v32 = vld [vmem:[%s3236_s1 + $0x1b0] sm:$0xff]  }
  0x28   : > { %2376 = vmatpush3.bf16.msra.mxu1 %v2587_v27  ;;  %2337 = vmatprep.subr.bf16.mxu0 %v2588_v28  ;;  %v2597_v27 = vld [vmem:[#allocation2 + $0xc] ss:$36 sps:$4 sm:$0xff]   ;;  %v364_v28 = vrot.slane %v362_v17, 5  ;;  %v2615_v44 = vld [vmem:[%s3236_s1 + $0x160] sm:$0xff]   ;;  %v269_v50 = vld [vmem:[%s2848_s14 + $0x28] sm:$0xf] }
  0x29   : > { %2377 = vmatprep.subr.bf16.mxu1 %v2589_v29  ;;  %v351_v29 = vor.u32 %v350_v23, %v347_v22  ;;  %1697 = vmatprep.mubr.bf16.mxu1 %v2597_v27  ;;  %v810_v34 = vld [vmem:[#allocation2 + $0x48] sm:$0xff]  ;;  %v2617_v46 = vld [vmem:[%s3236_s1 + $0x120] sm:$0xff]   ;;  %v2120_v53 = vld [vmem:[%s2848_s14 + $0x70] sm:$0xf]  ;;  %277 = vst [vmem:[#allocation2 + $0xb4] sm:$0xf] %v269_v50 }
  0x2a   : > { %v365_v33 = vor.u32 %v364_v28, %v361_v24  ;;  %v815_v35 = vld [vmem:[#allocation2 + $0x6c] sm:$0xff]  ;;  %v2618_v49 = vld [vmem:[%s3236_s1 + $0x1a0] sm:$0xff]   ;;  %v2119_v51 = vld [vmem:[%s2848_s14 + $0x68] sm:$0xf]  ;;  %294 = vst [vmem:[#allocation2 + $0xb8] sm:$0xf] %v2120_v53 }
  0x2b   : > { %2338 = vmatpush3.bf16.msra.mxu0 %v2590_v30  ;;  %v356_v30 = vrot.slane %v354_v14, 5  ;;  %v2606_v36 = vld [vmem:[#allocation2 + $0x4c] ss:$36 sps:$4 sm:$0xff]   ;;  %v352_v37 = vrot.slane %v351_v29, 4  ;;  %v2196_v39 = vcombine.low %v810_v34, %v815_v35  ;;  %293 = vst [vmem:[#allocation2 + $0x94] sm:$0xf] %v2119_v51 }
  0x2c   : > { %2378 = vmatpush3.bf16.msra.mxu1 %v2591_v31  ;;  %2403 = vmatprep.subr.bf16.mxu0 %v2598_v43  ;;  %v2595_v26 = vld [vmem:[#allocation2 + $0x8] ss:$36 sps:$4 sm:$0xff]   ;;  %v370_v31 = vrot.slane %v368_v18, 5  ;;  %v366_v38 = vrot.slane %v365_v33, 4  ;;  %v305_v54 = vld [vmem:[%s2848_s14 + $0x20] sm:$0xf] }
  0x2d   : > { %2443 = vmatprep.subr.bf16.mxu1 %v2599_v48  ;;  %v357_v41 = vsel %vm2871_vm2, %v352_v37, %v356_v30  ;;  %v2612_v42 = vld [vmem:[%s3236_s1 + $0x1e8] sm:$0xff]   ;;  %v268_v48 = vld [vmem:[%s2848_s14 + $0x20] sm:$0xf]  ;;  %v306_v55 = vld [vmem:[%s2848_s14 + $0x24] sm:$0x1]  ;;  %v373_v58 = vshrl.u32 %v305_v54, 16 }
  0x2e   : > { %1633 = vmatmul.mubr.bf16.vlgmr.msra.gmra.mxu0 %v2592_v60  ;;  %v371_v43 = vsel %vm2871_vm2, %v366_v38, %v370_v31  ;;  %438 = vst [vmem:[#allocation2 + $0x50] sm:$0xf] %v357_v41  ;;  %v2614_v45 = vld [vmem:[%s3236_s1 + $0x1a8] sm:$0xff]   ;;  %276 = vst [vmem:[#allocation2 + $0x90] sm:$0xf] %v268_v48  ;;  %v376_v59 = vshll.u32 %v305_v54, 16 }
  0x2f   : > { %2404 = vmatpush3.bf16.msra.mxu0 %v2600_v57  ;;  %1698 = vmatmul.mubr.bf16.vlgmr.msra.gmra.mxu1 %v2595_v26  ;;  %439 = vst [vmem:[#allocation2 + $0x74] sm:$0xf] %v371_v43  ;;  %v307_v56 = vld [vmem:[%s2848_s14 + $0x28] sm:$0xf]  ;;  %v308_v57 = vld [vmem:[%s2848_s14 + $0x2c] sm:$0x1] }
  0x30   : > { %2405 = vmatprep.subr.bf16.mxu0 %v2602_v0  ;;  %2444 = vmatpush3.bf16.msra.mxu1 %v2601_v16  ;;  %v382_v60 = vshll.u32 %v306_v55, 16  ;;  %v387_v61 = vshrl.u32 %v307_v56, 16  ;;  %v390_v62 = vshll.u32 %v307_v56, 16  ;;  %v396_v63 = vshll.u32 %v308_v57, 16  ;;  %v2127_v0 = vld [vmem:[%s2848_s14 + $0xb0] sm:$0xf] }
  0x31   : > { %2445 = vmatprep.subr.bf16.mxu1 %v2603_v21  ;;  %1640 = vmatprep.mubr.bf16.mxu0 %v2606_v36  ;;  %v2624_v1 = vld [vmem:[%s3236_s1 + $0x158] sm:$0xff]   ;;  %v375_v4 = vrot.slane %v373_v58, 4  ;;  %457 = vst [vmem:[#allocation2 + $0x9c] sm:$0xf] %v2127_v0  ;;  %v378_v5 = vrot.slane %v376_v59, 5  ;;  %v2628_v24 = vld [vmem:[%s3236_s1 + $0x150] sm:$0xff]  }
  0x32   : > { %v2608_v2 = vld [vmem:[#allocation2 + $0x54] ss:$36 sps:$4 sm:$0xff]   ;;  %v384_v6 = vrot.slane %v382_v60, 5  ;;  %v389_v7 = vrot.slane %v387_v61, 4  ;;  %v392_v8 = vrot.slane %v390_v62, 5  ;;  %v398_v10 = vrot.slane %v396_v63, 5 }
  0x33   : > { %2406 = vmatpush3.bf16.msra.mxu0 %v2604_v3  ;;  %v2128_v9 = vld [vmem:[%s2848_s14 + $0xb8] sm:$0xf]  ;;  %1705 = vmatprep.mubr.bf16.mxu1 %v2608_v2  ;;  %v379_v12 = vor.u32 %v378_v5, %v375_v4  ;;  %v2630_v26 = vld [vmem:[%s3236_s1 + $0x110] sm:$0xff]   ;;  %v2122_v31 = vld [vmem:[%s2848_s14 + $0x80] sm:$0xf] }
  0x34   : > { %2407 = vmatprep.subr.bf16.mxu0 %v2611_v25  ;;  %2446 = vmatpush3.bf16.msra.mxu1 %v2605_v32  ;;  %458 = vst [vmem:[#allocation2 + $0xc0] sm:$0xf] %v2128_v9  ;;  %v2625_v11 = vld [vmem:[%s3236_s1 + $0x1d8] sm:$0xff]   ;;  %v393_v13 = vor.u32 %v392_v8, %v389_v7  ;;  %v2629_v25 = vld [vmem:[%s3236_s1 + $0x1d0] sm:$0xff]   ;;  %296 = vst [vmem:[#allocation2 + $0x100] sm:$0xf] %v2122_v31 }
  0x35   : > { %2447 = vmatprep.subr.bf16.mxu1 %v2612_v42  ;;  %v820_v14 = vld [vmem:[#allocation2 + $0x90] sm:$0xff]  ;;  %v380_v17 = vrot.slane %v379_v12, 4  ;;  %v2626_v20 = vld [vmem:[%s3236_s1 + $0x118] sm:$0xff]   ;;  %v2129_v42 = vld [vmem:[%s2848_s14 + $0xc0] sm:$0xf] }
  0x36   : > { %1641 = vmatmul.mubr.bf16.gmra.mxu0 %v2196_v39  ;;  %v2610_v3 = vld [vmem:[#allocation2 + $0x50] ss:$36 sps:$4 sm:$0xff]   ;;  %v394_v18 = vrot.slane %v393_v13, 4  ;;  %v2627_v21 = vld [vmem:[%s3236_s1 + $0x198] sm:$0xff]   ;;  %v2130_v43 = vld [vmem:[%s2848_s14 + $0xc8] sm:$0xf] }
  0x37   : > { %2408 = vmatpush3.bf16.msra.mxu0 %v2613_v40  ;;  %1706 = vmatmul.mubr.bf16.gmra.mxu1 %v2610_v3  ;;  %v825_v15 = vld [vmem:[#allocation2 + $0xb4] sm:$0xff]  ;;  %v385_v22 = vsel %vm2871_vm2, %v380_v17, %v384_v6  ;;  %v270_v28 = vld [vmem:[%s2848_s14 + $0x30] sm:$0xf]  ;;  %v312_v35 = vld [vmem:[%s2848_s14 + $0x3c] sm:$0x1] }
  0x38   : > { %2409 = vmatprep.subr.bf16.mxu0 %v2615_v44  ;;  %2448 = vmatpush3.bf16.msra.mxu1 %v2614_v45  ;;  %v2619_v16 = vld [vmem:[#allocation2 + $0x94] ss:$36 sps:$4 sm:$0xff]   ;;  %v2205_v19 = vcombine.low %v820_v14, %v825_v15  ;;  %v399_v23 = vsel %vm2871_vm2, %v394_v18, %v398_v10  ;;  %440 = vst [vmem:[#allocation2 + $0x98] sm:$0xf] %v385_v22  ;;  %278 = vst [vmem:[#allocation2 + $0xd8] sm:$0xf] %v270_v28 }
  0x39   : > { %2449 = vmatprep.subr.bf16.mxu1 %v2616_v47  ;;  %1648 = vmatprep.mubr.bf16.mxu0 %v2619_v16  ;;  %441 = vst [vmem:[#allocation2 + $0xbc] sm:$0xf] %v399_v23  ;;  %v2631_v27 = vld [vmem:[%s3236_s1 + $0x190] sm:$0xff]   ;;  %v271_v29 = vld [vmem:[%s2848_s14 + $0x38] sm:$0xf]  ;;  %v424_v41 = vshll.u32 %v312_v35, 16 }
  0x3a   : > { %v2121_v30 = vld [vmem:[%s2848_s14 + $0x78] sm:$0xf]  ;;  %279 = vst [vmem:[#allocation2 + $0xfc] sm:$0xf] %v271_v29  ;;  %v309_v32 = vld [vmem:[%s2848_s14 + $0x30] sm:$0xf] }
  0x3b   : > { %2410 = vmatpush3.bf16.msra.mxu0 %v2617_v46  ;;  %295 = vst [vmem:[#allocation2 + $0xdc] sm:$0xf] %v2121_v30  ;;  %v310_v33 = vld [vmem:[%s2848_s14 + $0x34] sm:$0x1]  ;;  %v311_v34 = vld [vmem:[%s2848_s14 + $0x38] sm:$0xf] }
  0x3c   : > { %2411 = vmatprep.subr.bf16.mxu0 %v2624_v1  ;;  %2450 = vmatpush3.bf16.msra.mxu1 %v2618_v49  ;;  %v401_v36 = vshrl.u32 %v309_v32, 16  ;;  %v404_v37 = vshll.u32 %v309_v32, 16  ;;  %v410_v38 = vshll.u32 %v310_v33, 16  ;;  %v415_v39 = vshrl.u32 %v311_v34, 16  ;;  %v2621_v44 = vld [vmem:[#allocation2 + $0x9c] ss:$36 sps:$4 sm:$0xff]  }
  0x3d   : > { %2451 = vmatprep.subr.bf16.mxu1 %v2625_v11  ;;  %v418_v40 = vshll.u32 %v311_v34, 16  ;;  %459 = vst [vmem:[#allocation2 + $0xe4] sm:$0xf] %v2129_v42  ;;  %460 = vst [vmem:[#allocation2 + $0x108] sm:$0xf] %v2130_v43  ;;  %1713 = vmatprep.mubr.bf16.mxu1 %v2621_v44  ;;  %v2637_v53 = vld [vmem:[%s3236_s1 + $0x148] sm:$0xff]  }
  0x3e   : > { %1649 = vmatmul.mubr.bf16.gmra.mxu0 %v2205_v19  ;;  %v403_v45 = vrot.slane %v401_v36, 4  ;;  %v406_v46 = vrot.slane %v404_v37, 5  ;;  %v417_v48 = vrot.slane %v415_v39, 4  ;;  %v412_v51 = vrot.slane %v410_v38, 5  ;;  %v2638_v56 = vld [vmem:[%s3236_s1 + $0x1c8] sm:$0xff]   ;;  %v2641_v3 = vld [vmem:[%s3236_s1 + $0x140] sm:$0xff]  }
  0x3f   : > { %2412 = vmatpush3.bf16.msra.mxu0 %v2626_v20  ;;  %v420_v49 = vrot.slane %v418_v40, 5  ;;  %v426_v55 = vrot.slane %v424_v41, 5  ;;  %v2639_v63 = vld [vmem:[%s3236_s1 + $0x108] sm:$0xff]   ;;  %v2642_v4 = vld [vmem:[%s3236_s1 + $0x1c0] sm:$0xff]   ;;  %v2131_v7 = vld [vmem:[%s2848_s14 + $0xd8] sm:$0xf] }
  0x40   : > { %2452 = vmatpush3.bf16.msra.mxu1 %v2627_v21  ;;  %2413 = vmatprep.subr.bf16.mxu0 %v2628_v24  ;;  %v2623_v47 = vld [vmem:[#allocation2 + $0x98] ss:$36 sps:$4 sm:$0xff]   ;;  %v407_v50 = vor.u32 %v406_v46, %v403_v45  ;;  %v2640_v1 = vld [vmem:[%s3236_s1 + $0x188] sm:$0xff]   ;;  %v2643_v5 = vld [vmem:[%s3236_s1 + $0x100] sm:$0xff]   ;;  %470 = vst [vmem:[#allocation2 + $0x10] sm:$0xf] %v2131_v7 }
  0x41   : > { %2453 = vmatprep.subr.bf16.mxu1 %v2629_v25  ;;  %1714 = vmatmul.mubr.bf16.gmra.mxu1 %v2623_v47  ;;  %v421_v54 = vor.u32 %v420_v49, %v417_v48  ;;  %v835_v58 = vld [vmem:[#allocation2 + $0xfc] sm:$0xff]  ;;  %v2139_v9 = vld [vmem:[%s2848_s14 + $0x90] sm:$0xf]  ;;  %v2140_v10 = vld [vmem:[%s2848_s14 + $0x94] sm:$0x1] }
  0x42   : > { %v830_v57 = vld [vmem:[#allocation2 + $0xd8] sm:$0xff]  ;;  %v408_v60 = vrot.slane %v407_v50, 4  ;;  %v2644_v6 = vld [vmem:[%s3236_s1 + $0x180] sm:$0xff]   ;;  %v495_v13 = vshrl.u32 %v2139_v9, 16  ;;  %v498_v14 = vshll.u32 %v2139_v9, 16  ;;  %v504_v15 = vshll.u32 %v2140_v10, 16 }
  0x43   : > { %2414 = vmatpush3.bf16.msra.mxu0 %v2630_v26  ;;  %v2632_v59 = vld [vmem:[#allocation2 + $0xdc] ss:$36 sps:$4 sm:$0xff]   ;;  %v422_v61 = vrot.slane %v421_v54, 4  ;;  %v2214_v62 = vcombine.low %v830_v57, %v835_v58  ;;  %v2141_v11 = vld [vmem:[%s2848_s14 + $0x98] sm:$0xf]  ;;  %v3044_v57 = vld [vmem:[%s3236_s1 + $0x230] sm:$0xff]  }
  0x44   : > { %2454 = vmatpush3.bf16.msra.mxu1 %v2631_v27  ;;  %2415 = vmatprep.subr.bf16.mxu0 %v2637_v53  ;;  %v413_v0 = vsel %vm2871_vm2, %v408_v60, %v412_v51  ;;  %v2132_v8 = vld [vmem:[%s2848_s14 + $0xe0] sm:$0xf]  ;;  %v2142_v12 = vld [vmem:[%s2848_s14 + $0x9c] sm:$0x1]  ;;  %v509_v16 = vshrl.u32 %v2141_v11, 16  ;;  %v512_v18 = vshll.u32 %v2141_v11, 16 }
  0x45   : > { %2455 = vmatprep.subr.bf16.mxu1 %v2638_v56  ;;  %1656 = vmatprep.mubr.bf16.mxu0 %v2632_v59  ;;  %v427_v2 = vsel %vm2871_vm2, %v422_v61, %v426_v55  ;;  %442 = vst [vmem:[#allocation2 + $0xe0] sm:$0xf] %v413_v0  ;;  %471 = vst [vmem:[#allocation2 + $0x34] sm:$0xf] %v2132_v8  ;;  %v2155_v17 = vld [vmem:[%s2848_s14 + $0x8] sm:$0xf] }
  0x46   : > { %1657 = vmatmul.mubr.bf16.gmra.mxu0 %v2214_v62  ;;  %443 = vst [vmem:[#allocation2 + $0x104] sm:$0xf] %v427_v2  ;;  %v518_v19 = vshll.u32 %v2142_v12, 16  ;;  %v2156_v20 = vld [vmem:[%s2848_s14 + $0x10] sm:$0xf]  ;;  %v3022_v21 = vld [vmem:[%s3236_s1 + $0x238] sm:$0xff]  }
  0x47   : > { %2416 = vmatpush3.bf16.msra.mxu0 %v2639_v63  ;;  %631 = vst [vmem:[#allocation2 + $0x18] sm:$0xf] %v2155_v17  ;;  %v2634_v22 = vld [vmem:[#allocation2 + $0xe4] ss:$36 sps:$4 sm:$0xff]   ;;  %v497_v24 = vrot.slane %v495_v13, 4  ;;  %v500_v25 = vrot.slane %v498_v14, 5 }
  0x48   : > { %2456 = vmatpush3.bf16.msra.mxu1 %v2640_v1  ;;  %2417 = vmatprep.subr.bf16.mxu0 %v2641_v3  ;;  %632 = vst [vmem:[#allocation2 + $0x3c] sm:$0xf] %v2156_v20  ;;  %v511_v26 = vrot.slane %v509_v16, 4  ;;  %v514_v27 = vrot.slane %v512_v18, 5  ;;  %v2163_v28 = vld [vmem:[%s2848_s14 + $0x50] sm:$0xf] }
  0x49   : > { %2457 = vmatprep.subr.bf16.mxu1 %v2642_v4  ;;  %1721 = vmatprep.mubr.bf16.mxu1 %v2634_v22  ;;  %v506_v29 = vrot.slane %v504_v15, 5  ;;  %v520_v30 = vrot.slane %v518_v19, 5  ;;  %v2164_v31 = vld [vmem:[%s2848_s14 + $0x58] sm:$0xf]  ;;  %648 = vst [vmem:[#allocation2 + $0x1c] sm:$0xf] %v2163_v28  ;;  %v501_v32 = vor.u32 %v500_v25, %v497_v24 }
  0x4a   : > { %v515_v33 = vor.u32 %v514_v27, %v511_v26  ;;  %649 = vst [vmem:[#allocation2 + $0x40] sm:$0xf] %v2164_v31  ;;  %v2133_v34 = vld [vmem:[%s2848_s14 + $0xe8] sm:$0xf]  ;;  %v2134_v35 = vld [vmem:[%s2848_s14 + $0xf0] sm:$0xf] }
  0x4b   : > { %2418 = vmatpush3.bf16.msra.mxu0 %v2643_v5  ;;  %v2143_v36 = vld [vmem:[%s2848_s14 + $0xa0] sm:$0xf]  ;;  %v502_v37 = vrot.slane %v501_v32, 4  ;;  %472 = vst [vmem:[#allocation2 + $0x58] sm:$0xf] %v2133_v34  ;;  %v3056_v8 = vld [vmem:[%s3236_s1 + $0x228] sm:$0xff]  }
  0x4c   : > { %2458 = vmatpush3.bf16.msra.mxu1 %v2644_v6  ;;  %2495 = vmatprep.subr.bf16.mxu0 %v3022_v21  ;;  %v516_v38 = vrot.slane %v515_v33, 4  ;;  %473 = vst [vmem:[#allocation2 + $0x7c] sm:$0xf] %v2134_v35  ;;  %v2144_v39 = vld [vmem:[%s2848_s14 + $0xa4] sm:$0x1]  ;;  %v523_v42 = vshrl.u32 %v2143_v36, 16 }
  0x4d   : > { %v2636_v23 = vld [vmem:[#allocation2 + $0xe0] ss:$36 sps:$4 sm:$0xff]   ;;  %2519 = vmatprep.subr.bf16.mxu1 %v3022_v21  ;;  %v2145_v40 = vld [vmem:[%s2848_s14 + $0xa8] sm:$0xf]  ;;  %v2146_v41 = vld [vmem:[%s2848_s14 + $0xac] sm:$0x1]  ;;  %v507_v46 = vsel %vm2871_vm2, %v502_v37, %v506_v29 }
  0x4e   : > { %1722 = vmatmul.mubr.bf16.gmra.mxu1 %v2636_v23  ;;  %v526_v43 = vshll.u32 %v2143_v36, 16  ;;  %v532_v44 = vshll.u32 %v2144_v39, 16  ;;  %v537_v45 = vshrl.u32 %v2145_v40, 16  ;;  %v521_v47 = vsel %vm2871_vm2, %v516_v38, %v520_v30  ;;  %v2157_v50 = vld [vmem:[%s2848_s14 + $0x18] sm:$0xf]  ;;  %v3068_v24 = vld [vmem:[%s3236_s1 + $0x220] sm:$0xff]  }
  0x4f   : > { %v540_v48 = vshll.u32 %v2145_v40, 16  ;;  %v546_v49 = vshll.u32 %v2146_v41, 16  ;;  %v2158_v51 = vld [vmem:[%s2848_s14 + $0x20] sm:$0xf]  ;;  %614 = vst [vmem:[#allocation2 + $0x14] sm:$0xf] %v507_v46 }
  0x50   : > { %615 = vst [vmem:[#allocation2 + $0x38] sm:$0xf] %v521_v47  ;;  %v525_v53 = vrot.slane %v523_v42, 4  ;;  %v528_v54 = vrot.slane %v526_v43, 5  ;;  %v539_v55 = vrot.slane %v537_v45, 4  ;;  %v534_v58 = vrot.slane %v532_v44, 5 }
  0x51   : > { %633 = vst [vmem:[#allocation2 + $0x60] sm:$0xf] %v2157_v50  ;;  %634 = vst [vmem:[#allocation2 + $0x84] sm:$0xf] %v2158_v51  ;;  %v2165_v56 = vld [vmem:[%s2848_s14 + $0x60] sm:$0xf] }
  0x52   : > { %v542_v59 = vrot.slane %v540_v48, 5  ;;  %v2166_v60 = vld [vmem:[%s2848_s14 + $0x68] sm:$0xf]  ;;  %650 = vst [vmem:[#allocation2 + $0x64] sm:$0xf] %v2165_v56  ;;  %v529_v63 = vor.u32 %v528_v54, %v525_v53  ;;  %v548_v0 = vrot.slane %v546_v49, 5 }
  0x53   : > { %v2648_v61 = vld [vmem:[#allocation2 + $0x18] ss:$36 sps:$4 sm:$0xff]   ;;  %651 = vst [vmem:[#allocation2 + $0x88] sm:$0xf] %v2166_v60  ;;  %v2136_v5 = vld [vmem:[%s2848_s14 + $0x100] sm:$0xf] }
  0x54   : > { %v2650_v62 = vld [vmem:[#allocation2 + $0x1c] ss:$36 sps:$4 sm:$0xff]   ;;  %v543_v1 = vor.u32 %v542_v59, %v539_v55  ;;  %v530_v2 = vrot.slane %v529_v63, 4  ;;  %v2135_v3 = vld [vmem:[%s2848_s14 + $0xf8] sm:$0xf]  ;;  %v3103_v60 = vld [vmem:[%s3236_s1 + $0x210] sm:$0xff]  }
  0x55   : > { %1827 = vmatprep.mubr.bf16.mxu1 %v2650_v62  ;;  %474 = vst [vmem:[#allocation2 + $0xa0] sm:$0xf] %v2135_v3  ;;  %v2147_v6 = vld [vmem:[%s2848_s14 + $0xb0] sm:$0xf]  ;;  %475 = vst [vmem:[#allocation2 + $0xc4] sm:$0xf] %v2136_v5 }
  0x56   : > { %1828 = vmatmul.mubr.bf16.vlgmr.msra.gmra.mxu1 %v2648_v61  ;;  %v544_v4 = vrot.slane %v543_v1, 4  ;;  %v535_v7 = vsel %vm2871_vm2, %v530_v2, %v534_v58  ;;  %v2148_v9 = vld [vmem:[%s2848_s14 + $0xb4] sm:$0x1]  ;;  %v2149_v10 = vld [vmem:[%s2848_s14 + $0xb8] sm:$0xf]  ;;  %v551_v14 = vshrl.u32 %v2147_v6, 16 }
  0x57   : > { %2527 = vmatpush3.bf16.msra.mxu1 %v3022_v21  ;;  %v2150_v11 = vld [vmem:[%s2848_s14 + $0xbc] sm:$0x1]  ;;  %v2645_v12 = vld [vmem:[#allocation2 + $0x10] ss:$36 sps:$4 sm:$0xff]   ;;  %616 = vst [vmem:[#allocation2 + $0x5c] sm:$0xf] %v535_v7 }
  0x58   : > { %2520 = vmatprep.subr.bf16.mxu1 %v3044_v57  ;;  %v549_v13 = vsel %vm2871_vm2, %v544_v4, %v548_v0  ;;  %v554_v15 = vshll.u32 %v2147_v6, 16  ;;  %v2647_v16 = vld [vmem:[#allocation2 + $0x14] ss:$36 sps:$4 sm:$0xff]   ;;  %v560_v17 = vshll.u32 %v2148_v9, 16  ;;  %v565_v18 = vshrl.u32 %v2149_v10, 16 }
  0x59   : > { %617 = vst [vmem:[#allocation2 + $0x80] sm:$0xf] %v549_v13  ;;  %v568_v19 = vshll.u32 %v2149_v10, 16  ;;  %v2657_v22 = vld [vmem:[#allocation2 + $0x60] ss:$36 sps:$4 sm:$0xff]   ;;  %v553_v23 = vrot.slane %v551_v14, 4  ;;  %1762 = vmatprep.mubr.bf16.mxu0 %v2647_v16 }
  0x5a   : > { %v2655_v20 = vld [vmem:[#allocation2 + $0x64] ss:$36 sps:$4 sm:$0xff]   ;;  %v556_v25 = vrot.slane %v554_v15, 5  ;;  %v567_v26 = vrot.slane %v565_v18, 4  ;;  %1763 = vmatmul.mubr.bf16.vlgmr.msra.gmra.mxu0 %v2645_v12  ;;  %v562_v29 = vrot.slane %v560_v17, 5  ;;  %v574_v30 = vshll.u32 %v2150_v11, 16 }
  0x5b   : > { %2528 = vmatpush3.bf16.msra.mxu1 %v3044_v57  ;;  %v570_v27 = vrot.slane %v568_v19, 5  ;;  %v2159_v28 = vld [vmem:[%s2848_s14 + $0x28] sm:$0xf]  ;;  %1835 = vmatprep.mubr.bf16.mxu1 %v2655_v20  ;;  %v2160_v31 = vld [vmem:[%s2848_s14 + $0x30] sm:$0xf]  ;;  %v3081_v39 = vld [vmem:[%s3236_s1 + $0x218] sm:$0xff]  }
  0x5c   : > { %635 = vst [vmem:[#allocation2 + $0xa8] sm:$0xf] %v2159_v28  ;;  %v2167_v32 = vld [vmem:[%s2848_s14 + $0x70] sm:$0xf]  ;;  %2496 = vmatpush3.bf16.msra.mxu0 %v3022_v21  ;;  %2521 = vmatprep.subr.bf16.mxu1 %v3056_v8  ;;  %v557_v33 = vor.u32 %v556_v25, %v553_v23  ;;  %636 = vst [vmem:[#allocation2 + $0xcc] sm:$0xf] %v2160_v31 }
  0x5d   : > { %v571_v34 = vor.u32 %v570_v27, %v567_v26  ;;  %v2168_v35 = vld [vmem:[%s2848_s14 + $0x78] sm:$0xf]  ;;  %652 = vst [vmem:[#allocation2 + $0xac] sm:$0xf] %v2167_v32  ;;  %2497 = vmatprep.subr.bf16.mxu0 %v3044_v57  ;;  %v576_v36 = vrot.slane %v574_v30, 5  ;;  %v3114_v10 = vld [vmem:[%s3236_s1 + $0x208] sm:$0xff]  }
  0x5e   : > { %1836 = vmatmul.mubr.bf16.gmra.mxu1 %v2657_v22  ;;  %653 = vst [vmem:[#allocation2 + $0xd0] sm:$0xf] %v2168_v35  ;;  %v812_v37 = vld [vmem:[#allocation2 + $0x58] sm:$0xff]  ;;  %v558_v21 = vrot.slane %v557_v33, 4  ;;  %v2137_v40 = vld [vmem:[%s2848_s14 + $0x108] sm:$0xf] }
  0x5f   : > { %2529 = vmatpush3.bf16.msra.mxu1 %v3056_v8  ;;  %v572_v38 = vrot.slane %v571_v34, 4  ;;  %v2138_v43 = vld [vmem:[%s2848_s14 + $0x110] sm:$0xf]  ;;  %476 = vst [vmem:[#allocation2 + $0xe8] sm:$0xf] %v2137_v40 }
  0x60   : > { %v817_v41 = vld [vmem:[#allocation2 + $0x7c] sm:$0xff]  ;;  %2522 = vmatprep.subr.bf16.mxu1 %v3068_v24  ;;  %2498 = vmatpush3.bf16.msra.mxu0 %v3044_v57  ;;  %v563_v45 = vsel %vm2871_vm2, %v558_v21, %v562_v29  ;;  %477 = vst [vmem:[#allocation2 + $0x10c] sm:$0xf] %v2138_v43  ;;  %v2152_v48 = vld [vmem:[%s2848_s14 + $0xc4] sm:$0x1] }
  0x61   : > { %v2653_v42 = vld [vmem:[#allocation2 + $0x5c] ss:$36 sps:$4 sm:$0xff]   ;;  %v2200_v44 = vcombine.low %v812_v37, %v817_v41  ;;  %v577_v46 = vsel %vm2871_vm2, %v572_v38, %v576_v36  ;;  %v2153_v49 = vld [vmem:[%s2848_s14 + $0xc8] sm:$0xf]  ;;  %2499 = vmatprep.subr.bf16.mxu0 %v3056_v8  ;;  %618 = vst [vmem:[#allocation2 + $0xa4] sm:$0xf] %v563_v45 }
  0x62   : > { %v2151_v47 = vld [vmem:[%s2848_s14 + $0xc0] sm:$0xf]  ;;  %1770 = vmatprep.mubr.bf16.mxu0 %v2653_v42  ;;  %619 = vst [vmem:[#allocation2 + $0xc8] sm:$0xf] %v577_v46  ;;  %v2154_v50 = vld [vmem:[%s2848_s14 + $0xcc] sm:$0x1] }
  0x63   : > { %v579_v51 = vshrl.u32 %v2151_v47, 16  ;;  %v582_v53 = vshll.u32 %v2151_v47, 16  ;;  %v588_v54 = vshll.u32 %v2152_v48, 16  ;;  %v593_v55 = vshrl.u32 %v2153_v49, 16  ;;  %2530 = vmatpush3.bf16.msra.mxu1 %v3068_v24  ;;  %v2161_v58 = vld [vmem:[%s2848_s14 + $0x38] sm:$0xf]  ;;  %1771 = vmatmul.mubr.bf16.gmra.mxu0 %v2200_v44 }
  0x64   : > { %v596_v56 = vshll.u32 %v2153_v49, 16  ;;  %v602_v57 = vshll.u32 %v2154_v50, 16  ;;  %v2162_v59 = vld [vmem:[%s2848_s14 + $0x40] sm:$0xf]  ;;  %2523 = vmatprep.subr.bf16.mxu1 %v3081_v39  ;;  %637 = vst [vmem:[#allocation2 + $0xf0] sm:$0xf] %v2161_v58  ;;  %2500 = vmatpush3.bf16.msra.mxu0 %v3056_v8 }
  0x65   : > { %v581_v61 = vrot.slane %v579_v51, 4  ;;  %v584_v62 = vrot.slane %v582_v53, 5  ;;  %v595_v63 = vrot.slane %v593_v55, 4  ;;  %638 = vst [vmem:[#allocation2 + $0x114] sm:$0xf] %v2162_v59  ;;  %2501 = vmatprep.subr.bf16.mxu0 %v3068_v24  ;;  %v590_v4 = vrot.slane %v588_v54, 5 }
  0x66   : > { %v2662_v0 = vld [vmem:[#allocation2 + $0xac] ss:$36 sps:$4 sm:$0xff]   ;;  %v598_v2 = vrot.slane %v596_v56, 5  ;;  %v604_v5 = vrot.slane %v602_v57, 5  ;;  %v2169_v6 = vld [vmem:[%s2848_s14 + $0x80] sm:$0xf] }
  0x67   : > { %v2664_v1 = vld [vmem:[#allocation2 + $0xa8] ss:$36 sps:$4 sm:$0xff]   ;;  %v585_v3 = vor.u32 %v584_v62, %v581_v61  ;;  %1843 = vmatprep.mubr.bf16.mxu1 %v2662_v0  ;;  %2531 = vmatpush3.bf16.msra.mxu1 %v3081_v39  ;;  %654 = vst [vmem:[#allocation2 + $0xf4] sm:$0xf] %v2169_v6  ;;  %v2173_v20 = vld [vmem:[%s2848_s14 + $0x10] sm:$0xf] }
  0x68   : > { %v2170_v7 = vld [vmem:[%s2848_s14 + $0x88] sm:$0xf]  ;;  %v599_v9 = vor.u32 %v598_v2, %v595_v63  ;;  %1844 = vmatmul.mubr.bf16.gmra.mxu1 %v2664_v1  ;;  %2524 = vmatprep.subr.bf16.mxu1 %v3103_v60  ;;  %v822_v12 = vld [vmem:[#allocation2 + $0xa0] sm:$0xff]  ;;  %v2172_v19 = vld [vmem:[%s2848_s14 + $0xc] sm:$0x1]  ;;  %v687_v29 = vshrl.u32 %v2173_v20, 16 }
  0x69   : > { %655 = vst [vmem:[#allocation2 + $0x118] sm:$0xf] %v2170_v7  ;;  %v586_v8 = vrot.slane %v585_v3, 4  ;;  %v2171_v11 = vld [vmem:[%s2848_s14 + $0x8] sm:$0xf]  ;;  %2502 = vmatpush3.bf16.msra.mxu0 %v3068_v24  ;;  %v3130_v24 = vld [vmem:[%s3236_s1 + $0x200] sm:$0xff]  }
  0x6a   : > { %v827_v13 = vld [vmem:[#allocation2 + $0xc4] sm:$0xff]  ;;  %v600_v15 = vrot.slane %v599_v9, 4  ;;  %v673_v16 = vshrl.u32 %v2171_v11, 16  ;;  %2503 = vmatprep.subr.bf16.mxu0 %v3081_v39  ;;  %v2174_v22 = vld [vmem:[%s2848_s14 + $0x14] sm:$0x1]  ;;  %v676_v26 = vshll.u32 %v2171_v11, 16 }
  0x6b   : > { %v2660_v14 = vld [vmem:[#allocation2 + $0xa4] ss:$36 sps:$4 sm:$0xff]   ;;  %v2209_v17 = vcombine.low %v822_v12, %v827_v13  ;;  %v591_v18 = vsel %vm2871_vm2, %v586_v8, %v590_v4  ;;  %2532 = vmatpush3.bf16.msra.mxu1 %v3103_v60  ;;  %v682_v27 = vshll.u32 %v2172_v19, 16  ;;  %v690_v30 = vshll.u32 %v2173_v20, 16  ;;  %v2180_v32 = vld [vmem:[%s2848_s14 + $0x2c] sm:$0x1] }
  0x6c   : > { %1778 = vmatprep.mubr.bf16.mxu0 %v2660_v14  ;;  %v605_v23 = vsel %vm2871_vm2, %v600_v15, %v604_v5  ;;  %620 = vst [vmem:[#allocation2 + $0xec] sm:$0xf] %v591_v18  ;;  %v675_v25 = vrot.slane %v673_v16, 4  ;;  %v2179_v28 = vld [vmem:[%s2848_s14 + $0x28] sm:$0xf]  ;;  %2525 = vmatprep.subr.bf16.mxu1 %v3114_v10  ;;  %v696_v31 = vshll.u32 %v2174_v22, 16 }
  0x6d   : > { %1779 = vmatmul.mubr.bf16.gmra.mxu0 %v2209_v17  ;;  %621 = vst [vmem:[#allocation2 + $0x110] sm:$0xf] %v605_v23  ;;  %v729_v33 = vshrl.u32 %v2179_v28, 16  ;;  %v678_v34 = vrot.slane %v676_v26, 5  ;;  %v684_v35 = vrot.slane %v682_v27, 5  ;;  %v689_v38 = vrot.slane %v687_v29, 4 }
  0x6e   : > { %2504 = vmatpush3.bf16.msra.mxu0 %v3081_v39  ;;  %v2181_v36 = vld [vmem:[%s2848_s14 + $0x30] sm:$0xf]  ;;  %v2182_v37 = vld [vmem:[%s2848_s14 + $0x34] sm:$0x1]  ;;  %v692_v40 = vrot.slane %v690_v30, 5  ;;  %v698_v43 = vrot.slane %v696_v31, 5 }
  0x6f   : > { %2505 = vmatprep.subr.bf16.mxu0 %v3103_v60  ;;  %v2671_v41 = vld [vmem:[#allocation2 + $0xf0] ss:$36 sps:$4 sm:$0xff]   ;;  %2533 = vmatpush3.bf16.msra.mxu1 %v3114_v10  ;;  %v679_v42 = vor.u32 %v678_v34, %v675_v25  ;;  %v731_v44 = vrot.slane %v729_v33, 4  ;;  %v732_v45 = vshll.u32 %v2179_v28, 16  ;;  %v738_v46 = vshll.u32 %v2180_v32, 16 }
  0x70   : > { %v2669_v21 = vld [vmem:[#allocation2 + $0xf4] ss:$36 sps:$4 sm:$0xff]   ;;  %2526 = vmatprep.subr.bf16.mxu1 %v3130_v24  ;;  %v693_v39 = vor.u32 %v692_v40, %v689_v38  ;;  %v743_v47 = vshrl.u32 %v2181_v36, 16  ;;  %v746_v48 = vshll.u32 %v2181_v36, 16  ;;  %v752_v53 = vshll.u32 %v2182_v37, 16 }
  0x71   : > { %1851 = vmatprep.mubr.bf16.mxu1 %v2669_v21  ;;  %v2175_v49 = vld [vmem:[%s2848_s14 + $0x18] sm:$0xf]  ;;  %v680_v50 = vrot.slane %v679_v42, 4  ;;  %v734_v51 = vrot.slane %v732_v45, 5  ;;  %v2176_v54 = vld [vmem:[%s2848_s14 + $0x1c] sm:$0x1] }
  0x72   : > { %2506 = vmatpush3.bf16.msra.mxu0 %v3103_v60  ;;  %1852 = vmatmul.mubr.bf16.gmra.mxu1 %v2671_v41  ;;  %v701_v55 = vshrl.u32 %v2175_v49, 16  ;;  %v694_v57 = vrot.slane %v693_v39, 4  ;;  %v740_v58 = vrot.slane %v738_v46, 5  ;;  %v745_v59 = vrot.slane %v743_v47, 4  ;;  %v2177_v2 = vld [vmem:[%s2848_s14 + $0x20] sm:$0xf] }
  0x73   : > { %v832_v56 = vld [vmem:[#allocation2 + $0xe8] sm:$0xff]  ;;  %2507 = vmatprep.subr.bf16.mxu0 %v3114_v10  ;;  %v748_v61 = vrot.slane %v746_v48, 5  ;;  %2534 = vmatpush3.bf16.msra.mxu1 %v3130_v24  ;;  %v685_v60 = vsel %vm2871_vm2, %v680_v50, %v684_v35  ;;  %v735_v0 = vor.u32 %v734_v51, %v731_v44  ;;  %v754_v1 = vrot.slane %v752_v53, 5  ;;  %v2178_v6 = vld [vmem:[%s2848_s14 + $0x24] sm:$0x1] }
  0x74   : > { %v837_v62 = vld [vmem:[#allocation2 + $0x10c] sm:$0xff]  ;;  %v699_v4 = vsel %vm2871_vm2, %v694_v57, %v698_v43  ;;  %792 = vst [vmem:[#allocation2 + $0x20] sm:$0xf] %v685_v60  ;;  %v703_v7 = vrot.slane %v701_v55, 4  ;;  %v2183_v9 = vld [vmem:[%s2848_s14 + $0x38] sm:$0xf] }
  0x75   : > { %v2667_v63 = vld [vmem:[#allocation2 + $0xec] ss:$36 sps:$4 sm:$0xff]   ;;  %v2218_v3 = vcombine.low %v832_v56, %v837_v62  ;;  %v749_v5 = vor.u32 %v748_v61, %v745_v59  ;;  %793 = vst [vmem:[#allocation2 + $0x44] sm:$0xf] %v699_v4  ;;  %v736_v8 = vrot.slane %v735_v0, 4  ;;  %v704_v11 = vshll.u32 %v2175_v49, 16 }
  0x76   : > { %1786 = vmatprep.mubr.bf16.mxu0 %v2667_v63  ;;  %2508 = vmatpush3.bf16.msra.mxu0 %v3114_v10  ;;  %v710_v12 = vshll.u32 %v2176_v54, 16  ;;  %v715_v13 = vshrl.u32 %v2177_v2, 16  ;;  %v2184_v14 = vld [vmem:[%s2848_s14 + $0x3c] sm:$0x1]  ;;  %v718_v16 = vshll.u32 %v2177_v2, 16  ;;  %v724_v17 = vshll.u32 %v2178_v6, 16 }
  0x77   : > { %1787 = vmatmul.mubr.bf16.gmra.mxu0 %v2218_v3  ;;  %2509 = vmatprep.subr.bf16.mxu0 %v3130_v24  ;;  %v750_v15 = vrot.slane %v749_v5, 4  ;;  %v2185_v18 = vld [vmem:[%s2848_s14 + $0x40] sm:$0xf]  ;;  %v757_v19 = vshrl.u32 %v2183_v9, 16  ;;  %v741_v20 = vsel %vm2871_vm2, %v736_v8, %v740_v58  ;;  %v706_v22 = vrot.slane %v704_v11, 5 }
  0x78   : > { %v717_v10 = vrot.slane %v715_v13, 4  ;;  %v2186_v23 = vld [vmem:[%s2848_s14 + $0x44] sm:$0x1]  ;;  %796 = vst [vmem:[#allocation2 + $0xb0] sm:$0xf] %v741_v20  ;;  %v712_v26 = vrot.slane %v710_v12, 5 }
  0x79   : > { %v755_v25 = vsel %vm2871_vm2, %v750_v15, %v754_v1  ;;  %v720_v27 = vrot.slane %v718_v16, 5  ;;  %v759_v28 = vrot.slane %v757_v19, 4  ;;  %v707_v29 = vor.u32 %v706_v22, %v703_v7 }
  0x7a   : > { %2510 = vmatpush3.bf16.msra.mxu0 %v3130_v24  ;;  %797 = vst [vmem:[#allocation2 + $0xd4] sm:$0xf] %v755_v25  ;;  %v760_v30 = vshll.u32 %v2183_v9, 16  ;;  %v766_v31 = vshll.u32 %v2184_v14, 16  ;;  %v771_v32 = vshrl.u32 %v2185_v18, 16  ;;  %v726_v34 = vrot.slane %v724_v17, 5 }
  0x7b   : > { %v721_v33 = vor.u32 %v720_v27, %v717_v10  ;;  %v774_v35 = vshll.u32 %v2185_v18, 16  ;;  %v780_v36 = vshll.u32 %v2186_v23, 16  ;;  %v708_v37 = vrot.slane %v707_v29, 4 }
  0x7c   : > { %v762_v21 = vrot.slane %v760_v30, 5  ;;  %v773_v38 = vrot.slane %v771_v32, 4  ;;  %v2674_v40 = vld [vmem:[#allocation2 + $0x20] ss:$36 sps:$4 sm:$0xff]   ;;  %v768_v24 = vrot.slane %v766_v31, 5 }
  0x7d   : > { %v722_v41 = vrot.slane %v721_v33, 4  ;;  %v776_v42 = vrot.slane %v774_v35, 5  ;;  %v713_v43 = vsel %vm2871_vm2, %v708_v37, %v712_v26  ;;  %2511 = vmatprep.mubr.bf16.mxu0 %v2674_v40  ;;  %v782_v46 = vrot.slane %v780_v36, 5 }
  0x7e   : > { %v763_v44 = vor.u32 %v762_v21, %v759_v28  ;;  %794 = vst [vmem:[#allocation2 + $0x68] sm:$0xf] %v713_v43 }
  0x7f   : > { %v727_v45 = vsel %vm2871_vm2, %v722_v41, %v726_v34  ;;  %v777_v39 = vor.u32 %v776_v42, %v773_v38 }
  0x80   : > { %795 = vst [vmem:[#allocation2 + $0x8c] sm:$0xf] %v727_v45  ;;  %v764_v47 = vrot.slane %v763_v44, 4 }
  0x81   : > { %v2675_v48 = vld [vmem:[#allocation2 + $0xb0] ss:$36 sps:$4 sm:$0xff]   ;;  %v778_v49 = vrot.slane %v777_v39, 4 }
  0x82   : > { %v769_v50 = vsel %vm2871_vm2, %v764_v47, %v768_v24  ;;  %2515 = vmatprep.mubr.bf16.mxu1 %v2675_v48 }
  0x83   : > { %v783_v51 = vsel %vm2871_vm2, %v778_v49, %v782_v46  ;;  %798 = vst [vmem:[#allocation2 + $0xf8] sm:$0xf] %v769_v50 }
  0x84   : > { %799 = vst [vmem:[#allocation2 + $0x11c] sm:$0xf] %v783_v51 }
  0x87   : > { %v2676_v53 = vld [vmem:[#allocation2 + $0x68] ss:$36 sps:$4 sm:$0xff]  }
  0x88   : > { %2512 = vmatmul.mubr.bf16.vlgmr.msra.gmra.mxu0 %v2676_v53 }
  0x8b   : > { %v2677_v54 = vld [vmem:[#allocation2 + $0xf8] ss:$36 sps:$4 sm:$0xff]  }
  0x8c   : > { %2516 = vmatmul.mubr.bf16.vlgmr.msra.gmra.mxu1 %v2677_v54 }
  0xee   : > { %v2339_v55 = vpop.f32.mrf.mxu0 }
  0xef   : > { %v2379_v56 = vpop.f32.mrf.mxu1 }
  0xf0   : > { %v2340_v57 = vpop.f32.mrf.mxu0 }
  0xf1   : > { %v2380_v58 = vpop.f32.mrf.mxu1  ;;  %v2341_v51 = vadd.f32 %v2340_v57, %v2339_v55 }
  0xf2   : > { %v3171_v59 = vpop.f32.mrf.mxu0  ;;  %v2381_v53 = vadd.f32 %v2380_v58, %v2379_v56 }
  0xf3   : > { %v3173_v61 = vpop.f32.mrf.mxu1 }
  0xf4   : > { %3242 = vst [vmem:[#allocation3_spill] sm:$0xff] %v3173_v61  ;;  %v3175_v62 = vpop.f32.mrf.mxu0 }
  0xf5   : > { %v3177_v63 = vpop.f32.mrf.mxu1 }
  0xf6   : > { %3243 = vst [vmem:[#allocation4_spill] sm:$0xff] %v3177_v63  ;;  %v2345_v52 = vpop.f32.mrf.mxu0 }
  0xf7   : > { %v2385_v60 = vpop.f32.mrf.mxu1 }
  0xf8   : > { %v2346_v0 = vpop.f32.mrf.mxu0 }
  0xf9   : > { %v2386_v1 = vpop.f32.mrf.mxu1  ;;  %v2347_v49 = vadd.f32 %v2346_v0, %v2345_v52 }
  0xfa   : > { %v2348_v2 = vpop.f32.mrf.mxu0  ;;  %v2387_v50 = vadd.f32 %v2386_v1, %v2385_v60 }
  0xfb   : > { %v2388_v3 = vpop.f32.mrf.mxu1  ;;  %v3255_v52 = vld [vmem:[#allocation3_spill] sm:$0xff] }
  0xfc   : > { %v2349_v4 = vpop.f32.mrf.mxu0 }
  0xfd   : > { %v2389_v5 = vpop.f32.mrf.mxu1  ;;  %v3256_v60 = vld [vmem:[#allocation4_spill] sm:$0xff] }
  0xfe   : > { %v2351_v6 = vpop.f32.mrf.mxu0  ;;  %v2384_v55 = vadd.f32 %v3256_v60, %v3255_v52 }
 0x100   : > { %v2352_v9 = vpop.f32.mrf.mxu0 }
 0x101   : > { %v2391_v7 = vpop.f32.mrf.mxu1  ;;  %v2353_v63 = vadd.f32 %v2352_v9, %v2351_v6 }
 0x102   : > { %v3179_v11 = vpop.f32.mrf.mxu0 }
 0x103   : > { %v2392_v8 = vpop.f32.mrf.mxu1  ;;  %3244 = vst [vmem:[#allocation5_spill] sm:$0xff] %v3179_v11 }
 0x104   : > { %v3183_v13 = vpop.f32.mrf.mxu0  ;;  %v2393_v61 = vadd.f32 %v2392_v8, %v2391_v7 }
 0x105   : > { %v3181_v12 = vpop.f32.mrf.mxu1  ;;  %3246 = vst [vmem:[#allocation7_spill] sm:$0xff] %v3183_v13 }
 0x106   : > { %3245 = vst [vmem:[#allocation6_spill] sm:$0xff] %v3181_v12  ;;  %v2357_v15 = vpop.f32.mrf.mxu0  ;;  %v1708_v12 = vadd.f32 %v2387_v50, %v2347_v49 }
 0x107   : > { %v3185_v14 = vpop.f32.mrf.mxu1 }
 0x108   : > { %3247 = vst [vmem:[#allocation8_spill] sm:$0xff] %v3185_v14  ;;  %v2358_v18 = vpop.f32.mrf.mxu0 }
 0x109   : > { %v2359_v54 = vadd.f32 %v2358_v18, %v2357_v15 }
 0x10a   : > { %v2360_v22 = vpop.f32.mrf.mxu0  ;;  %v3257_v15 = vld [vmem:[#allocation5_spill] sm:$0xff] }
 0x10c   : > { %v2361_v23 = vpop.f32.mrf.mxu0 }
 0x10d   : > { %v3259_v6 = vld [vmem:[#allocation6_spill] sm:$0xff] }
 0x10e   : > { %v2397_v16 = vpop.f32.mrf.mxu1 }
 0x10f   : > { %v3260_v7 = vld [vmem:[#allocation8_spill] sm:$0xff] }
 0x110   : > { %v2398_v17 = vpop.f32.mrf.mxu1  ;;  %v2396_v9 = vadd.f32 %v3260_v7, %v3259_v6 }
 0x112   : > { %v2400_v19 = vpop.f32.mrf.mxu1 }
 0x114   : > { %v2401_v20 = vpop.f32.mrf.mxu1 }
 0x116   : > { %v3187_v10 = vpop.f32.mrf.mxu1 }
 0x117   : > { %3248 = vst [vmem:[#allocation9_spill] sm:$0xff] %v3187_v10  ;;  %v2390_v10 = vadd.f32 %v2389_v5, %v2388_v3  ;;  %v2402_v3 = vadd.f32 %v2401_v20, %v2400_v19 }
 0x118   : > { %v2460_v25 = vpop.f32.mrf.mxu1 }
 0x11a   : > { %v3189_v26 = vpop.f32.mrf.mxu1  ;;  %v2419_v27 = vpop.f32.mrf.mxu0 }
 0x11b   : > { %3249 = vst [vmem:[#allocation10_spill] sm:$0xff] %v3189_v26 }
 0x11c   : > { %v3191_v28 = vpop.f32.mrf.mxu1  ;;  %v2420_v29 = vpop.f32.mrf.mxu0 }
 0x11d   : > { %3250 = vst [vmem:[#allocation11_spill] sm:$0xff] %v3191_v28  ;;  %v2399_v28 = vadd.f32 %v2398_v17, %v2397_v16  ;;  %v2421_v13 = vadd.f32 %v2420_v29, %v2419_v27  ;;  %v3258_v16 = vld [vmem:[#allocation7_spill] sm:$0xff] }
 0x11e   : > { %v2465_v30 = vpop.f32.mrf.mxu1  ;;  %v2422_v31 = vpop.f32.mrf.mxu0  ;;  %v2356_v17 = vadd.f32 %v3258_v16, %v3257_v15 }
 0x11f   : > { %v1724_v56 = vadd.f32 %v2399_v28, %v2359_v54 }
 0x120   : > { %v2466_v32 = vpop.f32.mrf.mxu1  ;;  %v2423_v33 = vpop.f32.mrf.mxu0 }
 0x121   : > { %v2467_v27 = vadd.f32 %v2466_v32, %v2465_v30  ;;  %v2424_v8 = vadd.f32 %v2423_v33, %v2422_v31  ;;  %v1719_v32 = vadd.f32 %v2396_v9, %v2356_v17 }
 0x122   : > { %v3193_v35 = vpop.f32.mrf.mxu1 }
 0x123   : > { %v2425_v34 = vpop.f32.mrf.mxu0  ;;  %3251 = vst [vmem:[#allocation12_spill] sm:$0xff] %v3193_v35 }
 0x124   : > { %v2469_v21 = vpop.f32.mrf.mxu1 }
 0x125   : > { %v2426_v36 = vpop.f32.mrf.mxu0 }
 0x126   : > { %v2427_v26 = vadd.f32 %v2426_v36, %v2425_v34 }
 0x127   : > { %v2428_v37 = vpop.f32.mrf.mxu0 }
 0x128   : > { %v3195_v41 = vpop.f32.mrf.mxu1  ;;  %v1773_v57 = vadd.f32 %v2427_v26, %v1708_v12  ;;  %v3261_v12 = vld [vmem:[#allocation9_spill] sm:$0xff] }
 0x129   : > { %v2429_v38 = vpop.f32.mrf.mxu0  ;;  %3252 = vst [vmem:[#allocation13_spill] sm:$0xff] %v3195_v41  ;;  %v2350_v41 = vadd.f32 %v2349_v4, %v2348_v2  ;;  %v2362_v2 = vadd.f32 %v2361_v23, %v2360_v22  ;;  %v2461_v26 = vadd.f32 %v2460_v25, %v3261_v12 }
 0x12a   : > { %v2472_v43 = vpop.f32.mrf.mxu1  ;;  %v2430_v58 = vadd.f32 %v2429_v38, %v2428_v37  ;;  %v1838_v22 = vadd.f32 %v2467_v27, %v1773_v57  ;;  %v2296_v38 = vld [vmem:[%s3238_s3] ss:$0 sm:$0xff] }
 0x12b   : > { %v1711_v1 = vadd.f32 %v2390_v10, %v2350_v41  ;;  %v1727_v20 = vadd.f32 %v2402_v3, %v2362_v2 }
 0x12c   : > { %v3197_v45 = vpop.f32.mrf.mxu1 }
 0x12d   : > { %v2431_v40 = vpop.f32.mrf.mxu0  ;;  %3253 = vst [vmem:[#allocation14_spill] sm:$0xff] %v3197_v45  ;;  %v1700_v45 = vadd.f32 %v2381_v53, %v2341_v51  ;;  %v1776_v29 = vadd.f32 %v2430_v58, %v1711_v1 }
 0x12e   : > { %v3199_v46 = vpop.f32.mrf.mxu1 }
 0x12f   : > { %v2432_v42 = vpop.f32.mrf.mxu0  ;;  %3254 = vst [vmem:[#allocation15_spill] sm:$0xff] %v3199_v46  ;;  %v2344_v46 = vadd.f32 %v3175_v62, %v3171_v59  ;;  %v1765_v18 = vadd.f32 %v2421_v13, %v1700_v45  ;;  %v1716_v62 = vadd.f32 %v2393_v61, %v2353_v63  ;;  %v2295_v61 = vld [vmem:[%s3237_s2] ss:$0 sm:$0xff]  ;;  %v3262_v63 = vld [vmem:[#allocation12_spill] sm:$0xff] }
 0x130   : > { %v2433_v4 = vadd.f32 %v2432_v42, %v2431_v40  ;;  %v3263_v33 = vld [vmem:[#allocation13_spill] sm:$0xff]  ;;  %v3265_v45 = vld [vmem:[#allocation11_spill] sm:$0xff] }
 0x131   : > { %v2434_v44 = vpop.f32.mrf.mxu0  ;;  %v1703_v19 = vadd.f32 %v2384_v55, %v2344_v46  ;;  %v1830_v31 = vadd.f32 %v2461_v26, %v1765_v18 }
 0x132   : > { %v2477_v48 = vpop.f32.mrf.mxu1  ;;  %v1781_v23 = vadd.f32 %v2433_v4, %v1716_v62 }
 0x133   : > { %v2435_v24 = vpop.f32.mrf.mxu0  ;;  %v1768_v25 = vadd.f32 %v2424_v8, %v1703_v19 }
 0x134   : > { %v2478_v14 = vpop.f32.mrf.mxu1  ;;  %v2436_v34 = vadd.f32 %v2435_v24, %v2434_v44  ;;  %v3264_v24 = vld [vmem:[#allocation10_spill] sm:$0xff] }
 0x135   : > { %v2479_v10 = vadd.f32 %v2478_v14, %v2477_v48  ;;  %v2473_v14 = vadd.f32 %v2472_v43, %v3263_v33 }
 0x136   : > { %v2480_v5 = vpop.f32.mrf.mxu1  ;;  %v3267_v57 = vld [vmem:[#allocation15_spill] sm:$0xff] }
 0x137   : > { %v2437_v39 = vpop.f32.mrf.mxu0  ;;  %v1846_v48 = vadd.f32 %v2473_v14, %v1781_v23 }
 0x138   : > { %v2481_v36 = vpop.f32.mrf.mxu1 }
 0x139   : > { %v2438_v47 = vpop.f32.mrf.mxu0  ;;  %v2482_v46 = vadd.f32 %v2481_v36, %v2480_v5 }
 0x13a   : > { %v2439_v11 = vadd.f32 %v2438_v47, %v2437_v39  ;;  %v2464_v39 = vadd.f32 %v3265_v45, %v3264_v24 }
 0x13b   : > { %v2440_v35 = vpop.f32.mrf.mxu0 }
 0x13c   : > { %v1789_v59 = vadd.f32 %v2439_v11, %v1724_v56  ;;  %v2470_v11 = vadd.f32 %v2469_v21, %v3262_v63  ;;  %v1784_v21 = vadd.f32 %v2436_v34, %v1719_v32  ;;  %v1833_v60 = vadd.f32 %v2464_v39, %v1768_v25  ;;  %v3266_v56 = vld [vmem:[#allocation14_spill] sm:$0xff] }
 0x13d   : > { %v2441_v0 = vpop.f32.mrf.mxu0  ;;  %v2476_v58 = vadd.f32 %v3267_v57, %v3266_v56 }
 0x13e   : > { %v2442_v28 = vadd.f32 %v2441_v0, %v2440_v35  ;;  %v1854_v30 = vadd.f32 %v2479_v10, %v1789_v59  ;;  %v1841_v44 = vadd.f32 %v2470_v11, %v1776_v29 }
 0x13f   : > { %v1849_v17 = vadd.f32 %v2476_v58, %v1784_v21 }
 0x140   : > { %v1792_v35 = vadd.f32 %v2442_v28, %v1727_v20 }
 0x142   : > { %v1857_v52 = vadd.f32 %v2482_v46, %v1792_v35 }
 0x148   : > { %v2513_v37 = vpop.f32.mrf.mxu0 }
 0x149   : > { %v1903_v13 = vadd.f32 %v2513_v37, %v1838_v22 }
 0x14a   : > { %v1894_v40 = vpop.f32.mrf.mxu0 }
 0x14b   : > { %v1934_v41 = vmul.f32 %v2295_v61, %v1903_v13  ;;  %v1895_v42 = vadd.f32 %v1894_v40, %v1830_v31 }
 0x14c   : > { %v2517_v47 = vpop.f32.mrf.mxu1  ;;  %v2514_v49 = vpop.f32.mrf.mxu0 }
 0x14d   : > { %v1949_v50 = vadd.f32 %v2296_v38, %v1934_v41  ;;  %v1919_v51 = vadd.f32 %v2517_v47, %v1854_v30  ;;  %v1932_v43 = vmul.f32 %v2295_v61, %v1895_v42  ;;  %v1906_v53 = vadd.f32 %v2514_v49, %v1841_v44 }
 0x14e   : > { %v1910_v54 = vpop.f32.mrf.mxu1  ;;  %v1897_v55 = vpop.f32.mrf.mxu0 }
 0x14f   : > { %v1938_v0 = vmul.f32 %v2295_v61, %v1919_v51  ;;  %v1911_v1 = vadd.f32 %v1910_v54, %v1846_v48  ;;  %v1947_v2 = vadd.f32 %v2296_v38, %v1932_v43  ;;  %v1935_v3 = vmul.f32 %v2295_v61, %v1906_v53 }
 0x150   : > { %v2518_v4 = vpop.f32.mrf.mxu1  ;;  %v1898_v5 = vadd.f32 %v1897_v55, %v1833_v60  ;;  %v1957_v15 = vmul.f32 0.01, %v1949_v50 }
 0x151   : > { %v1936_v16 = vmul.f32 %v2295_v61, %v1911_v1  ;;  %v1953_v18 = vadd.f32 %v2296_v38, %v1938_v0  ;;  %v1950_v27 = vadd.f32 %v2296_v38, %v1935_v3  ;;  %v1922_v59 = vadd.f32 %v2518_v4, %v1857_v52 }
 0x152   : > { %v1933_v62 = vmul.f32 %v2295_v61, %v1898_v5  ;;  %v1913_v6 = vpop.f32.mrf.mxu1  ;;  %v1955_v8 = vmul.f32 0.01, %v1947_v2  ;;  %v1965_v29 = vmax.f32 %v1949_v50, %v1957_v15 }
 0x153   : > { %v1951_v7 = vadd.f32 %v2296_v38, %v1936_v16  ;;  %v1914_v9 = vadd.f32 %v1913_v6, %v1849_v17  ;;  %v1958_v28 = vmul.f32 0.01, %v1950_v27  ;;  %v1939_v12 = vmul.f32 %v2295_v61, %v1922_v59 }
 0x154   : > { %v1948_v26 = vadd.f32 %v2296_v38, %v1933_v62  ;;  %v1961_v22 = vmul.f32 0.01, %v1953_v18  ;;  %v1963_v37 = vmax.f32 %v1947_v2, %v1955_v8 }
 0x155   : > { %v1937_v10 = vmul.f32 %v2295_v61, %v1914_v9  ;;  %v1966_v19 = vmax.f32 %v1950_v27, %v1958_v28  ;;  %v1954_v20 = vadd.f32 %v2296_v38, %v1939_v12  ;;  %v1959_v34 = vmul.f32 0.01, %v1951_v7 }
 0x156   : > { %v1956_v23 = vmul.f32 0.01, %v1948_v26  ;;  %v1969_v31 = vmax.f32 %v1953_v18, %v1961_v22 }
 0x157   : > { %v1952_v36 = vadd.f32 %v2296_v38, %v1937_v10  ;;  %v2308_v63 = vpack.c.bf16 %v1966_v19, %v1965_v29  ;;  %v1962_v11 = vmul.f32 0.01, %v1954_v20  ;;  %v1967_v61 = vmax.f32 %v1951_v7, %v1959_v34 }
 0x158   : > { %v1964_v13 = vmax.f32 %v1948_v26, %v1956_v23 }
 0x159   : > { %v1960_v30 = vmul.f32 0.01, %v1952_v36  ;;  %2320 = vst [vmem:[%s262_s23 + $0x8] sm:$0xff] %v2308_v63   ;;  %v1970_v32 = vmax.f32 %v1954_v20, %v1962_v11 }
 0x15a   : > { %v2303_v25 = vpack.c.bf16 %v1964_v13, %v1963_v37 }
 0x15b   : > { %v1968_v33 = vmax.f32 %v1952_v36, %v1960_v30  ;;  %v2318_v14 = vpack.c.bf16 %v1970_v32, %v1969_v31 }
 0x15c   : > { %2304 = vst [vmem:[%s262_s23] sm:$0xff] %v2303_v25  }
 0x15d   : > { %v2313_v35 = vpack.c.bf16 %v1968_v33, %v1967_v61  ;;  %2322 = vst [vmem:[%s262_s23 + $0x18] sm:$0xff] %v2318_v14  }
 0x15f   : > { %2321 = vst [vmem:[%s262_s23 + $0x10] sm:$0xff] %v2313_v35  }
 0x160 PF: > { %s14_s17 = sadd.s32 1, %s2700_s17   ;;  %s3268_s15 = smov %s2696_s16 }
 0x161   : > { %p11_p5 = scmp.ge.s32.totalorder %s14_s17, 4   ;;  %s3269_s16 = smov %s3271_s18 }
 0x163   :  { %13 = sbr.rel (!%p11_p5) target bundleno = 2 (0x2), region = 80 }

// kernel: forward.11
= control target key start
LH: loop header
LB: loop body
LE: loop exit
PB: predicated region body
PF: predicated region fallthrough
CT: control target
= control target key end

     0   :  { %s3078_s18 = smov 0   ;;  %s3080_s19 = smov 0   ;;  %s3688_s0 = inlined_call_operand.vmem [shape: bf16[2,1,10,10,128], index: 0, kind: input, shape index: {}]   ;;  %s3689_s1 = inlined_call_operand.vmem [shape: bf16[1152,128], index: 1, kind: input, shape index: {}]   ;;  %s3690_s2 = inlined_call_operand.vmem [shape: f32[1,128], index: 2, kind: input, shape index: {}]   ;;  %s3691_s3 = inlined_call_operand.vmem [shape: f32[1,128], index: 3, kind: input, shape index: {}]   ;;  %s3692_s4 = inlined_call_operand.vmem [shape: bf16[2,8,8,128], index: 4, kind: input, shape index: {}]   ;;  %s3693_s5 = inlined_call_operand.vmem [shape: bf16[2,8,8,128], index: 5, kind: output, shape index: {}]  }
   0x1   :  { %s3082_s20 = smov 0  }
   0x2 LB: > { %s27_s21 = sadd.s32 1, %s3042_s19  ;;  %p2403_p0 = scmp.ge.s32.totalorder %s3046_s20, 1  ;;  %s3046_s20 = sphi %s3082_s20, %s15_s20   ;;  %s3042_s19 = sphi %s3080_s19, %s3715_s19   ;;  %s3038_s18 = sphi %s3078_s18, %s3714_s18  }
   0x3   : > { %p29_p1 = scmp.ge.s32.totalorder %s27_s21, 2  ;;  %p241_p2 = scmp.lt.s32.totalorder %s3046_s20, 3 }
   0x5   : > { %s3717_s21 = smov (%p29_p1, %s27_s21), 0  ;;  %p242_p3 = pnand %p2403_p0, %p241_p2 }
   0x7   : > { %245 = sbr.rel (%p242_p3) target bundleno = 367 (0x16f), region = 40 }
   0xc   : > { %v2906_v0 = vld [vmem:[%s3689_s1 + $0x78] sm:$0xff]   ;;  %v2910_v4 = vld [vmem:[%s3689_s1 + $0x70] sm:$0xff]   ;;  %v2914_v8 = vld [vmem:[%s3689_s1 + $0x68] sm:$0xff]   ;;  %p290_p4 = scmp.lt.s32.totalorder %s3038_s18, 1  ;;  %vm517_vm0 = vcmask 1042432   ;;  %vm518_vm1 = vcmask 1046532  }
   0xd   : > { %v2907_v1 = vld [vmem:[%s3689_s1 + $0xf8] sm:$0xff]   ;;  %2669 = vmatprep.subr.bf16.mxu0 %v2906_v0  ;;  %v2911_v5 = vld [vmem:[%s3689_s1 + $0xf0] sm:$0xff]   ;;  %v2915_v9 = vld [vmem:[%s3689_s1 + $0xe8] sm:$0xff]   ;;  %vm354_vm2 = vsmask.f32 3328 }
   0xe   : > { %v2908_v2 = vld [vmem:[%s3689_s1 + $0x38] sm:$0xff]   ;;  %2709 = vmatprep.subr.bf16.mxu1 %v2907_v1  ;;  %v2912_v6 = vld [vmem:[%s3689_s1 + $0x30] sm:$0xff]   ;;  %v2916_v10 = vld [vmem:[%s3689_s1 + $0x28] sm:$0xff]   ;;  %s3719_s18 = smov (!%p290_p4, %s3038_s18), 1  ;;  %vm355_vm3 = vsmask.f32 7440 }
   0xf   : > { %v2909_v3 = vld [vmem:[%s3689_s1 + $0xb8] sm:$0xff]   ;;  %2670 = vmatpush3.bf16.msra.mxu0 %v2908_v2  ;;  %v2913_v7 = vld [vmem:[%s3689_s1 + $0xb0] sm:$0xff]   ;;  %v2917_v11 = vld [vmem:[%s3689_s1 + $0xa8] sm:$0xff]   ;;  %s2881_s7 = smul.u32 80, %s3719_s18 }
  0x10   : > { %2710 = vmatpush3.bf16.msra.mxu1 %v2909_v3  ;;  %2671 = vmatprep.subr.bf16.mxu0 %v2910_v4  ;;  %v2918_v12 = vld [vmem:[%s3689_s1 + $0x60] sm:$0xff]   ;;  %v2922_v16 = vld [vmem:[%s3689_s1 + $0x58] sm:$0xff]   ;;  %v2926_v20 = vld [vmem:[%s3689_s1 + $0x50] sm:$0xff]  }
  0x11   : > { %2711 = vmatprep.subr.bf16.mxu1 %v2911_v5  ;;  %v2919_v13 = vld [vmem:[%s3689_s1 + $0xe0] sm:$0xff]   ;;  %v2923_v17 = vld [vmem:[%s3689_s1 + $0xd8] sm:$0xff]   ;;  %v2927_v21 = vld [vmem:[%s3689_s1 + $0xd0] sm:$0xff]   ;;  %s3196_s22 = scalar_lea.vmem %s3688_s0, %s2881_s7 }
  0x12   : > { %v2920_v14 = vld [vmem:[%s3689_s1 + $0x20] sm:$0xff]   ;;  %v2924_v18 = vld [vmem:[%s3689_s1 + $0x18] sm:$0xff]   ;;  %v2928_v22 = vld [vmem:[%s3689_s1 + $0x10] sm:$0xff]  }
  0x13   : > { %2672 = vmatpush3.bf16.msra.mxu0 %v2912_v6  ;;  %v2921_v15 = vld [vmem:[%s3689_s1 + $0xa0] sm:$0xff]   ;;  %v2925_v19 = vld [vmem:[%s3689_s1 + $0x98] sm:$0xff]   ;;  %v2929_v23 = vld [vmem:[%s3689_s1 + $0x90] sm:$0xff]  }
  0x14   : > { %2712 = vmatpush3.bf16.msra.mxu1 %v2913_v7  ;;  %2673 = vmatprep.subr.bf16.mxu0 %v2914_v8  ;;  %v2930_v24 = vld [vmem:[%s3689_s1 + $0x48] sm:$0xff]   ;;  %v2934_v28 = vld [vmem:[%s3689_s1 + $0x40] sm:$0xff]   ;;  %vm3216_vm4 = vmor %vm517_vm0, %vm518_vm1 }
  0x15   : > { %2713 = vmatprep.subr.bf16.mxu1 %v2915_v9  ;;  %v2931_v25 = vld [vmem:[%s3689_s1 + $0xc8] sm:$0xff]   ;;  %v2935_v29 = vld [vmem:[%s3689_s1 + $0xc0] sm:$0xff]   ;;  %vm3222_vm5 = vmor %vm354_vm2, %vm355_vm3 }
  0x16   : > { %v2932_v26 = vld [vmem:[%s3689_s1 + $0x8] sm:$0xff]   ;;  %v2936_v30 = vld [vmem:[%s3689_s1] sm:$0xff]   ;;  %v2944_v61 = vld [vmem:[%s3689_s1 + $0x178] sm:$0xff]  }
  0x17   : > { %2674 = vmatpush3.bf16.msra.mxu0 %v2916_v10  ;;  %v2933_v27 = vld [vmem:[%s3689_s1 + $0x88] sm:$0xff]   ;;  %v2937_v31 = vld [vmem:[%s3689_s1 + $0x80] sm:$0xff]   ;;  %v2418_v0 = vld [vmem:[%s3196_s22 + $0x10] sm:$0xf] }
  0x18   : > { %2714 = vmatpush3.bf16.msra.mxu1 %v2917_v11  ;;  %2675 = vmatprep.subr.bf16.mxu0 %v2918_v12  ;;  %v322_v32 = vld [vmem:[%s3196_s22] sm:$0xf]  ;;  %v323_v33 = vld [vmem:[%s3196_s22 + $0x8] sm:$0xf]  ;;  %v339_v35 = vld [vmem:[%s3196_s22 + $0x4] sm:$0x1] }
  0x19   : > { %2715 = vmatprep.subr.bf16.mxu1 %v2919_v13  ;;  %v338_v34 = vld [vmem:[%s3196_s22] sm:$0xf]  ;;  %330 = vst [vmem:[#allocation2] sm:$0xf] %v322_v32  ;;  %331 = vst [vmem:[#allocation2 + $0x24] sm:$0xf] %v323_v33 }
  0x1a   : > { %v340_v36 = vld [vmem:[%s3196_s22 + $0x8] sm:$0xf]  ;;  %v341_v37 = vld [vmem:[%s3196_s22 + $0xc] sm:$0x1]  ;;  %v358_v38 = vshrl.u32 %v338_v34, 16  ;;  %v361_v39 = vshll.u32 %v338_v34, 16 }
  0x1b   : > { %2676 = vmatpush3.bf16.msra.mxu0 %v2920_v14  ;;  %v367_v40 = vshll.u32 %v339_v35, 16  ;;  %v372_v41 = vshrl.u32 %v340_v36, 16  ;;  %v375_v42 = vshll.u32 %v340_v36, 16  ;;  %v381_v43 = vshll.u32 %v341_v37, 16  ;;  %v485_v44 = vld [vmem:[%s3196_s22] sm:$0xe] }
  0x1c   : > { %2716 = vmatpush3.bf16.msra.mxu1 %v2921_v15  ;;  %2677 = vmatprep.subr.bf16.mxu0 %v2922_v16  ;;  %v360_v45 = vrot.slane %v358_v38, 4  ;;  %v363_v46 = vrot.slane %v361_v39, 5  ;;  %v486_v47 = vld [vmem:[%s3196_s22 + $0x4] sm:$0x1]  ;;  %v487_v48 = vld [vmem:[%s3196_s22 + $0x8] sm:$0xe] }
  0x1d   : > { %2717 = vmatprep.subr.bf16.mxu1 %v2923_v17  ;;  %v369_v49 = vrot.slane %v367_v40, 5  ;;  %v374_v50 = vrot.slane %v372_v41, 4  ;;  %v377_v51 = vrot.slane %v375_v42, 5  ;;  %v383_v52 = vrot.slane %v381_v43, 5  ;;  %v488_v53 = vld [vmem:[%s3196_s22 + $0xc] sm:$0x1] }
  0x1e   : > { %v364_v56 = vor.u32 %v363_v46, %v360_v45  ;;  %v2409_v57 = vrot.slane %v485_v44, 9  ;;  %v522_v58 = vrot.slane %v486_v47, 5  ;;  %v2410_v59 = vrot.slane %v487_v48, 9  ;;  %v2417_v60 = vld [vmem:[%s3196_s22 + $0x8] sm:$0xf]  ;;  %v2945_v1 = vld [vmem:[%s3689_s1 + $0x1f8] sm:$0xff]  }
  0x1f   : > { %2678 = vmatpush3.bf16.msra.mxu0 %v2924_v18  ;;  %v378_v62 = vor.u32 %v377_v51, %v374_v50  ;;  %v526_v63 = vrot.slane %v488_v53, 5  ;;  %577 = vst [vmem:[#allocation2 + $0xc] sm:$0xf] %v2417_v60  ;;  %578 = vst [vmem:[#allocation2 + $0x30] sm:$0xf] %v2418_v0  ;;  %v2947_v8 = vld [vmem:[%s3689_s1 + $0x1b8] sm:$0xff]  }
  0x20   : > { %2718 = vmatpush3.bf16.msra.mxu1 %v2925_v19  ;;  %2679 = vmatprep.subr.bf16.mxu0 %v2926_v20  ;;  %v365_v2 = vrot.slane %v364_v56, 4  ;;  %v523_v3 = vsel %vm3216_vm4, %v2409_v57, %v522_v58  ;;  %v324_v9 = vld [vmem:[%s3196_s22 + $0x10] sm:$0xf]  ;;  %v325_v10 = vld [vmem:[%s3196_s22 + $0x18] sm:$0xf]  ;;  %v2957_v48 = vld [vmem:[%s3689_s1 + $0x168] sm:$0xff]  }
  0x21   : > { %2719 = vmatprep.subr.bf16.mxu1 %v2927_v21  ;;  %v379_v4 = vrot.slane %v378_v62, 4  ;;  %v527_v5 = vsel %vm3216_vm4, %v2410_v59, %v526_v63  ;;  %560 = vst [vmem:[#allocation2 + $0x8] sm:$0xf] %v523_v3  ;;  %v342_v11 = vld [vmem:[%s3196_s22 + $0x10] sm:$0xf]  ;;  %v2946_v18 = vld [vmem:[%s3689_s1 + $0x138] sm:$0xff]  }
  0x22   : > { %v370_v6 = vsel %vm3222_vm5, %v365_v2, %v369_v49  ;;  %561 = vst [vmem:[#allocation2 + $0x2c] sm:$0xf] %v527_v5  ;;  %v2949_v12 = vld [vmem:[%s3689_s1 + $0x1f0] sm:$0xff]   ;;  %332 = vst [vmem:[#allocation2 + $0x48] sm:$0xf] %v324_v9  ;;  %v386_v15 = vshrl.u32 %v342_v11, 16 }
  0x23   : > { %2680 = vmatpush3.bf16.msra.mxu0 %v2928_v22  ;;  %v384_v7 = vsel %vm3222_vm5, %v379_v4, %v383_v52  ;;  %477 = vst [vmem:[#allocation2 + $0x4] sm:$0xf] %v370_v6  ;;  %333 = vst [vmem:[#allocation2 + $0x6c] sm:$0xf] %v325_v10  ;;  %v343_v13 = vld [vmem:[%s3196_s22 + $0x14] sm:$0x1] }
  0x24   : > { %2720 = vmatpush3.bf16.msra.mxu1 %v2929_v23  ;;  %2681 = vmatprep.subr.bf16.mxu0 %v2930_v24  ;;  %478 = vst [vmem:[#allocation2 + $0x28] sm:$0xf] %v384_v7  ;;  %v344_v14 = vld [vmem:[%s3196_s22 + $0x18] sm:$0xf]  ;;  %v389_v19 = vshll.u32 %v342_v11, 16  ;;  %v2948_v20 = vld [vmem:[%s3689_s1 + $0x170] sm:$0xff]  }
  0x25   : > { %2721 = vmatprep.subr.bf16.mxu1 %v2931_v25  ;;  %v345_v21 = vld [vmem:[%s3196_s22 + $0x1c] sm:$0x1]  ;;  %v388_v22 = vrot.slane %v386_v15, 4  ;;  %v395_v23 = vshll.u32 %v343_v13, 16  ;;  %v400_v24 = vshrl.u32 %v344_v14, 16  ;;  %v2950_v34 = vld [vmem:[%s3689_s1 + $0x130] sm:$0xff]  }
  0x26   : > { %v2943_v17 = vld [vmem:[#allocation2 + $0xc] ss:$36 sps:$4 sm:$0xff]   ;;  %v2938_v25 = vld [vmem:[#allocation2] ss:$36 sps:$4 sm:$0xff]   ;;  %v409_v32 = vshll.u32 %v345_v21, 16 }
  0x27   : > { %2682 = vmatpush3.bf16.msra.mxu0 %v2932_v26  ;;  %1947 = vmatprep.mubr.bf16.mxu1 %v2943_v17  ;;  %v489_v33 = vld [vmem:[%s3196_s22 + $0x10] sm:$0xe]  ;;  %v490_v36 = vld [vmem:[%s3196_s22 + $0x14] sm:$0x1]  ;;  %v491_v37 = vld [vmem:[%s3196_s22 + $0x18] sm:$0xe] }
  0x28   : > { %2722 = vmatpush3.bf16.msra.mxu1 %v2933_v27  ;;  %2683 = vmatprep.subr.bf16.mxu0 %v2934_v28  ;;  %v2951_v27 = vld [vmem:[%s3689_s1 + $0x1b0] sm:$0xff]   ;;  %v391_v28 = vrot.slane %v389_v19, 5  ;;  %v492_v38 = vld [vmem:[%s3196_s22 + $0x1c] sm:$0x1]  ;;  %v411_v40 = vrot.slane %v409_v32, 5  ;;  %v2411_v41 = vrot.slane %v489_v33, 9 }
  0x29   : > { %2723 = vmatprep.subr.bf16.mxu1 %v2935_v29  ;;  %v2941_v16 = vld [vmem:[#allocation2 + $0x8] ss:$36 sps:$4 sm:$0xff]   ;;  %v397_v29 = vrot.slane %v395_v23, 5  ;;  %v530_v42 = vrot.slane %v490_v36, 5  ;;  %v2419_v43 = vld [vmem:[%s3196_s22 + $0x18] sm:$0xf] }
  0x2a   : > { %v392_v35 = vor.u32 %v391_v28, %v388_v22  ;;  %v2412_v45 = vrot.slane %v491_v37, 9  ;;  %v534_v46 = vrot.slane %v492_v38, 5  ;;  %v2420_v47 = vld [vmem:[%s3196_s22 + $0x20] sm:$0xf]  ;;  %579 = vst [vmem:[#allocation2 + $0x54] sm:$0xf] %v2419_v43 }
  0x2b   : > { %2684 = vmatpush3.bf16.msra.mxu0 %v2936_v30  ;;  %v2940_v26 = vld [vmem:[#allocation2 + $0x4] ss:$36 sps:$4 sm:$0xff]   ;;  %v402_v30 = vrot.slane %v400_v24, 4  ;;  %v531_v50 = vsel %vm3216_vm4, %v2411_v41, %v530_v42  ;;  %580 = vst [vmem:[#allocation2 + $0x78] sm:$0xf] %v2420_v47  ;;  %v2970_v19 = vld [vmem:[%s3689_s1 + $0x158] sm:$0xff]  }
  0x2c   : > { %2724 = vmatpush3.bf16.msra.mxu1 %v2937_v31  ;;  %2749 = vmatprep.subr.bf16.mxu0 %v2944_v61  ;;  %v403_v31 = vshll.u32 %v344_v14, 16  ;;  %v393_v44 = vrot.slane %v392_v35, 4  ;;  %v535_v52 = vsel %vm3216_vm4, %v2412_v45, %v534_v46  ;;  %562 = vst [vmem:[#allocation2 + $0x50] sm:$0xf] %v531_v50  ;;  %v2958_v53 = vld [vmem:[%s3689_s1 + $0x1e8] sm:$0xff]   ;;  %v2961_v60 = vld [vmem:[%s3689_s1 + $0x160] sm:$0xff]  }
  0x2d   : > { %2789 = vmatprep.subr.bf16.mxu1 %v2945_v1  ;;  %1882 = vmatprep.mubr.bf16.mxu0 %v2940_v26  ;;  %563 = vst [vmem:[#allocation2 + $0x74] sm:$0xf] %v535_v52  ;;  %v2959_v57 = vld [vmem:[%s3689_s1 + $0x128] sm:$0xff]   ;;  %v2962_v61 = vld [vmem:[%s3689_s1 + $0x1e0] sm:$0xff]   ;;  %v2422_v37 = vld [vmem:[%s3196_s22 + $0x30] sm:$0xf] }
  0x2e   : > { %1883 = vmatmul.mubr.bf16.vlgmr.msra.gmra.mxu0 %v2938_v25  ;;  %v405_v39 = vrot.slane %v403_v31, 5  ;;  %v398_v51 = vsel %vm3222_vm5, %v393_v44, %v397_v29  ;;  %v2960_v58 = vld [vmem:[%s3689_s1 + $0x1a8] sm:$0xff]   ;;  %v2963_v62 = vld [vmem:[%s3689_s1 + $0x120] sm:$0xff]   ;;  %v2971_v38 = vld [vmem:[%s3689_s1 + $0x1d8] sm:$0xff]   ;;  %582 = vst [vmem:[#allocation2 + $0xc0] sm:$0xf] %v2422_v37 }
  0x2f   : > { %1948 = vmatmul.mubr.bf16.vlgmr.msra.gmra.mxu1 %v2941_v16  ;;  %2750 = vmatpush3.bf16.msra.mxu0 %v2946_v18  ;;  %479 = vst [vmem:[#allocation2 + $0x4c] sm:$0xf] %v398_v51  ;;  %v2964_v63 = vld [vmem:[%s3689_s1 + $0x1a0] sm:$0xff]   ;;  %v327_v1 = vld [vmem:[%s3196_s22 + $0x28] sm:$0xf]  ;;  %v2972_v43 = vld [vmem:[%s3689_s1 + $0x118] sm:$0xff]  }
  0x30   : > { %2790 = vmatpush3.bf16.msra.mxu1 %v2947_v8  ;;  %2751 = vmatprep.subr.bf16.mxu0 %v2948_v20  ;;  %v406_v49 = vor.u32 %v405_v39, %v402_v30  ;;  %v326_v0 = vld [vmem:[%s3196_s22 + $0x20] sm:$0xf]  ;;  %335 = vst [vmem:[#allocation2 + $0xb4] sm:$0xf] %v327_v1  ;;  %v347_v8 = vld [vmem:[%s3196_s22 + $0x24] sm:$0x1] }
  0x31   : > { %2791 = vmatprep.subr.bf16.mxu1 %v2949_v12  ;;  %334 = vst [vmem:[#allocation2 + $0x90] sm:$0xf] %v326_v0  ;;  %v346_v2 = vld [vmem:[%s3196_s22 + $0x20] sm:$0xf]  ;;  %v348_v9 = vld [vmem:[%s3196_s22 + $0x28] sm:$0xf] }
  0x32   : > { %v407_v56 = vrot.slane %v406_v49, 4  ;;  %v2954_v4 = vld [vmem:[#allocation2 + $0x54] ss:$36 sps:$4 sm:$0xff]   ;;  %v414_v5 = vshrl.u32 %v346_v2, 16  ;;  %v417_v6 = vshll.u32 %v346_v2, 16  ;;  %v423_v13 = vshll.u32 %v347_v8, 16 }
  0x33   : > { %2752 = vmatpush3.bf16.msra.mxu0 %v2950_v34  ;;  %1955 = vmatprep.mubr.bf16.mxu1 %v2954_v4  ;;  %v349_v10 = vld [vmem:[%s3196_s22 + $0x2c] sm:$0x1]  ;;  %v428_v14 = vshrl.u32 %v348_v9, 16  ;;  %v431_v17 = vshll.u32 %v348_v9, 16  ;;  %v493_v24 = vld [vmem:[%s3196_s22 + $0x20] sm:$0xe] }
  0x34   : > { %2792 = vmatpush3.bf16.msra.mxu1 %v2951_v27  ;;  %v412_v59 = vsel %vm3222_vm5, %v407_v56, %v411_v40  ;;  %2753 = vmatprep.subr.bf16.mxu0 %v2957_v48  ;;  %v2956_v7 = vld [vmem:[#allocation2 + $0x50] ss:$36 sps:$4 sm:$0xff]   ;;  %v416_v11 = vrot.slane %v414_v5, 4  ;;  %v419_v12 = vrot.slane %v417_v6, 5  ;;  %v437_v18 = vshll.u32 %v349_v10, 16  ;;  %v2973_v44 = vld [vmem:[%s3689_s1 + $0x198] sm:$0xff]  }
  0x35   : > { %2793 = vmatprep.subr.bf16.mxu1 %v2958_v53  ;;  %480 = vst [vmem:[#allocation2 + $0x70] sm:$0xf] %v412_v59  ;;  %v425_v22 = vrot.slane %v423_v13, 5  ;;  %v430_v23 = vrot.slane %v428_v14, 4  ;;  %v494_v25 = vld [vmem:[%s3196_s22 + $0x24] sm:$0x1] }
  0x36   : > { %v1060_v3 = vld [vmem:[#allocation2 + $0x48] sm:$0xff]  ;;  %v420_v21 = vor.u32 %v419_v12, %v416_v11  ;;  %v433_v26 = vrot.slane %v431_v17, 5  ;;  %v439_v27 = vrot.slane %v437_v18, 5  ;;  %v2413_v31 = vrot.slane %v493_v24, 9  ;;  %v2974_v46 = vld [vmem:[%s3689_s1 + $0x150] sm:$0xff]   ;;  %v2990_v37 = vld [vmem:[%s3689_s1 + $0x180] sm:$0xff]  }
  0x37   : > { %2754 = vmatpush3.bf16.msra.mxu0 %v2959_v57  ;;  %1956 = vmatmul.mubr.bf16.gmra.mxu1 %v2956_v7  ;;  %v495_v28 = vld [vmem:[%s3196_s22 + $0x28] sm:$0xe]  ;;  %v496_v29 = vld [vmem:[%s3196_s22 + $0x2c] sm:$0x1]  ;;  %v538_v32 = vrot.slane %v494_v25, 5  ;;  %v2975_v47 = vld [vmem:[%s3689_s1 + $0x1d0] sm:$0xff]  }
  0x38   : > { %2794 = vmatpush3.bf16.msra.mxu1 %v2960_v58  ;;  %2755 = vmatprep.subr.bf16.mxu0 %v2961_v60  ;;  %v421_v30 = vrot.slane %v420_v21, 4  ;;  %v2414_v33 = vrot.slane %v495_v28, 9  ;;  %v2421_v34 = vld [vmem:[%s3196_s22 + $0x28] sm:$0xf]  ;;  %v434_v35 = vor.u32 %v433_v26, %v430_v23  ;;  %v542_v36 = vrot.slane %v496_v29, 5  ;;  %v2976_v48 = vld [vmem:[%s3689_s1 + $0x110] sm:$0xff]  }
  0x39   : > { %2795 = vmatprep.subr.bf16.mxu1 %v2962_v61  ;;  %581 = vst [vmem:[#allocation2 + $0x9c] sm:$0xf] %v2421_v34  ;;  %v539_v40 = vsel %vm3216_vm4, %v2413_v31, %v538_v32  ;;  %v2977_v49 = vld [vmem:[%s3689_s1 + $0x190] sm:$0xff]   ;;  %v329_v51 = vld [vmem:[%s3196_s22 + $0x38] sm:$0xf]  ;;  %v2983_v12 = vld [vmem:[%s3689_s1 + $0x148] sm:$0xff]  }
  0x3a   : > { %v426_v39 = vsel %vm3222_vm5, %v421_v30, %v425_v22  ;;  %v435_v41 = vrot.slane %v434_v35, 4  ;;  %v543_v42 = vsel %vm3216_vm4, %v2414_v33, %v542_v36  ;;  %564 = vst [vmem:[#allocation2 + $0x98] sm:$0xf] %v539_v40  ;;  %v328_v50 = vld [vmem:[%s3196_s22 + $0x30] sm:$0xf]  ;;  %v2984_v30 = vld [vmem:[%s3689_s1 + $0x1c8] sm:$0xff]  }
  0x3b   : > { %2756 = vmatpush3.bf16.msra.mxu0 %v2963_v62  ;;  %481 = vst [vmem:[#allocation2 + $0x94] sm:$0xf] %v426_v39  ;;  %565 = vst [vmem:[#allocation2 + $0xbc] sm:$0xf] %v543_v42  ;;  %v350_v52 = vld [vmem:[%s3196_s22 + $0x30] sm:$0xf] }
  0x3c   : > { %2796 = vmatpush3.bf16.msra.mxu1 %v2964_v63  ;;  %v1065_v15 = vld [vmem:[#allocation2 + $0x6c] sm:$0xff]  ;;  %2757 = vmatprep.subr.bf16.mxu0 %v2970_v19  ;;  %v440_v45 = vsel %vm3222_vm5, %v435_v41, %v439_v27  ;;  %336 = vst [vmem:[#allocation2 + $0xd8] sm:$0xf] %v328_v50  ;;  %337 = vst [vmem:[#allocation2 + $0xfc] sm:$0xf] %v329_v51  ;;  %v442_v57 = vshrl.u32 %v350_v52, 16 }
  0x3d   : > { %v2952_v16 = vld [vmem:[#allocation2 + $0x4c] ss:$36 sps:$4 sm:$0xff]   ;;  %v2522_v20 = vcombine.low %v1060_v3, %v1065_v15  ;;  %2797 = vmatprep.subr.bf16.mxu1 %v2971_v38  ;;  %482 = vst [vmem:[#allocation2 + $0xb8] sm:$0xf] %v440_v45  ;;  %v351_v56 = vld [vmem:[%s3196_s22 + $0x34] sm:$0x1] }
  0x3e   : > { %1890 = vmatprep.mubr.bf16.mxu0 %v2952_v16  ;;  %v445_v58 = vshll.u32 %v350_v52, 16  ;;  %v451_v61 = vshll.u32 %v351_v56, 16  ;;  %v352_v62 = vld [vmem:[%s3196_s22 + $0x38] sm:$0xf]  ;;  %v353_v63 = vld [vmem:[%s3196_s22 + $0x3c] sm:$0x1] }
  0x3f   : > { %1891 = vmatmul.mubr.bf16.gmra.mxu0 %v2522_v20  ;;  %v444_v0 = vrot.slane %v442_v57, 4  ;;  %v456_v5 = vshrl.u32 %v352_v62, 16  ;;  %v459_v6 = vshll.u32 %v352_v62, 16  ;;  %v465_v9 = vshll.u32 %v353_v63, 16  ;;  %v497_v10 = vld [vmem:[%s3196_s22 + $0x30] sm:$0xe] }
  0x40   : > { %2758 = vmatpush3.bf16.msra.mxu0 %v2972_v43  ;;  %2798 = vmatpush3.bf16.msra.mxu1 %v2973_v44  ;;  %v2967_v59 = vld [vmem:[#allocation2 + $0x9c] ss:$36 sps:$4 sm:$0xff]   ;;  %v447_v1 = vrot.slane %v445_v58, 5  ;;  %v453_v4 = vrot.slane %v451_v61, 5  ;;  %v498_v11 = vld [vmem:[%s3196_s22 + $0x34] sm:$0x1] }
  0x41   : > { %2759 = vmatprep.subr.bf16.mxu0 %v2974_v46  ;;  %2799 = vmatprep.subr.bf16.mxu1 %v2975_v47  ;;  %v458_v13 = vrot.slane %v456_v5, 4  ;;  %v461_v14 = vrot.slane %v459_v6, 5  ;;  %v499_v15 = vld [vmem:[%s3196_s22 + $0x38] sm:$0xe]  ;;  %v500_v16 = vld [vmem:[%s3196_s22 + $0x3c] sm:$0x1] }
  0x42   : > { %v1070_v53 = vld [vmem:[#allocation2 + $0x90] sm:$0xff]  ;;  %v2969_v60 = vld [vmem:[#allocation2 + $0x98] ss:$36 sps:$4 sm:$0xff]   ;;  %1963 = vmatprep.mubr.bf16.mxu1 %v2967_v59  ;;  %v448_v8 = vor.u32 %v447_v1, %v444_v0  ;;  %v467_v18 = vrot.slane %v465_v9, 5  ;;  %v2415_v19 = vrot.slane %v497_v10, 9  ;;  %v546_v20 = vrot.slane %v498_v11, 5 }
  0x43   : > { %1964 = vmatmul.mubr.bf16.gmra.mxu1 %v2969_v60  ;;  %v2423_v21 = vld [vmem:[%s3196_s22 + $0x38] sm:$0xf]  ;;  %v462_v22 = vor.u32 %v461_v14, %v458_v13  ;;  %v2416_v23 = vrot.slane %v499_v15, 9  ;;  %v550_v24 = vrot.slane %v500_v16, 5  ;;  %v2424_v25 = vld [vmem:[%s3196_s22 + $0x40] sm:$0xf] }
  0x44   : > { %2760 = vmatpush3.bf16.msra.mxu0 %v2976_v48  ;;  %2800 = vmatpush3.bf16.msra.mxu1 %v2977_v49  ;;  %v1075_v2 = vld [vmem:[#allocation2 + $0xb4] sm:$0xff]  ;;  %v449_v17 = vrot.slane %v448_v8, 4  ;;  %583 = vst [vmem:[#allocation2 + $0xe4] sm:$0xf] %v2423_v21  ;;  %v547_v27 = vsel %vm3216_vm4, %v2415_v19, %v546_v20  ;;  %584 = vst [vmem:[#allocation2 + $0x108] sm:$0xf] %v2424_v25 }
  0x45   : > { %v2965_v3 = vld [vmem:[#allocation2 + $0x94] ss:$36 sps:$4 sm:$0xff]   ;;  %v2531_v7 = vcombine.low %v1070_v53, %v1075_v2  ;;  %2761 = vmatprep.subr.bf16.mxu0 %v2983_v12  ;;  %v463_v28 = vrot.slane %v462_v22, 4  ;;  %v551_v29 = vsel %vm3216_vm4, %v2416_v23, %v550_v24  ;;  %566 = vst [vmem:[#allocation2 + $0xe0] sm:$0xf] %v547_v27  ;;  %v2985_v31 = vld [vmem:[%s3689_s1 + $0x108] sm:$0xff]   ;;  %2801 = vmatprep.subr.bf16.mxu1 %v2984_v30 }
  0x46   : > { %1898 = vmatprep.mubr.bf16.mxu0 %v2965_v3  ;;  %v454_v26 = vsel %vm3222_vm5, %v449_v17, %v453_v4  ;;  %567 = vst [vmem:[#allocation2 + $0x104] sm:$0xf] %v551_v29  ;;  %v2986_v33 = vld [vmem:[%s3689_s1 + $0x188] sm:$0xff]   ;;  %v2987_v34 = vld [vmem:[%s3689_s1 + $0x140] sm:$0xff]   ;;  %v2427_v41 = vld [vmem:[%s3196_s22 + $0x10] sm:$0xf] }
  0x47   : > { %1899 = vmatmul.mubr.bf16.gmra.mxu0 %v2531_v7  ;;  %483 = vst [vmem:[#allocation2 + $0xdc] sm:$0xf] %v454_v26  ;;  %v468_v32 = vsel %vm3222_vm5, %v463_v28, %v467_v18  ;;  %v2988_v35 = vld [vmem:[%s3689_s1 + $0x1c0] sm:$0xff]   ;;  %v2425_v38 = vld [vmem:[%s3196_s22 + $0x8] sm:$0xf]  ;;  %v616_v50 = vshrl.u32 %v2427_v41, 16 }
  0x48   : > { %484 = vst [vmem:[#allocation2 + $0x100] sm:$0xf] %v468_v32  ;;  %2762 = vmatpush3.bf16.msra.mxu0 %v2985_v31  ;;  %2802 = vmatpush3.bf16.msra.mxu1 %v2986_v33  ;;  %v2989_v36 = vld [vmem:[%s3689_s1 + $0x100] sm:$0xff]   ;;  %v2426_v39 = vld [vmem:[%s3196_s22 + $0xc] sm:$0x1]  ;;  %v602_v42 = vshrl.u32 %v2425_v38, 16 }
  0x49   : > { %2763 = vmatprep.subr.bf16.mxu0 %v2987_v34  ;;  %2803 = vmatprep.subr.bf16.mxu1 %v2988_v35  ;;  %v605_v43 = vshll.u32 %v2425_v38, 16  ;;  %v611_v46 = vshll.u32 %v2426_v39, 16  ;;  %v2428_v47 = vld [vmem:[%s3196_s22 + $0x14] sm:$0x1]  ;;  %v619_v51 = vshll.u32 %v2427_v41, 16  ;;  %v3399_v58 = vld [vmem:[%s3689_s1 + $0x238] sm:$0xff]  }
  0x4a   : > { %v604_v48 = vrot.slane %v602_v42, 4  ;;  %v625_v57 = vshll.u32 %v2428_v47, 16  ;;  %v618_v61 = vrot.slane %v616_v50, 4  ;;  %v2441_v63 = vld [vmem:[%s3196_s22 + $0x8] sm:$0xe] }
  0x4b   : > { %v2980_v44 = vld [vmem:[#allocation2 + $0xe4] ss:$36 sps:$4 sm:$0xff]   ;;  %v607_v49 = vrot.slane %v605_v43, 5  ;;  %v613_v56 = vrot.slane %v611_v46, 5  ;;  %v621_v62 = vrot.slane %v619_v51, 5  ;;  %v2457_v4 = vrot.slane %v2441_v63, 9 }
  0x4c   : > { %2764 = vmatpush3.bf16.msra.mxu0 %v2989_v36  ;;  %2804 = vmatpush3.bf16.msra.mxu1 %v2990_v37  ;;  %v2442_v0 = vld [vmem:[%s3196_s22 + $0xc] sm:$0x1]  ;;  %v627_v1 = vrot.slane %v625_v57, 5  ;;  %v2443_v2 = vld [vmem:[%s3196_s22 + $0x10] sm:$0xe] }
  0x4d   : > { %v2982_v45 = vld [vmem:[#allocation2 + $0xe0] ss:$36 sps:$4 sm:$0xff]   ;;  %1971 = vmatprep.mubr.bf16.mxu1 %v2980_v44  ;;  %v608_v60 = vor.u32 %v607_v49, %v604_v48  ;;  %v2444_v3 = vld [vmem:[%s3196_s22 + $0x14] sm:$0x1]  ;;  %2841 = vmatprep.subr.bf16.mxu0 %v3399_v58  ;;  %v622_v6 = vor.u32 %v621_v62, %v618_v61  ;;  %v763_v7 = vrot.slane %v2442_v0, 5  ;;  %v2458_v8 = vrot.slane %v2443_v2, 9 }
  0x4e   : > { %v1080_v40 = vld [vmem:[#allocation2 + $0xd8] sm:$0xff]  ;;  %1972 = vmatmul.mubr.bf16.gmra.mxu1 %v2982_v45  ;;  %v2465_v9 = vld [vmem:[%s3196_s22 + $0x10] sm:$0xf]  ;;  %2865 = vmatprep.subr.bf16.mxu1 %v3399_v58  ;;  %v767_v10 = vrot.slane %v2444_v3, 5  ;;  %v2474_v16 = vld [vmem:[%s3196_s22 + $0x14] sm:$0x1] }
  0x4f   : > { %v1085_v52 = vld [vmem:[#allocation2 + $0xfc] sm:$0xff]  ;;  %v609_v5 = vrot.slane %v608_v60, 4  ;;  %v2466_v11 = vld [vmem:[%s3196_s22 + $0x18] sm:$0xf]  ;;  %818 = vst [vmem:[#allocation2 + $0x18] sm:$0xf] %v2465_v9  ;;  %v764_v15 = vsel %vm3216_vm4, %v2457_v4, %v763_v7 }
  0x50   : > { %v2978_v53 = vld [vmem:[#allocation2 + $0xdc] ss:$36 sps:$4 sm:$0xff]   ;;  %v2540_v59 = vcombine.low %v1080_v40, %v1085_v52  ;;  %v2473_v12 = vld [vmem:[%s3196_s22 + $0x10] sm:$0xf]  ;;  %v623_v14 = vrot.slane %v622_v6, 4  ;;  %v768_v19 = vsel %vm3216_vm4, %v2458_v8, %v767_v10  ;;  %v852_v22 = vshll.u32 %v2474_v16, 16 }
  0x51   : > { %1906 = vmatprep.mubr.bf16.mxu0 %v2978_v53  ;;  %v614_v13 = vsel %vm3222_vm5, %v609_v5, %v613_v56  ;;  %819 = vst [vmem:[#allocation2 + $0x3c] sm:$0xf] %v2466_v11  ;;  %v2475_v17 = vld [vmem:[%s3196_s22 + $0x18] sm:$0xf]  ;;  %v843_v18 = vshrl.u32 %v2473_v12, 16  ;;  %v846_v21 = vshll.u32 %v2473_v12, 16 }
  0x52   : > { %1907 = vmatmul.mubr.bf16.gmra.mxu0 %v2540_v59  ;;  %721 = vst [vmem:[#allocation2 + $0x10] sm:$0xf] %v614_v13  ;;  %801 = vst [vmem:[#allocation2 + $0x14] sm:$0xf] %v764_v15  ;;  %v2476_v20 = vld [vmem:[%s3196_s22 + $0x1c] sm:$0x1]  ;;  %v628_v24 = vsel %vm3222_vm5, %v623_v14, %v627_v1 }
  0x53   : > { %v857_v23 = vshrl.u32 %v2475_v17, 16  ;;  %802 = vst [vmem:[#allocation2 + $0x38] sm:$0xf] %v768_v19  ;;  %v845_v25 = vrot.slane %v843_v18, 4  ;;  %v860_v26 = vshll.u32 %v2475_v17, 16  ;;  %v866_v27 = vshll.u32 %v2476_v20, 16 }
  0x54   : > { %722 = vst [vmem:[#allocation2 + $0x34] sm:$0xf] %v628_v24  ;;  %v848_v28 = vrot.slane %v846_v21, 5  ;;  %v854_v29 = vrot.slane %v852_v22, 5  ;;  %v2429_v34 = vld [vmem:[%s3196_s22 + $0x18] sm:$0xf] }
  0x55   : > { %v859_v30 = vrot.slane %v857_v23, 4  ;;  %v862_v31 = vrot.slane %v860_v26, 5  ;;  %v868_v32 = vrot.slane %v866_v27, 5  ;;  %v2430_v35 = vld [vmem:[%s3196_s22 + $0x1c] sm:$0x1]  ;;  %v630_v39 = vshrl.u32 %v2429_v34, 16 }
  0x56   : > { %v849_v33 = vor.u32 %v848_v28, %v845_v25  ;;  %v2431_v36 = vld [vmem:[%s3196_s22 + $0x20] sm:$0xf]  ;;  %v2432_v38 = vld [vmem:[%s3196_s22 + $0x24] sm:$0x1]  ;;  %v633_v40 = vshll.u32 %v2429_v34, 16  ;;  %v639_v41 = vshll.u32 %v2430_v35, 16 }
  0x57   : > { %v863_v37 = vor.u32 %v862_v31, %v859_v30  ;;  %v644_v43 = vshrl.u32 %v2431_v36, 16  ;;  %v647_v44 = vshll.u32 %v2431_v36, 16  ;;  %v653_v45 = vshll.u32 %v2432_v38, 16  ;;  %v2445_v46 = vld [vmem:[%s3196_s22 + $0x18] sm:$0xe]  ;;  %v3431_v51 = vld [vmem:[%s3689_s1 + $0x230] sm:$0xff]  }
  0x58   : > { %v850_v42 = vrot.slane %v849_v33, 4  ;;  %v632_v48 = vrot.slane %v630_v39, 4  ;;  %v635_v49 = vrot.slane %v633_v40, 5  ;;  %v641_v52 = vrot.slane %v639_v41, 5  ;;  %v2446_v57 = vld [vmem:[%s3196_s22 + $0x1c] sm:$0x1] }
  0x59   : > { %v864_v47 = vrot.slane %v863_v37, 4  ;;  %v646_v53 = vrot.slane %v644_v43, 4  ;;  %v649_v56 = vrot.slane %v647_v44, 5  ;;  %v2459_v63 = vrot.slane %v2445_v46, 9  ;;  %v2447_v2 = vld [vmem:[%s3196_s22 + $0x20] sm:$0xe] }
  0x5a   : > { %v855_v50 = vsel %vm3222_vm5, %v850_v42, %v854_v29  ;;  %v2993_v60 = vld [vmem:[#allocation2 + $0x14] ss:$36 sps:$4 sm:$0xff]   ;;  %v636_v62 = vor.u32 %v635_v49, %v632_v48  ;;  %v655_v1 = vrot.slane %v653_v45, 5  ;;  %v2448_v3 = vld [vmem:[%s3196_s22 + $0x24] sm:$0x1]  ;;  %v771_v4 = vrot.slane %v2446_v57, 5 }
  0x5b   : > { %v2991_v59 = vld [vmem:[#allocation2 + $0x10] ss:$36 sps:$4 sm:$0xff]   ;;  %v869_v61 = vsel %vm3222_vm5, %v864_v47, %v868_v32  ;;  %962 = vst [vmem:[#allocation2 + $0x1c] sm:$0xf] %v855_v50  ;;  %v650_v0 = vor.u32 %v649_v56, %v646_v53  ;;  %2012 = vmatprep.mubr.bf16.mxu0 %v2993_v60  ;;  %v2460_v6 = vrot.slane %v2447_v2, 9  ;;  %v775_v7 = vrot.slane %v2448_v3, 5 }
  0x5c   : > { %963 = vst [vmem:[#allocation2 + $0x40] sm:$0xf] %v869_v61  ;;  %v637_v5 = vrot.slane %v636_v62, 4  ;;  %v2467_v8 = vld [vmem:[%s3196_s22 + $0x20] sm:$0xf]  ;;  %2013 = vmatmul.mubr.bf16.vlgmr.msra.gmra.mxu0 %v2991_v59  ;;  %v772_v10 = vsel %vm3216_vm4, %v2459_v63, %v771_v4  ;;  %v3457_v22 = vld [vmem:[%s3689_s1 + $0x228] sm:$0xff]  }
  0x5d   : > { %v651_v9 = vrot.slane %v650_v0, 4  ;;  %v2468_v11 = vld [vmem:[%s3196_s22 + $0x28] sm:$0xf]  ;;  %820 = vst [vmem:[#allocation2 + $0x60] sm:$0xf] %v2467_v8  ;;  %2842 = vmatpush3.bf16.msra.mxu0 %v3399_v58  ;;  %v776_v14 = vsel %vm3216_vm4, %v2460_v6, %v775_v7  ;;  %v3462_v29 = vld [vmem:[%s3689_s1 + $0x220] sm:$0xff]  }
  0x5e   : > { %v2477_v12 = vld [vmem:[%s3196_s22 + $0x20] sm:$0xf]  ;;  %v642_v13 = vsel %vm3222_vm5, %v637_v5, %v641_v52  ;;  %803 = vst [vmem:[#allocation2 + $0x5c] sm:$0xf] %v772_v10  ;;  %821 = vst [vmem:[#allocation2 + $0x84] sm:$0xf] %v2468_v11  ;;  %2843 = vmatprep.subr.bf16.mxu0 %v3431_v51 }
  0x5f   : > { %v2478_v15 = vld [vmem:[%s3196_s22 + $0x24] sm:$0x1]  ;;  %v2479_v16 = vld [vmem:[%s3196_s22 + $0x28] sm:$0xf]  ;;  %v2480_v17 = vld [vmem:[%s3196_s22 + $0x2c] sm:$0x1]  ;;  %v656_v18 = vsel %vm3222_vm5, %v651_v9, %v655_v1 }
  0x60   : > { %723 = vst [vmem:[#allocation2 + $0x58] sm:$0xf] %v642_v13  ;;  %804 = vst [vmem:[#allocation2 + $0x80] sm:$0xf] %v776_v14  ;;  %v871_v19 = vshrl.u32 %v2477_v12, 16  ;;  %v874_v20 = vshll.u32 %v2477_v12, 16 }
  0x61   : > { %v880_v21 = vshll.u32 %v2478_v15, 16  ;;  %724 = vst [vmem:[#allocation2 + $0x7c] sm:$0xf] %v656_v18  ;;  %v885_v23 = vshrl.u32 %v2479_v16, 16  ;;  %v888_v24 = vshll.u32 %v2479_v16, 16  ;;  %v894_v25 = vshll.u32 %v2480_v17, 16  ;;  %2844 = vmatpush3.bf16.msra.mxu0 %v3431_v51 }
  0x62   : > { %v873_v26 = vrot.slane %v871_v19, 4  ;;  %v876_v27 = vrot.slane %v874_v20, 5  ;;  %v2994_v30 = vld [vmem:[#allocation2 + $0x18] ss:$36 sps:$4 sm:$0xff]   ;;  %2845 = vmatprep.subr.bf16.mxu0 %v3457_v22  ;;  %v2433_v36 = vld [vmem:[%s3196_s22 + $0x28] sm:$0xf] }
  0x63   : > { %v882_v28 = vrot.slane %v880_v21, 5  ;;  %v2996_v31 = vld [vmem:[#allocation2 + $0x1c] ss:$36 sps:$4 sm:$0xff]   ;;  %v887_v32 = vrot.slane %v885_v23, 4  ;;  %v890_v34 = vrot.slane %v888_v24, 5  ;;  %v896_v35 = vrot.slane %v894_v25, 5 }
  0x64   : > { %v877_v33 = vor.u32 %v876_v27, %v873_v26  ;;  %2077 = vmatprep.mubr.bf16.mxu1 %v2996_v31  ;;  %v2434_v37 = vld [vmem:[%s3196_s22 + $0x2c] sm:$0x1]  ;;  %v2435_v38 = vld [vmem:[%s3196_s22 + $0x30] sm:$0xf]  ;;  %v2436_v39 = vld [vmem:[%s3196_s22 + $0x34] sm:$0x1] }
  0x65   : > { %2078 = vmatmul.mubr.bf16.vlgmr.msra.gmra.mxu1 %v2994_v30  ;;  %v891_v41 = vor.u32 %v890_v34, %v887_v32  ;;  %v658_v42 = vshrl.u32 %v2433_v36, 16  ;;  %v661_v43 = vshll.u32 %v2433_v36, 16  ;;  %v2449_v44 = vld [vmem:[%s3196_s22 + $0x28] sm:$0xe]  ;;  %2846 = vmatpush3.bf16.msra.mxu0 %v3457_v22  ;;  %v667_v46 = vshll.u32 %v2434_v37, 16  ;;  %v3481_v0 = vld [vmem:[%s3689_s1 + $0x218] sm:$0xff]  }
  0x66   : > { %v878_v40 = vrot.slane %v877_v33, 4  ;;  %2873 = vmatpush3.bf16.msra.mxu1 %v3399_v58  ;;  %v672_v47 = vshrl.u32 %v2435_v38, 16  ;;  %v675_v48 = vshll.u32 %v2435_v38, 16  ;;  %v681_v49 = vshll.u32 %v2436_v39, 16  ;;  %2847 = vmatprep.subr.bf16.mxu0 %v3462_v29  ;;  %v2450_v63 = vld [vmem:[%s3196_s22 + $0x2c] sm:$0x1] }
  0x67   : > { %v1062_v45 = vld [vmem:[#allocation2 + $0x58] sm:$0xff]  ;;  %2866 = vmatprep.subr.bf16.mxu1 %v3431_v51  ;;  %v892_v56 = vrot.slane %v891_v41, 4  ;;  %v660_v58 = vrot.slane %v658_v42, 4  ;;  %v663_v57 = vrot.slane %v661_v43, 5  ;;  %v669_v60 = vrot.slane %v667_v46, 5 }
  0x68   : > { %v1067_v50 = vld [vmem:[#allocation2 + $0x7c] sm:$0xff]  ;;  %v883_v53 = vsel %vm3222_vm5, %v878_v40, %v882_v28  ;;  %v674_v61 = vrot.slane %v672_v47, 4  ;;  %v677_v62 = vrot.slane %v675_v48, 5  ;;  %v683_v3 = vrot.slane %v681_v49, 5  ;;  %v2451_v4 = vld [vmem:[%s3196_s22 + $0x30] sm:$0xe] }
  0x69   : > { %v2999_v52 = vld [vmem:[#allocation2 + $0x5c] ss:$36 sps:$4 sm:$0xff]   ;;  %964 = vst [vmem:[#allocation2 + $0x64] sm:$0xf] %v883_v53  ;;  %v2526_v59 = vcombine.low %v1062_v45, %v1067_v50  ;;  %v897_v1 = vsel %vm3222_vm5, %v892_v56, %v896_v35  ;;  %v664_v2 = vor.u32 %v663_v57, %v660_v58  ;;  %v2452_v5 = vld [vmem:[%s3196_s22 + $0x34] sm:$0x1]  ;;  %2848 = vmatpush3.bf16.msra.mxu0 %v3462_v29 }
  0x6a   : > { %2020 = vmatprep.mubr.bf16.mxu0 %v2999_v52  ;;  %v2461_v6 = vrot.slane %v2449_v44, 9  ;;  %2874 = vmatpush3.bf16.msra.mxu1 %v3431_v51  ;;  %965 = vst [vmem:[#allocation2 + $0x88] sm:$0xf] %v897_v1  ;;  %v678_v7 = vor.u32 %v677_v62, %v674_v61  ;;  %v779_v8 = vrot.slane %v2450_v63, 5  ;;  %v2462_v9 = vrot.slane %v2451_v4, 9  ;;  %v3496_v51 = vld [vmem:[%s3689_s1 + $0x210] sm:$0xff]  }
  0x6b   : > { %2021 = vmatmul.mubr.bf16.gmra.mxu0 %v2526_v59  ;;  %v783_v10 = vrot.slane %v2452_v5, 5  ;;  %v2469_v11 = vld [vmem:[%s3196_s22 + $0x30] sm:$0xf]  ;;  %2867 = vmatprep.subr.bf16.mxu1 %v3457_v22  ;;  %v665_v12 = vrot.slane %v664_v2, 4  ;;  %v2470_v13 = vld [vmem:[%s3196_s22 + $0x38] sm:$0xf] }
  0x6c   : > { %822 = vst [vmem:[#allocation2 + $0xa8] sm:$0xf] %v2469_v11  ;;  %v2481_v14 = vld [vmem:[%s3196_s22 + $0x30] sm:$0xf]  ;;  %v679_v15 = vrot.slane %v678_v7, 4  ;;  %v780_v16 = vsel %vm3216_vm4, %v2461_v6, %v779_v8  ;;  %2849 = vmatprep.subr.bf16.mxu0 %v3481_v0  ;;  %v3528_v49 = vld [vmem:[%s3689_s1 + $0x200] sm:$0xff]  }
  0x6d   : > { %v784_v17 = vsel %vm3216_vm4, %v2462_v9, %v783_v10  ;;  %823 = vst [vmem:[#allocation2 + $0xcc] sm:$0xf] %v2470_v13  ;;  %v2482_v18 = vld [vmem:[%s3196_s22 + $0x34] sm:$0x1]  ;;  %v2483_v19 = vld [vmem:[%s3196_s22 + $0x38] sm:$0xf]  ;;  %v670_v21 = vsel %vm3222_vm5, %v665_v12, %v669_v60  ;;  %2850 = vmatpush3.bf16.msra.mxu0 %v3481_v0 }
  0x6e   : > { %v899_v20 = vshrl.u32 %v2481_v14, 16  ;;  %805 = vst [vmem:[#allocation2 + $0xa4] sm:$0xf] %v780_v16  ;;  %806 = vst [vmem:[#allocation2 + $0xc8] sm:$0xf] %v784_v17  ;;  %v902_v24 = vshll.u32 %v2481_v14, 16  ;;  %2875 = vmatpush3.bf16.msra.mxu1 %v3457_v22  ;;  %v684_v27 = vsel %vm3222_vm5, %v679_v15, %v683_v3  ;;  %2851 = vmatprep.subr.bf16.mxu0 %v3496_v51 }
  0x6f   : > { %v2484_v23 = vld [vmem:[%s3196_s22 + $0x3c] sm:$0x1]  ;;  %v908_v25 = vshll.u32 %v2482_v18, 16  ;;  %v913_v26 = vshrl.u32 %v2483_v19, 16  ;;  %725 = vst [vmem:[#allocation2 + $0xa0] sm:$0xf] %v670_v21  ;;  %2868 = vmatprep.subr.bf16.mxu1 %v3462_v29 }
  0x70   : > { %v901_v28 = vrot.slane %v899_v20, 4  ;;  %v916_v30 = vshll.u32 %v2483_v19, 16  ;;  %v922_v31 = vshll.u32 %v2484_v23, 16  ;;  %726 = vst [vmem:[#allocation2 + $0xc4] sm:$0xf] %v684_v27  ;;  %v904_v32 = vrot.slane %v902_v24, 5 }
  0x71   : > { %v915_v33 = vrot.slane %v913_v26, 4  ;;  %v3516_v22 = vld [vmem:[%s3689_s1 + $0x208] sm:$0xff]   ;;  %v910_v34 = vrot.slane %v908_v25, 5  ;;  %v3003_v37 = vld [vmem:[#allocation2 + $0x60] ss:$36 sps:$4 sm:$0xff]   ;;  %2852 = vmatpush3.bf16.msra.mxu0 %v3496_v51 }
  0x72   : > { %v918_v35 = vrot.slane %v916_v30, 5  ;;  %v3001_v36 = vld [vmem:[#allocation2 + $0x64] ss:$36 sps:$4 sm:$0xff]   ;;  %v905_v38 = vor.u32 %v904_v32, %v901_v28  ;;  %v924_v39 = vrot.slane %v922_v31, 5  ;;  %2876 = vmatpush3.bf16.msra.mxu1 %v3462_v29  ;;  %v2437_v41 = vld [vmem:[%s3196_s22 + $0x38] sm:$0xf]  ;;  %2853 = vmatprep.subr.bf16.mxu0 %v3516_v22 }
  0x73   : > { %v2438_v42 = vld [vmem:[%s3196_s22 + $0x3c] sm:$0x1]  ;;  %v2439_v43 = vld [vmem:[%s3196_s22 + $0x40] sm:$0xf]  ;;  %2085 = vmatprep.mubr.bf16.mxu1 %v3001_v36  ;;  %2869 = vmatprep.subr.bf16.mxu1 %v3481_v0  ;;  %v2440_v45 = vld [vmem:[%s3196_s22 + $0x44] sm:$0x1] }
  0x74   : > { %v919_v40 = vor.u32 %v918_v35, %v915_v33  ;;  %v906_v44 = vrot.slane %v905_v38, 4  ;;  %v686_v46 = vshrl.u32 %v2437_v41, 16  ;;  %v689_v47 = vshll.u32 %v2437_v41, 16  ;;  %2086 = vmatmul.mubr.bf16.gmra.mxu1 %v3003_v37  ;;  %v2453_v56 = vld [vmem:[%s3196_s22 + $0x38] sm:$0xe] }
  0x75   : > { %v695_v48 = vshll.u32 %v2438_v42, 16  ;;  %v700_v50 = vshrl.u32 %v2439_v43, 16  ;;  %v703_v52 = vshll.u32 %v2439_v43, 16  ;;  %v709_v53 = vshll.u32 %v2440_v45, 16  ;;  %v2454_v62 = vld [vmem:[%s3196_s22 + $0x3c] sm:$0x1]  ;;  %2854 = vmatpush3.bf16.msra.mxu0 %v3516_v22 }
  0x76   : > { %v920_v29 = vrot.slane %v919_v40, 4  ;;  %v1072_v58 = vld [vmem:[#allocation2 + $0xa0] sm:$0xff]  ;;  %v911_v57 = vsel %vm3222_vm5, %v906_v44, %v910_v34  ;;  %v688_v59 = vrot.slane %v686_v46, 4  ;;  %v691_v60 = vrot.slane %v689_v47, 5  ;;  %2877 = vmatpush3.bf16.msra.mxu1 %v3481_v0  ;;  %v2472_v15 = vld [vmem:[%s3196_s22 + $0x48] sm:$0xf]  ;;  %2855 = vmatprep.subr.bf16.mxu0 %v3528_v49 }
  0x77   : > { %v697_v61 = vrot.slane %v695_v48, 5  ;;  %v1077_v63 = vld [vmem:[#allocation2 + $0xc4] sm:$0xff]  ;;  %966 = vst [vmem:[#allocation2 + $0xac] sm:$0xf] %v911_v57  ;;  %v702_v3 = vrot.slane %v700_v50, 4  ;;  %v705_v4 = vrot.slane %v703_v52, 5  ;;  %2870 = vmatprep.subr.bf16.mxu1 %v3496_v51 }
  0x78   : > { %v3006_v1 = vld [vmem:[#allocation2 + $0xa4] ss:$36 sps:$4 sm:$0xff]   ;;  %v925_v2 = vsel %vm3222_vm5, %v920_v29, %v924_v39  ;;  %v711_v5 = vrot.slane %v709_v53, 5  ;;  %v2535_v6 = vcombine.low %v1072_v58, %v1077_v63  ;;  %v692_v7 = vor.u32 %v691_v60, %v688_v59  ;;  %v2455_v8 = vld [vmem:[%s3196_s22 + $0x40] sm:$0xe] }
  0x79   : > { %967 = vst [vmem:[#allocation2 + $0xd0] sm:$0xf] %v925_v2  ;;  %v2456_v9 = vld [vmem:[%s3196_s22 + $0x44] sm:$0x1]  ;;  %v2463_v10 = vrot.slane %v2453_v56, 9  ;;  %v787_v11 = vrot.slane %v2454_v62, 5  ;;  %2028 = vmatprep.mubr.bf16.mxu0 %v3006_v1  ;;  %v706_v12 = vor.u32 %v705_v4, %v702_v3  ;;  %2856 = vmatpush3.bf16.msra.mxu0 %v3528_v49 }
  0x7a   : > { %v2464_v13 = vrot.slane %v2455_v8, 9  ;;  %v791_v0 = vrot.slane %v2456_v9, 5  ;;  %v2471_v14 = vld [vmem:[%s3196_s22 + $0x40] sm:$0xf]  ;;  %2029 = vmatmul.mubr.bf16.gmra.mxu0 %v2535_v6  ;;  %v693_v16 = vrot.slane %v692_v7, 4  ;;  %2878 = vmatpush3.bf16.msra.mxu1 %v3496_v51 }
  0x7b   : > { %v788_v17 = vsel %vm3216_vm4, %v2463_v10, %v787_v11  ;;  %824 = vst [vmem:[#allocation2 + $0xf0] sm:$0xf] %v2471_v14  ;;  %825 = vst [vmem:[#allocation2 + $0x114] sm:$0xf] %v2472_v15  ;;  %v2485_v18 = vld [vmem:[%s3196_s22 + $0x40] sm:$0xf]  ;;  %2871 = vmatprep.subr.bf16.mxu1 %v3516_v22 }
  0x7c   : > { %v2486_v19 = vld [vmem:[%s3196_s22 + $0x44] sm:$0x1]  ;;  %v707_v20 = vrot.slane %v706_v12, 4  ;;  %v792_v21 = vsel %vm3216_vm4, %v2464_v13, %v791_v0  ;;  %807 = vst [vmem:[#allocation2 + $0xec] sm:$0xf] %v788_v17  ;;  %v927_v25 = vshrl.u32 %v2485_v18, 16  ;;  %v698_v26 = vsel %vm3222_vm5, %v693_v16, %v697_v61 }
  0x7d   : > { %v2487_v23 = vld [vmem:[%s3196_s22 + $0x48] sm:$0xf]  ;;  %v2488_v24 = vld [vmem:[%s3196_s22 + $0x4c] sm:$0x1]  ;;  %808 = vst [vmem:[#allocation2 + $0x110] sm:$0xf] %v792_v21 }
  0x7e   : > { %v930_v27 = vshll.u32 %v2485_v18, 16  ;;  %v936_v28 = vshll.u32 %v2486_v19, 16  ;;  %v941_v30 = vshrl.u32 %v2487_v23, 16  ;;  %v712_v51 = vsel %vm3222_vm5, %v707_v20, %v711_v5  ;;  %727 = vst [vmem:[#allocation2 + $0xe8] sm:$0xf] %v698_v26  ;;  %2879 = vmatpush3.bf16.msra.mxu1 %v3516_v22 }
  0x7f   : > { %v929_v31 = vrot.slane %v927_v25, 4  ;;  %v944_v32 = vshll.u32 %v2487_v23, 16  ;;  %v950_v33 = vshll.u32 %v2488_v24, 16  ;;  %728 = vst [vmem:[#allocation2 + $0x10c] sm:$0xf] %v712_v51  ;;  %2872 = vmatprep.subr.bf16.mxu1 %v3528_v49 }
  0x80   : > { %v932_v34 = vrot.slane %v930_v27, 5  ;;  %v943_v35 = vrot.slane %v941_v30, 4  ;;  %v3008_v36 = vld [vmem:[#allocation2 + $0xac] ss:$36 sps:$4 sm:$0xff]   ;;  %v938_v40 = vrot.slane %v936_v28, 5 }
  0x81   : > { %v3010_v37 = vld [vmem:[#allocation2 + $0xa8] ss:$36 sps:$4 sm:$0xff]   ;;  %v946_v38 = vrot.slane %v944_v32, 5  ;;  %v952_v41 = vrot.slane %v950_v33, 5  ;;  %v2489_v42 = vld [vmem:[%s3196_s22 + $0x10] sm:$0xe]  ;;  %2093 = vmatprep.mubr.bf16.mxu1 %v3008_v36 }
  0x82   : > { %v933_v39 = vor.u32 %v932_v34, %v929_v31  ;;  %v2490_v44 = vld [vmem:[%s3196_s22 + $0x14] sm:$0x1]  ;;  %v2491_v45 = vld [vmem:[%s3196_s22 + $0x18] sm:$0xe]  ;;  %v2492_v46 = vld [vmem:[%s3196_s22 + $0x1c] sm:$0x1]  ;;  %2094 = vmatmul.mubr.bf16.gmra.mxu1 %v3010_v37 }
  0x83   : > { %v947_v43 = vor.u32 %v946_v38, %v943_v35  ;;  %v2505_v48 = vrot.slane %v2489_v42, 9  ;;  %v1004_v29 = vrot.slane %v2490_v44, 5  ;;  %v2506_v22 = vrot.slane %v2491_v45, 9  ;;  %v2497_v50 = vld [vmem:[%s3196_s22 + $0x30] sm:$0xe]  ;;  %2880 = vmatpush3.bf16.msra.mxu1 %v3528_v49 }
  0x84   : > { %v934_v47 = vrot.slane %v933_v39, 4  ;;  %v1008_v53 = vrot.slane %v2492_v46, 5  ;;  %v2498_v56 = vld [vmem:[%s3196_s22 + $0x34] sm:$0x1]  ;;  %v2499_v58 = vld [vmem:[%s3196_s22 + $0x38] sm:$0xe] }
  0x85   : > { %v948_v52 = vrot.slane %v947_v43, 4  ;;  %v1082_v57 = vld [vmem:[#allocation2 + $0xe8] sm:$0xff]  ;;  %v1005_v60 = vsel %vm3216_vm4, %v2505_v48, %v1004_v29  ;;  %v2500_v61 = vld [vmem:[%s3196_s22 + $0x3c] sm:$0x1]  ;;  %v2509_v62 = vrot.slane %v2497_v50, 9  ;;  %v1020_v63 = vrot.slane %v2498_v56, 5 }
  0x86   : > { %v939_v59 = vsel %vm3222_vm5, %v934_v47, %v938_v40  ;;  %v1087_v1 = vld [vmem:[#allocation2 + $0x10c] sm:$0xff]  ;;  %v1009_v3 = vsel %vm3216_vm4, %v2506_v22, %v1008_v53  ;;  %1042 = vst [vmem:[#allocation2 + $0x20] sm:$0xf] %v1005_v60  ;;  %v2510_v4 = vrot.slane %v2499_v58, 9  ;;  %v1024_v5 = vrot.slane %v2500_v61, 5 }
  0x87   : > { %v3013_v2 = vld [vmem:[#allocation2 + $0xec] ss:$36 sps:$4 sm:$0xff]   ;;  %v953_v49 = vsel %vm3222_vm5, %v948_v52, %v952_v41  ;;  %968 = vst [vmem:[#allocation2 + $0xf4] sm:$0xf] %v939_v59  ;;  %v2544_v6 = vcombine.low %v1082_v57, %v1087_v1  ;;  %1043 = vst [vmem:[#allocation2 + $0x44] sm:$0xf] %v1009_v3  ;;  %v1021_v7 = vsel %vm3216_vm4, %v2509_v62, %v1020_v63 }
  0x88   : > { %969 = vst [vmem:[#allocation2 + $0x118] sm:$0xf] %v953_v49  ;;  %v2493_v8 = vld [vmem:[%s3196_s22 + $0x20] sm:$0xe]  ;;  %v2494_v55 = vld [vmem:[%s3196_s22 + $0x24] sm:$0x1]  ;;  %2036 = vmatprep.mubr.bf16.mxu0 %v3013_v2  ;;  %v1025_v10 = vsel %vm3216_vm4, %v2510_v4, %v1024_v5 }
  0x89   : > { %v2495_v9 = vld [vmem:[%s3196_s22 + $0x28] sm:$0xe]  ;;  %1046 = vst [vmem:[#allocation2 + $0xb0] sm:$0xf] %v1021_v7  ;;  %v2496_v11 = vld [vmem:[%s3196_s22 + $0x2c] sm:$0x1]  ;;  %2037 = vmatmul.mubr.bf16.gmra.mxu0 %v2544_v6 }
  0x8a   : > { %v2507_v12 = vrot.slane %v2493_v8, 9  ;;  %v1012_v13 = vrot.slane %v2494_v55, 5  ;;  %v2508_v0 = vrot.slane %v2495_v9, 9  ;;  %1047 = vst [vmem:[#allocation2 + $0xd4] sm:$0xf] %v1025_v10  ;;  %v1016_v14 = vrot.slane %v2496_v11, 5 }
  0x8b   : > { %v2501_v15 = vld [vmem:[%s3196_s22 + $0x40] sm:$0xe]  ;;  %v2502_v16 = vld [vmem:[%s3196_s22 + $0x44] sm:$0x1]  ;;  %v2503_v18 = vld [vmem:[%s3196_s22 + $0x48] sm:$0xe] }
  0x8c   : > { %v1013_v17 = vsel %vm3216_vm4, %v2507_v12, %v1012_v13  ;;  %v2504_v19 = vld [vmem:[%s3196_s22 + $0x4c] sm:$0x1]  ;;  %v2511_v20 = vrot.slane %v2501_v15, 9  ;;  %v1028_v21 = vrot.slane %v2502_v16, 5  ;;  %v1017_v23 = vsel %vm3216_vm4, %v2508_v0, %v1016_v14  ;;  %v3017_v30 = vld [vmem:[#allocation2 + $0xf0] ss:$36 sps:$4 sm:$0xff]  }
  0x8d   : > { %1044 = vst [vmem:[#allocation2 + $0x68] sm:$0xf] %v1013_v17  ;;  %v2512_v24 = vrot.slane %v2503_v18, 9  ;;  %v1032_v25 = vrot.slane %v2504_v19, 5  ;;  %1045 = vst [vmem:[#allocation2 + $0x8c] sm:$0xf] %v1017_v23 }
  0x8e   : > { %v1029_v26 = vsel %vm3216_vm4, %v2511_v20, %v1028_v21  ;;  %v3020_v51 = vld [vmem:[#allocation2 + $0x20] ss:$36 sps:$4 sm:$0xff]   ;;  %s2625_s22 = sshll.u32 %s3719_s18, 5 }
  0x8f   : > { %v1033_v27 = vsel %vm3216_vm4, %v2512_v24, %v1032_v25  ;;  %1048 = vst [vmem:[#allocation2 + $0xf8] sm:$0xf] %v1029_v26  ;;  %v3015_v28 = vld [vmem:[#allocation2 + $0xf4] ss:$36 sps:$4 sm:$0xff]   ;;  %2857 = vmatprep.mubr.bf16.mxu0 %v3020_v51  ;;  %s3648_s8 = scalar_lea.vmem %s3692_s4, %s2625_s22  ;;  %s320_s11 = scalar_lea.vmem %s3693_s5, %s2625_s22 }
  0x90   : > { %1049 = vst [vmem:[#allocation2 + $0x11c] sm:$0xf] %v1033_v27  ;;  %2101 = vmatprep.mubr.bf16.mxu1 %v3015_v28 }
  0x91   : > { %v3021_v31 = vld [vmem:[#allocation2 + $0xb0] ss:$36 sps:$4 sm:$0xff]   ;;  %2102 = vmatmul.mubr.bf16.gmra.mxu1 %v3017_v30 }
  0x92   : > { %2861 = vmatprep.mubr.bf16.mxu1 %v3021_v31 }
  0x94   : > { %v3022_v32 = vld [vmem:[#allocation2 + $0x68] ss:$36 sps:$4 sm:$0xff]  }
  0x95   : > { %2858 = vmatmul.mubr.bf16.vlgmr.msra.gmra.mxu0 %v3022_v32 }
  0x97   : > { %v3023_v33 = vld [vmem:[#allocation2 + $0xf8] ss:$36 sps:$4 sm:$0xff]  }
  0x99   : > { %2862 = vmatmul.mubr.bf16.vlgmr.msra.gmra.mxu1 %v3023_v33 }
  0xee   : > { %v2685_v34 = vpop.f32.mrf.mxu0 }
  0xef   : > { %v2725_v36 = vpop.f32.mrf.mxu1 }
  0xf0   : > { %v2686_v35 = vpop.f32.mrf.mxu0 }
  0xf1   : > { %v2726_v54 = vpop.f32.mrf.mxu1  ;;  %v2687_v51 = vadd.f32 %v2686_v35, %v2685_v34 }
  0xf2   : > { %v3600_v37 = vpop.f32.mrf.mxu0  ;;  %v2727_v28 = vadd.f32 %v2726_v54, %v2725_v36 }
  0xf3   : > { %v3604_v39 = vpop.f32.mrf.mxu1 }
  0xf4   : > { %v3602_v38 = vpop.f32.mrf.mxu0  ;;  %v1950_v34 = vadd.f32 %v2727_v28, %v2687_v51 }
  0xf5   : > { %v3606_v41 = vpop.f32.mrf.mxu1 }
  0xf6   : > { %3698 = vst [vmem:[#allocation3_spill] sm:$0xff] %v3606_v41 }
  0xf7   : > { %v2731_v43 = vpop.f32.mrf.mxu1 }
  0xf9   : > { %v2732_v45 = vpop.f32.mrf.mxu1 }
  0xfa   : > { %v2733_v27 = vadd.f32 %v2732_v45, %v2731_v43 }
  0xfb   : > { %v2734_v47 = vpop.f32.mrf.mxu1 }
  0xfd   : > { %v2735_v29 = vpop.f32.mrf.mxu1 }
  0xff   : > { %v2691_v40 = vpop.f32.mrf.mxu0 }
 0x101   : > { %v2692_v42 = vpop.f32.mrf.mxu0 }
 0x102   : > { %v2693_v26 = vadd.f32 %v2692_v42, %v2691_v40  ;;  %v3706_v40 = vld [vmem:[#allocation3_spill] sm:$0xff] }
 0x103   : > { %v2694_v44 = vpop.f32.mrf.mxu0  ;;  %v2737_v50 = vpop.f32.mrf.mxu1  ;;  %v2730_v42 = vadd.f32 %v3706_v40, %v3604_v39 }
 0x105   : > { %v2695_v46 = vpop.f32.mrf.mxu0  ;;  %v2738_v53 = vpop.f32.mrf.mxu1 }
 0x106   : > { %v2739_v54 = vadd.f32 %v2738_v53, %v2737_v50 }
 0x107   : > { %v2697_v48 = vpop.f32.mrf.mxu0  ;;  %v3612_v58 = vpop.f32.mrf.mxu1 }
 0x108   : > { %3701 = vst [vmem:[#allocation6_spill] sm:$0xff] %v3612_v58  ;;  %v1958_v58 = vadd.f32 %v2733_v27, %v2693_v26 }
 0x109   : > { %v2698_v22 = vpop.f32.mrf.mxu0  ;;  %v3614_v59 = vpop.f32.mrf.mxu1 }
 0x10a   : > { %3702 = vst [vmem:[#allocation7_spill] sm:$0xff] %v3614_v59  ;;  %v2699_v36 = vadd.f32 %v2698_v22, %v2697_v48 }
 0x10b   : > { %v3608_v52 = vpop.f32.mrf.mxu0 }
 0x10c   : > { %3699 = vst [vmem:[#allocation4_spill] sm:$0xff] %v3608_v52 }
 0x10d   : > { %v3610_v56 = vpop.f32.mrf.mxu0 }
 0x10e   : > { %3700 = vst [vmem:[#allocation5_spill] sm:$0xff] %v3610_v56  ;;  %v2743_v61 = vpop.f32.mrf.mxu1  ;;  %v2696_v56 = vadd.f32 %v2695_v46, %v2694_v44 }
 0x110   : > { %v2744_v63 = vpop.f32.mrf.mxu1 }
 0x111   : > { %v2745_v32 = vadd.f32 %v2744_v63, %v2743_v61 }
 0x112   : > { %v2703_v57 = vpop.f32.mrf.mxu0  ;;  %v2746_v2 = vpop.f32.mrf.mxu1 }
 0x114   : > { %v2704_v60 = vpop.f32.mrf.mxu0  ;;  %v2747_v4 = vpop.f32.mrf.mxu1 }
 0x115   : > { %v2705_v31 = vadd.f32 %v2704_v60, %v2703_v57  ;;  %v2748_v57 = vadd.f32 %v2747_v4, %v2746_v2  ;;  %v3710_v2 = vld [vmem:[#allocation7_spill] sm:$0xff] }
 0x116   : > { %v2706_v62 = vpop.f32.mrf.mxu0 }
 0x117   : > { %v1974_v35 = vadd.f32 %v2745_v32, %v2705_v31 }
 0x118   : > { %v2707_v1 = vpop.f32.mrf.mxu0 }
 0x11c   : > { %v2765_v49 = vpop.f32.mrf.mxu0 }
 0x11e   : > { %v2766_v3 = vpop.f32.mrf.mxu0 }
 0x11f   : > { %v2767_v52 = vadd.f32 %v2766_v3, %v2765_v49 }
 0x120   : > { %v2768_v5 = vpop.f32.mrf.mxu0 }
 0x121   : > { %v2015_v46 = vadd.f32 %v2767_v52, %v1950_v34 }
 0x122   : > { %v2769_v7 = vpop.f32.mrf.mxu0 }
 0x123   : > { %v2770_v3 = vadd.f32 %v2769_v7, %v2768_v5 }
 0x125   : > { %v2805_v6 = vpop.f32.mrf.mxu1 }
 0x127   : > { %v2806_v8 = vpop.f32.mrf.mxu1 }
 0x128   : > { %v2807_v22 = vadd.f32 %v2806_v8, %v2805_v6 }
 0x129   : > { %v3616_v9 = vpop.f32.mrf.mxu1 }
 0x12a   : > { %3703 = vst [vmem:[#allocation8_spill] sm:$0xff] %v3616_v9  ;;  %v2080_v8 = vadd.f32 %v2807_v22, %v2015_v46 }
 0x12b   : > { %v2771_v55 = vpop.f32.mrf.mxu0  ;;  %v3618_v11 = vpop.f32.mrf.mxu1 }
 0x12c   : > { %3704 = vst [vmem:[#allocation9_spill] sm:$0xff] %v3618_v11  ;;  %v2736_v11 = vadd.f32 %v2735_v29, %v2734_v47  ;;  %v2708_v29 = vadd.f32 %v2707_v1, %v2706_v62  ;;  %v3709_v1 = vld [vmem:[#allocation6_spill] sm:$0xff] }
 0x12d   : > { %v2772_v10 = vpop.f32.mrf.mxu0  ;;  %v2742_v4 = vadd.f32 %v3710_v2, %v3709_v1 }
 0x12e   : > { %v2773_v33 = vadd.f32 %v2772_v10, %v2771_v55  ;;  %v1961_v44 = vadd.f32 %v2736_v11, %v2696_v56  ;;  %v3707_v55 = vld [vmem:[#allocation4_spill] sm:$0xff]  ;;  %v3708_v10 = vld [vmem:[#allocation5_spill] sm:$0xff]  ;;  %v1977_v56 = vadd.f32 %v2748_v57, %v2708_v29 }
 0x12f   : > { %v2774_v12 = vpop.f32.mrf.mxu0  ;;  %v2702_v62 = vadd.f32 %v3708_v10, %v3707_v55 }
 0x130   : > { %v2023_v43 = vadd.f32 %v2773_v33, %v1958_v58 }
 0x131   : > { %v2775_v0 = vpop.f32.mrf.mxu0 }
 0x132   : > { %v2776_v45 = vadd.f32 %v2775_v0, %v2774_v12 }
 0x134   : > { %v2811_v13 = vpop.f32.mrf.mxu1  ;;  %v2026_v50 = vadd.f32 %v2776_v45, %v1961_v44 }
 0x136   : > { %v2812_v14 = vpop.f32.mrf.mxu1 }
 0x137   : > { %v2813_v63 = vadd.f32 %v2812_v14, %v2811_v13 }
 0x138   : > { %v2814_v15 = vpop.f32.mrf.mxu1 }
 0x139   : > { %v2088_v58 = vadd.f32 %v2813_v63, %v2023_v43 }
 0x13a   : > { %v2777_v16 = vpop.f32.mrf.mxu0  ;;  %v2815_v18 = vpop.f32.mrf.mxu1 }
 0x13b   : > { %v2816_v5 = vadd.f32 %v2815_v18, %v2814_v15 }
 0x13c   : > { %v2778_v17 = vpop.f32.mrf.mxu0 }
 0x13d   : > { %v2779_v60 = vadd.f32 %v2778_v17, %v2777_v16  ;;  %v3641_v17 = vld [vmem:[%s3691_s3] ss:$0 sm:$0xff] }
 0x13e   : > { %v2780_v19 = vpop.f32.mrf.mxu0 }
 0x140   : > { %v2781_v23 = vpop.f32.mrf.mxu0 }
 0x141   : > { %v2782_v0 = vadd.f32 %v2781_v23, %v2780_v19  ;;  %v1969_v19 = vadd.f32 %v2742_v4, %v2702_v62  ;;  %v3712_v23 = vld [vmem:[#allocation9_spill] sm:$0xff]  ;;  %v2665_v62 = vld [vmem:[%s3648_s8 + $0x18] sm:$0xff]  }
 0x142   : > { %v2817_v20 = vpop.f32.mrf.mxu1 }
 0x143   : > { %v2034_v40 = vadd.f32 %v2782_v0, %v1969_v19 }
 0x144   : > { %v2818_v21 = vpop.f32.mrf.mxu1 }
 0x145   : > { %v2819_v13 = vadd.f32 %v2818_v21, %v2817_v20  ;;  %v2091_v20 = vadd.f32 %v2816_v5, %v2026_v50  ;;  %v3711_v21 = vld [vmem:[#allocation8_spill] sm:$0xff] }
 0x146   : > { %v3620_v24 = vpop.f32.mrf.mxu1 }
 0x147   : > { %3705 = vst [vmem:[#allocation10_spill] sm:$0xff] %v3620_v24  ;;  %v2690_v24 = vadd.f32 %v3602_v38, %v3600_v37  ;;  %v1966_v38 = vadd.f32 %v2739_v54, %v2699_v36 }
 0x148   : > { %v3622_v9 = vpop.f32.mrf.mxu1 }
 0x149   : > { %v2783_v25 = vpop.f32.mrf.mxu0  ;;  %v1953_v37 = vadd.f32 %v2730_v42, %v2690_v24  ;;  %v2031_v52 = vadd.f32 %v2779_v60, %v1966_v38  ;;  %v2663_v42 = vld [vmem:[%s3648_s8 + $0x8] sm:$0xff]  }
 0x14a   : > { %v2633_v63 = vunpack.c.l.bf16 %v2663_v42  ;;  %v2634_v10 = vunpack.c.h.bf16 %v2663_v42 }
 0x14b   : > { %v2784_v30 = vpop.f32.mrf.mxu0  ;;  %v2018_v12 = vadd.f32 %v2770_v3, %v1953_v37  ;;  %v2096_v28 = vadd.f32 %v2819_v13, %v2031_v52  ;;  %v2628_v3 = vld [vmem:[%s3648_s8] sm:$0xff]  }
 0x14c   : > { %v2785_v41 = vadd.f32 %v2784_v30, %v2783_v25  ;;  %v2810_v25 = vadd.f32 %v3712_v23, %v3711_v21  ;;  %v2630_v5 = vunpack.c.h.bf16 %v2628_v3 }
 0x14d   : > { %v2786_v59 = vpop.f32.mrf.mxu0 }
 0x14e   : > { %v2039_v49 = vadd.f32 %v2785_v41, %v1974_v35  ;;  %v2083_v34 = vadd.f32 %v2810_v25, %v2018_v12  ;;  %v3713_v57 = vld [vmem:[#allocation10_spill] sm:$0xff] }
 0x14f   : > { %v2787_v47 = vpop.f32.mrf.mxu0  ;;  %v2822_v60 = vadd.f32 %v3622_v9, %v3713_v57 }
 0x150   : > { %v2788_v48 = vadd.f32 %v2787_v47, %v2786_v59  ;;  %v3636_v59 = vld [vmem:[%s3690_s2] ss:$0 sm:$0xff] }
 0x151   : > { %v2823_v61 = vpop.f32.mrf.mxu1  ;;  %v2099_v50 = vadd.f32 %v2822_v60, %v2034_v40 }
 0x152   : > { %v2042_v14 = vadd.f32 %v2788_v48, %v1977_v56 }
 0x153   : > { %v2824_v39 = vpop.f32.mrf.mxu1 }
 0x154   : > { %v2825_v53 = vadd.f32 %v2824_v39, %v2823_v61 }
 0x155   : > { %v2826_v11 = vpop.f32.mrf.mxu1  ;;  %v2859_v41 = vpop.f32.mrf.mxu0 }
 0x156   : > { %v2153_v6 = vadd.f32 %v2859_v41, %v2088_v58  ;;  %v2104_v7 = vadd.f32 %v2825_v53, %v2039_v49 }
 0x157   : > { %v2827_v16 = vpop.f32.mrf.mxu1  ;;  %v2144_v24 = vpop.f32.mrf.mxu0 }
 0x158   : > { %v2184_v15 = vmul.f32 %v3636_v59, %v2153_v6  ;;  %v2145_v18 = vadd.f32 %v2144_v24, %v2080_v8  ;;  %v2828_v26 = vadd.f32 %v2827_v16, %v2826_v11  ;;  %v2629_v11 = vunpack.c.l.bf16 %v2628_v3  ;;  %v2664_v6 = vld [vmem:[%s3648_s8 + $0x10] sm:$0xff]  }
 0x159   : > { %v2863_v27 = vpop.f32.mrf.mxu1  ;;  %v2860_v30 = vpop.f32.mrf.mxu0  ;;  %v2641_v16 = vunpack.c.l.bf16 %v2665_v62  ;;  %v2642_v24 = vunpack.c.h.bf16 %v2665_v62  ;;  %v2637_v25 = vunpack.c.l.bf16 %v2664_v6 }
 0x15a   : > { %v2199_v51 = vadd.f32 %v3641_v17, %v2184_v15  ;;  %v2169_v31 = vadd.f32 %v2863_v27, %v2104_v7  ;;  %v2182_v32 = vmul.f32 %v3636_v59, %v2145_v18  ;;  %v2156_v33 = vadd.f32 %v2860_v30, %v2091_v20 }
 0x15b   : > { %v2160_v36 = vpop.f32.mrf.mxu1  ;;  %v2107_v54 = vadd.f32 %v2828_v26, %v2042_v14  ;;  %v2147_v35 = vpop.f32.mrf.mxu0  ;;  %v2638_v26 = vunpack.c.h.bf16 %v2664_v6 }
 0x15c   : > { %v2207_v43 = vmul.f32 0.01, %v2199_v51  ;;  %v2188_v45 = vmul.f32 %v3636_v59, %v2169_v31  ;;  %v2197_v47 = vadd.f32 %v3641_v17, %v2182_v32  ;;  %v2161_v29 = vadd.f32 %v2160_v36, %v2096_v28 }
 0x15d   : > { %v2185_v61 = vmul.f32 %v3636_v59, %v2156_v33  ;;  %v2864_v44 = vpop.f32.mrf.mxu1  ;;  %v2148_v46 = vadd.f32 %v2147_v35, %v2083_v34 }
 0x15e   : > { %v2203_v49 = vadd.f32 %v3641_v17, %v2188_v45  ;;  %v2205_v37 = vmul.f32 0.01, %v2197_v47  ;;  %v2186_v38 = vmul.f32 %v3636_v59, %v2161_v29  ;;  %v2172_v48 = vadd.f32 %v2864_v44, %v2107_v54 }
 0x15f   : > { %v2200_v39 = vadd.f32 %v3641_v17, %v2185_v61  ;;  %v2183_v22 = vmul.f32 %v3636_v59, %v2148_v46  ;;  %v2163_v9 = vpop.f32.mrf.mxu1  ;;  %v2215_v53 = vmax.f32 %v2199_v51, %v2207_v43 }
 0x160   : > { %v2211_v58 = vmul.f32 0.01, %v2203_v49  ;;  %v2201_v55 = vadd.f32 %v3641_v17, %v2186_v38  ;;  %v2189_v2 = vmul.f32 %v3636_v59, %v2172_v48  ;;  %v2164_v56 = vadd.f32 %v2163_v9, %v2099_v50 }
 0x161   : > { %v2208_v1 = vmul.f32 0.01, %v2200_v39  ;;  %v2198_v4 = vadd.f32 %v3641_v17, %v2183_v22  ;;  %v2213_v52 = vmax.f32 %v2197_v47, %v2205_v37  ;;  %v2239_v0 = vadd.f32 %v2633_v63, %v2215_v53 }
 0x162   : > { %v2209_v41 = vmul.f32 0.01, %v2201_v55  ;;  %v2204_v8 = vadd.f32 %v3641_v17, %v2189_v2  ;;  %v2187_v13 = vmul.f32 %v3636_v59, %v2164_v56  ;;  %v2219_v14 = vmax.f32 %v2203_v49, %v2211_v58 }
 0x163   : > { %v2216_v7 = vmax.f32 %v2200_v39, %v2208_v1  ;;  %v2206_v12 = vmul.f32 0.01, %v2198_v4  ;;  %v2237_v21 = vadd.f32 %v2629_v11, %v2213_v52 }
 0x164   : > { %v2212_v18 = vmul.f32 0.01, %v2204_v8  ;;  %v2202_v19 = vadd.f32 %v3641_v17, %v2187_v13  ;;  %v2217_v23 = vmax.f32 %v2201_v55, %v2209_v41  ;;  %v2243_v51 = vadd.f32 %v2641_v16, %v2219_v14 }
 0x165   : > { %v2240_v15 = vadd.f32 %v2634_v10, %v2216_v7  ;;  %v2214_v20 = vmax.f32 %v2198_v4, %v2206_v12 }
 0x166   : > { %v2220_v59 = vmax.f32 %v2204_v8, %v2212_v18  ;;  %v2210_v30 = vmul.f32 0.01, %v2202_v19  ;;  %v2241_v40 = vadd.f32 %v2637_v25, %v2217_v23 }
 0x167   : > { %v2651_v27 = vpack.c.bf16 %v2240_v15, %v2239_v0  ;;  %v2238_v28 = vadd.f32 %v2630_v5, %v2214_v20 }
 0x168   : > { %v2244_v31 = vadd.f32 %v2642_v24, %v2220_v59  ;;  %v2218_v33 = vmax.f32 %v2202_v19, %v2210_v30 }
 0x169   : > { %2666 = vst [vmem:[%s320_s11 + $0x8] sm:$0xff] %v2651_v27   ;;  %v2646_v32 = vpack.c.bf16 %v2238_v28, %v2237_v21 }
 0x16a   : > { %v2661_v17 = vpack.c.bf16 %v2244_v31, %v2243_v51  ;;  %v2242_v42 = vadd.f32 %v2638_v26, %v2218_v33 }
 0x16b   : > { %2647 = vst [vmem:[%s320_s11] sm:$0xff] %v2646_v32  }
 0x16c   : > { %2668 = vst [vmem:[%s320_s11 + $0x18] sm:$0xff] %v2661_v17   ;;  %v2656_v36 = vpack.c.bf16 %v2242_v42, %v2241_v40 }
 0x16e   : > { %2667 = vst [vmem:[%s320_s11 + $0x10] sm:$0xff] %v2656_v36  }
 0x16f PF: > { %s15_s20 = sadd.s32 1, %s3046_s20   ;;  %s3714_s18 = smov %s3042_s19 }
 0x170   : > { %p12_p5 = scmp.ge.s32.totalorder %s15_s20, 4   ;;  %s3715_s19 = smov %s3717_s21 }
 0x172   :  { %14 = sbr.rel (!%p12_p5) target bundleno = 2 (0x2), region = 84 }

// kernel: forward.14
= control target key start
LH: loop header
LB: loop body
LE: loop exit
PB: predicated region body
PF: predicated region fallthrough
CT: control target
= control target key end

     0   :  { %s690_s15 = smov 0   ;;  %s692_s16 = smov 0   ;;  %s760_s0 = inlined_call_operand.vmem [shape: bf16[2,1,4,4,128], index: 0, kind: input, shape index: {}]   ;;  %s761_s1 = inlined_call_operand.vmem [shape: bf16[128,128], index: 1, kind: input, shape index: {}]   ;;  %s762_s2 = inlined_call_operand.vmem [shape: f32[1,128], index: 2, kind: input, shape index: {}]   ;;  %s763_s3 = inlined_call_operand.vmem [shape: f32[1,128], index: 3, kind: input, shape index: {}]   ;;  %s764_s4 = inlined_call_operand.vmem [shape: bf16[2,4,4,128], index: 4, kind: output, shape index: {}]  }
   0x1   :  { %s694_s17 = smov 0  }
   0x2 LB: > { %s26_s18 = sadd.s32 1, %s656_s16  ;;  %p555_p0 = scmp.ge.s32.totalorder %s660_s17, 1  ;;  %s660_s17 = sphi %s694_s17, %s14_s17   ;;  %s656_s16 = sphi %s692_s16, %s766_s16   ;;  %s652_s15 = sphi %s690_s15, %s765_s15  }
   0x3   : > { %p28_p1 = scmp.ge.s32.totalorder %s26_s18, 2  ;;  %p201_p2 = scmp.lt.s32.totalorder %s660_s17, 3 }
   0x5   : > { %s768_s18 = smov (%p28_p1, %s26_s18), 0  ;;  %p202_p3 = pnand %p555_p0, %p201_p2 }
   0x6   : > { %p240_p4 = scmp.lt.s32.totalorder (!%p202_p3), %s652_s15, 1 }
   0x7   : > { %205 = sbr.rel (%p202_p3) target bundleno = 255 (0xff), region = 36 }
   0xc   : > { %v630_v0 = vld [vmem:[%s761_s1 + $0x38] sm:$0xff]   ;;  %v662_v1 = vmov 0.0   ;;  %v631_v2 = vld [vmem:[%s761_s1 + $0x30] sm:$0xff]   ;;  %vm663_vm0 = vmmov 0   ;;  %v632_v3 = vld [vmem:[%s761_s1 + $0x28] sm:$0xff]   ;;  %s770_s15 = smov (!%p240_p4, %s652_s15), 1  ;;  %v293_v7 = vlaneseq }
   0xd   : > { %583 = vmatprep.subr.bf16.mxu0 %v662_v1  ;;  %599 = vmatprep.mubr.msk.bf16.mxu0 %vm663_vm0, %v662_v1  ;;  %v633_v4 = vld [vmem:[%s761_s1 + $0x20] sm:$0xff]   ;;  %s572_s27 = sshll.u32 %s770_s15, 3  ;;  %v664_v5 = vmov 1983009808   ;;  %v634_v8 = vld [vmem:[%s761_s1 + $0x18] sm:$0xff]   ;;  %v635_v9 = vld [vmem:[%s761_s1 + $0x10] sm:$0xff]  }
   0xe   : > { %584 = vmatpush3.bf16.msra.mxu0 %v630_v0  ;;  %v291_v6 = vunpack.c.l.s4 %v664_v5  ;;  %s244_s6 = scalar_lea.vmem %s760_s0, %s572_s27  ;;  %v294_v12 = vshrl.u32 %v293_v7, 7  ;;  %v636_v19 = vld [vmem:[%s761_s1 + $0x8] sm:$0xff]   ;;  %v637_v22 = vld [vmem:[%s761_s1] sm:$0xff]   ;;  %s262_s23 = scalar_lea.vmem %s764_s4, %s572_s27 }
   0xf   : > { %585 = vmatprep.subr.bf16.mxu0 %v662_v1  ;;  %v264_v10 = vld [vmem:[%s244_s6] sm:$0x3]  ;;  %v265_v13 = vld [vmem:[%s244_s6 + $0x2] sm:$0x3]  ;;  %v266_v14 = vld [vmem:[%s244_s6 + $0x4] sm:$0x3] }
  0x10   : > { %v292_v11 = vunpack.c.0.s8 %v291_v6  ;;  %v267_v15 = vld [vmem:[%s244_s6 + $0x6] sm:$0x3]  ;;  %v288_v16 = vcombine.low %v264_v10, %v265_v13  ;;  %v568_v24 = vld [vmem:[%s762_s2] ss:$0 sm:$0xff] }
  0x11   : > { %v289_v17 = vcombine.low %v266_v14, %v267_v15  ;;  %v569_v26 = vld [vmem:[%s763_s3] ss:$0 sm:$0xff] }
  0x12   : > { %586 = vmatpush3.bf16.msra.mxu0 %v631_v2  ;;  %v295_v18 = vsub.s32 %v292_v11, %v294_v12 }
  0x13   : > { %587 = vmatprep.subr.bf16.mxu0 %v662_v1 }
  0x14   : > { %v296_v20 = vrot.slane %v288_v16, %v295_v18  ;;  %v303_v21 = vrot.slane %v289_v17, %v295_v18 }
  0x16   : > { %588 = vmatpush3.bf16.msra.mxu0 %v632_v3  ;;  %v304_v23 = vcombine.low %v296_v20, %v303_v21 }
  0x17   : > { %589 = vmatprep.subr.bf16.mxu0 %v662_v1 }
  0x1a   : > { %590 = vmatpush3.bf16.msra.mxu0 %v633_v4 }
  0x1b   : > { %591 = vmatprep.subr.bf16.mxu0 %v662_v1 }
  0x1e   : > { %592 = vmatpush3.bf16.msra.mxu0 %v634_v8 }
  0x1f   : > { %593 = vmatprep.subr.bf16.mxu0 %v662_v1 }
  0x22   : > { %594 = vmatpush3.bf16.msra.mxu0 %v635_v9 }
  0x23   : > { %595 = vmatprep.subr.bf16.mxu0 %v662_v1 }
  0x26   : > { %596 = vmatpush3.bf16.msra.mxu0 %v636_v19 }
  0x27   : > { %597 = vmatprep.subr.bf16.mxu0 %v662_v1 }
  0x2a   : > { %598 = vmatpush3.bf16.msra.mxu0 %v637_v22 }
  0x2d   : > { %600 = vmatmul.mubr.bf16.vlgmr.msra.gmra.mxu0 %v304_v23 }
  0xed   : > { %v388_v25 = vpop.f32.mrf.mxu0 }
  0xee   : > { %v402_v27 = vmul.f32 %v568_v24, %v388_v25 }
  0xef   : > { %v601_v28 = vpop.f32.mrf.mxu0 }
  0xf0   : > { %v411_v29 = vadd.f32 %v569_v26, %v402_v27 }
  0xf1   : > { %v391_v30 = vpop.f32.mrf.mxu0 }
  0xf2   : > { %v413_v31 = vmul.f32 0.01, %v411_v29  ;;  %v403_v32 = vmul.f32 %v568_v24, %v391_v30 }
  0xf3   : > { %v602_v33 = vpop.f32.mrf.mxu0 }
  0xf4   : > { %v415_v34 = vmax.f32 %v411_v29, %v413_v31  ;;  %v412_v35 = vadd.f32 %v569_v26, %v403_v32 }
  0xf6   : > { %v419_v36 = vcombine.high %v415_v34, %v415_v34  ;;  %v423_v37 = vpack.c.bf16 %v415_v34, %v415_v34  ;;  %v414_v38 = vmul.f32 0.01, %v412_v35 }
  0xf8   : > { %v424_v39 = vpack.c.bf16 %v419_v36, %v419_v36  ;;  %427 = vst [vmem:[%s262_s23] sm:$0x3] %v423_v37  ;;  %v416_v40 = vmax.f32 %v412_v35, %v414_v38 }
  0xfa   : > { %428 = vst [vmem:[%s262_s23 + $0x2] sm:$0x3] %v424_v39  ;;  %v420_v41 = vcombine.high %v416_v40, %v416_v40  ;;  %v425_v42 = vpack.c.bf16 %v416_v40, %v416_v40 }
  0xfc   : > { %v426_v43 = vpack.c.bf16 %v420_v41, %v420_v41  ;;  %429 = vst [vmem:[%s262_s23 + $0x4] sm:$0x3] %v425_v42 }
  0xfe   : > { %430 = vst [vmem:[%s262_s23 + $0x6] sm:$0x3] %v426_v43 }
  0xff PF: > { %s14_s17 = sadd.s32 1, %s660_s17   ;;  %s765_s15 = smov %s656_s16 }
 0x100   : > { %p11_p5 = scmp.ge.s32.totalorder %s14_s17, 4   ;;  %s766_s16 = smov %s768_s18 }
 0x102   :  { %13 = sbr.rel (!%p11_p5) target bundleno = 2 (0x2), region = 75 }

// kernel: forward.15
= control target key start
LH: loop header
LB: loop body
LE: loop exit
PB: predicated region body
PF: predicated region fallthrough
CT: control target
= control target key end

     0   :  { %s778_s15 = smov 0   ;;  %s780_s16 = smov 0   ;;  %s854_s0 = inlined_call_operand.vmem [shape: bf16[2,1,8,8,128], index: 0, kind: input, shape index: {}]   ;;  %s855_s1 = inlined_call_operand.vmem [shape: bf16[128,128], index: 1, kind: input, shape index: {}]   ;;  %s856_s2 = inlined_call_operand.vmem [shape: f32[1,128], index: 2, kind: input, shape index: {}]   ;;  %s857_s3 = inlined_call_operand.vmem [shape: f32[1,128], index: 3, kind: input, shape index: {}]   ;;  %s858_s4 = inlined_call_operand.vmem [shape: bf16[2,8,8,128], index: 4, kind: output, shape index: {}]  }
   0x1   :  { %s782_s17 = smov 0  }
   0x2 LB: > { %s26_s18 = sadd.s32 1, %s747_s16  ;;  %p595_p0 = scmp.ge.s32.totalorder %s751_s17, 1  ;;  %s751_s17 = sphi %s782_s17, %s14_s17   ;;  %s747_s16 = sphi %s780_s16, %s860_s16   ;;  %s743_s15 = sphi %s778_s15, %s859_s15  }
   0x3   : > { %p28_p1 = scmp.ge.s32.totalorder %s26_s18, 2  ;;  %p201_p2 = scmp.lt.s32.totalorder %s751_s17, 3 }
   0x5   : > { %s862_s18 = smov (%p28_p1, %s26_s18), 0  ;;  %p202_p3 = pnand %p595_p0, %p201_p2 }
   0x6   : > { %p240_p4 = scmp.lt.s32.totalorder (!%p202_p3), %s743_s15, 1 }
   0x7   : > { %205 = sbr.rel (%p202_p3) target bundleno = 251 (0xfb), region = 36 }
   0xc   : > { %v717_v0 = vld [vmem:[%s855_s1 + $0x38] sm:$0xff]   ;;  %v718_v1 = vld [vmem:[%s855_s1 + $0x30] sm:$0xff]   ;;  %s864_s15 = smov (!%p240_p4, %s743_s15), 1  ;;  %v719_v2 = vld [vmem:[%s855_s1 + $0x28] sm:$0xff]  }
   0xd   : > { %653 = vmatprep.subr.bf16.mxu0 %v717_v0  ;;  %677 = vmatprep.subr.bf16.mxu1 %v717_v0  ;;  %s616_s25 = sshll.u32 %s864_s15, 5  ;;  %v720_v3 = vld [vmem:[%s855_s1 + $0x20] sm:$0xff]   ;;  %v721_v6 = vld [vmem:[%s855_s1 + $0x18] sm:$0xff]   ;;  %v722_v7 = vld [vmem:[%s855_s1 + $0x10] sm:$0xff]  }
   0xe   : > { %654 = vmatpush3.bf16.msra.mxu0 %v717_v0  ;;  %685 = vmatpush3.bf16.msra.mxu1 %v717_v0  ;;  %s813_s28 = scalar_lea.vmem %s854_s0, %s616_s25  ;;  %v723_v8 = vld [vmem:[%s855_s1 + $0x8] sm:$0xff]   ;;  %v724_v9 = vld [vmem:[%s855_s1] sm:$0xff]   ;;  %s262_s23 = scalar_lea.vmem %s858_s4, %s616_s25 }
   0xf   : > { %655 = vmatprep.subr.bf16.mxu0 %v718_v1  ;;  %678 = vmatprep.subr.bf16.mxu1 %v718_v1  ;;  %v725_v4 = vld [vmem:[%s813_s28] sm:$0xff]   ;;  %v726_v5 = vld [vmem:[%s813_s28 + $0x10] sm:$0xff]   ;;  %v727_v10 = vld [vmem:[%s813_s28 + $0x8] sm:$0xff]  }
  0x10   : > { %669 = vmatprep.mubr.bf16.mxu0 %v725_v4  ;;  %673 = vmatprep.mubr.bf16.mxu1 %v726_v5  ;;  %v728_v11 = vld [vmem:[%s813_s28 + $0x18] sm:$0xff]   ;;  %v612_v12 = vld [vmem:[%s856_s2] ss:$0 sm:$0xff] }
  0x11   : > { %v613_v19 = vld [vmem:[%s857_s3] ss:$0 sm:$0xff] }
  0x12   : > { %656 = vmatpush3.bf16.msra.mxu0 %v718_v1  ;;  %686 = vmatpush3.bf16.msra.mxu1 %v718_v1 }
  0x13   : > { %657 = vmatprep.subr.bf16.mxu0 %v719_v2  ;;  %679 = vmatprep.subr.bf16.mxu1 %v719_v2 }
  0x16   : > { %658 = vmatpush3.bf16.msra.mxu0 %v719_v2  ;;  %687 = vmatpush3.bf16.msra.mxu1 %v719_v2 }
  0x17   : > { %659 = vmatprep.subr.bf16.mxu0 %v720_v3  ;;  %680 = vmatprep.subr.bf16.mxu1 %v720_v3 }
  0x1a   : > { %660 = vmatpush3.bf16.msra.mxu0 %v720_v3  ;;  %688 = vmatpush3.bf16.msra.mxu1 %v720_v3 }
  0x1b   : > { %661 = vmatprep.subr.bf16.mxu0 %v721_v6  ;;  %681 = vmatprep.subr.bf16.mxu1 %v721_v6 }
  0x1e   : > { %662 = vmatpush3.bf16.msra.mxu0 %v721_v6  ;;  %689 = vmatpush3.bf16.msra.mxu1 %v721_v6 }
  0x1f   : > { %663 = vmatprep.subr.bf16.mxu0 %v722_v7  ;;  %682 = vmatprep.subr.bf16.mxu1 %v722_v7 }
  0x22   : > { %664 = vmatpush3.bf16.msra.mxu0 %v722_v7  ;;  %690 = vmatpush3.bf16.msra.mxu1 %v722_v7 }
  0x23   : > { %665 = vmatprep.subr.bf16.mxu0 %v723_v8  ;;  %683 = vmatprep.subr.bf16.mxu1 %v723_v8 }
  0x26   : > { %666 = vmatpush3.bf16.msra.mxu0 %v723_v8  ;;  %691 = vmatpush3.bf16.msra.mxu1 %v723_v8 }
  0x27   : > { %667 = vmatprep.subr.bf16.mxu0 %v724_v9  ;;  %684 = vmatprep.subr.bf16.mxu1 %v724_v9 }
  0x2a   : > { %668 = vmatpush3.bf16.msra.mxu0 %v724_v9  ;;  %692 = vmatpush3.bf16.msra.mxu1 %v724_v9 }
  0x2d   : > { %670 = vmatmul.mubr.bf16.vlgmr.msra.gmra.mxu0 %v727_v10  ;;  %674 = vmatmul.mubr.bf16.vlgmr.msra.gmra.mxu1 %v728_v11 }
  0xed   : > { %v671_v13 = vpop.f32.mrf.mxu0  ;;  %v675_v14 = vpop.f32.mrf.mxu1 }
  0xee   : > { %v434_v15 = vmul.f32 %v671_v13, %v612_v12  ;;  %v438_v16 = vmul.f32 %v675_v14, %v612_v12 }
  0xef   : > { %v394_v17 = vpop.f32.mrf.mxu0  ;;  %v410_v18 = vpop.f32.mrf.mxu1 }
  0xf0   : > { %v432_v20 = vmul.f32 %v612_v12, %v394_v17  ;;  %v436_v21 = vmul.f32 %v612_v12, %v410_v18  ;;  %v449_v26 = vadd.f32 %v613_v19, %v434_v15  ;;  %v453_v27 = vadd.f32 %v613_v19, %v438_v16 }
  0xf1   : > { %v672_v22 = vpop.f32.mrf.mxu0  ;;  %v676_v23 = vpop.f32.mrf.mxu1 }
  0xf2   : > { %v435_v24 = vmul.f32 %v672_v22, %v612_v12  ;;  %v439_v25 = vmul.f32 %v676_v23, %v612_v12  ;;  %v447_v34 = vadd.f32 %v613_v19, %v432_v20  ;;  %v451_v35 = vadd.f32 %v613_v19, %v436_v21 }
  0xf3   : > { %v397_v28 = vpop.f32.mrf.mxu0  ;;  %v413_v29 = vpop.f32.mrf.mxu1 }
  0xf4   : > { %v450_v30 = vadd.f32 %v613_v19, %v435_v24  ;;  %v454_v31 = vadd.f32 %v613_v19, %v439_v25  ;;  %v433_v32 = vmul.f32 %v612_v12, %v397_v28  ;;  %v437_v33 = vmul.f32 %v612_v12, %v413_v29 }
  0xf6   : > { %v626_v36 = vpack.c.bf16 %v450_v30, %v449_v26  ;;  %v636_v37 = vpack.c.bf16 %v454_v31, %v453_v27  ;;  %v448_v38 = vadd.f32 %v613_v19, %v433_v32  ;;  %v452_v39 = vadd.f32 %v613_v19, %v437_v33 }
  0xf8   : > { %638 = vst [vmem:[%s262_s23 + $0x8] sm:$0xff] %v626_v36   ;;  %640 = vst [vmem:[%s262_s23 + $0x18] sm:$0xff] %v636_v37   ;;  %v621_v40 = vpack.c.bf16 %v448_v38, %v447_v34  ;;  %v631_v41 = vpack.c.bf16 %v452_v39, %v451_v35 }
  0xfa   : > { %622 = vst [vmem:[%s262_s23] sm:$0xff] %v621_v40   ;;  %639 = vst [vmem:[%s262_s23 + $0x10] sm:$0xff] %v631_v41  }
  0xfb PF: > { %s14_s17 = sadd.s32 1, %s751_s17   ;;  %s859_s15 = smov %s747_s16 }
  0xfc   : > { %p11_p5 = scmp.ge.s32.totalorder %s14_s17, 4   ;;  %s860_s16 = smov %s862_s18 }
  0xfe   :  { %13 = sbr.rel (!%p11_p5) target bundleno = 2 (0x2), region = 75 }

// kernel: forward.8
= control target key start
LH: loop header
LB: loop body
LE: loop exit
PB: predicated region body
PF: predicated region fallthrough
CT: control target
= control target key end

     0   :  { %s7049_s15 = smov 0   ;;  %s7051_s16 = smov 0   ;;  %s8660_s0 = inlined_call_operand.vmem [shape: bf16[2,1,18,18,128], index: 0, kind: input, shape index: {}]   ;;  %s8661_s1 = inlined_call_operand.vmem [shape: bf16[1152,128], index: 1, kind: input, shape index: {}]   ;;  %s8662_s2 = inlined_call_operand.vmem [shape: f32[1,128], index: 2, kind: input, shape index: {}]   ;;  %s8663_s3 = inlined_call_operand.vmem [shape: f32[1,128], index: 3, kind: input, shape index: {}]   ;;  %s8664_s4 = inlined_call_operand.vmem [shape: bf16[2,16,16,128], index: 4, kind: output, shape index: {}]  }
   0x1   :  { %s7053_s17 = smov 0  }
   0x2 LB: > { %s26_s18 = sadd.s32 1, %s7018_s16  ;;  %p5471_p0 = scmp.ge.s32.totalorder %s7022_s17, 1  ;;  %s7022_s17 = sphi %s7053_s17, %s14_s17   ;;  %s7018_s16 = sphi %s7051_s16, %s8696_s16   ;;  %s7014_s15 = sphi %s7049_s15, %s8695_s15  }
   0x3   : > { %p28_p1 = scmp.ge.s32.totalorder %s26_s18, 2  ;;  %p201_p2 = scmp.lt.s32.totalorder %s7022_s17, 3 }
   0x5   : > { %s8698_s18 = smov (%p28_p1, %s26_s18), 0  ;;  %p202_p3 = pnand %p5471_p0, %p201_p2 }
   0x7   : > { %205 = sbr.rel (%p202_p3) target bundleno = 664 (0x298), region = 36 }
   0xc   : > { %v6720_v0 = vld [vmem:[%s8661_s1 + $0x78] sm:$0xff]   ;;  %p240_p4 = scmp.lt.s32.totalorder %s7014_s15, 1  ;;  %v6722_v2 = vld [vmem:[%s8661_s1 + $0x70] sm:$0xff]   ;;  %v6724_v4 = vld [vmem:[%s8661_s1 + $0x68] sm:$0xff]   ;;  %vm376_vm0 = vsmask.f32 3328 }
   0xd   : > { %v6721_v1 = vld [vmem:[%s8661_s1 + $0x38] sm:$0xff]   ;;  %6159 = vmatprep.subr.bf16.mxu0 %v6720_v0  ;;  %6679 = vmatprep.subr.bf16.mxu1 %v6720_v0  ;;  %v6723_v3 = vld [vmem:[%s8661_s1 + $0x30] sm:$0xff]   ;;  %v6725_v5 = vld [vmem:[%s8661_s1 + $0x28] sm:$0xff]   ;;  %vm377_vm1 = vsmask.f32 7440  ;;  %vm923_vm3 = vcmask 1042432  }
   0xe   : > { %6160 = vmatpush3.bf16.msra.mxu0 %v6721_v1  ;;  %6687 = vmatpush3.bf16.msra.mxu1 %v6721_v1  ;;  %s8700_s15 = smov (!%p240_p4, %s7014_s15), 1  ;;  %v6726_v6 = vld [vmem:[%s8661_s1 + $0x60] sm:$0xff]   ;;  %v6728_v8 = vld [vmem:[%s8661_s1 + $0x58] sm:$0xff]   ;;  %v6730_v10 = vld [vmem:[%s8661_s1 + $0x50] sm:$0xff]   ;;  %vm924_vm4 = vcmask 1046532  }
   0xf   : > { %6161 = vmatprep.subr.bf16.mxu0 %v6722_v2  ;;  %6680 = vmatprep.subr.bf16.mxu1 %v6722_v2  ;;  %s6695_s7 = smul.u32 216, %s8700_s15  ;;  %v6727_v7 = vld [vmem:[%s8661_s1 + $0x20] sm:$0xff]   ;;  %v6729_v9 = vld [vmem:[%s8661_s1 + $0x18] sm:$0xff]   ;;  %v6731_v16 = vld [vmem:[%s8661_s1 + $0x10] sm:$0xff]   ;;  %s6031_s22 = sshll.u32 %s8700_s15, 7 }
  0x10   : > { %v6732_v24 = vld [vmem:[%s8661_s1 + $0x48] sm:$0xff]   ;;  %v6734_v34 = vld [vmem:[%s8661_s1 + $0x40] sm:$0xff]   ;;  %vm7132_vm2 = vmor %vm376_vm0, %vm377_vm1  ;;  %s8502_s24 = scalar_lea.vmem %s8664_s4, %s6031_s22 }
  0x11   : > { %s7100_s14 = scalar_lea.vmem %s8660_s0, %s6695_s7  ;;  %v6733_v29 = vld [vmem:[%s8661_s1 + $0x8] sm:$0xff]   ;;  %v6735_v47 = vld [vmem:[%s8661_s1] sm:$0xff]   ;;  %v6742_v55 = vld [vmem:[%s8661_s1 + $0xf8] sm:$0xff]  }
  0x12   : > { %6162 = vmatpush3.bf16.msra.mxu0 %v6723_v3  ;;  %6688 = vmatpush3.bf16.msra.mxu1 %v6723_v3  ;;  %v264_v11 = vld [vmem:[%s7100_s14] sm:$0xf]  ;;  %v265_v12 = vld [vmem:[%s7100_s14 + $0x4] sm:$0xf]  ;;  %v330_v15 = vld [vmem:[%s7100_s14 + $0x8] sm:$0x1] }
  0x13   : > { %6163 = vmatprep.subr.bf16.mxu0 %v6724_v4  ;;  %6681 = vmatprep.subr.bf16.mxu1 %v6724_v4  ;;  %v328_v13 = vld [vmem:[%s7100_s14] sm:$0xf]  ;;  %296 = vst [vmem:[#allocation2] sm:$0xf] %v264_v11  ;;  %297 = vst [vmem:[#allocation2 + $0x24] sm:$0xf] %v265_v12 }
  0x14   : > { %v329_v14 = vld [vmem:[%s7100_s14 + $0x4] sm:$0xf]  ;;  %v380_v17 = vshrl.u32 %v328_v13, 16  ;;  %v383_v18 = vshll.u32 %v328_v13, 16  ;;  %v399_v21 = vshll.u32 %v330_v15, 16  ;;  %v6745_v57 = vld [vmem:[%s8661_s1 + $0x178] sm:$0xff]   ;;  %vm7277_vm5 = vmor %vm923_vm3, %vm924_vm4 }
  0x15   : > { %v389_v19 = vshll.u32 %v329_v14, 16  ;;  %v393_v20 = vshrl.u32 %v329_v14, 16  ;;  %v288_v22 = vld [vmem:[%s7100_s14 + $0x90] sm:$0xf]  ;;  %v289_v23 = vld [vmem:[%s7100_s14 + $0x94] sm:$0xf] }
  0x16   : > { %6164 = vmatpush3.bf16.msra.mxu0 %v6725_v5  ;;  %6689 = vmatpush3.bf16.msra.mxu1 %v6725_v5  ;;  %v382_v25 = vrot.slane %v380_v17, 4  ;;  %v385_v26 = vrot.slane %v383_v18, 5  ;;  %320 = vst [vmem:[#allocation2 + $0x360] sm:$0xf] %v288_v22  ;;  %321 = vst [vmem:[#allocation2 + $0x384] sm:$0xf] %v289_v23 }
  0x17   : > { %6165 = vmatprep.subr.bf16.mxu0 %v6726_v6  ;;  %6682 = vmatprep.subr.bf16.mxu1 %v6726_v6  ;;  %v391_v27 = vrot.slane %v389_v19, 5  ;;  %v364_v28 = vld [vmem:[%s7100_s14 + $0x90] sm:$0xf]  ;;  %v395_v30 = vrot.slane %v393_v20, 4  ;;  %v401_v31 = vrot.slane %v399_v21, 5 }
  0x18   : > { %v365_v32 = vld [vmem:[%s7100_s14 + $0x94] sm:$0xf]  ;;  %v366_v33 = vld [vmem:[%s7100_s14 + $0x98] sm:$0x1]  ;;  %v386_v35 = vor.u32 %v385_v26, %v382_v25  ;;  %v668_v36 = vshrl.u32 %v364_v28, 16  ;;  %v671_v37 = vshll.u32 %v364_v28, 16 }
  0x19   : > { %v677_v38 = vshll.u32 %v365_v32, 16  ;;  %v396_v40 = vor.u32 %v395_v30, %v391_v27  ;;  %v681_v41 = vshrl.u32 %v365_v32, 16  ;;  %v687_v42 = vshll.u32 %v366_v33, 16  ;;  %v266_v59 = vld [vmem:[%s7100_s14 + $0xc] sm:$0xf]  ;;  %v6743_v28 = vld [vmem:[%s8661_s1 + $0xb8] sm:$0xff]  }
  0x1a   : > { %6166 = vmatpush3.bf16.msra.mxu0 %v6727_v7  ;;  %6690 = vmatpush3.bf16.msra.mxu1 %v6727_v7  ;;  %v387_v43 = vrot.slane %v386_v35, 4  ;;  %v670_v44 = vrot.slane %v668_v36, 4  ;;  %v673_v45 = vrot.slane %v671_v37, 5  ;;  %v267_v60 = vld [vmem:[%s7100_s14 + $0x10] sm:$0xf] }
  0x1b   : > { %6167 = vmatprep.subr.bf16.mxu0 %v6728_v8  ;;  %6683 = vmatprep.subr.bf16.mxu1 %v6728_v8  ;;  %v679_v46 = vrot.slane %v677_v38, 5  ;;  %v397_v48 = vrot.slane %v396_v40, 4  ;;  %v683_v49 = vrot.slane %v681_v41, 4  ;;  %v689_v54 = vrot.slane %v687_v42, 5  ;;  %298 = vst [vmem:[#allocation2 + $0x48] sm:$0xf] %v266_v59 }
  0x1c   : > { %v392_v50 = vsel %vm7132_vm2, %v387_v43, %v391_v27  ;;  %v674_v51 = vor.u32 %v673_v45, %v670_v44  ;;  %299 = vst [vmem:[#allocation2 + $0x6c] sm:$0xf] %v267_v60  ;;  %v331_v62 = vld [vmem:[%s7100_s14 + $0xc] sm:$0xf]  ;;  %v332_v63 = vld [vmem:[%s7100_s14 + $0x10] sm:$0xf] }
  0x1d   : > { %v402_v52 = vsel %vm7132_vm2, %v397_v48, %v401_v31  ;;  %795 = vst [vmem:[#allocation2 + $0x4] sm:$0xf] %v392_v50  ;;  %v684_v53 = vor.u32 %v683_v49, %v679_v46  ;;  %v333_v0 = vld [vmem:[%s7100_s14 + $0x14] sm:$0x1]  ;;  %v404_v2 = vshrl.u32 %v331_v62, 16  ;;  %v407_v3 = vshll.u32 %v331_v62, 16 }
  0x1e   : > { %6168 = vmatpush3.bf16.msra.mxu0 %v6729_v9  ;;  %6691 = vmatpush3.bf16.msra.mxu1 %v6729_v9  ;;  %796 = vst [vmem:[#allocation2 + $0x28] sm:$0xf] %v402_v52  ;;  %v675_v56 = vrot.slane %v674_v51, 4  ;;  %v413_v4 = vshll.u32 %v332_v63, 16  ;;  %v290_v5 = vld [vmem:[%s7100_s14 + $0x9c] sm:$0xf] }
  0x1f   : > { %6169 = vmatprep.subr.bf16.mxu0 %v6730_v10  ;;  %6684 = vmatprep.subr.bf16.mxu1 %v6730_v10  ;;  %v685_v58 = vrot.slane %v684_v53, 4  ;;  %v417_v6 = vshrl.u32 %v332_v63, 16  ;;  %v423_v7 = vshll.u32 %v333_v0, 16  ;;  %v291_v8 = vld [vmem:[%s7100_s14 + $0xa0] sm:$0xf]  ;;  %v6747_v10 = vld [vmem:[%s8661_s1 + $0x138] sm:$0xff]  }
  0x20   : > { %v680_v61 = vsel %vm7132_vm2, %v675_v56, %v679_v46  ;;  %322 = vst [vmem:[#allocation2 + $0x3a8] sm:$0xf] %v290_v5  ;;  %v367_v9 = vld [vmem:[%s7100_s14 + $0x9c] sm:$0xf]  ;;  %v406_v11 = vrot.slane %v404_v2, 4  ;;  %v409_v12 = vrot.slane %v407_v3, 5 }
  0x21   : > { %v690_v1 = vsel %vm7132_vm2, %v685_v58, %v689_v54  ;;  %819 = vst [vmem:[#allocation2 + $0x364] sm:$0xf] %v680_v61  ;;  %v415_v13 = vrot.slane %v413_v4, 5  ;;  %323 = vst [vmem:[#allocation2 + $0x3cc] sm:$0xf] %v291_v8  ;;  %v692_v15 = vshrl.u32 %v367_v9, 16 }
  0x22   : > { %6170 = vmatpush3.bf16.msra.mxu0 %v6731_v16  ;;  %6692 = vmatpush3.bf16.msra.mxu1 %v6731_v16  ;;  %820 = vst [vmem:[#allocation2 + $0x388] sm:$0xf] %v690_v1  ;;  %v368_v14 = vld [vmem:[%s7100_s14 + $0xa0] sm:$0xf]  ;;  %v419_v16 = vrot.slane %v417_v6, 4  ;;  %v425_v17 = vrot.slane %v423_v7, 5  ;;  %v410_v22 = vor.u32 %v409_v12, %v406_v11 }
  0x23   : > { %6171 = vmatprep.subr.bf16.mxu0 %v6732_v24  ;;  %6685 = vmatprep.subr.bf16.mxu1 %v6732_v24  ;;  %v369_v18 = vld [vmem:[%s7100_s14 + $0xa4] sm:$0x1]  ;;  %v695_v19 = vshll.u32 %v367_v9, 16  ;;  %v694_v23 = vrot.slane %v692_v15, 4  ;;  %v701_v26 = vshll.u32 %v368_v14, 16  ;;  %v705_v27 = vshrl.u32 %v368_v14, 16 }
  0x24   : > { %v6736_v20 = vld [vmem:[#allocation2] ss:$36 sps:$4 sm:$0xff]   ;;  %v420_v24 = vor.u32 %v419_v16, %v415_v13  ;;  %v711_v30 = vshll.u32 %v369_v18, 16  ;;  %v6744_v31 = vld [vmem:[%s8661_s1 + $0xf0] sm:$0xff]   ;;  %v268_v45 = vld [vmem:[%s7100_s14 + $0x18] sm:$0xf] }
  0x25   : > { %v6738_v21 = vld [vmem:[#allocation2 + $0x4] ss:$36 sps:$4 sm:$0xff]   ;;  %v697_v25 = vrot.slane %v695_v19, 5  ;;  %v707_v35 = vrot.slane %v705_v27, 4  ;;  %v6746_v44 = vld [vmem:[%s8661_s1 + $0xb0] sm:$0xff]   ;;  %v6764_v27 = vld [vmem:[%s8661_s1 + $0xd8] sm:$0xff]  }
  0x26   : > { %6172 = vmatpush3.bf16.msra.mxu0 %v6733_v29  ;;  %6693 = vmatpush3.bf16.msra.mxu1 %v6733_v29  ;;  %v411_v29 = vrot.slane %v410_v22, 4  ;;  %v421_v32 = vrot.slane %v420_v24, 4  ;;  %v6739_v36 = vld [vmem:[#allocation2 + $0x360] ss:$36 sps:$4 sm:$0xff]   ;;  %v713_v43 = vrot.slane %v711_v30, 5  ;;  %v6754_v48 = vld [vmem:[%s8661_s1 + $0xe8] sm:$0xff]  }
  0x27   : > { %6173 = vmatprep.subr.bf16.mxu0 %v6734_v34  ;;  %6686 = vmatprep.subr.bf16.mxu1 %v6734_v34  ;;  %v698_v33 = vor.u32 %v697_v25, %v694_v23  ;;  %v703_v34 = vrot.slane %v701_v26, 5  ;;  %v269_v49 = vld [vmem:[%s7100_s14 + $0x1c] sm:$0xf]  ;;  %300 = vst [vmem:[#allocation2 + $0x90] sm:$0xf] %v268_v45  ;;  %v6765_v60 = vld [vmem:[%s8661_s1 + $0x170] sm:$0xff]  }
  0x28   : > { %4272 = vmatprep.mubr.bf16.mxu0 %v6738_v21  ;;  %v416_v38 = vsel %vm7132_vm2, %v411_v29, %v415_v13  ;;  %v426_v40 = vsel %vm7132_vm2, %v421_v32, %v425_v17  ;;  %v334_v50 = vld [vmem:[%s7100_s14 + $0x18] sm:$0xf]  ;;  %301 = vst [vmem:[#allocation2 + $0xb4] sm:$0xf] %v269_v49  ;;  %v335_v51 = vld [vmem:[%s7100_s14 + $0x1c] sm:$0xf] }
  0x29   : > { %v6741_v37 = vld [vmem:[#allocation2 + $0x364] ss:$36 sps:$4 sm:$0xff]   ;;  %797 = vst [vmem:[#allocation2 + $0x4c] sm:$0xf] %v416_v38  ;;  %v699_v41 = vrot.slane %v698_v33, 4  ;;  %v708_v42 = vor.u32 %v707_v35, %v703_v34  ;;  %v428_v53 = vshrl.u32 %v334_v50, 16 }
  0x2a   : > { %6174 = vmatpush3.bf16.msra.mxu0 %v6735_v47  ;;  %6694 = vmatpush3.bf16.msra.mxu1 %v6735_v47  ;;  %798 = vst [vmem:[#allocation2 + $0x70] sm:$0xf] %v426_v40  ;;  %v336_v52 = vld [vmem:[%s7100_s14 + $0x20] sm:$0x1]  ;;  %v431_v54 = vshll.u32 %v334_v50, 16  ;;  %v437_v56 = vshll.u32 %v335_v51, 16 }
  0x2b   : > { %6271 = vmatprep.subr.bf16.mxu1 %v6742_v55  ;;  %6383 = vmatprep.subr.bf16.mxu0 %v6745_v57  ;;  %v704_v46 = vsel %vm7132_vm2, %v699_v41, %v703_v34  ;;  %v709_v47 = vrot.slane %v708_v42, 4  ;;  %v441_v57 = vshrl.u32 %v335_v51, 16  ;;  %v447_v58 = vshll.u32 %v336_v52, 16  ;;  %v292_v59 = vld [vmem:[%s7100_s14 + $0xa8] sm:$0xf]  ;;  %v6756_v2 = vld [vmem:[%s8661_s1 + $0xe0] sm:$0xff]  }
  0x2c   : > { %4368 = vmatprep.mubr.bf16.mxu1 %v6741_v37  ;;  %821 = vst [vmem:[#allocation2 + $0x3ac] sm:$0xf] %v704_v46  ;;  %v6755_v61 = vld [vmem:[%s8661_s1 + $0xa8] sm:$0xff]   ;;  %v430_v62 = vrot.slane %v428_v53, 4  ;;  %v433_v63 = vrot.slane %v431_v54, 5  ;;  %v439_v3 = vrot.slane %v437_v56, 5 }
  0x2d   : > { %4273 = vmatmul.mubr.bf16.vlgmr.msra.gmra.mxu0 %v6736_v20  ;;  %4369 = vmatmul.mubr.bf16.vlgmr.msra.gmra.mxu1 %v6739_v36  ;;  %v714_v55 = vsel %vm7132_vm2, %v709_v47, %v713_v43  ;;  %v293_v0 = vld [vmem:[%s7100_s14 + $0xac] sm:$0xf]  ;;  %324 = vst [vmem:[#allocation2 + $0x3f0] sm:$0xf] %v292_v59  ;;  %v370_v1 = vld [vmem:[%s7100_s14 + $0xa8] sm:$0xf] }
  0x2e   : > { %6384 = vmatpush3.bf16.msra.mxu0 %v6747_v10  ;;  %6272 = vmatpush3.bf16.msra.mxu1 %v6743_v28  ;;  %822 = vst [vmem:[#allocation2 + $0x3d0] sm:$0xf] %v714_v55  ;;  %v443_v4 = vrot.slane %v441_v57, 4  ;;  %v449_v5 = vrot.slane %v447_v58, 5  ;;  %325 = vst [vmem:[#allocation2 + $0x414] sm:$0xf] %v293_v0  ;;  %v434_v8 = vor.u32 %v433_v63, %v430_v62 }
  0x2f   : > { %6273 = vmatprep.subr.bf16.mxu1 %v6744_v31  ;;  %v371_v6 = vld [vmem:[%s7100_s14 + $0xac] sm:$0xf]  ;;  %v716_v7 = vshrl.u32 %v370_v1, 16  ;;  %6385 = vmatprep.subr.bf16.mxu0 %v6765_v60  ;;  %v372_v9 = vld [vmem:[%s7100_s14 + $0xb0] sm:$0x1]  ;;  %v719_v10 = vshll.u32 %v370_v1, 16 }
  0x30   : > { %v725_v11 = vshll.u32 %v371_v6, 16  ;;  %v729_v12 = vshrl.u32 %v371_v6, 16  ;;  %v6752_v14 = vld [vmem:[#allocation2 + $0x48] ss:$36 sps:$4 sm:$0xff]   ;;  %v444_v15 = vor.u32 %v443_v4, %v439_v3  ;;  %v435_v17 = vrot.slane %v434_v8, 4  ;;  %v6757_v21 = vld [vmem:[%s8661_s1 + $0xa0] sm:$0xff]  }
  0x31   : > { %v6748_v13 = vld [vmem:[#allocation2 + $0x4c] ss:$36 sps:$4 sm:$0xff]   ;;  %v718_v16 = vrot.slane %v716_v7, 4  ;;  %v721_v18 = vrot.slane %v719_v10, 5  ;;  %v735_v23 = vshll.u32 %v372_v9, 16  ;;  %v6766_v37 = vld [vmem:[%s8661_s1 + $0x98] sm:$0xff]  }
  0x32   : > { %6274 = vmatpush3.bf16.msra.mxu1 %v6746_v44  ;;  %v727_v19 = vrot.slane %v725_v11, 5  ;;  %v731_v20 = vrot.slane %v729_v12, 4  ;;  %4280 = vmatprep.mubr.bf16.mxu0 %v6748_v13  ;;  %v445_v22 = vrot.slane %v444_v15, 4  ;;  %v440_v24 = vsel %vm7132_vm2, %v435_v17, %v439_v3  ;;  %v6753_v29 = vld [vmem:[#allocation2 + $0x3a8] ss:$36 sps:$4 sm:$0xff]   ;;  %v6767_v34 = vld [vmem:[%s8661_s1 + $0x130] sm:$0xff]  }
  0x33   : > { %6275 = vmatprep.subr.bf16.mxu1 %v6754_v48  ;;  %v722_v25 = vor.u32 %v721_v18, %v718_v16  ;;  %799 = vst [vmem:[#allocation2 + $0x94] sm:$0xf] %v440_v24  ;;  %v737_v31 = vrot.slane %v735_v23, 5  ;;  %6386 = vmatpush3.bf16.msra.mxu0 %v6767_v34  ;;  %v6768_v38 = vld [vmem:[%s8661_s1 + $0xd0] sm:$0xff]   ;;  %v270_v40 = vld [vmem:[%s7100_s14 + $0x24] sm:$0xf] }
  0x34   : > { %v732_v26 = vor.u32 %v731_v20, %v727_v19  ;;  %v450_v30 = vsel %vm7132_vm2, %v445_v22, %v449_v5  ;;  %v271_v41 = vld [vmem:[%s7100_s14 + $0x28] sm:$0xf]  ;;  %302 = vst [vmem:[#allocation2 + $0xd8] sm:$0xf] %v270_v40  ;;  %v337_v42 = vld [vmem:[%s7100_s14 + $0x24] sm:$0xf] }
  0x35   : > { %4281 = vmatmul.mubr.bf16.gmra.mxu0 %v6752_v14  ;;  %v6750_v28 = vld [vmem:[#allocation2 + $0x3ac] ss:$36 sps:$4 sm:$0xff]   ;;  %800 = vst [vmem:[#allocation2 + $0xb8] sm:$0xf] %v450_v30  ;;  %v723_v32 = vrot.slane %v722_v25, 4  ;;  %v452_v46 = vshrl.u32 %v337_v42, 16 }
  0x36   : > { %6276 = vmatpush3.bf16.msra.mxu1 %v6755_v61  ;;  %v733_v33 = vrot.slane %v732_v26, 4  ;;  %4376 = vmatprep.mubr.bf16.mxu1 %v6750_v28  ;;  %v338_v43 = vld [vmem:[%s7100_s14 + $0x28] sm:$0xf]  ;;  %v6769_v44 = vld [vmem:[%s8661_s1 + $0x90] sm:$0xff]   ;;  %303 = vst [vmem:[#allocation2 + $0xfc] sm:$0xf] %v271_v41 }
  0x37   : > { %6277 = vmatprep.subr.bf16.mxu1 %v6756_v2  ;;  %4377 = vmatmul.mubr.bf16.gmra.mxu1 %v6753_v29  ;;  %v728_v35 = vsel %vm7132_vm2, %v723_v32, %v727_v19  ;;  %v339_v45 = vld [vmem:[%s7100_s14 + $0x2c] sm:$0x1]  ;;  %v455_v47 = vshll.u32 %v337_v42, 16  ;;  %v461_v48 = vshll.u32 %v338_v43, 16  ;;  %v465_v49 = vshrl.u32 %v338_v43, 16  ;;  %v6778_v22 = vld [vmem:[%s8661_s1 + $0xc0] sm:$0xff]  }
  0x38   : > { %v738_v36 = vsel %vm7132_vm2, %v733_v33, %v737_v31  ;;  %823 = vst [vmem:[#allocation2 + $0x3f4] sm:$0xf] %v728_v35  ;;  %v471_v50 = vshll.u32 %v339_v45, 16  ;;  %v294_v51 = vld [vmem:[%s7100_s14 + $0xb4] sm:$0xf]  ;;  %v454_v55 = vrot.slane %v452_v46, 4 }
  0x39   : > { %824 = vst [vmem:[#allocation2 + $0x418] sm:$0xf] %v738_v36  ;;  %v295_v52 = vld [vmem:[%s7100_s14 + $0xb8] sm:$0xf]  ;;  %v6762_v54 = vld [vmem:[#allocation2 + $0x90] ss:$36 sps:$4 sm:$0xff]  }
  0x3a   : > { %6278 = vmatpush3.bf16.msra.mxu1 %v6757_v21  ;;  %326 = vst [vmem:[#allocation2 + $0x438] sm:$0xf] %v294_v51  ;;  %327 = vst [vmem:[#allocation2 + $0x45c] sm:$0xf] %v295_v52  ;;  %v457_v56 = vrot.slane %v455_v47, 5  ;;  %v463_v57 = vrot.slane %v461_v48, 5 }
  0x3b   : > { %6279 = vmatprep.subr.bf16.mxu1 %v6764_v27  ;;  %v467_v58 = vrot.slane %v465_v49, 4  ;;  %v473_v59 = vrot.slane %v471_v50, 5  ;;  %v373_v60 = vld [vmem:[%s7100_s14 + $0xb4] sm:$0xf]  ;;  %v374_v61 = vld [vmem:[%s7100_s14 + $0xb8] sm:$0xf] }
  0x3c   : > { %v6758_v53 = vld [vmem:[#allocation2 + $0x94] ss:$36 sps:$4 sm:$0xff]   ;;  %v375_v62 = vld [vmem:[%s7100_s14 + $0xbc] sm:$0x1]  ;;  %v740_v63 = vshrl.u32 %v373_v60, 16  ;;  %v743_v0 = vshll.u32 %v373_v60, 16  ;;  %v458_v2 = vor.u32 %v457_v56, %v454_v55 }
  0x3d   : > { %4288 = vmatprep.mubr.bf16.mxu0 %v6758_v53  ;;  %v468_v3 = vor.u32 %v467_v58, %v463_v57  ;;  %v749_v4 = vshll.u32 %v374_v61, 16  ;;  %v753_v5 = vshrl.u32 %v374_v61, 16  ;;  %v6763_v6 = vld [vmem:[#allocation2 + $0x3f0] ss:$36 sps:$4 sm:$0xff]   ;;  %v759_v9 = vshll.u32 %v375_v62, 16  ;;  %v6776_v10 = vld [vmem:[%s8661_s1 + $0xc8] sm:$0xff]  }
  0x3e   : > { %6280 = vmatpush3.bf16.msra.mxu1 %v6766_v37  ;;  %4289 = vmatmul.mubr.bf16.gmra.mxu0 %v6762_v54  ;;  %v742_v7 = vrot.slane %v740_v63, 4  ;;  %v745_v8 = vrot.slane %v743_v0, 5  ;;  %v459_v11 = vrot.slane %v458_v2, 4  ;;  %v6777_v17 = vld [vmem:[%s8661_s1 + $0x88] sm:$0xff]   ;;  %v6780_v26 = vld [vmem:[%s8661_s1 + $0x80] sm:$0xff]  }
  0x3f   : > { %6281 = vmatprep.subr.bf16.mxu1 %v6768_v38  ;;  %v469_v12 = vrot.slane %v468_v3, 4  ;;  %v751_v13 = vrot.slane %v749_v4, 5  ;;  %v755_v14 = vrot.slane %v753_v5, 4  ;;  %v761_v16 = vrot.slane %v759_v9, 5  ;;  %v6779_v24 = vld [vmem:[%s8661_s1 + $0x168] sm:$0xff]  }
  0x40   : > { %v6760_v1 = vld [vmem:[#allocation2 + $0x3f4] ss:$36 sps:$4 sm:$0xff]   ;;  %v746_v15 = vor.u32 %v745_v8, %v742_v7  ;;  %v464_v18 = vsel %vm7132_vm2, %v459_v11, %v463_v57  ;;  %6387 = vmatprep.subr.bf16.mxu0 %v6779_v24  ;;  %v6781_v28 = vld [vmem:[%s8661_s1 + $0x128] sm:$0xff]   ;;  %v272_v29 = vld [vmem:[%s7100_s14 + $0x30] sm:$0xf] }
  0x41   : > { %4384 = vmatprep.mubr.bf16.mxu1 %v6760_v1  ;;  %v474_v19 = vsel %vm7132_vm2, %v469_v12, %v473_v59  ;;  %v756_v20 = vor.u32 %v755_v14, %v751_v13  ;;  %801 = vst [vmem:[#allocation2 + $0xdc] sm:$0xf] %v464_v18  ;;  %v273_v30 = vld [vmem:[%s7100_s14 + $0x34] sm:$0xf]  ;;  %304 = vst [vmem:[#allocation2 + $0x120] sm:$0xf] %v272_v29  ;;  %6388 = vmatpush3.bf16.msra.mxu0 %v6781_v28 }
  0x42   : > { %6282 = vmatpush3.bf16.msra.mxu1 %v6769_v44  ;;  %802 = vst [vmem:[#allocation2 + $0x100] sm:$0xf] %v474_v19  ;;  %v747_v21 = vrot.slane %v746_v15, 4  ;;  %305 = vst [vmem:[#allocation2 + $0x144] sm:$0xf] %v273_v30  ;;  %v6788_v57 = vld [vmem:[%s8661_s1 + $0x1f8] sm:$0xff]  }
  0x43   : > { %4385 = vmatmul.mubr.bf16.gmra.mxu1 %v6763_v6  ;;  %6283 = vmatprep.subr.bf16.mxu1 %v6776_v10  ;;  %v757_v23 = vrot.slane %v756_v20, 4  ;;  %v340_v31 = vld [vmem:[%s7100_s14 + $0x30] sm:$0xf]  ;;  %v341_v32 = vld [vmem:[%s7100_s14 + $0x34] sm:$0xf]  ;;  %v6796_v15 = vld [vmem:[%s8661_s1 + $0x160] sm:$0xff]  }
  0x44   : > { %v752_v25 = vsel %vm7132_vm2, %v747_v21, %v751_v13  ;;  %v342_v33 = vld [vmem:[%s7100_s14 + $0x38] sm:$0x1]  ;;  %v476_v34 = vshrl.u32 %v340_v31, 16  ;;  %v479_v35 = vshll.u32 %v340_v31, 16  ;;  %v485_v36 = vshll.u32 %v341_v32, 16  ;;  %6389 = vmatprep.subr.bf16.mxu0 %v6796_v15  ;;  %v6797_v30 = vld [vmem:[%s8661_s1 + $0x120] sm:$0xff]  }
  0x45   : > { %v762_v27 = vsel %vm7132_vm2, %v757_v23, %v761_v16  ;;  %825 = vst [vmem:[#allocation2 + $0x43c] sm:$0xf] %v752_v25  ;;  %v489_v37 = vshrl.u32 %v341_v32, 16  ;;  %v827_v38 = vld [vmem:[%s7100_s14] sm:$0xe]  ;;  %v495_v40 = vshll.u32 %v342_v33, 16  ;;  %6390 = vmatpush3.bf16.msra.mxu0 %v6797_v30 }
  0x46   : > { %6284 = vmatpush3.bf16.msra.mxu1 %v6777_v17  ;;  %826 = vst [vmem:[#allocation2 + $0x460] sm:$0xf] %v762_v27  ;;  %v828_v41 = vld [vmem:[%s7100_s14 + $0x4] sm:$0xf]  ;;  %v829_v42 = vld [vmem:[%s7100_s14 + $0x8] sm:$0x1] }
  0x47   : > { %6285 = vmatprep.subr.bf16.mxu1 %v6778_v22  ;;  %v5475_v44 = vrot.slane %v827_v38, 9  ;;  %v478_v46 = vrot.slane %v476_v34, 4  ;;  %v481_v47 = vrot.slane %v479_v35, 5  ;;  %v6774_v48 = vld [vmem:[#allocation2 + $0xd8] ss:$36 sps:$4 sm:$0xff]   ;;  %v487_v49 = vrot.slane %v485_v36, 5 }
  0x48   : > { %v491_v50 = vrot.slane %v489_v37, 4  ;;  %v497_v51 = vrot.slane %v495_v40, 5  ;;  %v928_v52 = vrot.slane %v828_v41, 5  ;;  %v931_v54 = vrot.slane %v829_v42, 5  ;;  %v5491_v55 = vld [vmem:[%s7100_s14 + $0xc] sm:$0xf] }
  0x49   : > { %v6770_v45 = vld [vmem:[#allocation2 + $0xdc] ss:$36 sps:$4 sm:$0xff]   ;;  %v482_v53 = vor.u32 %v481_v47, %v478_v46  ;;  %v5492_v56 = vld [vmem:[%s7100_s14 + $0x10] sm:$0xf]  ;;  %1135 = vst [vmem:[#allocation2 + $0xc] sm:$0xf] %v5491_v55 }
  0x4a   : > { %6286 = vmatpush3.bf16.msra.mxu1 %v6780_v26  ;;  %4296 = vmatprep.mubr.bf16.mxu0 %v6770_v45  ;;  %v492_v58 = vor.u32 %v491_v50, %v487_v49  ;;  %v929_v59 = vsel %vm7277_vm5, %v5475_v44, %v928_v52  ;;  %v930_v60 = vrot.slane %v928_v52, 4  ;;  %1136 = vst [vmem:[#allocation2 + $0x30] sm:$0xf] %v5492_v56  ;;  %v6775_v62 = vld [vmem:[#allocation2 + $0x438] ss:$36 sps:$4 sm:$0xff]   ;;  %v6804_v38 = vld [vmem:[%s8661_s1 + $0x1f0] sm:$0xff]  }
  0x4b   : > { %4297 = vmatmul.mubr.bf16.gmra.mxu0 %v6774_v48  ;;  %v483_v63 = vrot.slane %v482_v53, 4  ;;  %1070 = vst [vmem:[#allocation2 + $0x8] sm:$0xf] %v929_v59  ;;  %6495 = vmatprep.subr.bf16.mxu1 %v6788_v57  ;;  %v274_v3 = vld [vmem:[%s7100_s14 + $0x3c] sm:$0xf]  ;;  %v6805_v57 = vld [vmem:[%s8661_s1 + $0x1b0] sm:$0xff]  }
  0x4c   : > { %v493_v0 = vrot.slane %v492_v58, 4  ;;  %v932_v1 = vsel %vm7277_vm5, %v930_v60, %v931_v54  ;;  %v275_v4 = vld [vmem:[%s7100_s14 + $0x40] sm:$0xf]  ;;  %v343_v5 = vld [vmem:[%s7100_s14 + $0x3c] sm:$0xf] }
  0x4d   : > { %v6772_v61 = vld [vmem:[#allocation2 + $0x43c] ss:$36 sps:$4 sm:$0xff]   ;;  %v488_v2 = vsel %vm7132_vm2, %v483_v63, %v487_v49  ;;  %1071 = vst [vmem:[#allocation2 + $0x2c] sm:$0xf] %v932_v1  ;;  %306 = vst [vmem:[#allocation2 + $0x168] sm:$0xf] %v274_v3 }
  0x4e   : > { %4392 = vmatprep.mubr.bf16.mxu1 %v6772_v61  ;;  %v498_v6 = vsel %vm7132_vm2, %v493_v0, %v497_v51  ;;  %803 = vst [vmem:[#allocation2 + $0x124] sm:$0xf] %v488_v2  ;;  %307 = vst [vmem:[#allocation2 + $0x18c] sm:$0xf] %v275_v4  ;;  %v344_v7 = vld [vmem:[%s7100_s14 + $0x40] sm:$0xf] }
  0x4f   : > { %4393 = vmatmul.mubr.bf16.gmra.mxu1 %v6775_v62  ;;  %v345_v8 = vld [vmem:[%s7100_s14 + $0x44] sm:$0x1]  ;;  %v500_v9 = vshrl.u32 %v343_v5, 16  ;;  %v503_v10 = vshll.u32 %v343_v5, 16  ;;  %804 = vst [vmem:[#allocation2 + $0x148] sm:$0xf] %v498_v6 }
  0x50   : > { %v509_v11 = vshll.u32 %v344_v7, 16  ;;  %v513_v12 = vshrl.u32 %v344_v7, 16  ;;  %v519_v13 = vshll.u32 %v345_v8, 16  ;;  %v830_v14 = vld [vmem:[%s7100_s14 + $0xc] sm:$0xe]  ;;  %v6789_v25 = vld [vmem:[%s8661_s1 + $0x1b8] sm:$0xff]  }
  0x51   : > { %v502_v16 = vrot.slane %v500_v9, 4  ;;  %v505_v17 = vrot.slane %v503_v10, 5  ;;  %v831_v18 = vld [vmem:[%s7100_s14 + $0x10] sm:$0xf]  ;;  %v832_v19 = vld [vmem:[%s7100_s14 + $0x14] sm:$0x1] }
  0x52   : > { %v511_v20 = vrot.slane %v509_v11, 5  ;;  %v515_v21 = vrot.slane %v513_v12, 4  ;;  %v521_v22 = vrot.slane %v519_v13, 5  ;;  %v5476_v23 = vrot.slane %v830_v14, 9  ;;  %v5493_v24 = vld [vmem:[%s7100_s14 + $0x18] sm:$0xf] }
  0x53   : > { %v506_v26 = vor.u32 %v505_v17, %v502_v16  ;;  %v935_v27 = vrot.slane %v831_v18, 5  ;;  %v938_v28 = vrot.slane %v832_v19, 5  ;;  %v5494_v29 = vld [vmem:[%s7100_s14 + $0x1c] sm:$0xf]  ;;  %1137 = vst [vmem:[#allocation2 + $0x54] sm:$0xf] %v5493_v24 }
  0x54   : > { %v516_v31 = vor.u32 %v515_v21, %v511_v20  ;;  %1138 = vst [vmem:[#allocation2 + $0x78] sm:$0xf] %v5494_v29  ;;  %v6784_v32 = vld [vmem:[#allocation2 + $0x8] ss:$36 sps:$4 sm:$0xff]   ;;  %v6787_v41 = vld [vmem:[#allocation2 + $0x120] ss:$36 sps:$4 sm:$0xff]  }
  0x55   : > { %v6786_v33 = vld [vmem:[#allocation2 + $0xc] ss:$36 sps:$4 sm:$0xff]   ;;  %v507_v34 = vrot.slane %v506_v26, 4  ;;  %v936_v35 = vsel %vm7277_vm5, %v5476_v23, %v935_v27  ;;  %v937_v37 = vrot.slane %v935_v27, 4  ;;  %v276_v46 = vld [vmem:[%s7100_s14 + $0x48] sm:$0xf] }
  0x56   : > { %v517_v36 = vrot.slane %v516_v31, 4  ;;  %1072 = vst [vmem:[#allocation2 + $0x50] sm:$0xf] %v936_v35  ;;  %v6782_v40 = vld [vmem:[#allocation2 + $0x124] ss:$36 sps:$4 sm:$0xff]   ;;  %4433 = vmatprep.mubr.bf16.mxu1 %v6786_v33  ;;  %v6806_v7 = vld [vmem:[%s8661_s1 + $0x158] sm:$0xff]  }
  0x57   : > { %v512_v42 = vsel %vm7132_vm2, %v507_v34, %v511_v20  ;;  %4434 = vmatmul.mubr.bf16.vlgmr.msra.gmra.mxu1 %v6784_v32  ;;  %v939_v45 = vsel %vm7277_vm5, %v937_v37, %v938_v28  ;;  %v277_v47 = vld [vmem:[%s7100_s14 + $0x4c] sm:$0xf]  ;;  %v346_v48 = vld [vmem:[%s7100_s14 + $0x48] sm:$0xf]  ;;  %4304 = vmatprep.mubr.bf16.mxu0 %v6782_v40  ;;  %308 = vst [vmem:[#allocation2 + $0x1b0] sm:$0xf] %v276_v46 }
  0x58   : > { %v522_v44 = vsel %vm7132_vm2, %v517_v36, %v521_v22  ;;  %805 = vst [vmem:[#allocation2 + $0x16c] sm:$0xf] %v512_v42  ;;  %6496 = vmatpush3.bf16.msra.mxu1 %v6789_v25  ;;  %1073 = vst [vmem:[#allocation2 + $0x74] sm:$0xf] %v939_v45  ;;  %v347_v49 = vld [vmem:[%s7100_s14 + $0x4c] sm:$0xf]  ;;  %4305 = vmatmul.mubr.bf16.gmra.mxu0 %v6787_v41 }
  0x59   : > { %806 = vst [vmem:[#allocation2 + $0x190] sm:$0xf] %v522_v44  ;;  %309 = vst [vmem:[#allocation2 + $0x1d4] sm:$0xf] %v277_v47  ;;  %v348_v50 = vld [vmem:[%s7100_s14 + $0x50] sm:$0x1]  ;;  %6497 = vmatprep.subr.bf16.mxu1 %v6804_v38  ;;  %6391 = vmatprep.subr.bf16.mxu0 %v6806_v7 }
  0x5a   : > { %v524_v51 = vshrl.u32 %v346_v48, 16  ;;  %v527_v52 = vshll.u32 %v346_v48, 16  ;;  %v533_v53 = vshll.u32 %v347_v49, 16  ;;  %v537_v54 = vshrl.u32 %v347_v49, 16  ;;  %v833_v56 = vld [vmem:[%s7100_s14 + $0x18] sm:$0xe] }
  0x5b   : > { %v543_v55 = vshll.u32 %v348_v50, 16  ;;  %v834_v60 = vld [vmem:[%s7100_s14 + $0x1c] sm:$0xf]  ;;  %v835_v61 = vld [vmem:[%s7100_s14 + $0x20] sm:$0x1]  ;;  %v5477_v1 = vrot.slane %v833_v56, 9 }
  0x5c   : > { %v526_v58 = vrot.slane %v524_v51, 4  ;;  %v529_v59 = vrot.slane %v527_v52, 5  ;;  %v535_v62 = vrot.slane %v533_v53, 5  ;;  %v539_v63 = vrot.slane %v537_v54, 4  ;;  %v5495_v2 = vld [vmem:[%s7100_s14 + $0x24] sm:$0xf]  ;;  %6498 = vmatpush3.bf16.msra.mxu1 %v6805_v57 }
  0x5d   : > { %v545_v0 = vrot.slane %v543_v55, 5  ;;  %v942_v4 = vrot.slane %v834_v60, 5  ;;  %v945_v5 = vrot.slane %v835_v61, 5  ;;  %v5496_v6 = vld [vmem:[%s7100_s14 + $0x28] sm:$0xf]  ;;  %v6807_v12 = vld [vmem:[%s8661_s1 + $0x118] sm:$0xff]  }
  0x5e   : > { %v530_v3 = vor.u32 %v529_v59, %v526_v58  ;;  %1139 = vst [vmem:[#allocation2 + $0x9c] sm:$0xf] %v5495_v2  ;;  %v540_v8 = vor.u32 %v539_v63, %v535_v62  ;;  %1140 = vst [vmem:[#allocation2 + $0xc0] sm:$0xf] %v5496_v6  ;;  %v6792_v15 = vld [vmem:[#allocation2 + $0x54] ss:$36 sps:$4 sm:$0xff]   ;;  %6392 = vmatpush3.bf16.msra.mxu0 %v6807_v12 }
  0x5f   : > { %v943_v10 = vsel %vm7277_vm5, %v5477_v1, %v942_v4  ;;  %v944_v11 = vrot.slane %v942_v4, 4  ;;  %v6794_v16 = vld [vmem:[#allocation2 + $0x168] ss:$36 sps:$4 sm:$0xff]   ;;  %v6795_v17 = vld [vmem:[#allocation2 + $0x50] ss:$36 sps:$4 sm:$0xff]   ;;  %4441 = vmatprep.mubr.bf16.mxu1 %v6792_v15 }
  0x60   : > { %v531_v9 = vrot.slane %v530_v3, 4  ;;  %v6790_v13 = vld [vmem:[#allocation2 + $0x16c] ss:$36 sps:$4 sm:$0xff]   ;;  %v541_v14 = vrot.slane %v540_v8, 4  ;;  %1074 = vst [vmem:[#allocation2 + $0x98] sm:$0xf] %v943_v10  ;;  %4442 = vmatmul.mubr.bf16.gmra.mxu1 %v6795_v17 }
  0x61   : > { %v946_v19 = vsel %vm7277_vm5, %v944_v11, %v945_v5  ;;  %4312 = vmatprep.mubr.bf16.mxu0 %v6790_v13  ;;  %v278_v21 = vld [vmem:[%s7100_s14 + $0x54] sm:$0xf]  ;;  %v279_v22 = vld [vmem:[%s7100_s14 + $0x58] sm:$0xf]  ;;  %v351_v25 = vld [vmem:[%s7100_s14 + $0x5c] sm:$0x1] }
  0x62   : > { %v536_v18 = vsel %vm7132_vm2, %v531_v9, %v535_v62  ;;  %v546_v20 = vsel %vm7132_vm2, %v541_v14, %v545_v0  ;;  %1075 = vst [vmem:[#allocation2 + $0xbc] sm:$0xf] %v946_v19  ;;  %4313 = vmatmul.mubr.bf16.gmra.mxu0 %v6794_v16  ;;  %310 = vst [vmem:[#allocation2 + $0x1f8] sm:$0xf] %v278_v21  ;;  %v349_v23 = vld [vmem:[%s7100_s14 + $0x54] sm:$0xf] }
  0x63   : > { %807 = vst [vmem:[#allocation2 + $0x1b4] sm:$0xf] %v536_v18  ;;  %808 = vst [vmem:[#allocation2 + $0x1d8] sm:$0xf] %v546_v20  ;;  %v350_v24 = vld [vmem:[%s7100_s14 + $0x58] sm:$0xf] }
  0x64   : > { %311 = vst [vmem:[#allocation2 + $0x21c] sm:$0xf] %v279_v22  ;;  %v548_v26 = vshrl.u32 %v349_v23, 16  ;;  %v551_v27 = vshll.u32 %v349_v23, 16  ;;  %v557_v28 = vshll.u32 %v350_v24, 16  ;;  %v561_v29 = vshrl.u32 %v350_v24, 16 }
  0x65   : > { %v836_v30 = vld [vmem:[%s7100_s14 + $0x24] sm:$0xe]  ;;  %v567_v31 = vshll.u32 %v351_v25, 16  ;;  %v837_v32 = vld [vmem:[%s7100_s14 + $0x28] sm:$0xf]  ;;  %v6820_v40 = vld [vmem:[%s8661_s1 + $0x150] sm:$0xff]  }
  0x66   : > { %v838_v33 = vld [vmem:[%s7100_s14 + $0x2c] sm:$0x1]  ;;  %v5478_v34 = vrot.slane %v836_v30, 9  ;;  %v550_v35 = vrot.slane %v548_v26, 4  ;;  %v553_v36 = vrot.slane %v551_v27, 5  ;;  %v559_v37 = vrot.slane %v557_v28, 5  ;;  %6393 = vmatprep.subr.bf16.mxu0 %v6820_v40 }
  0x67   : > { %v563_v38 = vrot.slane %v561_v29, 4  ;;  %v949_v41 = vrot.slane %v837_v32, 5  ;;  %v952_v42 = vrot.slane %v838_v33, 5  ;;  %v5497_v44 = vld [vmem:[%s7100_s14 + $0x30] sm:$0xf]  ;;  %v6821_v45 = vld [vmem:[%s8661_s1 + $0x1e8] sm:$0xff]  }
  0x68   : > { %v6800_v46 = vld [vmem:[#allocation2 + $0x9c] ss:$36 sps:$4 sm:$0xff]   ;;  %v554_v47 = vor.u32 %v553_v36, %v550_v35  ;;  %v569_v49 = vrot.slane %v567_v31, 5  ;;  %1141 = vst [vmem:[#allocation2 + $0xe4] sm:$0xf] %v5497_v44  ;;  %6499 = vmatprep.subr.bf16.mxu1 %v6821_v45  ;;  %v6822_v8 = vld [vmem:[%s8661_s1 + $0x110] sm:$0xff]  }
  0x69   : > { %v564_v48 = vor.u32 %v563_v38, %v559_v37  ;;  %v6802_v51 = vld [vmem:[#allocation2 + $0x1b0] ss:$36 sps:$4 sm:$0xff]   ;;  %v950_v52 = vsel %vm7277_vm5, %v5478_v34, %v949_v41  ;;  %v951_v53 = vrot.slane %v949_v41, 4  ;;  %4449 = vmatprep.mubr.bf16.mxu1 %v6800_v46  ;;  %v6803_v54 = vld [vmem:[#allocation2 + $0x98] ss:$36 sps:$4 sm:$0xff]   ;;  %6394 = vmatpush3.bf16.msra.mxu0 %v6822_v8  ;;  %v6823_v34 = vld [vmem:[%s8661_s1 + $0x1a8] sm:$0xff]  }
  0x6a   : > { %v6798_v50 = vld [vmem:[#allocation2 + $0x1b4] ss:$36 sps:$4 sm:$0xff]   ;;  %v555_v55 = vrot.slane %v554_v47, 4  ;;  %1076 = vst [vmem:[#allocation2 + $0xe0] sm:$0xf] %v950_v52  ;;  %4450 = vmatmul.mubr.bf16.gmra.mxu1 %v6803_v54  ;;  %v6831_v54 = vld [vmem:[%s8661_s1 + $0x108] sm:$0xff]  }
  0x6b   : > { %v565_v56 = vrot.slane %v564_v48, 4  ;;  %v5498_v57 = vld [vmem:[%s7100_s14 + $0x34] sm:$0xf]  ;;  %4320 = vmatprep.mubr.bf16.mxu0 %v6798_v50  ;;  %v953_v58 = vsel %vm7277_vm5, %v951_v53, %v952_v42  ;;  %v280_v59 = vld [vmem:[%s7100_s14 + $0x60] sm:$0xf]  ;;  %6500 = vmatpush3.bf16.msra.mxu1 %v6823_v34 }
  0x6c   : > { %1142 = vst [vmem:[#allocation2 + $0x108] sm:$0xf] %v5498_v57  ;;  %v281_v60 = vld [vmem:[%s7100_s14 + $0x64] sm:$0xf]  ;;  %v352_v61 = vld [vmem:[%s7100_s14 + $0x60] sm:$0xf]  ;;  %4321 = vmatmul.mubr.bf16.gmra.mxu0 %v6802_v51  ;;  %v560_v62 = vsel %vm7132_vm2, %v555_v55, %v559_v37 }
  0x6d   : > { %v570_v63 = vsel %vm7132_vm2, %v565_v56, %v569_v49  ;;  %1077 = vst [vmem:[#allocation2 + $0x104] sm:$0xf] %v953_v58  ;;  %312 = vst [vmem:[#allocation2 + $0x240] sm:$0xf] %v280_v59  ;;  %v353_v0 = vld [vmem:[%s7100_s14 + $0x64] sm:$0xf] }
  0x6e   : > { %313 = vst [vmem:[#allocation2 + $0x264] sm:$0xf] %v281_v60  ;;  %v354_v1 = vld [vmem:[%s7100_s14 + $0x68] sm:$0x1]  ;;  %v572_v2 = vshrl.u32 %v352_v61, 16  ;;  %v575_v3 = vshll.u32 %v352_v61, 16 }
  0x6f   : > { %809 = vst [vmem:[#allocation2 + $0x1fc] sm:$0xf] %v560_v62  ;;  %810 = vst [vmem:[#allocation2 + $0x220] sm:$0xf] %v570_v63  ;;  %v581_v4 = vshll.u32 %v353_v0, 16  ;;  %v585_v5 = vshrl.u32 %v353_v0, 16 }
  0x70   : > { %v591_v6 = vshll.u32 %v354_v1, 16  ;;  %v839_v7 = vld [vmem:[%s7100_s14 + $0x30] sm:$0xe]  ;;  %v574_v9 = vrot.slane %v572_v2, 4  ;;  %v577_v10 = vrot.slane %v575_v3, 5  ;;  %v6830_v49 = vld [vmem:[%s8661_s1 + $0x148] sm:$0xff]  }
  0x71   : > { %v840_v11 = vld [vmem:[%s7100_s14 + $0x34] sm:$0xf]  ;;  %v841_v12 = vld [vmem:[%s7100_s14 + $0x38] sm:$0x1]  ;;  %v583_v13 = vrot.slane %v581_v4, 5  ;;  %v587_v14 = vrot.slane %v585_v5, 4  ;;  %6395 = vmatprep.subr.bf16.mxu0 %v6830_v49 }
  0x72   : > { %v5479_v15 = vrot.slane %v839_v7, 9  ;;  %v5499_v16 = vld [vmem:[%s7100_s14 + $0x3c] sm:$0xf]  ;;  %v578_v17 = vor.u32 %v577_v10, %v574_v9  ;;  %v956_v18 = vrot.slane %v840_v11, 5  ;;  %v959_v19 = vrot.slane %v841_v12, 5  ;;  %v6838_v58 = vld [vmem:[%s8661_s1 + $0x1e0] sm:$0xff]   ;;  %6396 = vmatpush3.bf16.msra.mxu0 %v6831_v54 }
  0x73   : > { %v5500_v20 = vld [vmem:[%s7100_s14 + $0x40] sm:$0xf]  ;;  %1143 = vst [vmem:[#allocation2 + $0x12c] sm:$0xf] %v5499_v16  ;;  %v588_v21 = vor.u32 %v587_v14, %v583_v13  ;;  %v593_v22 = vrot.slane %v591_v6, 5  ;;  %6501 = vmatprep.subr.bf16.mxu1 %v6838_v58 }
  0x74   : > { %1144 = vst [vmem:[#allocation2 + $0x150] sm:$0xf] %v5500_v20  ;;  %v579_v23 = vrot.slane %v578_v17, 4  ;;  %v957_v24 = vsel %vm7277_vm5, %v5479_v15, %v956_v18  ;;  %v958_v25 = vrot.slane %v956_v18, 4  ;;  %v6810_v26 = vld [vmem:[#allocation2 + $0xe4] ss:$36 sps:$4 sm:$0xff]  }
  0x75   : > { %v6813_v27 = vld [vmem:[#allocation2 + $0xe0] ss:$36 sps:$4 sm:$0xff]   ;;  %v589_v28 = vrot.slane %v588_v21, 4  ;;  %1078 = vst [vmem:[#allocation2 + $0x128] sm:$0xf] %v957_v24  ;;  %4457 = vmatprep.mubr.bf16.mxu1 %v6810_v26 }
  0x76   : > { %v6808_v29 = vld [vmem:[#allocation2 + $0x1fc] ss:$36 sps:$4 sm:$0xff]   ;;  %v584_v30 = vsel %vm7132_vm2, %v579_v23, %v583_v13  ;;  %v960_v31 = vsel %vm7277_vm5, %v958_v25, %v959_v19  ;;  %4458 = vmatmul.mubr.bf16.gmra.mxu1 %v6813_v27  ;;  %v282_v35 = vld [vmem:[%s7100_s14 + $0x6c] sm:$0xf]  ;;  %v283_v36 = vld [vmem:[%s7100_s14 + $0x70] sm:$0xf] }
  0x77   : > { %v6812_v32 = vld [vmem:[#allocation2 + $0x1f8] ss:$36 sps:$4 sm:$0xff]   ;;  %v594_v33 = vsel %vm7132_vm2, %v589_v28, %v593_v22  ;;  %811 = vst [vmem:[#allocation2 + $0x244] sm:$0xf] %v584_v30  ;;  %1079 = vst [vmem:[#allocation2 + $0x14c] sm:$0xf] %v960_v31  ;;  %4328 = vmatprep.mubr.bf16.mxu0 %v6808_v29 }
  0x78   : > { %812 = vst [vmem:[#allocation2 + $0x268] sm:$0xf] %v594_v33  ;;  %4329 = vmatmul.mubr.bf16.gmra.mxu0 %v6812_v32  ;;  %314 = vst [vmem:[#allocation2 + $0x288] sm:$0xf] %v282_v35  ;;  %v355_v37 = vld [vmem:[%s7100_s14 + $0x6c] sm:$0xf] }
  0x79   : > { %v356_v38 = vld [vmem:[%s7100_s14 + $0x70] sm:$0xf]  ;;  %315 = vst [vmem:[#allocation2 + $0x2ac] sm:$0xf] %v283_v36  ;;  %v357_v40 = vld [vmem:[%s7100_s14 + $0x74] sm:$0x1] }
  0x7a   : > { %v596_v41 = vshrl.u32 %v355_v37, 16  ;;  %v599_v42 = vshll.u32 %v355_v37, 16  ;;  %v605_v44 = vshll.u32 %v356_v38, 16  ;;  %v609_v45 = vshrl.u32 %v356_v38, 16  ;;  %v842_v47 = vld [vmem:[%s7100_s14 + $0x3c] sm:$0xe] }
  0x7b   : > { %v615_v46 = vshll.u32 %v357_v40, 16  ;;  %v843_v48 = vld [vmem:[%s7100_s14 + $0x40] sm:$0xf]  ;;  %v844_v55 = vld [vmem:[%s7100_s14 + $0x44] sm:$0x1]  ;;  %v5480_v56 = vrot.slane %v842_v47, 9 }
  0x7c   : > { %v598_v50 = vrot.slane %v596_v41, 4  ;;  %v601_v51 = vrot.slane %v599_v42, 5  ;;  %v607_v52 = vrot.slane %v605_v44, 5  ;;  %v611_v53 = vrot.slane %v609_v45, 4  ;;  %v6816_v59 = vld [vmem:[#allocation2 + $0x12c] ss:$36 sps:$4 sm:$0xff]  }
  0x7d   : > { %v963_v57 = vrot.slane %v843_v48, 5  ;;  %v617_v62 = vrot.slane %v615_v46, 5  ;;  %v966_v63 = vrot.slane %v844_v55, 5  ;;  %v6818_v1 = vld [vmem:[#allocation2 + $0x240] ss:$36 sps:$4 sm:$0xff]   ;;  %4465 = vmatprep.mubr.bf16.mxu1 %v6816_v59 }
  0x7e   : > { %v602_v60 = vor.u32 %v601_v51, %v598_v50  ;;  %v612_v61 = vor.u32 %v611_v53, %v607_v52  ;;  %v6819_v4 = vld [vmem:[#allocation2 + $0x128] ss:$36 sps:$4 sm:$0xff]   ;;  %v284_v12 = vld [vmem:[%s7100_s14 + $0x78] sm:$0xf]  ;;  %v285_v13 = vld [vmem:[%s7100_s14 + $0x7c] sm:$0xf] }
  0x7f   : > { %v6814_v0 = vld [vmem:[#allocation2 + $0x244] ss:$36 sps:$4 sm:$0xff]   ;;  %v964_v2 = vsel %vm7277_vm5, %v5480_v56, %v963_v57  ;;  %v965_v3 = vrot.slane %v963_v57, 4  ;;  %v5502_v9 = vld [vmem:[%s7100_s14 + $0x4c] sm:$0xf]  ;;  %4466 = vmatmul.mubr.bf16.gmra.mxu1 %v6819_v4 }
  0x80   : > { %v603_v5 = vrot.slane %v602_v60, 4  ;;  %v613_v6 = vrot.slane %v612_v61, 4  ;;  %1080 = vst [vmem:[#allocation2 + $0x170] sm:$0xf] %v964_v2  ;;  %v5501_v7 = vld [vmem:[%s7100_s14 + $0x48] sm:$0xf]  ;;  %4336 = vmatprep.mubr.bf16.mxu0 %v6814_v0 }
  0x81   : > { %v967_v8 = vsel %vm7277_vm5, %v965_v3, %v966_v63  ;;  %1145 = vst [vmem:[#allocation2 + $0x174] sm:$0xf] %v5501_v7  ;;  %4337 = vmatmul.mubr.bf16.gmra.mxu0 %v6818_v1  ;;  %1146 = vst [vmem:[#allocation2 + $0x198] sm:$0xf] %v5502_v9  ;;  %v358_v14 = vld [vmem:[%s7100_s14 + $0x78] sm:$0xf] }
  0x82   : > { %v608_v10 = vsel %vm7132_vm2, %v603_v5, %v607_v52  ;;  %v618_v11 = vsel %vm7132_vm2, %v613_v6, %v617_v62  ;;  %1081 = vst [vmem:[#allocation2 + $0x194] sm:$0xf] %v967_v8  ;;  %316 = vst [vmem:[#allocation2 + $0x2d0] sm:$0xf] %v284_v12  ;;  %v359_v15 = vld [vmem:[%s7100_s14 + $0x7c] sm:$0xf] }
  0x83   : > { %813 = vst [vmem:[#allocation2 + $0x28c] sm:$0xf] %v608_v10  ;;  %814 = vst [vmem:[#allocation2 + $0x2b0] sm:$0xf] %v618_v11  ;;  %v360_v16 = vld [vmem:[%s7100_s14 + $0x80] sm:$0x1] }
  0x84   : > { %317 = vst [vmem:[#allocation2 + $0x2f4] sm:$0xf] %v285_v13  ;;  %v620_v17 = vshrl.u32 %v358_v14, 16  ;;  %v623_v18 = vshll.u32 %v358_v14, 16  ;;  %v629_v19 = vshll.u32 %v359_v15, 16  ;;  %v633_v20 = vshrl.u32 %v359_v15, 16 }
  0x85   : > { %v639_v21 = vshll.u32 %v360_v16, 16  ;;  %v845_v22 = vld [vmem:[%s7100_s14 + $0x48] sm:$0xe]  ;;  %v846_v23 = vld [vmem:[%s7100_s14 + $0x4c] sm:$0xf]  ;;  %v6839_v24 = vld [vmem:[%s8661_s1 + $0x1a0] sm:$0xff]  }
  0x86   : > { %v622_v25 = vrot.slane %v620_v17, 4  ;;  %v625_v26 = vrot.slane %v623_v18, 5  ;;  %v631_v27 = vrot.slane %v629_v19, 5  ;;  %v635_v28 = vrot.slane %v633_v20, 4  ;;  %v847_v29 = vld [vmem:[%s7100_s14 + $0x50] sm:$0x1]  ;;  %6502 = vmatpush3.bf16.msra.mxu1 %v6839_v24 }
  0x87   : > { %v5481_v30 = vrot.slane %v845_v22, 9  ;;  %v970_v31 = vrot.slane %v846_v23, 5  ;;  %v973_v32 = vrot.slane %v847_v29, 5  ;;  %v5503_v33 = vld [vmem:[%s7100_s14 + $0x54] sm:$0xf]  ;;  %v641_v36 = vrot.slane %v639_v21, 5 }
  0x88   : > { %v626_v34 = vor.u32 %v625_v26, %v622_v25  ;;  %v636_v35 = vor.u32 %v635_v28, %v631_v27  ;;  %v5504_v37 = vld [vmem:[%s7100_s14 + $0x58] sm:$0xf]  ;;  %1147 = vst [vmem:[#allocation2 + $0x1bc] sm:$0xf] %v5503_v33  ;;  %v6828_v47 = vld [vmem:[#allocation2 + $0x288] ss:$36 sps:$4 sm:$0xff]  }
  0x89   : > { %v6826_v38 = vld [vmem:[#allocation2 + $0x174] ss:$36 sps:$4 sm:$0xff]   ;;  %v971_v41 = vsel %vm7277_vm5, %v5481_v30, %v970_v31  ;;  %v972_v42 = vrot.slane %v970_v31, 4  ;;  %1148 = vst [vmem:[#allocation2 + $0x1e0] sm:$0xf] %v5504_v37  ;;  %v6846_v12 = vld [vmem:[%s8661_s1 + $0x140] sm:$0xff]  }
  0x8a   : > { %v6829_v40 = vld [vmem:[#allocation2 + $0x170] ss:$36 sps:$4 sm:$0xff]   ;;  %v627_v45 = vrot.slane %v626_v34, 4  ;;  %v637_v46 = vrot.slane %v636_v35, 4  ;;  %1082 = vst [vmem:[#allocation2 + $0x1b8] sm:$0xf] %v971_v41  ;;  %4473 = vmatprep.mubr.bf16.mxu1 %v6826_v38  ;;  %6397 = vmatprep.subr.bf16.mxu0 %v6846_v12 }
  0x8b   : > { %v6824_v44 = vld [vmem:[#allocation2 + $0x28c] ss:$36 sps:$4 sm:$0xff]   ;;  %v974_v48 = vsel %vm7277_vm5, %v972_v42, %v973_v32  ;;  %4474 = vmatmul.mubr.bf16.gmra.mxu1 %v6829_v40  ;;  %v286_v51 = vld [vmem:[%s7100_s14 + $0x84] sm:$0xf]  ;;  %v287_v52 = vld [vmem:[%s7100_s14 + $0x88] sm:$0xf] }
  0x8c   : > { %4344 = vmatprep.mubr.bf16.mxu0 %v6824_v44  ;;  %v632_v49 = vsel %vm7132_vm2, %v627_v45, %v631_v27  ;;  %v642_v50 = vsel %vm7132_vm2, %v637_v46, %v641_v36  ;;  %1083 = vst [vmem:[#allocation2 + $0x1dc] sm:$0xf] %v974_v48  ;;  %318 = vst [vmem:[#allocation2 + $0x318] sm:$0xf] %v286_v51  ;;  %v361_v53 = vld [vmem:[%s7100_s14 + $0x84] sm:$0xf] }
  0x8d   : > { %4345 = vmatmul.mubr.bf16.gmra.mxu0 %v6828_v47  ;;  %815 = vst [vmem:[#allocation2 + $0x2d4] sm:$0xf] %v632_v49  ;;  %816 = vst [vmem:[#allocation2 + $0x2f8] sm:$0xf] %v642_v50  ;;  %v362_v54 = vld [vmem:[%s7100_s14 + $0x88] sm:$0xf] }
  0x8e   : > { %319 = vst [vmem:[#allocation2 + $0x33c] sm:$0xf] %v287_v52  ;;  %v363_v55 = vld [vmem:[%s7100_s14 + $0x8c] sm:$0x1]  ;;  %v644_v56 = vshrl.u32 %v361_v53, 16  ;;  %v647_v57 = vshll.u32 %v361_v53, 16 }
  0x8f   : > { %v653_v58 = vshll.u32 %v362_v54, 16  ;;  %v657_v59 = vshrl.u32 %v362_v54, 16  ;;  %v848_v60 = vld [vmem:[%s7100_s14 + $0x54] sm:$0xe]  ;;  %v663_v61 = vshll.u32 %v363_v55, 16  ;;  %v6847_v24 = vld [vmem:[%s8661_s1 + $0x100] sm:$0xff]  }
  0x90   : > { %v849_v62 = vld [vmem:[%s7100_s14 + $0x58] sm:$0xf]  ;;  %v850_v63 = vld [vmem:[%s7100_s14 + $0x5c] sm:$0x1]  ;;  %v5482_v0 = vrot.slane %v848_v60, 9  ;;  %v646_v1 = vrot.slane %v644_v56, 4  ;;  %6398 = vmatpush3.bf16.msra.mxu0 %v6847_v24 }
  0x91   : > { %v649_v2 = vrot.slane %v647_v57, 5  ;;  %v655_v3 = vrot.slane %v653_v58, 5  ;;  %v659_v4 = vrot.slane %v657_v59, 4  ;;  %v5505_v5 = vld [vmem:[%s7100_s14 + $0x60] sm:$0xf]  ;;  %v977_v6 = vrot.slane %v849_v62, 5 }
  0x92   : > { %v980_v7 = vrot.slane %v850_v63, 5  ;;  %v5506_v8 = vld [vmem:[%s7100_s14 + $0x64] sm:$0xf]  ;;  %1149 = vst [vmem:[#allocation2 + $0x204] sm:$0xf] %v5505_v5  ;;  %v665_v11 = vrot.slane %v663_v61, 5 }
  0x93   : > { %v650_v9 = vor.u32 %v649_v2, %v646_v1  ;;  %v660_v10 = vor.u32 %v659_v4, %v655_v3  ;;  %1150 = vst [vmem:[#allocation2 + $0x228] sm:$0xf] %v5506_v8  ;;  %v6834_v13 = vld [vmem:[#allocation2 + $0x1bc] ss:$36 sps:$4 sm:$0xff]   ;;  %v978_v15 = vsel %vm7277_vm5, %v5482_v0, %v977_v6  ;;  %v979_v16 = vrot.slane %v977_v6, 4 }
  0x94   : > { %v6837_v14 = vld [vmem:[#allocation2 + $0x1b8] ss:$36 sps:$4 sm:$0xff]   ;;  %1084 = vst [vmem:[#allocation2 + $0x200] sm:$0xf] %v978_v15  ;;  %4481 = vmatprep.mubr.bf16.mxu1 %v6834_v13  ;;  %v6836_v20 = vld [vmem:[#allocation2 + $0x2d0] ss:$36 sps:$4 sm:$0xff]  }
  0x95   : > { %v6832_v17 = vld [vmem:[#allocation2 + $0x2d4] ss:$36 sps:$4 sm:$0xff]   ;;  %v651_v18 = vrot.slane %v650_v9, 4  ;;  %v661_v19 = vrot.slane %v660_v10, 4  ;;  %v981_v21 = vsel %vm7277_vm5, %v979_v16, %v980_v7  ;;  %4482 = vmatmul.mubr.bf16.gmra.mxu1 %v6837_v14  ;;  %v851_v25 = vld [vmem:[%s7100_s14 + $0x60] sm:$0xe] }
  0x96   : > { %4352 = vmatprep.mubr.bf16.mxu0 %v6832_v17  ;;  %1085 = vst [vmem:[#allocation2 + $0x224] sm:$0xf] %v981_v21  ;;  %v852_v26 = vld [vmem:[%s7100_s14 + $0x64] sm:$0xf]  ;;  %v853_v27 = vld [vmem:[%s7100_s14 + $0x68] sm:$0x1] }
  0x97   : > { %v656_v22 = vsel %vm7132_vm2, %v651_v18, %v655_v3  ;;  %v666_v23 = vsel %vm7132_vm2, %v661_v19, %v665_v11  ;;  %4353 = vmatmul.mubr.bf16.gmra.mxu0 %v6836_v20  ;;  %v5483_v28 = vrot.slane %v851_v25, 9  ;;  %v984_v29 = vrot.slane %v852_v26, 5  ;;  %v5507_v30 = vld [vmem:[%s7100_s14 + $0x6c] sm:$0xf]  ;;  %v5508_v32 = vld [vmem:[%s7100_s14 + $0x70] sm:$0xf] }
  0x98   : > { %817 = vst [vmem:[#allocation2 + $0x31c] sm:$0xf] %v656_v22  ;;  %818 = vst [vmem:[#allocation2 + $0x340] sm:$0xf] %v666_v23  ;;  %v987_v31 = vrot.slane %v853_v27, 5  ;;  %v6854_v34 = vld [vmem:[%s8661_s1 + $0x1d8] sm:$0xff]  }
  0x99   : > { %1151 = vst [vmem:[#allocation2 + $0x24c] sm:$0xf] %v5507_v30  ;;  %v5523_v33 = vld [vmem:[%s7100_s14 + $0xc] sm:$0xf]  ;;  %v985_v35 = vsel %vm7277_vm5, %v5483_v28, %v984_v29  ;;  %v986_v36 = vrot.slane %v984_v29, 4  ;;  %6503 = vmatprep.subr.bf16.mxu1 %v6854_v34  ;;  %v6855_v4 = vld [vmem:[%s8661_s1 + $0x198] sm:$0xff]  }
  0x9a   : > { %1152 = vst [vmem:[#allocation2 + $0x270] sm:$0xf] %v5508_v32  ;;  %v5524_v37 = vld [vmem:[%s7100_s14 + $0x10] sm:$0xf]  ;;  %v5525_v38 = vld [vmem:[%s7100_s14 + $0x14] sm:$0x1]  ;;  %6504 = vmatpush3.bf16.msra.mxu1 %v6855_v4 }
  0x9b   : > { %v1216_v40 = vshrl.u32 %v5523_v33, 16  ;;  %1086 = vst [vmem:[#allocation2 + $0x248] sm:$0xf] %v985_v35  ;;  %v1219_v41 = vshll.u32 %v5523_v33, 16  ;;  %v1225_v42 = vshll.u32 %v5524_v37, 16  ;;  %v1229_v44 = vshrl.u32 %v5524_v37, 16 }
  0x9c   : > { %v1235_v45 = vshll.u32 %v5525_v38, 16  ;;  %v5571_v46 = vld [vmem:[%s7100_s14 + $0xc] sm:$0xe]  ;;  %v988_v47 = vsel %vm7277_vm5, %v986_v36, %v987_v31  ;;  %v5572_v49 = vld [vmem:[%s7100_s14 + $0x10] sm:$0xf]  ;;  %v7503_v8 = vld [vmem:[%s8661_s1 + $0x238] sm:$0xff]  }
  0x9d   : > { %v1218_v48 = vrot.slane %v1216_v40, 4  ;;  %v5573_v50 = vld [vmem:[%s7100_s14 + $0x14] sm:$0x1]  ;;  %1087 = vst [vmem:[#allocation2 + $0x26c] sm:$0xf] %v988_v47  ;;  %v1221_v51 = vrot.slane %v1219_v41, 5  ;;  %6631 = vmatprep.subr.bf16.mxu0 %v7503_v8 }
  0x9e   : > { %v1227_v52 = vrot.slane %v1225_v42, 5  ;;  %v1231_v53 = vrot.slane %v1229_v44, 4  ;;  %v1237_v54 = vrot.slane %v1235_v45, 5  ;;  %v6842_v55 = vld [vmem:[#allocation2 + $0x204] ss:$36 sps:$4 sm:$0xff]   ;;  %v5619_v57 = vrot.slane %v5571_v46, 9 }
  0x9f   : > { %v6845_v56 = vld [vmem:[#allocation2 + $0x200] ss:$36 sps:$4 sm:$0xff]   ;;  %v1222_v59 = vor.u32 %v1221_v51, %v1218_v48  ;;  %v1761_v61 = vrot.slane %v5572_v49, 5  ;;  %v1764_v62 = vrot.slane %v5573_v50, 5  ;;  %4489 = vmatprep.mubr.bf16.mxu1 %v6842_v55  ;;  %v6844_v63 = vld [vmem:[#allocation2 + $0x318] ss:$36 sps:$4 sm:$0xff]  }
  0xa0   : > { %v6840_v58 = vld [vmem:[#allocation2 + $0x31c] ss:$36 sps:$4 sm:$0xff]   ;;  %v1232_v60 = vor.u32 %v1231_v53, %v1227_v52  ;;  %4490 = vmatmul.mubr.bf16.gmra.mxu1 %v6845_v56  ;;  %v854_v9 = vld [vmem:[%s7100_s14 + $0x6c] sm:$0xe]  ;;  %v855_v10 = vld [vmem:[%s7100_s14 + $0x70] sm:$0xf] }
  0xa1   : > { %4360 = vmatprep.mubr.bf16.mxu0 %v6840_v58  ;;  %v1223_v0 = vrot.slane %v1222_v59, 4  ;;  %v1762_v2 = vsel %vm7277_vm5, %v5619_v57, %v1761_v61  ;;  %v1763_v3 = vrot.slane %v1761_v61, 4  ;;  %v6848_v11 = vld [vmem:[#allocation2 + $0x24c] ss:$36 sps:$4 sm:$0xff]   ;;  %v5484_v13 = vrot.slane %v854_v9, 9 }
  0xa2   : > { %v1233_v1 = vrot.slane %v1232_v60, 4  ;;  %4361 = vmatmul.mubr.bf16.gmra.mxu0 %v6844_v63  ;;  %1903 = vst [vmem:[#allocation2 + $0x14] sm:$0xf] %v1762_v2  ;;  %v856_v14 = vld [vmem:[%s7100_s14 + $0x74] sm:$0x1]  ;;  %v991_v15 = vrot.slane %v855_v10, 5  ;;  %4497 = vmatprep.mubr.bf16.mxu1 %v6848_v11 }
  0xa3   : > { %v1228_v5 = vsel %vm7132_vm2, %v1223_v0, %v1227_v52  ;;  %v1765_v7 = vsel %vm7277_vm5, %v1763_v3, %v1764_v62  ;;  %v5509_v16 = vld [vmem:[%s7100_s14 + $0x78] sm:$0xf]  ;;  %v6869_v17 = vld [vmem:[%s8661_s1 + $0x1d0] sm:$0xff]   ;;  %v994_v18 = vrot.slane %v856_v14, 5  ;;  %v5510_v19 = vld [vmem:[%s7100_s14 + $0x7c] sm:$0xf] }
  0xa4   : > { %v1238_v6 = vsel %vm7132_vm2, %v1233_v1, %v1237_v54  ;;  %1631 = vst [vmem:[#allocation2 + $0x10] sm:$0xf] %v1228_v5  ;;  %1904 = vst [vmem:[#allocation2 + $0x38] sm:$0xf] %v1765_v7  ;;  %v6853_v12 = vld [vmem:[#allocation2 + $0x248] ss:$36 sps:$4 sm:$0xff]   ;;  %v992_v22 = vsel %vm7277_vm5, %v5484_v13, %v991_v15  ;;  %6505 = vmatprep.subr.bf16.mxu1 %v6869_v17 }
  0xa5   : > { %1632 = vst [vmem:[#allocation2 + $0x34] sm:$0xf] %v1238_v6  ;;  %1153 = vst [vmem:[#allocation2 + $0x294] sm:$0xf] %v5509_v16  ;;  %v5526_v20 = vld [vmem:[%s7100_s14 + $0x18] sm:$0xf] }
  0xa6   : > { %v6870_v21 = vld [vmem:[%s8661_s1 + $0x190] sm:$0xff]   ;;  %v993_v23 = vrot.slane %v991_v15, 4  ;;  %1154 = vst [vmem:[#allocation2 + $0x2b8] sm:$0xf] %v5510_v19  ;;  %v5527_v24 = vld [vmem:[%s7100_s14 + $0x1c] sm:$0xf] }
  0xa7   : > { %v5528_v25 = vld [vmem:[%s7100_s14 + $0x20] sm:$0x1]  ;;  %v1240_v26 = vshrl.u32 %v5526_v20, 16  ;;  %1088 = vst [vmem:[#allocation2 + $0x290] sm:$0xf] %v992_v22  ;;  %v1243_v27 = vshll.u32 %v5526_v20, 16  ;;  %6506 = vmatpush3.bf16.msra.mxu1 %v6870_v21 }
  0xa8   : > { %v1249_v28 = vshll.u32 %v5527_v24, 16  ;;  %v1253_v29 = vshrl.u32 %v5527_v24, 16  ;;  %v1259_v30 = vshll.u32 %v5528_v25, 16  ;;  %v5574_v31 = vld [vmem:[%s7100_s14 + $0x18] sm:$0xe]  ;;  %4498 = vmatmul.mubr.bf16.gmra.mxu1 %v6853_v12  ;;  %v995_v32 = vsel %vm7277_vm5, %v993_v23, %v994_v18  ;;  %v6871_v57 = vld [vmem:[%s8661_s1 + $0x230] sm:$0xff]  }
  0xa9   : > { %v1242_v33 = vrot.slane %v1240_v26, 4  ;;  %v5575_v34 = vld [vmem:[%s7100_s14 + $0x1c] sm:$0xf]  ;;  %v5576_v35 = vld [vmem:[%s7100_s14 + $0x20] sm:$0x1]  ;;  %v5620_v36 = vrot.slane %v5574_v31, 9 }
  0xaa   : > { %1089 = vst [vmem:[#allocation2 + $0x2b4] sm:$0xf] %v995_v32  ;;  %v1245_v37 = vrot.slane %v1243_v27, 5  ;;  %v1251_v38 = vrot.slane %v1249_v28, 5  ;;  %v1255_v40 = vrot.slane %v1253_v29, 4  ;;  %v1261_v41 = vrot.slane %v1259_v30, 5 }
  0xab   : > { %v857_v42 = vld [vmem:[%s7100_s14 + $0x78] sm:$0xe]  ;;  %v1768_v45 = vrot.slane %v5575_v34, 5  ;;  %v1771_v46 = vrot.slane %v5576_v35, 5  ;;  %v858_v50 = vld [vmem:[%s7100_s14 + $0x7c] sm:$0xf] }
  0xac   : > { %v6850_v44 = vld [vmem:[#allocation2 + $0x10] ss:$36 sps:$4 sm:$0xff]   ;;  %v1246_v48 = vor.u32 %v1245_v37, %v1242_v33  ;;  %v1256_v49 = vor.u32 %v1255_v40, %v1251_v38  ;;  %v859_v51 = vld [vmem:[%s7100_s14 + $0x80] sm:$0x1]  ;;  %v5485_v54 = vrot.slane %v857_v42, 9  ;;  %v998_v55 = vrot.slane %v858_v50, 5 }
  0xad   : > { %v6852_v47 = vld [vmem:[#allocation2 + $0x14] ss:$36 sps:$4 sm:$0xff]   ;;  %v1769_v52 = vsel %vm7277_vm5, %v5620_v36, %v1768_v45  ;;  %v1770_v53 = vrot.slane %v1768_v45, 4  ;;  %v5511_v56 = vld [vmem:[%s7100_s14 + $0x84] sm:$0xf]  ;;  %v1001_v60 = vrot.slane %v859_v51, 5 }
  0xae   : > { %4594 = vmatprep.mubr.bf16.mxu0 %v6852_v47  ;;  %v1247_v58 = vrot.slane %v1246_v48, 4  ;;  %v1257_v59 = vrot.slane %v1256_v49, 4  ;;  %1905 = vst [vmem:[#allocation2 + $0x5c] sm:$0xf] %v1769_v52  ;;  %v5512_v61 = vld [vmem:[%s7100_s14 + $0x88] sm:$0xf]  ;;  %v999_v0 = vsel %vm7277_vm5, %v5485_v54, %v998_v55 }
  0xaf   : > { %1155 = vst [vmem:[#allocation2 + $0x2dc] sm:$0xf] %v5511_v56  ;;  %v6884_v62 = vld [vmem:[%s8661_s1 + $0x1c8] sm:$0xff]   ;;  %4595 = vmatmul.mubr.bf16.vlgmr.msra.gmra.mxu0 %v6850_v44  ;;  %v1772_v63 = vsel %vm7277_vm5, %v1770_v53, %v1771_v46  ;;  %v1000_v1 = vrot.slane %v998_v55, 4  ;;  %1156 = vst [vmem:[#allocation2 + $0x300] sm:$0xf] %v5512_v61 }
  0xb0   : > { %v5529_v2 = vld [vmem:[%s7100_s14 + $0x24] sm:$0xf]  ;;  %v5530_v3 = vld [vmem:[%s7100_s14 + $0x28] sm:$0xf]  ;;  %6632 = vmatpush3.bf16.msra.mxu0 %v7503_v8  ;;  %v1252_v4 = vsel %vm7132_vm2, %v1247_v58, %v1251_v38  ;;  %v1262_v5 = vsel %vm7132_vm2, %v1257_v59, %v1261_v41  ;;  %1906 = vst [vmem:[#allocation2 + $0x80] sm:$0xf] %v1772_v63  ;;  %6507 = vmatprep.subr.bf16.mxu1 %v6884_v62 }
  0xb1   : > { %1090 = vst [vmem:[#allocation2 + $0x2d8] sm:$0xf] %v999_v0  ;;  %v5531_v6 = vld [vmem:[%s7100_s14 + $0x2c] sm:$0x1]  ;;  %v1264_v7 = vshrl.u32 %v5529_v2, 16  ;;  %v1267_v9 = vshll.u32 %v5529_v2, 16  ;;  %v1002_v8 = vsel %vm7277_vm5, %v1000_v1, %v1001_v60  ;;  %6633 = vmatprep.subr.bf16.mxu0 %v6871_v57 }
  0xb2   : > { %v5577_v10 = vld [vmem:[%s7100_s14 + $0x24] sm:$0xe]  ;;  %v6857_v11 = vld [vmem:[#allocation2 + $0x294] ss:$36 sps:$4 sm:$0xff]   ;;  %1633 = vst [vmem:[#allocation2 + $0x58] sm:$0xf] %v1252_v4 }
  0xb3   : > { %1634 = vst [vmem:[#allocation2 + $0x7c] sm:$0xf] %v1262_v5  ;;  %v6861_v12 = vld [vmem:[#allocation2 + $0x290] ss:$36 sps:$4 sm:$0xff]   ;;  %v1273_v13 = vshll.u32 %v5530_v3, 16  ;;  %v1266_v14 = vrot.slane %v1264_v7, 4  ;;  %4505 = vmatprep.mubr.bf16.mxu1 %v6857_v11 }
  0xb4   : > { %1091 = vst [vmem:[#allocation2 + $0x2fc] sm:$0xf] %v1002_v8  ;;  %v1269_v15 = vrot.slane %v1267_v9, 5  ;;  %v1277_v16 = vshrl.u32 %v5530_v3, 16  ;;  %v1283_v17 = vshll.u32 %v5531_v6, 16  ;;  %v5621_v21 = vrot.slane %v5577_v10, 9  ;;  %4506 = vmatmul.mubr.bf16.gmra.mxu1 %v6861_v12  ;;  %6634 = vmatpush3.bf16.msra.mxu0 %v6871_v57 }
  0xb5   : > { %v5578_v18 = vld [vmem:[%s7100_s14 + $0x28] sm:$0xf]  ;;  %v1275_v19 = vrot.slane %v1273_v13, 5  ;;  %v5579_v20 = vld [vmem:[%s7100_s14 + $0x2c] sm:$0x1]  ;;  %v6899_v31 = vld [vmem:[%s8661_s1 + $0x1c0] sm:$0xff]  }
  0xb6   : > { %v1775_v22 = vrot.slane %v5578_v18, 5  ;;  %v6885_v23 = vld [vmem:[%s8661_s1 + $0x188] sm:$0xff]   ;;  %v1270_v24 = vor.u32 %v1269_v15, %v1266_v14  ;;  %v1279_v25 = vrot.slane %v1277_v16, 4  ;;  %v1285_v26 = vrot.slane %v1283_v17, 5  ;;  %v6900_v34 = vld [vmem:[%s8661_s1 + $0x180] sm:$0xff]   ;;  %v6914_v9 = vld [vmem:[%s8661_s1 + $0x218] sm:$0xff]  }
  0xb7   : > { %v1778_v27 = vrot.slane %v5579_v20, 5  ;;  %v6886_v28 = vld [vmem:[%s8661_s1 + $0x228] sm:$0xff]   ;;  %6508 = vmatpush3.bf16.msra.mxu1 %v6885_v23  ;;  %v860_v36 = vld [vmem:[%s7100_s14 + $0x84] sm:$0xe]  ;;  %v6859_v37 = vld [vmem:[#allocation2 + $0x5c] ss:$36 sps:$4 sm:$0xff]  }
  0xb8   : > { %v1776_v29 = vsel %vm7277_vm5, %v5621_v21, %v1775_v22  ;;  %v1777_v30 = vrot.slane %v1775_v22, 4  ;;  %v1271_v32 = vrot.slane %v1270_v24, 4  ;;  %v1280_v33 = vor.u32 %v1279_v25, %v1275_v19  ;;  %6635 = vmatprep.subr.bf16.mxu0 %v6886_v28  ;;  %6509 = vmatprep.subr.bf16.mxu1 %v6899_v31  ;;  %v6863_v42 = vld [vmem:[#allocation2 + $0x2dc] ss:$36 sps:$4 sm:$0xff]   ;;  %v861_v47 = vld [vmem:[%s7100_s14 + $0x88] sm:$0xf] }
  0xb9   : > { %1907 = vst [vmem:[#allocation2 + $0xa4] sm:$0xf] %v1776_v29  ;;  %6636 = vmatpush3.bf16.msra.mxu0 %v6886_v28  ;;  %v5486_v44 = vrot.slane %v860_v36, 9  ;;  %4602 = vmatprep.mubr.bf16.mxu0 %v6859_v37  ;;  %v862_v48 = vld [vmem:[%s7100_s14 + $0x8c] sm:$0x1]  ;;  %v1005_v49 = vrot.slane %v861_v47, 5 }
  0xba   : > { %v1779_v35 = vsel %vm7277_vm5, %v1777_v30, %v1778_v27  ;;  %v1276_v38 = vsel %vm7132_vm2, %v1271_v32, %v1275_v19  ;;  %v1281_v40 = vrot.slane %v1280_v33, 4  ;;  %v6862_v41 = vld [vmem:[#allocation2 + $0x58] ss:$36 sps:$4 sm:$0xff]   ;;  %4513 = vmatprep.mubr.bf16.mxu1 %v6863_v42  ;;  %v1008_v50 = vrot.slane %v862_v48, 5  ;;  %v5513_v51 = vld [vmem:[%s7100_s14 + $0x90] sm:$0xf] }
  0xbb   : > { %1908 = vst [vmem:[#allocation2 + $0xc8] sm:$0xf] %v1779_v35  ;;  %1635 = vst [vmem:[#allocation2 + $0xa0] sm:$0xf] %v1276_v38  ;;  %6510 = vmatpush3.bf16.msra.mxu1 %v6900_v34  ;;  %v6867_v46 = vld [vmem:[#allocation2 + $0x2d8] ss:$36 sps:$4 sm:$0xff]   ;;  %4603 = vmatmul.mubr.bf16.gmra.mxu0 %v6862_v41  ;;  %v1006_v56 = vsel %vm7277_vm5, %v5486_v44, %v1005_v49 }
  0xbc   : > { %v1286_v45 = vsel %vm7132_vm2, %v1281_v40, %v1285_v26  ;;  %v5514_v52 = vld [vmem:[%s7100_s14 + $0x94] sm:$0xf]  ;;  %4514 = vmatmul.mubr.bf16.gmra.mxu1 %v6867_v46  ;;  %1157 = vst [vmem:[#allocation2 + $0x324] sm:$0xf] %v5513_v51  ;;  %v5532_v53 = vld [vmem:[%s7100_s14 + $0x30] sm:$0xf] }
  0xbd   : > { %1636 = vst [vmem:[#allocation2 + $0xc4] sm:$0xf] %v1286_v45  ;;  %1158 = vst [vmem:[#allocation2 + $0x348] sm:$0xf] %v5514_v52  ;;  %v5533_v54 = vld [vmem:[%s7100_s14 + $0x34] sm:$0xf] }
  0xbe   : > { %v5534_v55 = vld [vmem:[%s7100_s14 + $0x38] sm:$0x1]  ;;  %v1007_v57 = vrot.slane %v1005_v49, 4  ;;  %v1288_v58 = vshrl.u32 %v5532_v53, 16  ;;  %v1291_v59 = vshll.u32 %v5532_v53, 16  ;;  %v6901_v61 = vld [vmem:[%s8661_s1 + $0x220] sm:$0xff]  }
  0xbf   : > { %v5580_v60 = vld [vmem:[%s7100_s14 + $0x30] sm:$0xe]  ;;  %1092 = vst [vmem:[#allocation2 + $0x320] sm:$0xf] %v1006_v56  ;;  %v1297_v62 = vshll.u32 %v5533_v54, 16  ;;  %v1301_v63 = vshrl.u32 %v5533_v54, 16  ;;  %6637 = vmatprep.subr.bf16.mxu0 %v6901_v61 }
  0xc0   : > { %v1307_v0 = vshll.u32 %v5534_v55, 16  ;;  %v5581_v1 = vld [vmem:[%s7100_s14 + $0x34] sm:$0xf]  ;;  %v5622_v2 = vrot.slane %v5580_v60, 9  ;;  %v1009_v3 = vsel %vm7277_vm5, %v1007_v57, %v1008_v50  ;;  %v1290_v4 = vrot.slane %v1288_v58, 4  ;;  %6638 = vmatpush3.bf16.msra.mxu0 %v6901_v61  ;;  %v6940_v28 = vld [vmem:[%s8661_s1 + $0x208] sm:$0xff]  }
  0xc1   : > { %v1293_v5 = vrot.slane %v1291_v59, 5  ;;  %v5582_v6 = vld [vmem:[%s7100_s14 + $0x38] sm:$0x1]  ;;  %v1782_v7 = vrot.slane %v5581_v1, 5  ;;  %1093 = vst [vmem:[#allocation2 + $0x344] sm:$0xf] %v1009_v3  ;;  %6639 = vmatprep.subr.bf16.mxu0 %v6914_v9 }
  0xc2   : > { %v1299_v10 = vrot.slane %v1297_v62, 5  ;;  %v1303_v11 = vrot.slane %v1301_v63, 4  ;;  %v1309_v12 = vrot.slane %v1307_v0, 5  ;;  %v1785_v8 = vrot.slane %v5582_v6, 5  ;;  %v863_v16 = vld [vmem:[%s7100_s14 + $0x90] sm:$0xe] }
  0xc3   : > { %v1294_v13 = vor.u32 %v1293_v5, %v1290_v4  ;;  %v1783_v14 = vsel %vm7277_vm5, %v5622_v2, %v1782_v7  ;;  %v1784_v15 = vrot.slane %v1782_v7, 4  ;;  %v864_v17 = vld [vmem:[%s7100_s14 + $0x94] sm:$0xf]  ;;  %v6865_v19 = vld [vmem:[#allocation2 + $0xa4] ss:$36 sps:$4 sm:$0xff]   ;;  %v5487_v22 = vrot.slane %v863_v16, 9 }
  0xc4   : > { %v6927_v18 = vld [vmem:[%s8661_s1 + $0x210] sm:$0xff]   ;;  %v6868_v20 = vld [vmem:[#allocation2 + $0xa0] ss:$36 sps:$4 sm:$0xff]   ;;  %v1304_v21 = vor.u32 %v1303_v11, %v1299_v10  ;;  %1909 = vst [vmem:[#allocation2 + $0xec] sm:$0xf] %v1783_v14  ;;  %v1012_v26 = vrot.slane %v864_v17, 5  ;;  %4610 = vmatprep.mubr.bf16.mxu0 %v6865_v19  ;;  %6640 = vmatpush3.bf16.msra.mxu0 %v6914_v9 }
  0xc5   : > { %v1295_v23 = vrot.slane %v1294_v13, 4  ;;  %v1786_v24 = vsel %vm7277_vm5, %v1784_v15, %v1785_v8  ;;  %v865_v25 = vld [vmem:[%s7100_s14 + $0x98] sm:$0x1]  ;;  %v5515_v27 = vld [vmem:[%s7100_s14 + $0x9c] sm:$0xf]  ;;  %4611 = vmatmul.mubr.bf16.gmra.mxu0 %v6868_v20  ;;  %6641 = vmatprep.subr.bf16.mxu0 %v6927_v18  ;;  %v6953_v1 = vld [vmem:[%s8661_s1 + $0x200] sm:$0xff]  }
  0xc6   : > { %v1305_v29 = vrot.slane %v1304_v21, 4  ;;  %1910 = vst [vmem:[#allocation2 + $0x110] sm:$0xf] %v1786_v24  ;;  %v1015_v30 = vrot.slane %v865_v25, 5  ;;  %v5516_v31 = vld [vmem:[%s7100_s14 + $0xa0] sm:$0xf]  ;;  %v1013_v34 = vsel %vm7277_vm5, %v5487_v22, %v1012_v26 }
  0xc7   : > { %1159 = vst [vmem:[#allocation2 + $0x36c] sm:$0xf] %v5515_v27  ;;  %v5535_v32 = vld [vmem:[%s7100_s14 + $0x3c] sm:$0xf]  ;;  %v1300_v33 = vsel %vm7132_vm2, %v1295_v23, %v1299_v10  ;;  %v1014_v35 = vrot.slane %v1012_v26, 4 }
  0xc8   : > { %1160 = vst [vmem:[#allocation2 + $0x390] sm:$0xf] %v5516_v31  ;;  %v5536_v36 = vld [vmem:[%s7100_s14 + $0x40] sm:$0xf]  ;;  %v5537_v37 = vld [vmem:[%s7100_s14 + $0x44] sm:$0x1]  ;;  %v1310_v38 = vsel %vm7132_vm2, %v1305_v29, %v1309_v12  ;;  %6642 = vmatpush3.bf16.msra.mxu0 %v6927_v18 }
  0xc9   : > { %1637 = vst [vmem:[#allocation2 + $0xe8] sm:$0xf] %v1300_v33  ;;  %1094 = vst [vmem:[#allocation2 + $0x368] sm:$0xf] %v1013_v34  ;;  %v1312_v40 = vshrl.u32 %v5535_v32, 16  ;;  %v1315_v41 = vshll.u32 %v5535_v32, 16  ;;  %v1016_v47 = vsel %vm7277_vm5, %v1014_v35, %v1015_v30  ;;  %6643 = vmatprep.subr.bf16.mxu0 %v6940_v28 }
  0xca   : > { %v1321_v42 = vshll.u32 %v5536_v36, 16  ;;  %v5583_v44 = vld [vmem:[%s7100_s14 + $0x3c] sm:$0xe]  ;;  %v6872_v45 = vld [vmem:[#allocation2 + $0x324] ss:$36 sps:$4 sm:$0xff]   ;;  %v1325_v48 = vshrl.u32 %v5536_v36, 16 }
  0xcb   : > { %1638 = vst [vmem:[#allocation2 + $0x10c] sm:$0xf] %v1310_v38  ;;  %v6876_v46 = vld [vmem:[#allocation2 + $0x320] ss:$36 sps:$4 sm:$0xff]   ;;  %1095 = vst [vmem:[#allocation2 + $0x38c] sm:$0xf] %v1016_v47  ;;  %4521 = vmatprep.mubr.bf16.mxu1 %v6872_v45 }
  0xcc   : > { %v1314_v49 = vrot.slane %v1312_v40, 4  ;;  %v1317_v50 = vrot.slane %v1315_v41, 5  ;;  %v1323_v51 = vrot.slane %v1321_v42, 5  ;;  %v1331_v52 = vshll.u32 %v5537_v37, 16  ;;  %v5584_v53 = vld [vmem:[%s7100_s14 + $0x40] sm:$0xf]  ;;  %4522 = vmatmul.mubr.bf16.gmra.mxu1 %v6876_v46  ;;  %6644 = vmatpush3.bf16.msra.mxu0 %v6940_v28 }
  0xcd   : > { %v1327_v54 = vrot.slane %v1325_v48, 4  ;;  %v5585_v55 = vld [vmem:[%s7100_s14 + $0x44] sm:$0x1]  ;;  %v5623_v56 = vrot.slane %v5583_v44, 9  ;;  %v1789_v57 = vrot.slane %v5584_v53, 5  ;;  %6645 = vmatprep.subr.bf16.mxu0 %v6953_v1 }
  0xce   : > { %v1318_v58 = vor.u32 %v1317_v50, %v1314_v49  ;;  %v1792_v59 = vrot.slane %v5585_v55, 5  ;;  %v1333_v61 = vrot.slane %v1331_v52, 5  ;;  %v866_v4 = vld [vmem:[%s7100_s14 + $0x9c] sm:$0xe]  ;;  %v6874_v5 = vld [vmem:[#allocation2 + $0xec] ss:$36 sps:$4 sm:$0xff]  }
  0xcf   : > { %v1328_v60 = vor.u32 %v1327_v54, %v1323_v51  ;;  %v1790_v62 = vsel %vm7277_vm5, %v5623_v56, %v1789_v57  ;;  %v1791_v63 = vrot.slane %v1789_v57, 4  ;;  %v6878_v9 = vld [vmem:[#allocation2 + $0x36c] ss:$36 sps:$4 sm:$0xff]   ;;  %v5488_v12 = vrot.slane %v866_v4, 9  ;;  %4618 = vmatprep.mubr.bf16.mxu0 %v6874_v5  ;;  %v867_v8 = vld [vmem:[%s7100_s14 + $0xa0] sm:$0xf] }
  0xd0   : > { %v1319_v0 = vrot.slane %v1318_v58, 4  ;;  %1911 = vst [vmem:[#allocation2 + $0x134] sm:$0xf] %v1790_v62  ;;  %v868_v13 = vld [vmem:[%s7100_s14 + $0xa4] sm:$0x1]  ;;  %6646 = vmatpush3.bf16.msra.mxu0 %v6953_v1  ;;  %4529 = vmatprep.mubr.bf16.mxu1 %v6878_v9  ;;  %v1019_v15 = vrot.slane %v867_v8, 5 }
  0xd1   : > { %v1329_v2 = vrot.slane %v1328_v60, 4  ;;  %v1793_v3 = vsel %vm7277_vm5, %v1791_v63, %v1792_v59  ;;  %v5517_v14 = vld [vmem:[%s7100_s14 + $0xa8] sm:$0xf]  ;;  %v1022_v16 = vrot.slane %v868_v13, 5  ;;  %v5518_v17 = vld [vmem:[%s7100_s14 + $0xac] sm:$0xf] }
  0xd2   : > { %v6877_v6 = vld [vmem:[#allocation2 + $0xe8] ss:$36 sps:$4 sm:$0xff]   ;;  %v1324_v7 = vsel %vm7132_vm2, %v1319_v0, %v1323_v51  ;;  %1912 = vst [vmem:[#allocation2 + $0x158] sm:$0xf] %v1793_v3  ;;  %1161 = vst [vmem:[#allocation2 + $0x3b4] sm:$0xf] %v5517_v14  ;;  %v1020_v23 = vsel %vm7277_vm5, %v5488_v12, %v1019_v15 }
  0xd3   : > { %v1334_v10 = vsel %vm7132_vm2, %v1329_v2, %v1333_v61  ;;  %1639 = vst [vmem:[#allocation2 + $0x130] sm:$0xf] %v1324_v7  ;;  %v6882_v11 = vld [vmem:[#allocation2 + $0x368] ss:$36 sps:$4 sm:$0xff]   ;;  %4619 = vmatmul.mubr.bf16.gmra.mxu0 %v6877_v6  ;;  %1162 = vst [vmem:[#allocation2 + $0x3d8] sm:$0xf] %v5518_v17 }
  0xd4   : > { %1640 = vst [vmem:[#allocation2 + $0x154] sm:$0xf] %v1334_v10  ;;  %v5538_v18 = vld [vmem:[%s7100_s14 + $0x48] sm:$0xf]  ;;  %4530 = vmatmul.mubr.bf16.gmra.mxu1 %v6882_v11  ;;  %v5539_v19 = vld [vmem:[%s7100_s14 + $0x4c] sm:$0xf] }
  0xd5   : > { %v5540_v20 = vld [vmem:[%s7100_s14 + $0x50] sm:$0x1]  ;;  %v1336_v21 = vshrl.u32 %v5538_v18, 16  ;;  %v1339_v22 = vshll.u32 %v5538_v18, 16  ;;  %v1021_v24 = vrot.slane %v1019_v15, 4  ;;  %v1345_v25 = vshll.u32 %v5539_v19, 16 }
  0xd6   : > { %v1349_v26 = vshrl.u32 %v5539_v19, 16  ;;  %v5586_v27 = vld [vmem:[%s7100_s14 + $0x48] sm:$0xe]  ;;  %1096 = vst [vmem:[#allocation2 + $0x3b0] sm:$0xf] %v1020_v23  ;;  %v1355_v30 = vshll.u32 %v5540_v20, 16 }
  0xd7   : > { %v1338_v28 = vrot.slane %v1336_v21, 4  ;;  %v1341_v29 = vrot.slane %v1339_v22, 5  ;;  %v5587_v31 = vld [vmem:[%s7100_s14 + $0x4c] sm:$0xf]  ;;  %v5624_v32 = vrot.slane %v5586_v27, 9  ;;  %v1023_v33 = vsel %vm7277_vm5, %v1021_v24, %v1022_v16 }
  0xd8   : > { %v1347_v34 = vrot.slane %v1345_v25, 5  ;;  %v1351_v35 = vrot.slane %v1349_v26, 4  ;;  %v5588_v36 = vld [vmem:[%s7100_s14 + $0x50] sm:$0x1]  ;;  %v1796_v37 = vrot.slane %v5587_v31, 5  ;;  %v1357_v40 = vrot.slane %v1355_v30, 5 }
  0xd9   : > { %1097 = vst [vmem:[#allocation2 + $0x3d4] sm:$0xf] %v1023_v33  ;;  %v1342_v38 = vor.u32 %v1341_v29, %v1338_v28  ;;  %v1799_v41 = vrot.slane %v5588_v36, 5  ;;  %v869_v42 = vld [vmem:[%s7100_s14 + $0xa8] sm:$0xe] }
  0xda   : > { %v6880_v44 = vld [vmem:[#allocation2 + $0x134] ss:$36 sps:$4 sm:$0xff]   ;;  %v1352_v46 = vor.u32 %v1351_v35, %v1347_v34  ;;  %v1797_v47 = vsel %vm7277_vm5, %v5624_v32, %v1796_v37  ;;  %v1798_v48 = vrot.slane %v1796_v37, 4  ;;  %v870_v50 = vld [vmem:[%s7100_s14 + $0xac] sm:$0xf]  ;;  %v5489_v52 = vrot.slane %v869_v42, 9 }
  0xdb   : > { %v6883_v45 = vld [vmem:[#allocation2 + $0x130] ss:$36 sps:$4 sm:$0xff]   ;;  %v1343_v49 = vrot.slane %v1342_v38, 4  ;;  %1913 = vst [vmem:[#allocation2 + $0x17c] sm:$0xf] %v1797_v47  ;;  %4626 = vmatprep.mubr.bf16.mxu0 %v6880_v44  ;;  %v1026_v55 = vrot.slane %v870_v50, 5 }
  0xdc   : > { %v871_v51 = vld [vmem:[%s7100_s14 + $0xb0] sm:$0x1]  ;;  %v1353_v53 = vrot.slane %v1352_v46, 4  ;;  %v1800_v54 = vsel %vm7277_vm5, %v1798_v48, %v1799_v41  ;;  %v5519_v57 = vld [vmem:[%s7100_s14 + $0xb4] sm:$0xf]  ;;  %4627 = vmatmul.mubr.bf16.gmra.mxu0 %v6883_v45 }
  0xdd   : > { %v1029_v56 = vrot.slane %v871_v51, 5  ;;  %v1348_v58 = vsel %vm7132_vm2, %v1343_v49, %v1347_v34  ;;  %1914 = vst [vmem:[#allocation2 + $0x1a0] sm:$0xf] %v1800_v54  ;;  %v5520_v59 = vld [vmem:[%s7100_s14 + $0xb8] sm:$0xf]  ;;  %v1027_v63 = vsel %vm7277_vm5, %v5489_v52, %v1026_v55  ;;  %v1028_v0 = vrot.slane %v1026_v55, 4 }
  0xde   : > { %1163 = vst [vmem:[#allocation2 + $0x3fc] sm:$0xf] %v5519_v57  ;;  %v5541_v60 = vld [vmem:[%s7100_s14 + $0x54] sm:$0xf]  ;;  %v5542_v61 = vld [vmem:[%s7100_s14 + $0x58] sm:$0xf]  ;;  %v1358_v62 = vsel %vm7132_vm2, %v1353_v53, %v1357_v40 }
  0xdf   : > { %1641 = vst [vmem:[#allocation2 + $0x178] sm:$0xf] %v1348_v58  ;;  %1164 = vst [vmem:[#allocation2 + $0x420] sm:$0xf] %v5520_v59  ;;  %v5543_v1 = vld [vmem:[%s7100_s14 + $0x5c] sm:$0x1]  ;;  %v1030_v11 = vsel %vm7277_vm5, %v1028_v0, %v1029_v56 }
  0xe0   : > { %v1360_v2 = vshrl.u32 %v5541_v60, 16  ;;  %1642 = vst [vmem:[#allocation2 + $0x19c] sm:$0xf] %v1358_v62  ;;  %1098 = vst [vmem:[#allocation2 + $0x3f8] sm:$0xf] %v1027_v63  ;;  %v1363_v3 = vshll.u32 %v5541_v60, 16 }
  0xe1   : > { %v1369_v4 = vshll.u32 %v5542_v61, 16  ;;  %v1373_v5 = vshrl.u32 %v5542_v61, 16  ;;  %v1379_v6 = vshll.u32 %v5543_v1, 16  ;;  %v5589_v7 = vld [vmem:[%s7100_s14 + $0x54] sm:$0xe] }
  0xe2   : > { %v6887_v9 = vld [vmem:[#allocation2 + $0x3b4] ss:$36 sps:$4 sm:$0xff]   ;;  %v1362_v12 = vrot.slane %v1360_v2, 4  ;;  %1099 = vst [vmem:[#allocation2 + $0x41c] sm:$0xf] %v1030_v11  ;;  %v1365_v8 = vrot.slane %v1363_v3, 5 }
  0xe3   : > { %v6891_v10 = vld [vmem:[#allocation2 + $0x3b0] ss:$36 sps:$4 sm:$0xff]   ;;  %v1371_v13 = vrot.slane %v1369_v4, 5  ;;  %v1375_v14 = vrot.slane %v1373_v5, 4  ;;  %v5590_v15 = vld [vmem:[%s7100_s14 + $0x58] sm:$0xf]  ;;  %4537 = vmatprep.mubr.bf16.mxu1 %v6887_v9 }
  0xe4   : > { %v5591_v16 = vld [vmem:[%s7100_s14 + $0x5c] sm:$0x1]  ;;  %v5625_v17 = vrot.slane %v5589_v7, 9  ;;  %v1803_v18 = vrot.slane %v5590_v15, 5  ;;  %4538 = vmatmul.mubr.bf16.gmra.mxu1 %v6891_v10  ;;  %v1366_v19 = vor.u32 %v1365_v8, %v1362_v12  ;;  %v1381_v21 = vrot.slane %v1379_v6, 5 }
  0xe5   : > { %v1376_v20 = vor.u32 %v1375_v14, %v1371_v13  ;;  %v1806_v22 = vrot.slane %v5591_v16, 5  ;;  %v6889_v27 = vld [vmem:[#allocation2 + $0x17c] ss:$36 sps:$4 sm:$0xff]   ;;  %v872_v32 = vld [vmem:[%s7100_s14 + $0xb4] sm:$0xe] }
  0xe6   : > { %v1804_v23 = vsel %vm7277_vm5, %v5625_v17, %v1803_v18  ;;  %v1805_v24 = vrot.slane %v1803_v18, 4  ;;  %v1367_v25 = vrot.slane %v1366_v19, 4  ;;  %v873_v33 = vld [vmem:[%s7100_s14 + $0xb8] sm:$0xf]  ;;  %4634 = vmatprep.mubr.bf16.mxu0 %v6889_v27  ;;  %v6893_v34 = vld [vmem:[#allocation2 + $0x3fc] ss:$36 sps:$4 sm:$0xff]  }
  0xe7   : > { %v1377_v26 = vrot.slane %v1376_v20, 4  ;;  %1915 = vst [vmem:[#allocation2 + $0x1c4] sm:$0xf] %v1804_v23  ;;  %v6892_v28 = vld [vmem:[#allocation2 + $0x178] ss:$36 sps:$4 sm:$0xff]   ;;  %v5490_v36 = vrot.slane %v872_v32, 9  ;;  %4545 = vmatprep.mubr.bf16.mxu1 %v6893_v34 }
  0xe8   : > { %v1807_v29 = vsel %vm7277_vm5, %v1805_v24, %v1806_v22  ;;  %v1372_v30 = vsel %vm7132_vm2, %v1367_v25, %v1371_v13  ;;  %4635 = vmatmul.mubr.bf16.gmra.mxu0 %v6892_v28  ;;  %v874_v38 = vld [vmem:[%s7100_s14 + $0xbc] sm:$0x1]  ;;  %v1033_v40 = vrot.slane %v873_v33, 5  ;;  %v5521_v41 = vld [vmem:[%s7100_s14 + $0xc0] sm:$0xf] }
  0xe9   : > { %v1382_v31 = vsel %vm7132_vm2, %v1377_v26, %v1381_v21  ;;  %1916 = vst [vmem:[#allocation2 + $0x1e8] sm:$0xf] %v1807_v29  ;;  %1643 = vst [vmem:[#allocation2 + $0x1c0] sm:$0xf] %v1372_v30  ;;  %v6897_v35 = vld [vmem:[#allocation2 + $0x3f8] ss:$36 sps:$4 sm:$0xff]  }
  0xea   : > { %1644 = vst [vmem:[#allocation2 + $0x1e4] sm:$0xf] %v1382_v31  ;;  %v1036_v42 = vrot.slane %v874_v38, 5  ;;  %v5522_v44 = vld [vmem:[%s7100_s14 + $0xc4] sm:$0xf]  ;;  %v1034_v47 = vsel %vm7277_vm5, %v5490_v36, %v1033_v40  ;;  %v1035_v48 = vrot.slane %v1033_v40, 4 }
  0xeb   : > { %1165 = vst [vmem:[#allocation2 + $0x444] sm:$0xf] %v5521_v41  ;;  %v5544_v45 = vld [vmem:[%s7100_s14 + $0x60] sm:$0xf]  ;;  %1166 = vst [vmem:[#allocation2 + $0x468] sm:$0xf] %v5522_v44 }
  0xec   : > { %4546 = vmatmul.mubr.bf16.gmra.mxu1 %v6897_v35  ;;  %v5545_v49 = vld [vmem:[%s7100_s14 + $0x64] sm:$0xf]  ;;  %v5546_v50 = vld [vmem:[%s7100_s14 + $0x68] sm:$0x1]  ;;  %v1384_v51 = vshrl.u32 %v5544_v45, 16  ;;  %v1387_v53 = vshll.u32 %v5544_v45, 16  ;;  %v1037_v59 = vsel %vm7277_vm5, %v1035_v48, %v1036_v42 }
  0xed   : > { %v6175_v37 = vpop.f32.mrf.mxu0  ;;  %1100 = vst [vmem:[#allocation2 + $0x440] sm:$0xf] %v1034_v47  ;;  %v1393_v54 = vshll.u32 %v5545_v49, 16  ;;  %v1397_v55 = vshrl.u32 %v5545_v49, 16  ;;  %v1403_v56 = vshll.u32 %v5546_v50, 16  ;;  %v6247_v58 = vpop.f32.mrf.mxu1 }
  0xee   : > { %v5592_v57 = vld [vmem:[%s7100_s14 + $0x60] sm:$0xe]  ;;  %v1386_v60 = vrot.slane %v1384_v51, 4  ;;  %v5593_v61 = vld [vmem:[%s7100_s14 + $0x64] sm:$0xf]  ;;  %v1389_v1 = vrot.slane %v1387_v53, 5 }
  0xef   : > { %v6176_v46 = vpop.f32.mrf.mxu0  ;;  %v5594_v62 = vld [vmem:[%s7100_s14 + $0x68] sm:$0x1]  ;;  %v5626_v63 = vrot.slane %v5592_v57, 9  ;;  %1101 = vst [vmem:[#allocation2 + $0x464] sm:$0xf] %v1037_v59  ;;  %v1395_v2 = vrot.slane %v1393_v54, 5  ;;  %v6248_v6 = vpop.f32.mrf.mxu1 }
  0xf0   : > { %v7694_v52 = vadd.f32 %v6176_v46, %v6175_v37  ;;  %v1399_v3 = vrot.slane %v1397_v55, 4  ;;  %v1405_v4 = vrot.slane %v1403_v56, 5  ;;  %v5547_v5 = vld [vmem:[%s7100_s14 + $0x6c] sm:$0xf]  ;;  %v6895_v7 = vld [vmem:[#allocation2 + $0x1c4] ss:$36 sps:$4 sm:$0xff]   ;;  %v7704_v11 = vadd.f32 %v6248_v6, %v6247_v58 }
  0xf1   : > { %v7701_v0 = vpop.f32.mrf.mxu0  ;;  %v1810_v9 = vrot.slane %v5593_v61, 5  ;;  %v1813_v10 = vrot.slane %v5594_v62, 5  ;;  %v6898_v12 = vld [vmem:[#allocation2 + $0x1c0] ss:$36 sps:$4 sm:$0xff]   ;;  %v1390_v8 = vor.u32 %v1389_v1, %v1386_v60  ;;  %v5548_v14 = vld [vmem:[%s7100_s14 + $0x70] sm:$0xf]  ;;  %4642 = vmatprep.mubr.bf16.mxu0 %v6895_v7  ;;  %v7711_v21 = vpop.f32.mrf.mxu1 }
  0xf2   : > { %v1400_v13 = vor.u32 %v1399_v3, %v1395_v2  ;;  %v5549_v15 = vld [vmem:[%s7100_s14 + $0x74] sm:$0x1]  ;;  %v1408_v18 = vshrl.u32 %v5547_v5, 16  ;;  %v1411_v19 = vshll.u32 %v5547_v5, 16  ;;  %v5595_v20 = vld [vmem:[%s7100_s14 + $0x6c] sm:$0xe]  ;;  %4643 = vmatmul.mubr.bf16.gmra.mxu0 %v6898_v12 }
  0xf3   : > { %v1811_v16 = vsel %vm7277_vm5, %v5626_v63, %v1810_v9  ;;  %v1812_v17 = vrot.slane %v1810_v9, 4  ;;  %v7713_v22 = vpop.f32.mrf.mxu0  ;;  %v1391_v23 = vrot.slane %v1390_v8, 4  ;;  %v1417_v25 = vshll.u32 %v5548_v14, 16  ;;  %v5596_v27 = vld [vmem:[%s7100_s14 + $0x70] sm:$0xf]  ;;  %v7725_v45 = vpop.f32.mrf.mxu1 }
  0xf4   : > { %v1401_v24 = vrot.slane %v1400_v13, 4  ;;  %1917 = vst [vmem:[#allocation2 + $0x20c] sm:$0xf] %v1811_v16  ;;  %v1421_v26 = vshrl.u32 %v5548_v14, 16  ;;  %v1410_v29 = vrot.slane %v1408_v18, 4  ;;  %v1413_v30 = vrot.slane %v1411_v19, 5 }
  0xf5   : > { %v1814_v28 = vsel %vm7277_vm5, %v1812_v17, %v1813_v10  ;;  %v1427_v31 = vshll.u32 %v5549_v15, 16  ;;  %v5597_v32 = vld [vmem:[%s7100_s14 + $0x74] sm:$0x1]  ;;  %v1396_v33 = vsel %vm7132_vm2, %v1391_v23, %v1395_v2  ;;  %v1419_v35 = vrot.slane %v1417_v25, 5  ;;  %v5635_v37 = vld [vmem:[%s7100_s14 + $0x18] sm:$0xf]  ;;  %v6181_v46 = vpop.f32.mrf.mxu0 }
  0xf6   : > { %v1406_v34 = vsel %vm7132_vm2, %v1401_v24, %v1405_v4  ;;  %1918 = vst [vmem:[#allocation2 + $0x230] sm:$0xf] %v1814_v28  ;;  %v1423_v36 = vrot.slane %v1421_v26, 4  ;;  %v5636_v38 = vld [vmem:[%s7100_s14 + $0x1c] sm:$0xf]  ;;  %v1414_v42 = vor.u32 %v1413_v30, %v1410_v29  ;;  %v5627_v48 = vrot.slane %v5595_v20, 9 }
  0xf7   : > { %v6902_v40 = vld [vmem:[#allocation2 + $0x444] ss:$36 sps:$4 sm:$0xff]   ;;  %1645 = vst [vmem:[#allocation2 + $0x208] sm:$0xf] %v1396_v33  ;;  %1646 = vst [vmem:[#allocation2 + $0x22c] sm:$0xf] %v1406_v34  ;;  %v6182_v57 = vpop.f32.mrf.mxu0  ;;  %v6253_v3 = vpop.f32.mrf.mxu1 }
  0xf8   : > { %v6906_v41 = vld [vmem:[#allocation2 + $0x440] ss:$36 sps:$4 sm:$0xff]   ;;  %v1429_v44 = vrot.slane %v1427_v31, 5  ;;  %1968 = vst [vmem:[#allocation2 + $0x18] sm:$0xf] %v5635_v37  ;;  %v1424_v47 = vor.u32 %v1423_v36, %v1419_v35  ;;  %v1817_v49 = vrot.slane %v5596_v27, 5  ;;  %4553 = vmatprep.mubr.bf16.mxu1 %v6902_v40  ;;  %v7743_v24 = vadd.f32 %v6182_v57, %v6181_v46 }
  0xf9   : > { %1969 = vst [vmem:[#allocation2 + $0x3c] sm:$0xf] %v5636_v38  ;;  %v1820_v50 = vrot.slane %v5597_v32, 5  ;;  %v5667_v51 = vld [vmem:[%s7100_s14 + $0x18] sm:$0xf]  ;;  %v1415_v53 = vrot.slane %v1414_v42, 4  ;;  %4554 = vmatmul.mubr.bf16.gmra.mxu1 %v6906_v41  ;;  %v7734_v4 = vpop.f32.mrf.mxu0  ;;  %v6254_v17 = vpop.f32.mrf.mxu1 }
  0xfa   : > { %v5668_v54 = vld [vmem:[%s7100_s14 + $0x1c] sm:$0xf]  ;;  %v5669_v55 = vld [vmem:[%s7100_s14 + $0x20] sm:$0x1]  ;;  %v2049_v56 = vshrl.u32 %v5667_v51, 16  ;;  %v1425_v58 = vrot.slane %v1424_v47, 4  ;;  %v1818_v59 = vsel %vm7277_vm5, %v5627_v48, %v1817_v49  ;;  %v7750_v36 = vadd.f32 %v6254_v17, %v6253_v3 }
  0xfb   : > { %v1819_v60 = vrot.slane %v1817_v49, 4  ;;  %v2052_v61 = vshll.u32 %v5667_v51, 16  ;;  %v1420_v62 = vsel %vm7132_vm2, %v1415_v53, %v1419_v35  ;;  %1919 = vst [vmem:[#allocation2 + $0x254] sm:$0xf] %v1818_v59  ;;  %v2058_v1 = vshll.u32 %v5668_v54, 16  ;;  %v7745_v30 = vpop.f32.mrf.mxu1  ;;  %v7747_v31 = vpop.f32.mrf.mxu0 }
  0xfc   : > { %v2051_v63 = vrot.slane %v2049_v56, 4  ;;  %v2062_v2 = vshrl.u32 %v5668_v54, 16  ;;  %v1430_v5 = vsel %vm7132_vm2, %v1425_v58, %v1429_v44  ;;  %1647 = vst [vmem:[#allocation2 + $0x250] sm:$0xf] %v1420_v62  ;;  %v2068_v9 = vshll.u32 %v5669_v55, 16 }
  0xfd   : > { %v1821_v6 = vsel %vm7277_vm5, %v1819_v60, %v1820_v50  ;;  %v2054_v7 = vrot.slane %v2052_v61, 5  ;;  %v5550_v10 = vld [vmem:[%s7100_s14 + $0x78] sm:$0xf]  ;;  %v5551_v12 = vld [vmem:[%s7100_s14 + $0x7c] sm:$0xf]  ;;  %v2060_v8 = vrot.slane %v2058_v1, 5  ;;  %v7757_v50 = vpop.f32.mrf.mxu1 }
  0xfe   : > { %1648 = vst [vmem:[#allocation2 + $0x274] sm:$0xf] %v1430_v5  ;;  %1920 = vst [vmem:[#allocation2 + $0x278] sm:$0xf] %v1821_v6  ;;  %v2064_v13 = vrot.slane %v2062_v2, 4  ;;  %v1432_v15 = vshrl.u32 %v5550_v10, 16  ;;  %v6187_v57 = vpop.f32.mrf.mxu0 }
  0xff   : > { %v5552_v14 = vld [vmem:[%s7100_s14 + $0x80] sm:$0x1]  ;;  %v1435_v16 = vshll.u32 %v5550_v10, 16  ;;  %v6904_v18 = vld [vmem:[#allocation2 + $0x20c] ss:$36 sps:$4 sm:$0xff]   ;;  %v2055_v19 = vor.u32 %v2054_v7, %v2051_v63  ;;  %v2070_v20 = vrot.slane %v2068_v9, 5 }
 0x100   : > { %v1441_v23 = vshll.u32 %v5551_v12, 16  ;;  %v6907_v25 = vld [vmem:[#allocation2 + $0x208] ss:$36 sps:$4 sm:$0xff]   ;;  %v2065_v26 = vor.u32 %v2064_v13, %v2060_v8  ;;  %v1434_v27 = vrot.slane %v1432_v15, 4  ;;  %v1445_v29 = vshrl.u32 %v5551_v12, 16  ;;  %4650 = vmatprep.mubr.bf16.mxu0 %v6904_v18  ;;  %v6188_v12 = vpop.f32.mrf.mxu0 }
 0x101   : > { %v1437_v28 = vrot.slane %v1435_v16, 5  ;;  %v2056_v32 = vrot.slane %v2055_v19, 4  ;;  %v1451_v34 = vshll.u32 %v5552_v14, 16  ;;  %v5598_v35 = vld [vmem:[%s7100_s14 + $0x78] sm:$0xe]  ;;  %4651 = vmatmul.mubr.bf16.gmra.mxu0 %v6907_v25  ;;  %v7775_v17 = vadd.f32 %v6188_v12, %v6187_v57 }
 0x102   : > { %v1443_v33 = vrot.slane %v1441_v23, 5  ;;  %v2066_v37 = vrot.slane %v2065_v26, 4  ;;  %v1447_v40 = vrot.slane %v1445_v29, 4  ;;  %v5599_v41 = vld [vmem:[%s7100_s14 + $0x7c] sm:$0xf]  ;;  %v5628_v47 = vrot.slane %v5598_v35, 9 }
 0x103   : > { %v1438_v38 = vor.u32 %v1437_v28, %v1434_v27  ;;  %v5600_v42 = vld [vmem:[%s7100_s14 + $0x80] sm:$0x1]  ;;  %v2061_v44 = vsel %vm7132_vm2, %v2056_v32, %v2060_v8  ;;  %v1453_v46 = vrot.slane %v1451_v34, 5  ;;  %v1824_v48 = vrot.slane %v5599_v41, 5  ;;  %v5637_v49 = vld [vmem:[%s7100_s14 + $0x24] sm:$0xf]  ;;  %v6259_v10 = vpop.f32.mrf.mxu1  ;;  %v7780_v41 = vpop.f32.mrf.mxu0 }
 0x104   : > { %v2071_v51 = vsel %vm7132_vm2, %v2066_v37, %v2070_v20  ;;  %2464 = vst [vmem:[#allocation2 + $0x1c] sm:$0xf] %v2061_v44  ;;  %v1448_v54 = vor.u32 %v1447_v40, %v1443_v33  ;;  %v1827_v55 = vrot.slane %v5600_v42, 5  ;;  %v5638_v56 = vld [vmem:[%s7100_s14 + $0x28] sm:$0xf] }
 0x105   : > { %v1439_v53 = vrot.slane %v1438_v38, 4  ;;  %1970 = vst [vmem:[#allocation2 + $0x60] sm:$0xf] %v5637_v49  ;;  %v6908_v58 = vld [vmem:[#allocation2 + $0x254] ss:$36 sps:$4 sm:$0xff]   ;;  %v1825_v60 = vsel %vm7277_vm5, %v5628_v47, %v1824_v48  ;;  %v1826_v61 = vrot.slane %v1824_v48, 4  ;;  %v6260_v26 = vpop.f32.mrf.mxu1 }
 0x106   : > { %2465 = vst [vmem:[#allocation2 + $0x40] sm:$0xf] %v2071_v51  ;;  %v6913_v59 = vld [vmem:[#allocation2 + $0x250] ss:$36 sps:$4 sm:$0xff]   ;;  %1971 = vst [vmem:[#allocation2 + $0x84] sm:$0xf] %v5638_v56  ;;  %4658 = vmatprep.mubr.bf16.mxu0 %v6908_v58  ;;  %v7782_v48 = vadd.f32 %v6260_v26, %v6259_v10 }
 0x107   : > { %v1444_v62 = vsel %vm7132_vm2, %v1439_v53, %v1443_v33  ;;  %v1449_v63 = vrot.slane %v1448_v54, 4  ;;  %1921 = vst [vmem:[#allocation2 + $0x29c] sm:$0xf] %v1825_v60  ;;  %v5670_v1 = vld [vmem:[%s7100_s14 + $0x24] sm:$0xf]  ;;  %v1828_v3 = vsel %vm7277_vm5, %v1826_v61, %v1827_v55 }
 0x108   : > { %v5671_v2 = vld [vmem:[%s7100_s14 + $0x28] sm:$0xf]  ;;  %1649 = vst [vmem:[#allocation2 + $0x298] sm:$0xf] %v1444_v62  ;;  %v5672_v5 = vld [vmem:[%s7100_s14 + $0x2c] sm:$0x1] }
 0x109   : > { %v2073_v6 = vshrl.u32 %v5670_v1, 16  ;;  %v2076_v7 = vshll.u32 %v5670_v1, 16  ;;  %v2082_v9 = vshll.u32 %v5671_v2, 16  ;;  %v1454_v8 = vsel %vm7132_vm2, %v1449_v63, %v1453_v46  ;;  %1922 = vst [vmem:[#allocation2 + $0x2c0] sm:$0xf] %v1828_v3  ;;  %4659 = vmatmul.mubr.bf16.gmra.mxu0 %v6913_v59  ;;  %v7790_v3 = vpop.f32.mrf.mxu1 }
 0x10a   : > { %v2086_v13 = vshrl.u32 %v5671_v2, 16  ;;  %v2092_v14 = vshll.u32 %v5672_v5, 16  ;;  %v5553_v15 = vld [vmem:[%s7100_s14 + $0x84] sm:$0xf]  ;;  %v5554_v16 = vld [vmem:[%s7100_s14 + $0x88] sm:$0xf]  ;;  %v7792_v5 = vpop.f32.mrf.mxu0 }
 0x10b   : > { %1650 = vst [vmem:[#allocation2 + $0x2bc] sm:$0xf] %v1454_v8  ;;  %v2075_v18 = vrot.slane %v2073_v6, 4  ;;  %v2078_v19 = vrot.slane %v2076_v7, 5  ;;  %v2084_v20 = vrot.slane %v2082_v9, 5  ;;  %v1456_v25 = vshrl.u32 %v5553_v15, 16 }
 0x10c   : > { %v5555_v23 = vld [vmem:[%s7100_s14 + $0x8c] sm:$0x1]  ;;  %v2088_v27 = vrot.slane %v2086_v13, 4  ;;  %v2094_v28 = vrot.slane %v2092_v14, 5  ;;  %v1459_v29 = vshll.u32 %v5553_v15, 16  ;;  %v1465_v32 = vshll.u32 %v5554_v16, 16 }
 0x10d   : > { %v5601_v33 = vld [vmem:[%s7100_s14 + $0x84] sm:$0xe]  ;;  %v2079_v34 = vor.u32 %v2078_v19, %v2075_v18  ;;  %v1458_v35 = vrot.slane %v1456_v25, 4  ;;  %v1469_v37 = vshrl.u32 %v5554_v16, 16  ;;  %v1475_v38 = vshll.u32 %v5555_v23, 16 }
 0x10e   : > { %v5602_v40 = vld [vmem:[%s7100_s14 + $0x88] sm:$0xf]  ;;  %v6910_v42 = vld [vmem:[#allocation2 + $0x18] ss:$36 sps:$4 sm:$0xff]   ;;  %v2089_v46 = vor.u32 %v2088_v27, %v2084_v20  ;;  %v1461_v47 = vrot.slane %v1459_v29, 5  ;;  %v1467_v51 = vrot.slane %v1465_v32, 5  ;;  %v7807_v29 = vpop.f32.mrf.mxu1  ;;  %v6193_v32 = vpop.f32.mrf.mxu0 }
 0x10f   : > { %v6912_v44 = vld [vmem:[#allocation2 + $0x1c] ss:$36 sps:$4 sm:$0xff]   ;;  %v2080_v49 = vrot.slane %v2079_v34, 4  ;;  %v1471_v53 = vrot.slane %v1469_v37, 4  ;;  %v5603_v54 = vld [vmem:[%s7100_s14 + $0x8c] sm:$0x1] }
 0x110   : > { %4755 = vmatprep.mubr.bf16.mxu1 %v6912_v44  ;;  %v2090_v55 = vrot.slane %v2089_v46, 4  ;;  %v1462_v56 = vor.u32 %v1461_v47, %v1458_v35  ;;  %v5629_v57 = vrot.slane %v5601_v33, 9  ;;  %v1831_v58 = vrot.slane %v5602_v40, 5  ;;  %v5639_v59 = vld [vmem:[%s7100_s14 + $0x30] sm:$0xf] }
 0x111   : > { %4756 = vmatmul.mubr.bf16.vlgmr.msra.gmra.mxu1 %v6910_v42  ;;  %v2085_v60 = vsel %vm7132_vm2, %v2080_v49, %v2084_v20  ;;  %v1472_v61 = vor.u32 %v1471_v53, %v1467_v51  ;;  %v1477_v62 = vrot.slane %v1475_v38, 5  ;;  %v1834_v63 = vrot.slane %v5603_v54, 5  ;;  %v5640_v1 = vld [vmem:[%s7100_s14 + $0x34] sm:$0xf]  ;;  %1972 = vst [vmem:[#allocation2 + $0xa8] sm:$0xf] %v5639_v59 }
 0x112   : > { %v5673_v2 = vld [vmem:[%s7100_s14 + $0x30] sm:$0xf]  ;;  %v6915_v6 = vld [vmem:[#allocation2 + $0x29c] ss:$36 sps:$4 sm:$0xff]   ;;  %v2095_v7 = vsel %vm7132_vm2, %v2090_v55, %v2094_v28  ;;  %2466 = vst [vmem:[#allocation2 + $0x64] sm:$0xf] %v2085_v60  ;;  %v1832_v12 = vsel %vm7277_vm5, %v5629_v57, %v1831_v58 }
 0x113   : > { %v6919_v9 = vld [vmem:[#allocation2 + $0x298] ss:$36 sps:$4 sm:$0xff]   ;;  %v1463_v10 = vrot.slane %v1462_v56, 4  ;;  %1973 = vst [vmem:[#allocation2 + $0xcc] sm:$0xf] %v5640_v1  ;;  %v1473_v8 = vrot.slane %v1472_v61, 4  ;;  %4666 = vmatprep.mubr.bf16.mxu0 %v6915_v6  ;;  %v6194_v56 = vpop.f32.mrf.mxu0 }
 0x114   : > { %2467 = vst [vmem:[#allocation2 + $0x88] sm:$0xf] %v2095_v7  ;;  %v1833_v13 = vrot.slane %v1831_v58, 4  ;;  %1923 = vst [vmem:[#allocation2 + $0x2e4] sm:$0xf] %v1832_v12  ;;  %v2097_v18 = vshrl.u32 %v5673_v2, 16  ;;  %4667 = vmatmul.mubr.bf16.gmra.mxu0 %v6919_v9  ;;  %v7813_v6 = vadd.f32 %v6194_v56, %v6193_v32 }
 0x115   : > { %v5674_v14 = vld [vmem:[%s7100_s14 + $0x34] sm:$0xf]  ;;  %v5675_v15 = vld [vmem:[%s7100_s14 + $0x38] sm:$0x1]  ;;  %v1468_v16 = vsel %vm7132_vm2, %v1463_v10, %v1467_v51  ;;  %v2100_v19 = vshll.u32 %v5673_v2, 16  ;;  %v1478_v23 = vsel %vm7132_vm2, %v1473_v8, %v1477_v62  ;;  %v6265_v62 = vpop.f32.mrf.mxu1 }
 0x116   : > { %v2106_v20 = vshll.u32 %v5674_v14, 16  ;;  %1651 = vst [vmem:[#allocation2 + $0x2e0] sm:$0xf] %v1468_v16  ;;  %v1835_v25 = vsel %vm7277_vm5, %v1833_v13, %v1834_v63  ;;  %v2110_v26 = vshrl.u32 %v5674_v14, 16  ;;  %v2116_v27 = vshll.u32 %v5675_v15, 16 }
 0x117   : > { %v5556_v28 = vld [vmem:[%s7100_s14 + $0x90] sm:$0xf]  ;;  %1652 = vst [vmem:[#allocation2 + $0x304] sm:$0xf] %v1478_v23  ;;  %1924 = vst [vmem:[#allocation2 + $0x308] sm:$0xf] %v1835_v25  ;;  %v6266_v13 = vpop.f32.mrf.mxu1 }
 0x118   : > { %v2099_v33 = vrot.slane %v2097_v18, 4  ;;  %v2102_v34 = vrot.slane %v2100_v19, 5  ;;  %v2108_v35 = vrot.slane %v2106_v20, 5  ;;  %v5557_v37 = vld [vmem:[%s7100_s14 + $0x94] sm:$0xf]  ;;  %v1480_v38 = vshrl.u32 %v5556_v28, 16  ;;  %v7821_v20 = vpop.f32.mrf.mxu0 }
 0x119   : > { %v2112_v40 = vrot.slane %v2110_v26, 4  ;;  %v2118_v42 = vrot.slane %v2116_v27, 5  ;;  %v5558_v44 = vld [vmem:[%s7100_s14 + $0x98] sm:$0x1]  ;;  %v1483_v46 = vshll.u32 %v5556_v28, 16  ;;  %v1489_v47 = vshll.u32 %v5557_v37, 16  ;;  %v7825_v32 = vpop.f32.mrf.mxu1 }
 0x11a   : > { %v2103_v49 = vor.u32 %v2102_v34, %v2099_v33  ;;  %v1482_v51 = vrot.slane %v1480_v38, 4  ;;  %v1493_v53 = vshrl.u32 %v5557_v37, 16  ;;  %v1499_v54 = vshll.u32 %v5558_v44, 16  ;;  %v5604_v55 = vld [vmem:[%s7100_s14 + $0x90] sm:$0xe]  ;;  %8669 = vst [vmem:[#allocation3_spill] sm:$0xff] %v7825_v32  ;;  %v7840_v56 = vpop.f32.mrf.mxu0 }
 0x11b   : > { %v2113_v57 = vor.u32 %v2112_v40, %v2108_v35  ;;  %v1485_v58 = vrot.slane %v1483_v46, 5  ;;  %v1491_v59 = vrot.slane %v1489_v47, 5  ;;  %v5605_v60 = vld [vmem:[%s7100_s14 + $0x94] sm:$0xf]  ;;  %v5630_v61 = vrot.slane %v5604_v55, 9  ;;  %v7835_v47 = vpop.f32.mrf.mxu1 }
 0x11c   : > { %v6917_v63 = vld [vmem:[#allocation2 + $0x64] ss:$36 sps:$4 sm:$0xff]   ;;  %v2104_v2 = vrot.slane %v2103_v49, 4  ;;  %v1495_v10 = vrot.slane %v1493_v53, 4  ;;  %v1501_v12 = vrot.slane %v1499_v54, 5  ;;  %v1838_v15 = vrot.slane %v5605_v60, 5 }
 0x11d   : > { %v6920_v1 = vld [vmem:[#allocation2 + $0x60] ss:$36 sps:$4 sm:$0xff]   ;;  %v2114_v7 = vrot.slane %v2113_v57, 4  ;;  %v1486_v9 = vor.u32 %v1485_v58, %v1482_v51  ;;  %v5606_v8 = vld [vmem:[%s7100_s14 + $0x98] sm:$0x1]  ;;  %4763 = vmatprep.mubr.bf16.mxu1 %v6917_v63  ;;  %v7819_v19 = vadd.f32 %v6266_v13, %v6265_v62  ;;  %8670 = vst [vmem:[#allocation4_spill] sm:$0xff] %v7835_v47 }
 0x11e   : > { %v2109_v14 = vsel %vm7132_vm2, %v2104_v2, %v2108_v35  ;;  %v1841_v16 = vrot.slane %v5606_v8, 5  ;;  %v5641_v18 = vld [vmem:[%s7100_s14 + $0x3c] sm:$0xf]  ;;  %4764 = vmatmul.mubr.bf16.gmra.mxu1 %v6920_v1  ;;  %v6921_v23 = vld [vmem:[#allocation2 + $0x2e4] ss:$36 sps:$4 sm:$0xff]   ;;  %v1496_v28 = vor.u32 %v1495_v10, %v1491_v59  ;;  %v1839_v33 = vsel %vm7277_vm5, %v5630_v61, %v1838_v15 }
 0x11f   : > { %v2119_v25 = vsel %vm7132_vm2, %v2114_v7, %v2118_v42  ;;  %2468 = vst [vmem:[#allocation2 + $0xac] sm:$0xf] %v2109_v14  ;;  %v6925_v26 = vld [vmem:[#allocation2 + $0x2e0] ss:$36 sps:$4 sm:$0xff]   ;;  %v1487_v27 = vrot.slane %v1486_v9, 4  ;;  %v1840_v34 = vrot.slane %v1838_v15, 4  ;;  %4674 = vmatprep.mubr.bf16.mxu0 %v6921_v23  ;;  %v6287_v9 = vpop.f32.mrf.mxu1 }
 0x120   : > { %1974 = vst [vmem:[#allocation2 + $0xf0] sm:$0xf] %v5641_v18  ;;  %2469 = vst [vmem:[#allocation2 + $0xd0] sm:$0xf] %v2119_v25  ;;  %v5642_v35 = vld [vmem:[%s7100_s14 + $0x40] sm:$0xf]  ;;  %4675 = vmatmul.mubr.bf16.gmra.mxu0 %v6925_v26  ;;  %v6199_v26 = vpop.f32.mrf.mxu0 }
 0x121   : > { %v5676_v37 = vld [vmem:[%s7100_s14 + $0x3c] sm:$0xf]  ;;  %v1492_v38 = vsel %vm7132_vm2, %v1487_v27, %v1491_v59  ;;  %v1497_v40 = vrot.slane %v1496_v28, 4  ;;  %1925 = vst [vmem:[#allocation2 + $0x32c] sm:$0xf] %v1839_v33  ;;  %v1842_v49 = vsel %vm7277_vm5, %v1840_v34, %v1841_v16  ;;  %v6288_v27 = vpop.f32.mrf.mxu1 }
 0x122   : > { %1975 = vst [vmem:[#allocation2 + $0x114] sm:$0xf] %v5642_v35  ;;  %v5677_v42 = vld [vmem:[%s7100_s14 + $0x40] sm:$0xf]  ;;  %v5678_v44 = vld [vmem:[%s7100_s14 + $0x44] sm:$0x1]  ;;  %v6289_v35 = vadd.f32 %v6288_v27, %v6287_v9 }
 0x123   : > { %v2121_v46 = vshrl.u32 %v5676_v37, 16  ;;  %1653 = vst [vmem:[#allocation2 + $0x328] sm:$0xf] %v1492_v38  ;;  %v2124_v51 = vshll.u32 %v5676_v37, 16  ;;  %v2130_v53 = vshll.u32 %v5677_v42, 16  ;;  %v2134_v54 = vshrl.u32 %v5677_v42, 16 }
 0x124   : > { %v5559_v55 = vld [vmem:[%s7100_s14 + $0x9c] sm:$0xf]  ;;  %v1502_v57 = vsel %vm7132_vm2, %v1497_v40, %v1501_v12  ;;  %1926 = vst [vmem:[#allocation2 + $0x350] sm:$0xf] %v1842_v49  ;;  %v2140_v59 = vshll.u32 %v5678_v44, 16  ;;  %v7850_v49 = vpop.f32.mrf.mxu1 }
 0x125   : > { %v2123_v58 = vrot.slane %v2121_v46, 4  ;;  %v5560_v60 = vld [vmem:[%s7100_s14 + $0xa0] sm:$0xf]  ;;  %v5561_v61 = vld [vmem:[%s7100_s14 + $0xa4] sm:$0x1]  ;;  %v2126_v62 = vrot.slane %v2124_v51, 5  ;;  %v6200_v46 = vpop.f32.mrf.mxu0 }
 0x126   : > { %1654 = vst [vmem:[#allocation2 + $0x34c] sm:$0xf] %v1502_v57  ;;  %v2132_v63 = vrot.slane %v2130_v53, 5  ;;  %v2136_v1 = vrot.slane %v2134_v54, 4  ;;  %v1504_v2 = vshrl.u32 %v5559_v55, 16  ;;  %v2142_v10 = vrot.slane %v2140_v59, 5 }
 0x127   : > { %v5607_v7 = vld [vmem:[%s7100_s14 + $0x9c] sm:$0xe]  ;;  %v1507_v8 = vshll.u32 %v5559_v55, 16  ;;  %v1513_v13 = vshll.u32 %v5560_v60, 16  ;;  %v1517_v14 = vshrl.u32 %v5560_v60, 16  ;;  %v2127_v12 = vor.u32 %v2126_v62, %v2123_v58 }
 0x128   : > { %v5608_v15 = vld [vmem:[%s7100_s14 + $0xa0] sm:$0xf]  ;;  %v2137_v16 = vor.u32 %v2136_v1, %v2132_v63  ;;  %v1506_v18 = vrot.slane %v1504_v2, 4  ;;  %v1523_v23 = vshll.u32 %v5561_v61, 16  ;;  %v5609_v25 = vld [vmem:[%s7100_s14 + $0xa4] sm:$0x1]  ;;  %v7859_v2 = vpop.f32.mrf.mxu0 }
 0x129   : > { %v6923_v28 = vld [vmem:[#allocation2 + $0xac] ss:$36 sps:$4 sm:$0xff]   ;;  %v1509_v34 = vrot.slane %v1507_v8, 5  ;;  %v2128_v37 = vrot.slane %v2127_v12, 4  ;;  %v1515_v40 = vrot.slane %v1513_v13, 5  ;;  %v1519_v42 = vrot.slane %v1517_v14, 4 }
 0x12a   : > { %v6926_v33 = vld [vmem:[#allocation2 + $0xa8] ss:$36 sps:$4 sm:$0xff]   ;;  %v2138_v38 = vrot.slane %v2137_v16, 4  ;;  %4771 = vmatprep.mubr.bf16.mxu1 %v6923_v28  ;;  %v1525_v53 = vrot.slane %v1523_v23, 5  ;;  %v5631_v54 = vrot.slane %v5607_v7, 9  ;;  %v1845_v55 = vrot.slane %v5608_v15, 5  ;;  %v7869_v23 = vpop.f32.mrf.mxu0 }
 0x12b   : > { %v5643_v44 = vld [vmem:[%s7100_s14 + $0x48] sm:$0xf]  ;;  %v1510_v51 = vor.u32 %v1509_v34, %v1506_v18  ;;  %v5644_v57 = vld [vmem:[%s7100_s14 + $0x4c] sm:$0xf]  ;;  %4772 = vmatmul.mubr.bf16.gmra.mxu1 %v6926_v33  ;;  %v2133_v58 = vsel %vm7132_vm2, %v2128_v37, %v2132_v63  ;;  %v1520_v60 = vor.u32 %v1519_v42, %v1515_v40  ;;  %v1848_v61 = vrot.slane %v5609_v25, 5  ;;  %v6291_v25 = vpop.f32.mrf.mxu1 }
 0x12c   : > { %1976 = vst [vmem:[#allocation2 + $0x138] sm:$0xf] %v5643_v44  ;;  %v2143_v59 = vsel %vm7132_vm2, %v2138_v38, %v2142_v10  ;;  %1977 = vst [vmem:[#allocation2 + $0x15c] sm:$0xf] %v5644_v57  ;;  %v5679_v62 = vld [vmem:[%s7100_s14 + $0x48] sm:$0xf]  ;;  %v1846_v13 = vsel %vm7277_vm5, %v5631_v54, %v1845_v55  ;;  %v7863_v63 = vadd.f32 %v6200_v46, %v6199_v26  ;;  %v6205_v54 = vpop.f32.mrf.mxu0 }
 0x12d   : > { %v5680_v1 = vld [vmem:[%s7100_s14 + $0x4c] sm:$0xf]  ;;  %2470 = vst [vmem:[#allocation2 + $0xf4] sm:$0xf] %v2133_v58  ;;  %2471 = vst [vmem:[#allocation2 + $0x118] sm:$0xf] %v2143_v59  ;;  %v7866_v10 = vadd.f32 %v6289_v35, %v7694_v52 }
 0x12e   : > { %v6928_v9 = vld [vmem:[#allocation2 + $0x32c] ss:$36 sps:$4 sm:$0xff]   ;;  %v1511_v8 = vrot.slane %v1510_v51, 4  ;;  %v1521_v14 = vrot.slane %v1520_v60, 4  ;;  %v1847_v15 = vrot.slane %v1845_v55, 4  ;;  %v2145_v16 = vshrl.u32 %v5679_v62, 16  ;;  %v6293_v60 = vpop.f32.mrf.mxu1 }
 0x12f   : > { %v6932_v7 = vld [vmem:[#allocation2 + $0x328] ss:$36 sps:$4 sm:$0xff]   ;;  %1927 = vst [vmem:[#allocation2 + $0x374] sm:$0xf] %v1846_v13  ;;  %v5681_v12 = vld [vmem:[%s7100_s14 + $0x50] sm:$0x1]  ;;  %4682 = vmatprep.mubr.bf16.mxu0 %v6928_v9  ;;  %v6206_v13 = vpop.f32.mrf.mxu0 }
 0x130   : > { %v2148_v18 = vshll.u32 %v5679_v62, 16  ;;  %v1516_v27 = vsel %vm7132_vm2, %v1511_v8, %v1515_v40  ;;  %v2154_v26 = vshll.u32 %v5680_v1, 16  ;;  %v2158_v28 = vshrl.u32 %v5680_v1, 16  ;;  %4683 = vmatmul.mubr.bf16.gmra.mxu0 %v6932_v7  ;;  %v5562_v38 = vld [vmem:[%s7100_s14 + $0xa8] sm:$0xf] }
 0x131   : > { %v2164_v33 = vshll.u32 %v5681_v12, 16  ;;  %v1526_v52 = vsel %vm7132_vm2, %v1521_v14, %v1525_v53  ;;  %1655 = vst [vmem:[#allocation2 + $0x370] sm:$0xf] %v1516_v27  ;;  %v1849_v34 = vsel %vm7277_vm5, %v1847_v15, %v1848_v61  ;;  %v2147_v35 = vrot.slane %v2145_v16, 4  ;;  %v5563_v46 = vld [vmem:[%s7100_s14 + $0xac] sm:$0xf]  ;;  %v6294_v27 = vpop.f32.mrf.mxu1 }
 0x132   : > { %v2150_v37 = vrot.slane %v2148_v18, 5  ;;  %1656 = vst [vmem:[#allocation2 + $0x394] sm:$0xf] %v1526_v52  ;;  %1928 = vst [vmem:[#allocation2 + $0x398] sm:$0xf] %v1849_v34  ;;  %v2156_v42 = vrot.slane %v2154_v26, 5  ;;  %v6180_v62 = vadd.f32 %v7713_v22, %v7701_v0  ;;  %v6292_v16 = vadd.f32 %v6291_v25, %v7850_v49  ;;  %v7887_v22 = vpop.f32.mrf.mxu0 }
 0x133   : > { %v2160_v40 = vrot.slane %v2158_v28, 4  ;;  %v2166_v44 = vrot.slane %v2164_v33, 5  ;;  %v1528_v51 = vshrl.u32 %v5562_v38, 16  ;;  %v5564_v57 = vld [vmem:[%s7100_s14 + $0xb0] sm:$0x1]  ;;  %v1531_v53 = vshll.u32 %v5562_v38, 16 }
 0x134   : > { %v2151_v55 = vor.u32 %v2150_v37, %v2147_v35  ;;  %v1537_v58 = vshll.u32 %v5563_v46, 16  ;;  %v1541_v59 = vshrl.u32 %v5563_v46, 16  ;;  %v1547_v9 = vshll.u32 %v5564_v57, 16  ;;  %v5610_v7 = vld [vmem:[%s7100_s14 + $0xa8] sm:$0xe] }
 0x135   : > { %v2161_v61 = vor.u32 %v2160_v40, %v2156_v42  ;;  %v1530_v1 = vrot.slane %v1528_v51, 4  ;;  %v5611_v8 = vld [vmem:[%s7100_s14 + $0xac] sm:$0xf]  ;;  %v6930_v14 = vld [vmem:[#allocation2 + $0xf4] ss:$36 sps:$4 sm:$0xff]   ;;  %v1533_v12 = vrot.slane %v1531_v53, 5  ;;  %v7885_v18 = vadd.f32 %v6206_v13, %v6205_v54  ;;  %v6296_v40 = vpop.f32.mrf.mxu1 }
 0x136   : > { %v2152_v15 = vrot.slane %v2151_v55, 4  ;;  %v6933_v26 = vld [vmem:[#allocation2 + $0xf0] ss:$36 sps:$4 sm:$0xff]   ;;  %v1539_v33 = vrot.slane %v1537_v58, 5  ;;  %v1543_v52 = vrot.slane %v1541_v59, 4  ;;  %v1549_v0 = vrot.slane %v1547_v9, 5  ;;  %4779 = vmatprep.mubr.bf16.mxu1 %v6930_v14 }
 0x137   : > { %v2162_v28 = vrot.slane %v2161_v61, 4  ;;  %v1534_v35 = vor.u32 %v1533_v12, %v1530_v1  ;;  %v5612_v37 = vld [vmem:[%s7100_s14 + $0xb0] sm:$0x1]  ;;  %v5632_v38 = vrot.slane %v5610_v7, 9  ;;  %v1852_v49 = vrot.slane %v5611_v8, 5  ;;  %4780 = vmatmul.mubr.bf16.gmra.mxu1 %v6933_v26  ;;  %v6297_v9 = vpop.f32.mrf.mxu1 }
 0x138   : > { %v2157_v34 = vsel %vm7132_vm2, %v2152_v15, %v2156_v42  ;;  %v5645_v25 = vld [vmem:[%s7100_s14 + $0x54] sm:$0xf]  ;;  %v1544_v51 = vor.u32 %v1543_v52, %v1539_v33  ;;  %v1855_v54 = vrot.slane %v5612_v37, 5  ;;  %v5646_v55 = vld [vmem:[%s7100_s14 + $0x58] sm:$0xf]  ;;  %v7897_v53 = vadd.f32 %v6292_v16, %v6180_v62  ;;  %v7899_v42 = vpop.f32.mrf.mxu0 }
 0x139   : > { %v2167_v46 = vsel %vm7132_vm2, %v2162_v28, %v2166_v44  ;;  %2472 = vst [vmem:[#allocation2 + $0x13c] sm:$0xf] %v2157_v34  ;;  %1978 = vst [vmem:[#allocation2 + $0x180] sm:$0xf] %v5645_v25  ;;  %v5682_v57 = vld [vmem:[%s7100_s14 + $0x54] sm:$0xf]  ;;  %v1853_v1 = vsel %vm7277_vm5, %v5632_v38, %v1852_v49  ;;  %v6295_v44 = vadd.f32 %v6294_v27, %v6293_v60 }
 0x13a   : > { %v6934_v58 = vld [vmem:[#allocation2 + $0x374] ss:$36 sps:$4 sm:$0xff]   ;;  %2473 = vst [vmem:[#allocation2 + $0x160] sm:$0xf] %v2167_v46  ;;  %v1535_v61 = vrot.slane %v1534_v35, 4  ;;  %v1545_v7 = vrot.slane %v1544_v51, 4  ;;  %v6186_v14 = vadd.f32 %v7747_v31, %v7734_v4  ;;  %v6298_v15 = vadd.f32 %v6297_v9, %v6296_v40  ;;  %v6211_v37 = vpop.f32.mrf.mxu0 }
 0x13b   : > { %v6938_v59 = vld [vmem:[#allocation2 + $0x370] ss:$36 sps:$4 sm:$0xff]   ;;  %1979 = vst [vmem:[#allocation2 + $0x1a4] sm:$0xf] %v5646_v55  ;;  %v1854_v8 = vrot.slane %v1852_v49, 4  ;;  %4690 = vmatprep.mubr.bf16.mxu0 %v6934_v58  ;;  %v2169_v16 = vshrl.u32 %v5682_v57, 16 }
 0x13c   : > { %1929 = vst [vmem:[#allocation2 + $0x3bc] sm:$0xf] %v1853_v1  ;;  %v5683_v13 = vld [vmem:[%s7100_s14 + $0x58] sm:$0xf]  ;;  %v5684_v62 = vld [vmem:[%s7100_s14 + $0x5c] sm:$0x1]  ;;  %v1540_v12 = vsel %vm7132_vm2, %v1535_v61, %v1539_v33  ;;  %4691 = vmatmul.mubr.bf16.gmra.mxu0 %v6938_v59  ;;  %v1550_v27 = vsel %vm7132_vm2, %v1545_v7, %v1549_v0  ;;  %v6299_v33 = vpop.f32.mrf.mxu1  ;;  %v6212_v58 = vpop.f32.mrf.mxu0 }
 0x13d   : > { %v2172_v26 = vshll.u32 %v5682_v57, 16  ;;  %v2178_v28 = vshll.u32 %v5683_v13, 16  ;;  %v5565_v60 = vld [vmem:[%s7100_s14 + $0xb4] sm:$0xf]  ;;  %1657 = vst [vmem:[#allocation2 + $0x3b8] sm:$0xf] %v1540_v12  ;;  %v1856_v52 = vsel %vm7277_vm5, %v1854_v8, %v1855_v54 }
 0x13e   : > { %v2182_v34 = vshrl.u32 %v5683_v13, 16  ;;  %v2188_v4 = vshll.u32 %v5684_v62, 16  ;;  %v5566_v31 = vld [vmem:[%s7100_s14 + $0xb8] sm:$0xf]  ;;  %v5567_v35 = vld [vmem:[%s7100_s14 + $0xbc] sm:$0x1]  ;;  %v6300_v59 = vpop.f32.mrf.mxu1 }
 0x13f   : > { %1658 = vst [vmem:[#allocation2 + $0x3dc] sm:$0xf] %v1550_v27  ;;  %1930 = vst [vmem:[#allocation2 + $0x3e0] sm:$0xf] %v1856_v52  ;;  %v2171_v38 = vrot.slane %v2169_v16, 4  ;;  %v2174_v49 = vrot.slane %v2172_v26, 5  ;;  %v7920_v26 = vadd.f32 %v6295_v44, %v7743_v24 }
 0x140   : > { %v2180_v25 = vrot.slane %v2178_v28, 5  ;;  %v1552_v40 = vshrl.u32 %v5565_v60, 16  ;;  %v5613_v46 = vld [vmem:[%s7100_s14 + $0xb4] sm:$0xe]  ;;  %v2184_v0 = vrot.slane %v2182_v34, 4  ;;  %v2190_v51 = vrot.slane %v2188_v4, 5  ;;  %v7926_v27 = vpop.f32.mrf.mxu1 }
 0x141   : > { %v1555_v55 = vshll.u32 %v5565_v60, 16  ;;  %v1561_v57 = vshll.u32 %v5566_v31, 16  ;;  %v5614_v54 = vld [vmem:[%s7100_s14 + $0xb8] sm:$0xf]  ;;  %v2175_v61 = vor.u32 %v2174_v49, %v2171_v38  ;;  %v1565_v9 = vshrl.u32 %v5566_v31, 16  ;;  %v7924_v60 = vpop.f32.mrf.mxu0 }
 0x142   : > { %v1554_v1 = vrot.slane %v1552_v40, 4  ;;  %v1571_v7 = vshll.u32 %v5567_v35, 16  ;;  %v5615_v8 = vld [vmem:[%s7100_s14 + $0xbc] sm:$0x1]  ;;  %v2185_v12 = vor.u32 %v2184_v0, %v2180_v25  ;;  %v7922_v28 = vadd.f32 %v6298_v15, %v6186_v14  ;;  %v5647_v35 = vld [vmem:[%s7100_s14 + $0x60] sm:$0xf]  ;;  %v7930_v44 = vpop.f32.mrf.mxu1 }
 0x143   : > { %v6936_v13 = vld [vmem:[#allocation2 + $0x13c] ss:$36 sps:$4 sm:$0xff]   ;;  %v1557_v16 = vrot.slane %v1555_v55, 5  ;;  %v2176_v52 = vrot.slane %v2175_v61, 4  ;;  %v1563_v34 = vrot.slane %v1561_v57, 5  ;;  %v1567_v4 = vrot.slane %v1565_v9, 4 }
 0x144   : > { %v6939_v62 = vld [vmem:[#allocation2 + $0x138] ss:$36 sps:$4 sm:$0xff]   ;;  %v1573_v31 = vrot.slane %v1571_v7, 5  ;;  %4787 = vmatprep.mubr.bf16.mxu1 %v6936_v13  ;;  %v2186_v38 = vrot.slane %v2185_v12, 4  ;;  %v5633_v40 = vrot.slane %v5613_v46, 9  ;;  %v1859_v0 = vrot.slane %v5614_v54, 5  ;;  %v7938_v7 = vpop.f32.mrf.mxu0 }
 0x145   : > { %v1558_v49 = vor.u32 %v1557_v16, %v1554_v1  ;;  %v5648_v24 = vld [vmem:[%s7100_s14 + $0x64] sm:$0xf]  ;;  %1980 = vst [vmem:[#allocation2 + $0x1c8] sm:$0xf] %v5647_v35  ;;  %4788 = vmatmul.mubr.bf16.gmra.mxu1 %v6939_v62  ;;  %v2181_v14 = vsel %vm7132_vm2, %v2176_v52, %v2180_v25  ;;  %v1568_v15 = vor.u32 %v1567_v4, %v1563_v34  ;;  %v1862_v55 = vrot.slane %v5615_v8, 5 }
 0x146   : > { %1981 = vst [vmem:[#allocation2 + $0x1ec] sm:$0xf] %v5648_v24  ;;  %v5685_v57 = vld [vmem:[%s7100_s14 + $0x60] sm:$0xf]  ;;  %v5686_v61 = vld [vmem:[%s7100_s14 + $0x64] sm:$0xf]  ;;  %v7936_v9 = vadd.f32 %v6212_v58, %v6211_v37  ;;  %v2191_v54 = vsel %vm7132_vm2, %v2186_v38, %v2190_v51  ;;  %v1860_v25 = vsel %vm7277_vm5, %v5633_v40, %v1859_v0  ;;  %v6301_v62 = vadd.f32 %v6300_v59, %v6299_v33  ;;  %v7947_v38 = vpop.f32.mrf.mxu1  ;;  %v6217_v24 = vpop.f32.mrf.mxu0 }
 0x147   : > { %v6941_v46 = vld [vmem:[#allocation2 + $0x3bc] ss:$36 sps:$4 sm:$0xff]   ;;  %2474 = vst [vmem:[#allocation2 + $0x184] sm:$0xf] %v2181_v14  ;;  %v1559_v13 = vrot.slane %v1558_v49, 4  ;;  %v1569_v8 = vrot.slane %v1568_v15, 4 }
 0x148   : > { %v6945_v1 = vld [vmem:[#allocation2 + $0x3b8] ss:$36 sps:$4 sm:$0xff]   ;;  %2475 = vst [vmem:[#allocation2 + $0x1a8] sm:$0xf] %v2191_v54  ;;  %v1861_v12 = vrot.slane %v1859_v0, 4  ;;  %v2193_v58 = vshrl.u32 %v5685_v57, 16  ;;  %4698 = vmatprep.mubr.bf16.mxu0 %v6941_v46  ;;  %v6306_v46 = vpop.f32.mrf.mxu1 }
 0x149   : > { %1931 = vst [vmem:[#allocation2 + $0x404] sm:$0xf] %v1860_v25  ;;  %v5687_v37 = vld [vmem:[%s7100_s14 + $0x68] sm:$0x1]  ;;  %v2196_v16 = vshll.u32 %v5685_v57, 16  ;;  %v1564_v52 = vsel %vm7132_vm2, %v1559_v13, %v1563_v34  ;;  %v2202_v51 = vshll.u32 %v5686_v61, 16  ;;  %4699 = vmatmul.mubr.bf16.gmra.mxu0 %v6945_v1  ;;  %v1574_v33 = vsel %vm7132_vm2, %v1569_v8, %v1573_v31 }
 0x14a   : > { %v2206_v4 = vshrl.u32 %v5686_v61, 16  ;;  %v2212_v35 = vshll.u32 %v5687_v37, 16  ;;  %1659 = vst [vmem:[#allocation2 + $0x400] sm:$0xf] %v1564_v52  ;;  %v1863_v59 = vsel %vm7277_vm5, %v1861_v12, %v1862_v55  ;;  %v2195_v49 = vrot.slane %v2193_v58, 4  ;;  %v6218_v55 = vpop.f32.mrf.mxu0 }
 0x14b   : > { %v2198_v40 = vrot.slane %v2196_v16, 5  ;;  %v5568_v0 = vld [vmem:[%s7100_s14 + $0xc0] sm:$0xf]  ;;  %1660 = vst [vmem:[#allocation2 + $0x424] sm:$0xf] %v1574_v33  ;;  %v2204_v34 = vrot.slane %v2202_v51, 5  ;;  %v7959_v52 = vadd.f32 %v6301_v62, %v7775_v17  ;;  %v6308_v51 = vpop.f32.mrf.mxu1  ;;  %v7967_v17 = vadd.f32 %v6218_v55, %v6217_v24 }
 0x14c   : > { %1932 = vst [vmem:[#allocation2 + $0x428] sm:$0xf] %v1863_v59  ;;  %v2208_v14 = vrot.slane %v2206_v4, 4  ;;  %v2214_v15 = vrot.slane %v2212_v35, 5  ;;  %v5569_v57 = vld [vmem:[%s7100_s14 + $0xc4] sm:$0xf] }
 0x14d   : > { %v1576_v61 = vshrl.u32 %v5568_v0, 16  ;;  %v2199_v31 = vor.u32 %v2198_v40, %v2195_v49  ;;  %v5570_v54 = vld [vmem:[%s7100_s14 + $0xc8] sm:$0x1]  ;;  %v1579_v1 = vshll.u32 %v5568_v0, 16  ;;  %v1585_v13 = vshll.u32 %v5569_v57, 16  ;;  %v7961_v49 = vpop.f32.mrf.mxu0  ;;  %v6309_v62 = vpop.f32.mrf.mxu1 }
 0x14e   : > { %v1589_v25 = vshrl.u32 %v5569_v57, 16  ;;  %v2209_v8 = vor.u32 %v2208_v14, %v2204_v34  ;;  %v1595_v37 = vshll.u32 %v5570_v54, 16  ;;  %v5616_v58 = vld [vmem:[%s7100_s14 + $0xc0] sm:$0xe]  ;;  %v5617_v16 = vld [vmem:[%s7100_s14 + $0xc4] sm:$0xf]  ;;  %v6192_v14 = vadd.f32 %v7792_v5, %v7780_v41 }
 0x14f   : > { %v1578_v12 = vrot.slane %v1576_v61, 4  ;;  %v2200_v4 = vrot.slane %v2199_v31, 4  ;;  %v1581_v35 = vrot.slane %v1579_v1, 5  ;;  %v1587_v33 = vrot.slane %v1585_v13, 5  ;;  %v6943_v40 = vld [vmem:[#allocation2 + $0x184] ss:$36 sps:$4 sm:$0xff]   ;;  %v7973_v32 = vpop.f32.mrf.mxu0 }
 0x150   : > { %v1591_v59 = vrot.slane %v1589_v25, 4  ;;  %v6946_v0 = vld [vmem:[#allocation2 + $0x180] ss:$36 sps:$4 sm:$0xff]   ;;  %v2210_v57 = vrot.slane %v2209_v8, 4  ;;  %v6304_v61 = vadd.f32 %v7930_v44, %v7926_v27  ;;  %v1597_v13 = vrot.slane %v1595_v37, 5  ;;  %4795 = vmatprep.mubr.bf16.mxu1 %v6943_v40 }
 0x151   : > { %v2205_v31 = vsel %vm7132_vm2, %v2200_v4, %v2204_v34  ;;  %v1582_v54 = vor.u32 %v1581_v35, %v1578_v12  ;;  %v5618_v25 = vld [vmem:[%s7100_s14 + $0xc8] sm:$0x1]  ;;  %v5649_v47 = vld [vmem:[%s7100_s14 + $0x6c] sm:$0xf]  ;;  %v5634_v5 = vrot.slane %v5616_v58, 9  ;;  %v1866_v27 = vrot.slane %v5617_v16, 5  ;;  %4796 = vmatmul.mubr.bf16.gmra.mxu1 %v6946_v0  ;;  %v6223_v40 = vpop.f32.mrf.mxu0  ;;  %v6311_v0 = vpop.f32.mrf.mxu1 }
 0x152   : > { %v1592_v1 = vor.u32 %v1591_v59, %v1587_v33  ;;  %v2215_v41 = vsel %vm7132_vm2, %v2210_v57, %v2214_v15  ;;  %2476 = vst [vmem:[#allocation2 + $0x1cc] sm:$0xf] %v2205_v31  ;;  %v1869_v44 = vrot.slane %v5618_v25, 5  ;;  %v5650_v24 = vld [vmem:[%s7100_s14 + $0x70] sm:$0xf]  ;;  %v6198_v12 = vadd.f32 %v7840_v56, %v7821_v20 }
 0x153   : > { %1982 = vst [vmem:[#allocation2 + $0x210] sm:$0xf] %v5649_v47  ;;  %v6947_v34 = vld [vmem:[#allocation2 + $0x404] ss:$36 sps:$4 sm:$0xff]   ;;  %2477 = vst [vmem:[#allocation2 + $0x1f0] sm:$0xf] %v2215_v41  ;;  %v7980_v37 = vadd.f32 %v6304_v61, %v6192_v14  ;;  %v6307_v15 = vadd.f32 %v6306_v46, %v7947_v38  ;;  %v1867_v16 = vsel %vm7277_vm5, %v5634_v5, %v1866_v27 }
 0x154   : > { %v6951_v55 = vld [vmem:[#allocation2 + $0x400] ss:$36 sps:$4 sm:$0xff]   ;;  %v1583_v8 = vrot.slane %v1582_v54, 4  ;;  %1983 = vst [vmem:[#allocation2 + $0x234] sm:$0xf] %v5650_v24  ;;  %v1593_v58 = vrot.slane %v1592_v1, 4  ;;  %v6310_v59 = vadd.f32 %v6309_v62, %v6308_v51  ;;  %4706 = vmatprep.mubr.bf16.mxu0 %v6947_v34  ;;  %v6224_v54 = vpop.f32.mrf.mxu0  ;;  %v6312_v1 = vpop.f32.mrf.mxu1 }
 0x155   : > { %v1868_v4 = vrot.slane %v1866_v27, 4  ;;  %v5688_v47 = vld [vmem:[%s7100_s14 + $0x6c] sm:$0xf]  ;;  %v5689_v35 = vld [vmem:[%s7100_s14 + $0x70] sm:$0xf]  ;;  %4707 = vmatmul.mubr.bf16.gmra.mxu0 %v6951_v55  ;;  %v7998_v27 = vadd.f32 %v6307_v15, %v7813_v6 }
 0x156   : > { %v1588_v20 = vsel %vm7132_vm2, %v1583_v8, %v1587_v33  ;;  %1933 = vst [vmem:[#allocation2 + $0x44c] sm:$0xf] %v1867_v16  ;;  %v5690_v56 = vld [vmem:[%s7100_s14 + $0x74] sm:$0x1]  ;;  %v2217_v57 = vshrl.u32 %v5688_v47, 16  ;;  %v2220_v38 = vshll.u32 %v5688_v47, 16  ;;  %v1598_v14 = vsel %vm7132_vm2, %v1593_v58, %v1597_v13  ;;  %v6226_v16 = vpop.f32.mrf.mxu0 }
 0x157   : > { %v2226_v46 = vshll.u32 %v5689_v35, 16  ;;  %1661 = vst [vmem:[#allocation2 + $0x448] sm:$0xf] %v1588_v20  ;;  %v1870_v51 = vsel %vm7277_vm5, %v1868_v4, %v1869_v44  ;;  %v2230_v61 = vshrl.u32 %v5689_v35, 16  ;;  %v2236_v62 = vshll.u32 %v5690_v56, 16  ;;  %v6314_v4 = vpop.f32.mrf.mxu1 }
 0x158   : > { %v5651_v31 = vld [vmem:[%s7100_s14 + $0x78] sm:$0xf]  ;;  %v5652_v33 = vld [vmem:[%s7100_s14 + $0x7c] sm:$0xf]  ;;  %1662 = vst [vmem:[#allocation2 + $0x46c] sm:$0xf] %v1598_v14  ;;  %v8002_v8 = vadd.f32 %v6310_v59, %v6198_v12  ;;  %v8004_v58 = vadd.f32 %v6224_v54, %v6223_v40  ;;  %v8009_v14 = vadd.f32 %v7869_v23, %v7859_v2  ;;  %v6313_v12 = vadd.f32 %v6312_v1, %v6311_v0 }
 0x159   : > { %1934 = vst [vmem:[#allocation2 + $0x470] sm:$0xf] %v1870_v51  ;;  %v2219_v25 = vrot.slane %v2217_v57, 4  ;;  %v2222_v41 = vrot.slane %v2220_v38, 5  ;;  %v2228_v5 = vrot.slane %v2226_v46, 5  ;;  %v2232_v44 = vrot.slane %v2230_v61, 4  ;;  %v6315_v59 = vpop.f32.mrf.mxu1 }
 0x15a   : > { %1984 = vst [vmem:[#allocation2 + $0x258] sm:$0xf] %v5651_v31  ;;  %1985 = vst [vmem:[#allocation2 + $0x27c] sm:$0xf] %v5652_v33  ;;  %v5691_v13 = vld [vmem:[%s7100_s14 + $0x78] sm:$0xf]  ;;  %v6227_v33 = vpop.f32.mrf.mxu0 }
 0x15b   : > { %v2238_v24 = vrot.slane %v2236_v62, 5  ;;  %v5692_v34 = vld [vmem:[%s7100_s14 + $0x7c] sm:$0xf]  ;;  %v5693_v55 = vld [vmem:[%s7100_s14 + $0x80] sm:$0x1]  ;;  %v2223_v47 = vor.u32 %v2222_v41, %v2219_v25  ;;  %v2241_v35 = vshrl.u32 %v5691_v13, 16  ;;  %v2233_v6 = vor.u32 %v2232_v44, %v2228_v5 }
 0x15c   : > { %v2244_v20 = vshll.u32 %v5691_v13, 16  ;;  %v2250_v56 = vshll.u32 %v5692_v34, 16  ;;  %v5715_v57 = vld [vmem:[%s7100_s14 + $0x18] sm:$0xe]  ;;  %v6949_v38 = vld [vmem:[#allocation2 + $0x1cc] ss:$36 sps:$4 sm:$0xff]  }
 0x15d   : > { %v6952_v46 = vld [vmem:[#allocation2 + $0x1c8] ss:$36 sps:$4 sm:$0xff]   ;;  %v2254_v15 = vshrl.u32 %v5692_v34, 16  ;;  %v2224_v40 = vrot.slane %v2223_v47, 4  ;;  %v2243_v51 = vrot.slane %v2241_v35, 4  ;;  %4803 = vmatprep.mubr.bf16.mxu1 %v6949_v38  ;;  %v2234_v54 = vrot.slane %v2233_v6, 4  ;;  %v6317_v38 = vpop.f32.mrf.mxu1 }
 0x15e   : > { %v2246_v61 = vrot.slane %v2244_v20, 5  ;;  %v2252_v62 = vrot.slane %v2250_v56, 5  ;;  %v5716_v31 = vld [vmem:[%s7100_s14 + $0x1c] sm:$0xf]  ;;  %v2260_v41 = vshll.u32 %v5693_v55, 16  ;;  %v5763_v44 = vrot.slane %v5715_v57, 9  ;;  %4804 = vmatmul.mubr.bf16.gmra.mxu1 %v6952_v46 }
 0x15f   : > { %v2256_v25 = vrot.slane %v2254_v15, 4  ;;  %v5717_v13 = vld [vmem:[%s7100_s14 + $0x20] sm:$0x1]  ;;  %v2229_v2 = vsel %vm7132_vm2, %v2224_v40, %v2228_v5  ;;  %v2594_v0 = vrot.slane %v5716_v31, 5  ;;  %v5718_v34 = vld [vmem:[%s7100_s14 + $0x24] sm:$0xe]  ;;  %v2239_v35 = vsel %vm7132_vm2, %v2234_v54, %v2238_v24 }
 0x160   : > { %v2247_v23 = vor.u32 %v2246_v61, %v2243_v51  ;;  %v2597_v1 = vrot.slane %v5717_v13, 5  ;;  %v6954_v47 = vld [vmem:[#allocation2 + $0x44c] ss:$36 sps:$4 sm:$0xff]   ;;  %2478 = vst [vmem:[#allocation2 + $0x214] sm:$0xf] %v2229_v2  ;;  %v2262_v55 = vrot.slane %v2260_v41, 5  ;;  %v8019_v57 = vadd.f32 %v6313_v12, %v7863_v63  ;;  %v6229_v51 = vpop.f32.mrf.mxu0 }
 0x161   : > { %v6958_v20 = vld [vmem:[#allocation2 + $0x448] ss:$36 sps:$4 sm:$0xff]   ;;  %v2257_v56 = vor.u32 %v2256_v25, %v2252_v62  ;;  %2479 = vst [vmem:[#allocation2 + $0x238] sm:$0xf] %v2239_v35  ;;  %v2595_v46 = vsel %vm7277_vm5, %v5763_v44, %v2594_v0  ;;  %v2596_v6 = vrot.slane %v2594_v0, 4  ;;  %v8025_v24 = vadd.f32 %v6227_v33, %v6226_v16  ;;  %4714 = vmatprep.mubr.bf16.mxu0 %v6954_v47  ;;  %v6318_v25 = vpop.f32.mrf.mxu1 }
 0x162   : > { %v2248_v5 = vrot.slane %v2247_v23, 4  ;;  %v5719_v15 = vld [vmem:[%s7100_s14 + $0x28] sm:$0xf]  ;;  %v5720_v40 = vld [vmem:[%s7100_s14 + $0x2c] sm:$0x1]  ;;  %v5764_v63 = vrot.slane %v5718_v34, 9  ;;  %4715 = vmatmul.mubr.bf16.gmra.mxu0 %v6958_v20  ;;  %v6316_v2 = vadd.f32 %v6315_v59, %v6314_v4  ;;  %v6230_v23 = vpop.f32.mrf.mxu0  ;;  %v6319_v0 = vadd.f32 %v6318_v25, %v6317_v38 }
 0x163   : > { %v2258_v61 = vrot.slane %v2257_v56, 4  ;;  %2736 = vst [vmem:[#allocation2 + $0x20] sm:$0xf] %v2595_v46  ;;  %v2601_v12 = vrot.slane %v5719_v15, 5  ;;  %v2604_v31 = vrot.slane %v5720_v40, 5  ;;  %v2598_v13 = vsel %vm7277_vm5, %v2596_v6, %v2597_v1  ;;  %v6320_v56 = vpop.f32.mrf.mxu1 }
 0x164   : > { %v5653_v54 = vld [vmem:[%s7100_s14 + $0x84] sm:$0xf]  ;;  %v2253_v41 = vsel %vm7132_vm2, %v2248_v5, %v2252_v62  ;;  %v5654_v16 = vld [vmem:[%s7100_s14 + $0x88] sm:$0xf]  ;;  %2737 = vst [vmem:[#allocation2 + $0x44] sm:$0xf] %v2598_v13  ;;  %v6232_v46 = vpop.f32.mrf.mxu0  ;;  %v6210_v13 = vadd.f32 %v7899_v42, %v7887_v22  ;;  %v8056_v22 = vadd.f32 %v6319_v0, %v7885_v18 }
 0x165   : > { %1986 = vst [vmem:[#allocation2 + $0x2a0] sm:$0xf] %v5653_v54  ;;  %v5694_v33 = vld [vmem:[%s7100_s14 + $0x84] sm:$0xf]  ;;  %v5695_v44 = vld [vmem:[%s7100_s14 + $0x88] sm:$0xf]  ;;  %v2263_v34 = vsel %vm7132_vm2, %v2258_v61, %v2262_v55  ;;  %v2602_v62 = vsel %vm7277_vm5, %v5764_v63, %v2601_v12 }
 0x166   : > { %2480 = vst [vmem:[#allocation2 + $0x25c] sm:$0xf] %v2253_v41  ;;  %v2603_v47 = vrot.slane %v2601_v12, 4  ;;  %1987 = vst [vmem:[#allocation2 + $0x2c4] sm:$0xf] %v5654_v16  ;;  %v2265_v35 = vshrl.u32 %v5694_v33, 16  ;;  %v6321_v12 = vpop.f32.mrf.mxu1  ;;  %v6233_v16 = vpop.f32.mrf.mxu0 }
 0x167   : > { %v5696_v1 = vld [vmem:[%s7100_s14 + $0x8c] sm:$0x1]  ;;  %v5721_v20 = vld [vmem:[%s7100_s14 + $0x30] sm:$0xe]  ;;  %2481 = vst [vmem:[#allocation2 + $0x280] sm:$0xf] %v2263_v34 }
 0x168   : > { %2738 = vst [vmem:[#allocation2 + $0x68] sm:$0xf] %v2602_v62  ;;  %v2268_v4 = vshll.u32 %v5694_v33, 16  ;;  %v2274_v59 = vshll.u32 %v5695_v44, 16  ;;  %v2278_v38 = vshrl.u32 %v5695_v44, 16  ;;  %v2284_v5 = vshll.u32 %v5696_v1, 16 }
 0x169   : > { %v5722_v55 = vld [vmem:[%s7100_s14 + $0x34] sm:$0xf]  ;;  %v2605_v6 = vsel %vm7277_vm5, %v2603_v47, %v2604_v31  ;;  %v2267_v15 = vrot.slane %v2265_v35, 4  ;;  %v5723_v40 = vld [vmem:[%s7100_s14 + $0x38] sm:$0x1]  ;;  %v5765_v61 = vrot.slane %v5721_v20, 9  ;;  %v8050_v62 = vadd.f32 %v6316_v2, %v8009_v14  ;;  %v6323_v14 = vpop.f32.mrf.mxu1 }
 0x16a   : > { %v2608_v63 = vrot.slane %v5722_v55, 5  ;;  %2739 = vst [vmem:[#allocation2 + $0x8c] sm:$0xf] %v2605_v6  ;;  %v2270_v54 = vrot.slane %v2268_v4, 5  ;;  %v2276_v25 = vrot.slane %v2274_v59, 5  ;;  %v2280_v41 = vrot.slane %v2278_v38, 4 }
 0x16b   : > { %v6956_v33 = vld [vmem:[#allocation2 + $0x214] ss:$36 sps:$4 sm:$0xff]   ;;  %v8052_v47 = vadd.f32 %v6230_v23, %v6229_v51  ;;  %v2611_v20 = vrot.slane %v5723_v40, 5  ;;  %v5724_v4 = vld [vmem:[%s7100_s14 + $0x3c] sm:$0xe]  ;;  %v2286_v42 = vrot.slane %v2284_v5, 5  ;;  %v8060_v6 = vadd.f32 %v6233_v16, %v6232_v46  ;;  %v6324_v5 = vpop.f32.mrf.mxu1 }
 0x16c   : > { %v6959_v44 = vld [vmem:[#allocation2 + $0x210] ss:$36 sps:$4 sm:$0xff]   ;;  %v2609_v31 = vsel %vm7277_vm5, %v5765_v61, %v2608_v63  ;;  %v2610_v34 = vrot.slane %v2608_v63, 4  ;;  %v2271_v1 = vor.u32 %v2270_v54, %v2267_v15  ;;  %v2281_v35 = vor.u32 %v2280_v41, %v2276_v25  ;;  %4811 = vmatprep.mubr.bf16.mxu1 %v6956_v33  ;;  %v5725_v59 = vld [vmem:[%s7100_s14 + $0x40] sm:$0xf]  ;;  %v6235_v15 = vpop.f32.mrf.mxu0 }
 0x16d   : > { %2740 = vst [vmem:[#allocation2 + $0xb0] sm:$0xf] %v2609_v31  ;;  %v5726_v38 = vld [vmem:[%s7100_s14 + $0x44] sm:$0x1]  ;;  %v5766_v55 = vrot.slane %v5724_v4, 9  ;;  %v6322_v61 = vadd.f32 %v6321_v12, %v6320_v56  ;;  %4812 = vmatmul.mubr.bf16.gmra.mxu1 %v6959_v44  ;;  %v2615_v46 = vrot.slane %v5725_v59, 5  ;;  %v6325_v16 = vadd.f32 %v6324_v5, %v6323_v14 }
 0x16e   : > { %v6963_v51 = vld [vmem:[#allocation2 + $0x20] ss:$36 sps:$4 sm:$0xff]   ;;  %v2272_v2 = vrot.slane %v2271_v1, 4  ;;  %v2612_v23 = vsel %vm7277_vm5, %v2610_v34, %v2611_v20  ;;  %v2282_v18 = vrot.slane %v2281_v35, 4  ;;  %v6960_v63 = vld [vmem:[#allocation2 + $0x258] ss:$36 sps:$4 sm:$0xff]   ;;  %v6236_v41 = vpop.f32.mrf.mxu0  ;;  %v6326_v34 = vpop.f32.mrf.mxu1 }
 0x16f   : > { %v6962_v40 = vld [vmem:[#allocation2 + $0x25c] ss:$36 sps:$4 sm:$0xff]   ;;  %2741 = vst [vmem:[#allocation2 + $0xd4] sm:$0xf] %v2612_v23  ;;  %v8064_v0 = vadd.f32 %v6322_v61, %v6210_v13  ;;  %6647 = vmatprep.mubr.bf16.mxu0 %v6963_v51  ;;  %v2618_v12 = vrot.slane %v5726_v38, 5  ;;  %v8072_v31 = vadd.f32 %v6236_v41, %v6235_v15  ;;  %v2617_v1 = vrot.slane %v2615_v46, 4 }
 0x170   : > { %v2277_v56 = vsel %vm7132_vm2, %v2272_v2, %v2276_v25  ;;  %v5655_v54 = vld [vmem:[%s7100_s14 + $0x90] sm:$0xf]  ;;  %4819 = vmatprep.mubr.bf16.mxu1 %v6962_v40  ;;  %v2287_v44 = vsel %vm7132_vm2, %v2282_v18, %v2286_v42  ;;  %v5656_v13 = vld [vmem:[%s7100_s14 + $0x94] sm:$0xf]  ;;  %v2616_v25 = vsel %vm7277_vm5, %v5766_v55, %v2615_v46  ;;  %v8079_v4 = vadd.f32 %v6325_v16, %v7936_v9  ;;  %v6238_v42 = vpop.f32.mrf.mxu0  ;;  %v5699_v59 = vld [vmem:[%s7100_s14 + $0x98] sm:$0x1]  ;;  %v6327_v14 = vpop.f32.mrf.mxu1 }
 0x171   : > { %v6964_v33 = vld [vmem:[#allocation2 + $0x68] ss:$36 sps:$4 sm:$0xff]   ;;  %2482 = vst [vmem:[#allocation2 + $0x2a4] sm:$0xf] %v2277_v56  ;;  %1988 = vst [vmem:[#allocation2 + $0x2e8] sm:$0xf] %v5655_v54  ;;  %v2619_v55 = vsel %vm7277_vm5, %v2617_v1, %v2618_v12  ;;  %v6328_v54 = vadd.f32 %v6327_v14, %v6326_v34 }
 0x172   : > { %2483 = vst [vmem:[#allocation2 + $0x2c8] sm:$0xf] %v2287_v44  ;;  %1989 = vst [vmem:[#allocation2 + $0x30c] sm:$0xf] %v5656_v13  ;;  %v5697_v35 = vld [vmem:[%s7100_s14 + $0x90] sm:$0xf]  ;;  %6648 = vmatmul.mubr.bf16.vlgmr.msra.gmra.mxu0 %v6964_v33  ;;  %v6239_v40 = vpop.f32.mrf.mxu0  ;;  %v6216_v33 = vadd.f32 %v7938_v7, %v7924_v60 }
 0x173   : > { %v5698_v20 = vld [vmem:[%s7100_s14 + $0x94] sm:$0xf]  ;;  %2742 = vst [vmem:[#allocation2 + $0xf8] sm:$0xf] %v2616_v25  ;;  %v2289_v38 = vshrl.u32 %v5697_v35, 16  ;;  %v2292_v61 = vshll.u32 %v5697_v35, 16  ;;  %v8087_v46 = vadd.f32 %v6239_v40, %v6238_v42 }
 0x174   : > { %v2298_v51 = vshll.u32 %v5698_v20, 16  ;;  %v2302_v2 = vshrl.u32 %v5698_v20, 16  ;;  %v2308_v23 = vshll.u32 %v5699_v59, 16  ;;  %v5727_v15 = vld [vmem:[%s7100_s14 + $0x48] sm:$0xe]  ;;  %v6329_v20 = vpop.f32.mrf.mxu1  ;;  %v8094_v34 = vadd.f32 %v6328_v54, %v6216_v33 }
 0x175   : > { %2743 = vst [vmem:[#allocation2 + $0x11c] sm:$0xf] %v2619_v55  ;;  %v2291_v9 = vrot.slane %v2289_v38, 4  ;;  %v2294_v18 = vrot.slane %v2292_v61, 5  ;;  %v5728_v5 = vld [vmem:[%s7100_s14 + $0x4c] sm:$0xf]  ;;  %4820 = vmatmul.mubr.bf16.gmra.mxu1 %v6960_v63  ;;  %v6241_v63 = vpop.f32.mrf.mxu0 }
 0x176   : > { %v5729_v56 = vld [vmem:[%s7100_s14 + $0x50] sm:$0x1]  ;;  %v2300_v16 = vrot.slane %v2298_v51, 5  ;;  %v2304_v12 = vrot.slane %v2302_v2, 4  ;;  %v2310_v13 = vrot.slane %v2308_v23, 5  ;;  %v5767_v25 = vrot.slane %v5727_v15, 9  ;;  %v6330_v7 = vpop.f32.mrf.mxu1 }
 0x177   : > { %v6968_v41 = vld [vmem:[#allocation2 + $0xb0] ss:$36 sps:$4 sm:$0xff]   ;;  %v2295_v44 = vor.u32 %v2294_v18, %v2291_v9  ;;  %v2622_v1 = vrot.slane %v5728_v5, 5  ;;  %v2625_v42 = vrot.slane %v5729_v56, 5  ;;  %v5731_v38 = vld [vmem:[%s7100_s14 + $0x58] sm:$0xf]  ;;  %v6242_v9 = vpop.f32.mrf.mxu0 }
 0x178   : > { %v5730_v35 = vld [vmem:[%s7100_s14 + $0x54] sm:$0xe]  ;;  %6651 = vmatprep.mubr.bf16.mxu0 %v6968_v41  ;;  %v2305_v59 = vor.u32 %v2304_v12, %v2300_v16  ;;  %v5732_v61 = vld [vmem:[%s7100_s14 + $0x5c] sm:$0x1]  ;;  %v6965_v14 = vld [vmem:[#allocation2 + $0x2a0] ss:$36 sps:$4 sm:$0xff]   ;;  %v8102_v41 = vadd.f32 %v6242_v9, %v6241_v63  ;;  %v6331_v12 = vadd.f32 %v6330_v7, %v6329_v20  ;;  %v6332_v33 = vpop.f32.mrf.mxu1 }
 0x179   : > { %v6967_v55 = vld [vmem:[#allocation2 + $0x2a4] ss:$36 sps:$4 sm:$0xff]   ;;  %v2296_v51 = vrot.slane %v2295_v44, 4  ;;  %v2623_v60 = vsel %vm7277_vm5, %v5767_v25, %v2622_v1  ;;  %v2624_v23 = vrot.slane %v2622_v1, 4  ;;  %v5768_v15 = vrot.slane %v5730_v35, 9 }
 0x17a   : > { %v2306_v2 = vrot.slane %v2305_v59, 4  ;;  %2744 = vst [vmem:[#allocation2 + $0x140] sm:$0xf] %v2623_v60  ;;  %v2629_v40 = vrot.slane %v5731_v38, 5  ;;  %4827 = vmatprep.mubr.bf16.mxu1 %v6967_v55  ;;  %v2632_v5 = vrot.slane %v5732_v61, 5  ;;  %v6244_v59 = vpop.f32.mrf.mxu0  ;;  %v6333_v63 = vpop.f32.mrf.mxu1 }
 0x17b   : > { %v2301_v18 = vsel %vm7132_vm2, %v2296_v51, %v2300_v16  ;;  %v5657_v56 = vld [vmem:[%s7100_s14 + $0x9c] sm:$0xf]  ;;  %v5658_v54 = vld [vmem:[%s7100_s14 + $0xa0] sm:$0xf]  ;;  %v2626_v1 = vsel %vm7277_vm5, %v2624_v23, %v2625_v42  ;;  %v5702_v61 = vld [vmem:[%s7100_s14 + $0xa4] sm:$0x1]  ;;  %v8116_v42 = vadd.f32 %v6331_v12, %v7967_v17  ;;  %v6334_v17 = vadd.f32 %v6333_v63, %v6332_v33 }
 0x17c   : > { %v6969_v44 = vld [vmem:[#allocation2 + $0xf8] ss:$36 sps:$4 sm:$0xff]   ;;  %v2311_v25 = vsel %vm7132_vm2, %v2306_v2, %v2310_v13  ;;  %2484 = vst [vmem:[#allocation2 + $0x2ec] sm:$0xf] %v2301_v18  ;;  %v2630_v16 = vsel %vm7277_vm5, %v5768_v15, %v2629_v40  ;;  %v2631_v35 = vrot.slane %v2629_v40, 4  ;;  %v6222_v13 = vadd.f32 %v7973_v32, %v7961_v49  ;;  %v6245_v23 = vpop.f32.mrf.mxu0 }
 0x17d   : > { %1990 = vst [vmem:[#allocation2 + $0x330] sm:$0xf] %v5657_v56  ;;  %1991 = vst [vmem:[#allocation2 + $0x354] sm:$0xf] %v5658_v54  ;;  %v5700_v20 = vld [vmem:[%s7100_s14 + $0x9c] sm:$0xf]  ;;  %4828 = vmatmul.mubr.bf16.gmra.mxu1 %v6965_v14  ;;  %6652 = vmatmul.mubr.bf16.gmra.mxu0 %v6969_v44  ;;  %v8123_v49 = vadd.f32 %v6245_v23, %v6244_v59  ;;  %v6335_v14 = vpop.f32.mrf.mxu1 }
 0x17e   : > { %2485 = vst [vmem:[#allocation2 + $0x310] sm:$0xf] %v2311_v25  ;;  %2745 = vst [vmem:[#allocation2 + $0x164] sm:$0xf] %v2626_v1  ;;  %v5701_v38 = vld [vmem:[%s7100_s14 + $0xa0] sm:$0xf]  ;;  %v2633_v55 = vsel %vm7277_vm5, %v2631_v35, %v2632_v5 }
 0x17f   : > { %2746 = vst [vmem:[#allocation2 + $0x188] sm:$0xf] %v2630_v16  ;;  %8671 = vst [vmem:[#allocation5_spill] sm:$0xff] %v8116_v42  ;;  %v2313_v51 = vshrl.u32 %v5700_v20, 16  ;;  %v2316_v60 = vshll.u32 %v5700_v20, 16  ;;  %v2322_v7 = vshll.u32 %v5701_v38, 16  ;;  %v6336_v35 = vpop.f32.mrf.mxu1  ;;  %v8128_v42 = vadd.f32 %v6334_v17, %v6222_v13 }
 0x180   : > { %v5733_v2 = vld [vmem:[%s7100_s14 + $0x60] sm:$0xe]  ;;  %2747 = vst [vmem:[#allocation2 + $0x1ac] sm:$0xf] %v2633_v55  ;;  %v2326_v15 = vshrl.u32 %v5701_v38, 16  ;;  %v2332_v40 = vshll.u32 %v5702_v61, 16  ;;  %v6337_v59 = vadd.f32 %v6336_v35, %v6335_v14  ;;  %v6399_v14 = vpop.f32.mrf.mxu0 }
 0x181   : > { %v5734_v9 = vld [vmem:[%s7100_s14 + $0x64] sm:$0xf]  ;;  %v5735_v32 = vld [vmem:[%s7100_s14 + $0x68] sm:$0x1]  ;;  %v2315_v18 = vrot.slane %v2313_v51, 4  ;;  %v2318_v56 = vrot.slane %v2316_v60, 5 }
 0x182   : > { %v2324_v5 = vrot.slane %v2322_v7, 5  ;;  %v5769_v54 = vrot.slane %v5733_v2, 9  ;;  %v5736_v12 = vld [vmem:[%s7100_s14 + $0x6c] sm:$0xe]  ;;  %v2328_v44 = vrot.slane %v2326_v15, 4  ;;  %v2334_v25 = vrot.slane %v2332_v40, 5  ;;  %v6338_v2 = vpop.f32.mrf.mxu1 }
 0x183   : > { %v2636_v1 = vrot.slane %v5734_v9, 5  ;;  %v2639_v16 = vrot.slane %v5735_v32, 5  ;;  %v2319_v20 = vor.u32 %v2318_v56, %v2315_v18  ;;  %v5737_v38 = vld [vmem:[%s7100_s14 + $0x70] sm:$0xf]  ;;  %v5738_v61 = vld [vmem:[%s7100_s14 + $0x74] sm:$0x1]  ;;  %v8134_v9 = vadd.f32 %v6337_v59, %v8004_v58 }
 0x184   : > { %v5770_v55 = vrot.slane %v5736_v12, 9  ;;  %v2329_v33 = vor.u32 %v2328_v44, %v2324_v5  ;;  %v2643_v60 = vrot.slane %v5737_v38, 5  ;;  %v5659_v7 = vld [vmem:[%s7100_s14 + $0xa8] sm:$0xf]  ;;  %v6339_v18 = vpop.f32.mrf.mxu1 }
 0x185   : > { %v2637_v63 = vsel %vm7277_vm5, %v5769_v54, %v2636_v1  ;;  %v2638_v51 = vrot.slane %v2636_v1, 4  ;;  %v6970_v23 = vld [vmem:[#allocation2 + $0x2e8] ss:$36 sps:$4 sm:$0xff]   ;;  %v2320_v40 = vrot.slane %v2319_v20, 4  ;;  %1992 = vst [vmem:[#allocation2 + $0x378] sm:$0xf] %v5659_v7  ;;  %v6340_v44 = vadd.f32 %v6339_v18, %v6338_v2  ;;  %v6400_v20 = vpop.f32.mrf.mxu0 }
 0x186   : > { %v6972_v15 = vld [vmem:[#allocation2 + $0x2ec] ss:$36 sps:$4 sm:$0xff]   ;;  %2748 = vst [vmem:[#allocation2 + $0x1d0] sm:$0xf] %v2637_v63  ;;  %v6973_v32 = vld [vmem:[#allocation2 + $0x140] ss:$36 sps:$4 sm:$0xff]   ;;  %v2644_v17 = vsel %vm7277_vm5, %v5770_v55, %v2643_v60  ;;  %v6401_v63 = vadd.f32 %v6400_v20, %v6399_v14  ;;  %v6341_v14 = vpop.f32.mrf.mxu1 }
 0x187   : > { %v2640_v13 = vsel %vm7277_vm5, %v2638_v51, %v2639_v16  ;;  %4835 = vmatprep.mubr.bf16.mxu1 %v6972_v15  ;;  %v6974_v56 = vld [vmem:[#allocation2 + $0x188] ss:$36 sps:$4 sm:$0xff]   ;;  %v2325_v54 = vsel %vm7132_vm2, %v2320_v40, %v2324_v5  ;;  %v2330_v12 = vrot.slane %v2329_v33, 4  ;;  %v2645_v58 = vrot.slane %v2643_v60, 4  ;;  %2750 = vst [vmem:[#allocation2 + $0x218] sm:$0xf] %v2644_v17  ;;  %6655 = vmatprep.mubr.bf16.mxu0 %v6973_v32 }
 0x188   : > { %2749 = vst [vmem:[#allocation2 + $0x1f4] sm:$0xf] %v2640_v13  ;;  %4836 = vmatmul.mubr.bf16.gmra.mxu1 %v6970_v23  ;;  %2486 = vst [vmem:[#allocation2 + $0x334] sm:$0xf] %v2325_v54  ;;  %v2646_v1 = vrot.slane %v5738_v61, 5  ;;  %6656 = vmatmul.mubr.bf16.gmra.mxu0 %v6974_v56  ;;  %v6402_v23 = vpop.f32.mrf.mxu0  ;;  %v8154_v13 = vadd.f32 %v6401_v63, %v7866_v10  ;;  %v8157_v17 = vadd.f32 %v6340_v44, %v8025_v24 }
 0x189   : > { %v5660_v16 = vld [vmem:[%s7100_s14 + $0xac] sm:$0xf]  ;;  %v5703_v35 = vld [vmem:[%s7100_s14 + $0xa8] sm:$0xf]  ;;  %v2335_v38 = vsel %vm7132_vm2, %v2330_v12, %v2334_v25  ;;  %v5705_v55 = vld [vmem:[%s7100_s14 + $0xb0] sm:$0x1] }
 0x18a   : > { %1993 = vst [vmem:[#allocation2 + $0x39c] sm:$0xf] %v5660_v16  ;;  %v5704_v5 = vld [vmem:[%s7100_s14 + $0xac] sm:$0xf]  ;;  %v2337_v59 = vshrl.u32 %v5703_v35, 16  ;;  %v2340_v33 = vshll.u32 %v5703_v35, 16  ;;  %v2647_v61 = vsel %vm7277_vm5, %v2645_v58, %v2646_v1  ;;  %v6403_v58 = vpop.f32.mrf.mxu0 }
 0x18b   : > { %2487 = vst [vmem:[#allocation2 + $0x358] sm:$0xf] %v2335_v38  ;;  %v2346_v51 = vshll.u32 %v5704_v5, 16  ;;  %v2350_v60 = vshrl.u32 %v5704_v5, 16  ;;  %v2356_v7 = vshll.u32 %v5705_v55, 16  ;;  %v6404_v5 = vadd.f32 %v6403_v58, %v6402_v23  ;;  %v6342_v55 = vpop.f32.mrf.mxu1 }
 0x18c   : > { %v5739_v2 = vld [vmem:[%s7100_s14 + $0x78] sm:$0xe]  ;;  %2751 = vst [vmem:[#allocation2 + $0x23c] sm:$0xf] %v2647_v61  ;;  %v2339_v25 = vrot.slane %v2337_v59, 4  ;;  %v2342_v15 = vrot.slane %v2340_v33, 5  ;;  %v6343_v33 = vadd.f32 %v6342_v55, %v6341_v14 }
 0x18d   : > { %v5740_v40 = vld [vmem:[%s7100_s14 + $0x7c] sm:$0xf]  ;;  %v5741_v32 = vld [vmem:[%s7100_s14 + $0x80] sm:$0x1]  ;;  %v2348_v18 = vrot.slane %v2346_v51, 5  ;;  %v2352_v56 = vrot.slane %v2350_v60, 4  ;;  %v6344_v60 = vpop.f32.mrf.mxu1  ;;  %v8166_v23 = vadd.f32 %v6404_v5, %v7897_v53 }
 0x18e   : > { %v2358_v54 = vrot.slane %v2356_v7, 5  ;;  %v5771_v12 = vrot.slane %v5739_v2, 9  ;;  %v2343_v1 = vor.u32 %v2342_v15, %v2339_v25  ;;  %v2650_v16 = vrot.slane %v5740_v40, 5  ;;  %v5742_v20 = vld [vmem:[%s7100_s14 + $0x84] sm:$0xe] }
 0x18f   : > { %v2653_v35 = vrot.slane %v5741_v32, 5  ;;  %v5743_v38 = vld [vmem:[%s7100_s14 + $0x88] sm:$0xf]  ;;  %v6978_v10 = vld [vmem:[#allocation2 + $0x1d0] ss:$36 sps:$4 sm:$0xff]   ;;  %v2353_v59 = vor.u32 %v2352_v56, %v2348_v18  ;;  %v5772_v51 = vrot.slane %v5742_v20, 9  ;;  %v6345_v58 = vpop.f32.mrf.mxu1  ;;  %v6405_v20 = vpop.f32.mrf.mxu0 }
 0x190   : > { %v2344_v24 = vrot.slane %v2343_v1, 4  ;;  %v2651_v44 = vsel %vm7277_vm5, %v5771_v12, %v2650_v16  ;;  %v2652_v63 = vrot.slane %v2650_v16, 4  ;;  %v5744_v61 = vld [vmem:[%s7100_s14 + $0x8c] sm:$0x1]  ;;  %6659 = vmatprep.mubr.bf16.mxu0 %v6978_v10  ;;  %v2657_v2 = vrot.slane %v5743_v38, 5 }
 0x191   : > { %v2354_v7 = vrot.slane %v2353_v59, 4  ;;  %2752 = vst [vmem:[#allocation2 + $0x260] sm:$0xf] %v2651_v44  ;;  %v2660_v25 = vrot.slane %v5744_v61, 5  ;;  %v5661_v15 = vld [vmem:[%s7100_s14 + $0xb4] sm:$0xf]  ;;  %v8173_v12 = vadd.f32 %v6343_v33, %v8052_v47  ;;  %v6347_v55 = vpop.f32.mrf.mxu1  ;;  %v6406_v44 = vpop.f32.mrf.mxu0 }
 0x192   : > { %v6975_v40 = vld [vmem:[#allocation2 + $0x330] ss:$36 sps:$4 sm:$0xff]   ;;  %v2349_v14 = vsel %vm7132_vm2, %v2344_v24, %v2348_v18  ;;  %v2654_v56 = vsel %vm7277_vm5, %v2652_v63, %v2653_v35  ;;  %1994 = vst [vmem:[#allocation2 + $0x3c0] sm:$0xf] %v5661_v15  ;;  %v2658_v18 = vsel %vm7277_vm5, %v5772_v51, %v2657_v2  ;;  %v2659_v16 = vrot.slane %v2657_v2, 4 }
 0x193   : > { %v6977_v32 = vld [vmem:[#allocation2 + $0x334] ss:$36 sps:$4 sm:$0xff]   ;;  %v2359_v53 = vsel %vm7132_vm2, %v2354_v7, %v2358_v54  ;;  %2488 = vst [vmem:[#allocation2 + $0x37c] sm:$0xf] %v2349_v14  ;;  %2753 = vst [vmem:[#allocation2 + $0x284] sm:$0xf] %v2654_v56  ;;  %v6346_v35 = vadd.f32 %v6345_v58, %v6344_v60  ;;  %v6407_v7 = vadd.f32 %v6406_v44, %v6405_v20  ;;  %v6408_v58 = vpop.f32.mrf.mxu0 }
 0x194   : > { %v6979_v1 = vld [vmem:[#allocation2 + $0x218] ss:$36 sps:$4 sm:$0xff]   ;;  %4843 = vmatprep.mubr.bf16.mxu1 %v6977_v32  ;;  %2489 = vst [vmem:[#allocation2 + $0x3a0] sm:$0xf] %v2359_v53  ;;  %2754 = vst [vmem:[#allocation2 + $0x2a8] sm:$0xf] %v2658_v18  ;;  %v2661_v54 = vsel %vm7277_vm5, %v2659_v16, %v2660_v25  ;;  %v6348_v25 = vpop.f32.mrf.mxu1 }
 0x195   : > { %v5662_v38 = vld [vmem:[%s7100_s14 + $0xb8] sm:$0xf]  ;;  %v5706_v47 = vld [vmem:[%s7100_s14 + $0xb4] sm:$0xf]  ;;  %4844 = vmatmul.mubr.bf16.gmra.mxu1 %v6975_v40  ;;  %6660 = vmatmul.mubr.bf16.gmra.mxu0 %v6979_v1  ;;  %v5708_v10 = vld [vmem:[%s7100_s14 + $0xbc] sm:$0x1]  ;;  %v8188_v2 = vadd.f32 %v6346_v35, %v8060_v6  ;;  %v8195_v6 = vadd.f32 %v6407_v7, %v7920_v26  ;;  %v6409_v35 = vpop.f32.mrf.mxu0 }
 0x196   : > { %v5707_v5 = vld [vmem:[%s7100_s14 + $0xb8] sm:$0xf]  ;;  %1995 = vst [vmem:[#allocation2 + $0x3e4] sm:$0xf] %v5662_v38  ;;  %v2361_v59 = vshrl.u32 %v5706_v47, 16  ;;  %v2364_v33 = vshll.u32 %v5706_v47, 16  ;;  %v6350_v38 = vpop.f32.mrf.mxu1 }
 0x197   : > { %v2370_v24 = vshll.u32 %v5707_v5, 16  ;;  %2755 = vst [vmem:[#allocation2 + $0x2cc] sm:$0xf] %v2661_v54  ;;  %v2374_v63 = vshrl.u32 %v5707_v5, 16  ;;  %v2380_v61 = vshll.u32 %v5708_v10, 16  ;;  %v6349_v10 = vadd.f32 %v6348_v25, %v6347_v55 }
 0x198   : > { %v5745_v51 = vld [vmem:[%s7100_s14 + $0x90] sm:$0xe]  ;;  %v5746_v60 = vld [vmem:[%s7100_s14 + $0x94] sm:$0xf]  ;;  %v2363_v15 = vrot.slane %v2361_v59, 4  ;;  %v2366_v40 = vrot.slane %v2364_v33, 5 }
 0x199   : > { %v2372_v32 = vrot.slane %v2370_v24, 5  ;;  %v5747_v14 = vld [vmem:[%s7100_s14 + $0x98] sm:$0x1]  ;;  %v5773_v56 = vrot.slane %v5745_v51, 9  ;;  %v2376_v1 = vrot.slane %v2374_v63, 4  ;;  %v2382_v53 = vrot.slane %v2380_v61, 5  ;;  %v6351_v61 = vpop.f32.mrf.mxu1 }
 0x19a   : > { %v2664_v18 = vrot.slane %v5746_v60, 5  ;;  %v2667_v16 = vrot.slane %v5747_v14, 5  ;;  %v2367_v47 = vor.u32 %v2366_v40, %v2363_v15  ;;  %v5748_v5 = vld [vmem:[%s7100_s14 + $0x9c] sm:$0xe]  ;;  %v5749_v20 = vld [vmem:[%s7100_s14 + $0xa0] sm:$0xf]  ;;  %v6410_v63 = vadd.f32 %v6409_v35, %v6408_v58 }
 0x19b   : > { %v5750_v54 = vld [vmem:[%s7100_s14 + $0xa4] sm:$0x1]  ;;  %v2377_v33 = vor.u32 %v2376_v1, %v2372_v32  ;;  %v6980_v51 = vld [vmem:[#allocation2 + $0x378] ss:$36 sps:$4 sm:$0xff]   ;;  %v8200_v15 = vadd.f32 %v6349_v10, %v8072_v31  ;;  %v6352_v40 = vadd.f32 %v6351_v61, %v6350_v38  ;;  %v5774_v7 = vrot.slane %v5748_v5, 9 }
 0x19c   : > { %v6983_v59 = vld [vmem:[#allocation2 + $0x260] ss:$36 sps:$4 sm:$0xff]   ;;  %v2665_v24 = vsel %vm7277_vm5, %v5773_v56, %v2664_v18  ;;  %v2666_v44 = vrot.slane %v2664_v18, 4  ;;  %v2368_v14 = vrot.slane %v2367_v47, 4  ;;  %v2671_v25 = vrot.slane %v5749_v20, 5  ;;  %v6411_v18 = vpop.f32.mrf.mxu0 }
 0x19d   : > { %v6982_v60 = vld [vmem:[#allocation2 + $0x37c] ss:$36 sps:$4 sm:$0xff]   ;;  %2756 = vst [vmem:[#allocation2 + $0x2f0] sm:$0xf] %v2665_v24  ;;  %6663 = vmatprep.mubr.bf16.mxu0 %v6983_v59  ;;  %v2378_v26 = vrot.slane %v2377_v33, 4  ;;  %v2674_v1 = vrot.slane %v5750_v54, 5  ;;  %v8207_v31 = vadd.f32 %v6410_v63, %v7922_v28 }
 0x19e   : > { %v2668_v55 = vsel %vm7277_vm5, %v2666_v44, %v2667_v16  ;;  %4851 = vmatprep.mubr.bf16.mxu1 %v6982_v60  ;;  %v6984_v56 = vld [vmem:[#allocation2 + $0x2a8] ss:$36 sps:$4 sm:$0xff]   ;;  %v2373_v58 = vsel %vm7132_vm2, %v2368_v14, %v2372_v32  ;;  %v8210_v16 = vadd.f32 %v6352_v40, %v8087_v46  ;;  %v2672_v32 = vsel %vm7277_vm5, %v5774_v7, %v2671_v25  ;;  %v5663_v5 = vld [vmem:[%s7100_s14 + $0xc0] sm:$0xf]  ;;  %v5664_v20 = vld [vmem:[%s7100_s14 + $0xc4] sm:$0xf]  ;;  %v6412_v35 = vpop.f32.mrf.mxu0 }
 0x19f   : > { %2757 = vst [vmem:[#allocation2 + $0x314] sm:$0xf] %v2668_v55  ;;  %4852 = vmatmul.mubr.bf16.gmra.mxu1 %v6980_v51  ;;  %v2383_v38 = vsel %vm7132_vm2, %v2378_v26, %v2382_v53  ;;  %2490 = vst [vmem:[#allocation2 + $0x3c4] sm:$0xf] %v2373_v58  ;;  %v2673_v47 = vrot.slane %v2671_v25, 4  ;;  %6664 = vmatmul.mubr.bf16.gmra.mxu0 %v6984_v56  ;;  %v6413_v60 = vadd.f32 %v6412_v35, %v6411_v18  ;;  %v6353_v25 = vpop.f32.mrf.mxu1 }
 0x1a0   : > { %2491 = vst [vmem:[#allocation2 + $0x3e8] sm:$0xf] %v2383_v38  ;;  %2758 = vst [vmem:[#allocation2 + $0x338] sm:$0xf] %v2672_v32  ;;  %v5709_v28 = vld [vmem:[%s7100_s14 + $0xc0] sm:$0xf]  ;;  %v6414_v14 = vpop.f32.mrf.mxu0 }
 0x1a1   : > { %1996 = vst [vmem:[#allocation2 + $0x408] sm:$0xf] %v5663_v5  ;;  %1997 = vst [vmem:[#allocation2 + $0x42c] sm:$0xf] %v5664_v20  ;;  %v5710_v46 = vld [vmem:[%s7100_s14 + $0xc4] sm:$0xf]  ;;  %v2675_v53 = vsel %vm7277_vm5, %v2673_v47, %v2674_v1 }
 0x1a2   : > { %v5711_v54 = vld [vmem:[%s7100_s14 + $0xc8] sm:$0x1]  ;;  %v2385_v10 = vshrl.u32 %v5709_v28, 16  ;;  %v2388_v59 = vshll.u32 %v5709_v28, 16  ;;  %v2394_v33 = vshll.u32 %v5710_v46, 16  ;;  %v2398_v44 = vshrl.u32 %v5710_v46, 16  ;;  %v6415_v47 = vpop.f32.mrf.mxu0 }
 0x1a3   : > { %v5751_v24 = vld [vmem:[%s7100_s14 + $0xa8] sm:$0xe]  ;;  %2759 = vst [vmem:[#allocation2 + $0x35c] sm:$0xf] %v2675_v53  ;;  %v2404_v63 = vshll.u32 %v5711_v54, 16  ;;  %v8229_v46 = vadd.f32 %v6413_v60, %v7959_v52  ;;  %v6416_v18 = vadd.f32 %v6415_v47, %v6414_v14  ;;  %v6354_v54 = vpop.f32.mrf.mxu1 }
 0x1a4   : > { %v5752_v61 = vld [vmem:[%s7100_s14 + $0xac] sm:$0xf]  ;;  %v5753_v51 = vld [vmem:[%s7100_s14 + $0xb0] sm:$0x1]  ;;  %v2387_v40 = vrot.slane %v2385_v10, 4  ;;  %v2390_v26 = vrot.slane %v2388_v59, 5  ;;  %v6355_v52 = vadd.f32 %v6354_v54, %v6353_v25 }
 0x1a5   : > { %v2396_v55 = vrot.slane %v2394_v33, 5  ;;  %v5775_v7 = vrot.slane %v5751_v24, 9  ;;  %v2400_v56 = vrot.slane %v2398_v44, 4  ;;  %v2406_v58 = vrot.slane %v2404_v63, 5  ;;  %v5754_v32 = vld [vmem:[%s7100_s14 + $0xb4] sm:$0xe] }
 0x1a6   : > { %v2678_v1 = vrot.slane %v5752_v61, 5  ;;  %v2681_v38 = vrot.slane %v5753_v51, 5  ;;  %v6988_v5 = vld [vmem:[#allocation2 + $0x2f0] ss:$36 sps:$4 sm:$0xff]   ;;  %v2391_v20 = vor.u32 %v2390_v26, %v2387_v40  ;;  %v5755_v28 = vld [vmem:[%s7100_s14 + $0xb8] sm:$0xf]  ;;  %v8235_v61 = vadd.f32 %v6416_v18, %v7980_v37  ;;  %v6356_v51 = vpop.f32.mrf.mxu1 }
 0x1a7   : > { %v2401_v35 = vor.u32 %v2400_v56, %v2396_v55  ;;  %v5756_v59 = vld [vmem:[%s7100_s14 + $0xbc] sm:$0x1]  ;;  %v5776_v33 = vrot.slane %v5754_v32, 9  ;;  %v6985_v24 = vld [vmem:[#allocation2 + $0x3c0] ss:$36 sps:$4 sm:$0xff]   ;;  %6667 = vmatprep.mubr.bf16.mxu0 %v6988_v5  ;;  %v2685_v40 = vrot.slane %v5755_v28, 5  ;;  %v8243_v37 = vadd.f32 %v6355_v52, %v8102_v41 }
 0x1a8   : > { %v2679_v53 = vsel %vm7277_vm5, %v5775_v7, %v2678_v1  ;;  %v2680_v10 = vrot.slane %v2678_v1, 4  ;;  %v6987_v44 = vld [vmem:[#allocation2 + $0x3c4] ss:$36 sps:$4 sm:$0xff]   ;;  %v2392_v63 = vrot.slane %v2391_v20, 4  ;;  %v2688_v26 = vrot.slane %v5756_v59, 5  ;;  %v6357_v25 = vpop.f32.mrf.mxu1  ;;  %v6417_v20 = vpop.f32.mrf.mxu0 }
 0x1a9   : > { %2760 = vst [vmem:[#allocation2 + $0x380] sm:$0xf] %v2679_v53  ;;  %v2402_v60 = vrot.slane %v2401_v35, 4  ;;  %4859 = vmatprep.mubr.bf16.mxu1 %v6987_v44  ;;  %v5665_v1 = vld [vmem:[%s7100_s14 + $0xcc] sm:$0xf]  ;;  %v2686_v32 = vsel %vm7277_vm5, %v5776_v33, %v2685_v40  ;;  %v2687_v47 = vrot.slane %v2685_v40, 4  ;;  %v6358_v28 = vadd.f32 %v6357_v25, %v6356_v51 }
 0x1aa   : > { %v2682_v14 = vsel %vm7277_vm5, %v2680_v10, %v2681_v38  ;;  %v6989_v7 = vld [vmem:[#allocation2 + $0x338] ss:$36 sps:$4 sm:$0xff]   ;;  %v2397_v56 = vsel %vm7132_vm2, %v2392_v63, %v2396_v55  ;;  %4860 = vmatmul.mubr.bf16.gmra.mxu1 %v6985_v24  ;;  %v5666_v5 = vld [vmem:[%s7100_s14 + $0xd0] sm:$0xf]  ;;  %1998 = vst [vmem:[#allocation2 + $0x450] sm:$0xf] %v5665_v1  ;;  %v6359_v35 = vpop.f32.mrf.mxu1  ;;  %v6418_v44 = vpop.f32.mrf.mxu0 }
 0x1ab   : > { %2761 = vst [vmem:[#allocation2 + $0x3a4] sm:$0xf] %v2682_v14  ;;  %v2407_v38 = vsel %vm7132_vm2, %v2402_v60, %v2406_v58  ;;  %2492 = vst [vmem:[#allocation2 + $0x40c] sm:$0xf] %v2397_v56  ;;  %v5712_v55 = vld [vmem:[%s7100_s14 + $0xcc] sm:$0xf]  ;;  %6668 = vmatmul.mubr.bf16.gmra.mxu0 %v6989_v7  ;;  %v2689_v53 = vsel %vm7277_vm5, %v2687_v47, %v2688_v26  ;;  %v6419_v14 = vadd.f32 %v6418_v44, %v6417_v20 }
 0x1ac   : > { %2493 = vst [vmem:[#allocation2 + $0x430] sm:$0xf] %v2407_v38  ;;  %2762 = vst [vmem:[#allocation2 + $0x3c8] sm:$0xf] %v2686_v32  ;;  %v5713_v41 = vld [vmem:[%s7100_s14 + $0xd0] sm:$0xf]  ;;  %v8259_v40 = vadd.f32 %v6358_v28, %v8123_v49  ;;  %v6360_v7 = vpop.f32.mrf.mxu1  ;;  %v6420_v38 = vpop.f32.mrf.mxu0  ;;  %v6252_v49 = vadd.f32 %v7725_v45, %v7711_v21 }
 0x1ad   : > { %1999 = vst [vmem:[#allocation2 + $0x474] sm:$0xf] %v5666_v5  ;;  %v5714_v18 = vld [vmem:[%s7100_s14 + $0xd4] sm:$0x1]  ;;  %v2409_v58 = vshrl.u32 %v5712_v55, 16  ;;  %v2412_v54 = vshll.u32 %v5712_v55, 16 }
 0x1ae   : > { %v2418_v10 = vshll.u32 %v5713_v41, 16  ;;  %v2422_v59 = vshrl.u32 %v5713_v41, 16  ;;  %v2428_v33 = vshll.u32 %v5714_v18, 16  ;;  %v5757_v24 = vld [vmem:[%s7100_s14 + $0xc0] sm:$0xe]  ;;  %v8264_v18 = vadd.f32 %v6419_v14, %v7998_v27 }
 0x1af   : > { %2763 = vst [vmem:[#allocation2 + $0x3ec] sm:$0xf] %v2689_v53  ;;  %v2411_v63 = vrot.slane %v2409_v58, 4  ;;  %v2414_v52 = vrot.slane %v2412_v54, 5  ;;  %v5758_v51 = vld [vmem:[%s7100_s14 + $0xc4] sm:$0xf]  ;;  %v6362_v58 = vpop.f32.mrf.mxu1  ;;  %v6421_v53 = vpop.f32.mrf.mxu0 }
 0x1b0   : > { %v5759_v60 = vld [vmem:[%s7100_s14 + $0xc8] sm:$0x1]  ;;  %v2420_v56 = vrot.slane %v2418_v10, 5  ;;  %v2424_v26 = vrot.slane %v2422_v59, 4  ;;  %v2430_v1 = vrot.slane %v2428_v33, 5  ;;  %v5777_v25 = vrot.slane %v5757_v24, 9 }
 0x1b1   : > { %v2415_v32 = vor.u32 %v2414_v52, %v2411_v63  ;;  %v2692_v47 = vrot.slane %v5758_v51, 5  ;;  %v2695_v5 = vrot.slane %v5759_v60, 5  ;;  %v5760_v55 = vld [vmem:[%s7100_s14 + $0xcc] sm:$0xe]  ;;  %v5761_v41 = vld [vmem:[%s7100_s14 + $0xd0] sm:$0xf]  ;;  %v6361_v10 = vadd.f32 %v6360_v7, %v6359_v35  ;;  %v6363_v63 = vpop.f32.mrf.mxu1 }
 0x1b2   : > { %v6993_v20 = vld [vmem:[#allocation2 + $0x380] ss:$36 sps:$4 sm:$0xff]   ;;  %v2425_v28 = vor.u32 %v2424_v26, %v2420_v56  ;;  %v5762_v54 = vld [vmem:[%s7100_s14 + $0xd4] sm:$0x1]  ;;  %v5778_v44 = vrot.slane %v5760_v55, 9  ;;  %v6422_v60 = vadd.f32 %v6421_v53, %v6420_v38  ;;  %v6364_v45 = vadd.f32 %v6363_v63, %v6362_v58 }
 0x1b3   : > { %v2416_v59 = vrot.slane %v2415_v32, 4  ;;  %v2693_v33 = vsel %vm7277_vm5, %v5777_v25, %v2692_v47  ;;  %v2694_v24 = vrot.slane %v2692_v47, 4  ;;  %v6990_v52 = vld [vmem:[#allocation2 + $0x408] ss:$36 sps:$4 sm:$0xff]   ;;  %6671 = vmatprep.mubr.bf16.mxu0 %v6993_v20  ;;  %v8272_v21 = vadd.f32 %v6361_v10, %v7704_v11  ;;  %v6423_v25 = vpop.f32.mrf.mxu0 }
 0x1b4   : > { %v6992_v51 = vld [vmem:[#allocation2 + $0x40c] ss:$36 sps:$4 sm:$0xff]   ;;  %v2426_v27 = vrot.slane %v2425_v28, 4  ;;  %2764 = vst [vmem:[#allocation2 + $0x410] sm:$0xf] %v2693_v33  ;;  %v2699_v7 = vrot.slane %v5761_v41, 5  ;;  %v8281_v11 = vadd.f32 %v6422_v60, %v8002_v8  ;;  %v8283_v38 = vadd.f32 %v6364_v45, %v6252_v49  ;;  %v6365_v49 = vpop.f32.mrf.mxu1 }
 0x1b5   : > { %v2421_v35 = vsel %vm7132_vm2, %v2416_v59, %v2420_v56  ;;  %v2696_v14 = vsel %vm7277_vm5, %v2694_v24, %v2695_v5  ;;  %v2702_v26 = vrot.slane %v5762_v54, 5  ;;  %4867 = vmatprep.mubr.bf16.mxu1 %v6992_v51  ;;  %v6424_v55 = vpop.f32.mrf.mxu0  ;;  %v6995_v53 = vld [vmem:[#allocation2 + $0x450] ss:$36 sps:$4 sm:$0xff]  }
 0x1b6   : > { %v6994_v32 = vld [vmem:[#allocation2 + $0x3c8] ss:$36 sps:$4 sm:$0xff]   ;;  %v2431_v47 = vsel %vm7132_vm2, %v2426_v27, %v2430_v1  ;;  %2494 = vst [vmem:[#allocation2 + $0x454] sm:$0xf] %v2421_v35  ;;  %2765 = vst [vmem:[#allocation2 + $0x434] sm:$0xf] %v2696_v14  ;;  %4868 = vmatmul.mubr.bf16.gmra.mxu1 %v6990_v52  ;;  %v2700_v56 = vsel %vm7277_vm5, %v5778_v44, %v2699_v7  ;;  %v6425_v41 = vadd.f32 %v6424_v55, %v6423_v25  ;;  %v6366_v54 = vpop.f32.mrf.mxu1 }
 0x1b7   : > { %2495 = vst [vmem:[#allocation2 + $0x478] sm:$0xf] %v2431_v47  ;;  %v2701_v5 = vrot.slane %v2699_v7, 4  ;;  %6672 = vmatmul.mubr.bf16.gmra.mxu0 %v6994_v32  ;;  %2766 = vst [vmem:[#allocation2 + $0x458] sm:$0xf] %v2700_v56  ;;  %v6426_v1 = vpop.f32.mrf.mxu0  ;;  %v6367_v33 = vadd.f32 %v6366_v54, %v6365_v49  ;;  %v6258_v52 = vadd.f32 %v7757_v50, %v7745_v30 }
 0x1b8   : > { %v8290_v8 = vadd.f32 %v6425_v41, %v8019_v57  ;;  %v6368_v24 = vpop.f32.mrf.mxu1  ;;  %v6264_v50 = vadd.f32 %v7807_v29, %v7790_v3 }
 0x1b9   : > { %v2703_v39 = vsel %vm7277_vm5, %v2701_v5, %v2702_v26  ;;  %v6427_v58 = vpop.f32.mrf.mxu0  ;;  %v8296_v43 = vadd.f32 %v6367_v33, %v7750_v36  ;;  %v8673_v33 = vld [vmem:[#allocation4_spill] sm:$0xff] }
 0x1ba   : > { %2767 = vst [vmem:[#allocation2 + $0x47c] sm:$0xf] %v2703_v39  ;;  %v6428_v20 = vadd.f32 %v6427_v58, %v6426_v1  ;;  %v6369_v63 = vpop.f32.mrf.mxu1 }
 0x1bb   : > { %v6429_v44 = vpop.f32.mrf.mxu0  ;;  %v6370_v51 = vadd.f32 %v6369_v63, %v6368_v24 }
 0x1bc   : > { %v8293_v59 = vadd.f32 %v6428_v20, %v8050_v62  ;;  %v6371_v60 = vpop.f32.mrf.mxu1 }
 0x1bd   : > { %v6998_v28 = vld [vmem:[#allocation2 + $0x410] ss:$36 sps:$4 sm:$0xff]   ;;  %v6430_v27 = vpop.f32.mrf.mxu0  ;;  %v8300_v45 = vadd.f32 %v6370_v51, %v6258_v52 }
 0x1be   : > { %v6997_v10 = vld [vmem:[#allocation2 + $0x454] ss:$36 sps:$4 sm:$0xff]   ;;  %6675 = vmatprep.mubr.bf16.mxu0 %v6998_v28  ;;  %v6431_v62 = vadd.f32 %v6430_v27, %v6429_v44  ;;  %v6372_v14 = vpop.f32.mrf.mxu1 }
 0x1bf   : > { %4875 = vmatprep.mubr.bf16.mxu1 %v6997_v10  ;;  %v6432_v35 = vpop.f32.mrf.mxu0  ;;  %v6373_v36 = vadd.f32 %v6372_v14, %v6371_v60  ;;  %v8672_v10 = vld [vmem:[#allocation3_spill] sm:$0xff]  ;;  %v8674_v27 = vld [vmem:[#allocation5_spill] sm:$0xff] }
 0x1c0   : > { %4876 = vmatmul.mubr.bf16.gmra.mxu1 %v6995_v53  ;;  %v8303_v7 = vadd.f32 %v6431_v62, %v8056_v22  ;;  %v6374_v25 = vpop.f32.mrf.mxu1  ;;  %v6270_v24 = vadd.f32 %v8673_v33, %v8672_v10 }
 0x1c1   : > { %v6999_v57 = vld [vmem:[#allocation2 + $0x458] ss:$36 sps:$4 sm:$0xff]   ;;  %v6433_v26 = vpop.f32.mrf.mxu0  ;;  %v8306_v47 = vadd.f32 %v6373_v36, %v7782_v48 }
 0x1c2   : > { %6676 = vmatmul.mubr.bf16.gmra.mxu0 %v6999_v57  ;;  %v6434_v32 = vadd.f32 %v6433_v26, %v6432_v35  ;;  %v6375_v30 = vpop.f32.mrf.mxu1 }
 0x1c3   : > { %v6435_v5 = vpop.f32.mrf.mxu0  ;;  %v6376_v55 = vadd.f32 %v6375_v30, %v6374_v25 }
 0x1c4   : > { %v8311_v56 = vadd.f32 %v6434_v32, %v8064_v0  ;;  %v6377_v48 = vpop.f32.mrf.mxu1 }
 0x1c5   : > { %v6436_v41 = vpop.f32.mrf.mxu0  ;;  %v8313_v39 = vadd.f32 %v6376_v55, %v6264_v50 }
 0x1c6   : > { %v6437_v22 = vadd.f32 %v6436_v41, %v6435_v5  ;;  %v6378_v28 = vpop.f32.mrf.mxu1 }
 0x1c7   : > { %v6438_v1 = vpop.f32.mrf.mxu0  ;;  %v6379_v3 = vadd.f32 %v6378_v28, %v6377_v48 }
 0x1c8   : > { %v8316_v58 = vadd.f32 %v6437_v22, %v8079_v4  ;;  %v6380_v29 = vpop.f32.mrf.mxu1 }
 0x1c9   : > { %v6439_v49 = vpop.f32.mrf.mxu0  ;;  %v8322_v0 = vadd.f32 %v6379_v3, %v7819_v19 }
 0x1ca   : > { %v6440_v20 = vadd.f32 %v6439_v49, %v6438_v1  ;;  %v6381_v53 = vpop.f32.mrf.mxu1 }
 0x1cb   : > { %v6441_v57 = vpop.f32.mrf.mxu0  ;;  %v6382_v44 = vadd.f32 %v6381_v53, %v6380_v29 }
 0x1cc   : > { %v8319_v54 = vadd.f32 %v6440_v20, %v8094_v34 }
 0x1cd   : > { %v6442_v4 = vpop.f32.mrf.mxu0  ;;  %v8326_v63 = vadd.f32 %v6382_v44, %v6270_v24 }
 0x1ce   : > { %v6443_v52 = vadd.f32 %v6442_v4, %v6441_v57 }
 0x1cf   : > { %v6444_v51 = vpop.f32.mrf.mxu0 }
 0x1d0   : > { %v8329_v60 = vadd.f32 %v6443_v52, %v8674_v27 }
 0x1d1   : > { %v6445_v34 = vpop.f32.mrf.mxu0  ;;  %v8334_v25 = vpop.f32.mrf.mxu1 }
 0x1d2   : > { %v6446_v62 = vadd.f32 %v6445_v34, %v6444_v51 }
 0x1d3   : > { %v6447_v35 = vpop.f32.mrf.mxu0  ;;  %v8339_v50 = vpop.f32.mrf.mxu1 }
 0x1d4   : > { %v8332_v19 = vadd.f32 %v6446_v62, %v8128_v42 }
 0x1d5   : > { %v6448_v14 = vpop.f32.mrf.mxu0  ;;  %v8341_v55 = vpop.f32.mrf.mxu1 }
 0x1d6   : > { %v6449_v36 = vadd.f32 %v6448_v14, %v6447_v35 }
 0x1d7   : > { %v6450_v26 = vpop.f32.mrf.mxu0  ;;  %v8346_v49 = vpop.f32.mrf.mxu1 }
 0x1d8   : > { %v8337_v32 = vadd.f32 %v6449_v36, %v8134_v9 }
 0x1d9   : > { %v6451_v30 = vpop.f32.mrf.mxu0 }
 0x1da   : > { %v6452_v5 = vadd.f32 %v6451_v30, %v6450_v26 }
 0x1db   : > { %v6453_v22 = vpop.f32.mrf.mxu0 }
 0x1dc   : > { %v8344_v41 = vadd.f32 %v6452_v5, %v8157_v17 }
 0x1dd   : > { %v6454_v42 = vpop.f32.mrf.mxu0 }
 0x1de   : > { %v6455_v1 = vadd.f32 %v6454_v42, %v6453_v22  ;;  %v8351_v3 = vpop.f32.mrf.mxu1 }
 0x1df   : > { %v6456_v48 = vpop.f32.mrf.mxu0 }
 0x1e0   : > { %v8349_v20 = vadd.f32 %v6455_v1, %v8173_v12  ;;  %v8356_v53 = vpop.f32.mrf.mxu1 }
 0x1e1   : > { %v6457_v9 = vpop.f32.mrf.mxu0 }
 0x1e2   : > { %v6458_v28 = vadd.f32 %v6457_v9, %v6456_v48  ;;  %v8358_v10 = vpop.f32.mrf.mxu1 }
 0x1e3   : > { %v6459_v17 = vpop.f32.mrf.mxu0 }
 0x1e4   : > { %v8354_v29 = vadd.f32 %v6458_v28, %v8188_v2  ;;  %v8360_v57 = vpop.f32.mrf.mxu1 }
 0x1e5   : > { %v6460_v33 = vpop.f32.mrf.mxu0 }
 0x1e6   : > { %v6461_v24 = vadd.f32 %v6460_v33, %v6459_v17 }
 0x1e7   : > { %v6462_v44 = vpop.f32.mrf.mxu0 }
 0x1e8   : > { %v8363_v12 = vadd.f32 %v6461_v24, %v8200_v15 }
 0x1e9   : > { %v6463_v4 = vpop.f32.mrf.mxu0 }
 0x1ea   : > { %8675 = vst [vmem:[#allocation3_spill] sm:$0xff] %v8363_v12  ;;  %v6464_v52 = vadd.f32 %v6463_v4, %v6462_v44 }
 0x1eb   : > { %v8365_v51 = vpop.f32.mrf.mxu1 }
 0x1ec   : > { %v8368_v2 = vadd.f32 %v6464_v52, %v8210_v16 }
 0x1ed   : > { %v8370_v27 = vpop.f32.mrf.mxu1 }
 0x1ee   : > { %8676 = vst [vmem:[#allocation4_spill] sm:$0xff] %v8368_v2 }
 0x1ef   : > { %v8372_v34 = vpop.f32.mrf.mxu1 }
 0x1f0   : > { %v6465_v62 = vpop.f32.mrf.mxu0 }
 0x1f1   : > { %v8374_v14 = vpop.f32.mrf.mxu1 }
 0x1f2   : > { %v6466_v35 = vpop.f32.mrf.mxu0 }
 0x1f3   : > { %v6467_v36 = vadd.f32 %v6466_v35, %v6465_v62 }
 0x1f4   : > { %v6468_v26 = vpop.f32.mrf.mxu0 }
 0x1f5   : > { %v8377_v15 = vadd.f32 %v6467_v36, %v8243_v37 }
 0x1f6   : > { %v6469_v30 = vpop.f32.mrf.mxu0 }
 0x1f7   : > { %v8379_v5 = vpop.f32.mrf.mxu1  ;;  %v6470_v22 = vadd.f32 %v6469_v30, %v6468_v26 }
 0x1f9   : > { %v8381_v42 = vpop.f32.mrf.mxu1  ;;  %v8384_v16 = vadd.f32 %v6470_v22, %v8259_v40 }
 0x1fb   : > { %8677 = vst [vmem:[#allocation5_spill] sm:$0xff] %v8384_v16  ;;  %v8386_v1 = vpop.f32.mrf.mxu1 }
 0x1fc   : > { %v6471_v48 = vpop.f32.mrf.mxu0 }
 0x1fd   : > { %v8388_v28 = vpop.f32.mrf.mxu1 }
 0x1fe   : > { %v6472_v9 = vpop.f32.mrf.mxu0 }
 0x1ff   : > { %v6473_v17 = vadd.f32 %v6472_v9, %v6471_v48 }
 0x200   : > { %v6474_v33 = vpop.f32.mrf.mxu0 }
 0x201   : > { %v8391_v37 = vadd.f32 %v6473_v17, %v8272_v21 }
 0x202   : > { %v6475_v24 = vpop.f32.mrf.mxu0 }
 0x203   : > { %8678 = vst [vmem:[#allocation6_spill] sm:$0xff] %v8391_v37  ;;  %v6476_v4 = vadd.f32 %v6475_v24, %v6474_v33 }
 0x205   : > { %v8393_v44 = vpop.f32.mrf.mxu1  ;;  %v8398_v40 = vadd.f32 %v6476_v4, %v8283_v38 }
 0x207   : > { %v8395_v52 = vpop.f32.mrf.mxu1  ;;  %8679 = vst [vmem:[#allocation7_spill] sm:$0xff] %v8398_v40 }
 0x209   : > { %v8400_v62 = vpop.f32.mrf.mxu1  ;;  %v6477_v35 = vpop.f32.mrf.mxu0 }
 0x20b   : > { %v6478_v36 = vpop.f32.mrf.mxu0  ;;  %v8402_v30 = vpop.f32.mrf.mxu1 }
 0x20c   : > { %v6479_v26 = vadd.f32 %v6478_v36, %v6477_v35 }
 0x20d   : > { %v6480_v22 = vpop.f32.mrf.mxu0 }
 0x20e   : > { %v8405_v21 = vadd.f32 %v6479_v26, %v8296_v43 }
 0x20f   : > { %v6481_v48 = vpop.f32.mrf.mxu0 }
 0x210   : > { %8680 = vst [vmem:[#allocation8_spill] sm:$0xff] %v8405_v21  ;;  %v6482_v9 = vadd.f32 %v6481_v48, %v6480_v22 }
 0x211   : > { %v8407_v17 = vpop.f32.mrf.mxu1 }
 0x212   : > { %v8410_v33 = vadd.f32 %v6482_v9, %v8300_v45 }
 0x213   : > { %v8412_v38 = vpop.f32.mrf.mxu1 }
 0x214   : > { %8681 = vst [vmem:[#allocation9_spill] sm:$0xff] %v8410_v33 }
 0x215   : > { %v6483_v24 = vpop.f32.mrf.mxu0  ;;  %v8414_v4 = vpop.f32.mrf.mxu1 }
 0x217   : > { %v6484_v40 = vpop.f32.mrf.mxu0  ;;  %v8416_v35 = vpop.f32.mrf.mxu1 }
 0x218   : > { %v6485_v36 = vadd.f32 %v6484_v40, %v6483_v24 }
 0x219   : > { %v6486_v37 = vpop.f32.mrf.mxu0 }
 0x21a   : > { %v8419_v43 = vadd.f32 %v6485_v36, %v8306_v47 }
 0x21b   : > { %v6487_v26 = vpop.f32.mrf.mxu0 }
 0x21c   : > { %v6488_v48 = vadd.f32 %v6487_v26, %v6486_v37  ;;  %v6519_v37 = vadd.f32 %v8356_v53, %v8351_v3  ;;  %v8454_v3 = vld [vmem:[%s8662_s2] ss:$0 sm:$0xff] }
 0x21e   : > { %v8421_v22 = vpop.f32.mrf.mxu1  ;;  %v8426_v45 = vadd.f32 %v6488_v48, %v8313_v39  ;;  %v6513_v48 = vadd.f32 %v8339_v50, %v8334_v25 }
 0x220   : > { %v8423_v21 = vpop.f32.mrf.mxu1  ;;  %8682 = vst [vmem:[#allocation10_spill] sm:$0xff] %v8426_v45  ;;  %v4758_v50 = vadd.f32 %v6513_v48, %v8154_v13 }
 0x222   : > { %v8428_v9 = vpop.f32.mrf.mxu1  ;;  %v6489_v33 = vpop.f32.mrf.mxu0 }
 0x224   : > { %v6490_v2 = vpop.f32.mrf.mxu0  ;;  %v8430_v12 = vpop.f32.mrf.mxu1 }
 0x225   : > { %v6491_v16 = vadd.f32 %v6490_v2, %v6489_v33  ;;  %v6522_v33 = vadd.f32 %v8360_v57, %v8358_v10  ;;  %v8464_v10 = vld [vmem:[%s8663_s3] ss:$0 sm:$0xff] }
 0x226   : > { %v6492_v40 = vpop.f32.mrf.mxu0 }
 0x227   : > { %v8433_v47 = vadd.f32 %v6491_v16, %v8322_v0  ;;  %v4766_v16 = vadd.f32 %v6519_v37, %v8195_v6  ;;  %v4769_v37 = vadd.f32 %v6522_v33, %v8207_v31 }
 0x228   : > { %v6493_v24 = vpop.f32.mrf.mxu0 }
 0x229   : > { %8683 = vst [vmem:[#allocation11_spill] sm:$0xff] %v8433_v47  ;;  %v6494_v36 = vadd.f32 %v6493_v24, %v6492_v40 }
 0x22b   : > { %v8440_v39 = vadd.f32 %v6494_v36, %v8326_v63  ;;  %v6516_v63 = vadd.f32 %v8346_v49, %v8341_v55 }
 0x22d   : > { %v8437_v26 = vpop.f32.mrf.mxu1  ;;  %8684 = vst [vmem:[#allocation12_spill] sm:$0xff] %v8440_v39 }
 0x22f   : > { %v8444_v2 = vpop.f32.mrf.mxu1 }
 0x231   : > { %v8448_v0 = vpop.f32.mrf.mxu1 }
 0x232   : > { %v6649_v40 = vpop.f32.mrf.mxu0 }
 0x233   : > { %v8458_v53 = vpop.f32.mrf.mxu1  ;;  %v4927_v25 = vadd.f32 %v6649_v40, %v4766_v16  ;;  %v4761_v16 = vadd.f32 %v6516_v63, %v8166_v23  ;;  %v6531_v40 = vadd.f32 %v8381_v42, %v8379_v5  ;;  %v6534_v5 = vadd.f32 %v8388_v28, %v8386_v1 }
 0x234   : > { %v4918_v6 = vpop.f32.mrf.mxu0 }
 0x235   : > { %v8466_v57 = vpop.f32.mrf.mxu1  ;;  %v5054_v24 = vmul.f32 %v8454_v3, %v4927_v25  ;;  %v4919_v36 = vadd.f32 %v4918_v6, %v4758_v50  ;;  %v6525_v6 = vadd.f32 %v8370_v27, %v8365_v51  ;;  %v4782_v42 = vadd.f32 %v6531_v40, %v8264_v18 }
 0x236   : > { %v6650_v39 = vpop.f32.mrf.mxu0 }
 0x237   : > { %v5093_v55 = vadd.f32 %v8464_v10, %v5054_v24  ;;  %v8471_v49 = vpop.f32.mrf.mxu1  ;;  %v5052_v13 = vmul.f32 %v8454_v3, %v4919_v36  ;;  %v4930_v48 = vadd.f32 %v6650_v39, %v4769_v37 }
 0x238   : > { %v4921_v45 = vpop.f32.mrf.mxu0 }
 0x239   : > { %v5091_v25 = vadd.f32 %v8464_v10, %v5052_v13  ;;  %v8478_v50 = vpop.f32.mrf.mxu1  ;;  %v5055_v31 = vmul.f32 %v8454_v3, %v4930_v48  ;;  %v4922_v33 = vadd.f32 %v4921_v45, %v4761_v16  ;;  %v5125_v24 = vmul.f32 0.01, %v5093_v55 }
 0x23a   : > { %v4774_v48 = vadd.f32 %v6525_v6, %v8229_v46  ;;  %v6528_v16 = vadd.f32 %v8374_v14, %v8372_v34  ;;  %v4785_v46 = vadd.f32 %v6534_v5, %v8281_v11 }
 0x23b   : > { %v5094_v39 = vadd.f32 %v8464_v10, %v5055_v31  ;;  %v8484_v36 = vpop.f32.mrf.mxu1  ;;  %v5053_v23 = vmul.f32 %v8454_v3, %v4922_v33  ;;  %v5123_v63 = vmul.f32 0.01, %v5091_v25  ;;  %v5157_v31 = vmax.f32 %v5093_v55, %v5125_v24 }
 0x23c   : > { %v6543_v24 = vadd.f32 %v8412_v38, %v8407_v17  ;;  %v4777_v11 = vadd.f32 %v6528_v16, %v8235_v61  ;;  %v6546_v17 = vadd.f32 %v8416_v35, %v8414_v4  ;;  %v6540_v16 = vadd.f32 %v8402_v30, %v8400_v62 }
 0x23d   : > { %v5126_v37 = vmul.f32 0.01, %v5094_v39  ;;  %v5092_v45 = vadd.f32 %v8464_v10, %v5053_v23  ;;  %v8492_v13 = vpop.f32.mrf.mxu1  ;;  %v6653_v51 = vpop.f32.mrf.mxu0  ;;  %v5155_v6 = vmax.f32 %v5091_v25, %v5123_v63 }
 0x23e   : > { %v4943_v27 = vadd.f32 %v6653_v51, %v4782_v42  ;;  %v4798_v61 = vadd.f32 %v6543_v24, %v8303_v7 }
 0x23f   : > { %v5158_v33 = vmax.f32 %v5094_v39, %v5126_v37  ;;  %v5124_v47 = vmul.f32 0.01, %v5092_v45  ;;  %v8497_v1 = vpop.f32.mrf.mxu1  ;;  %v4934_v18 = vpop.f32.mrf.mxu0 }
 0x240   : > { %v5058_v28 = vmul.f32 %v8454_v3, %v4943_v27  ;;  %v4935_v40 = vadd.f32 %v4934_v18, %v4774_v48 }
 0x241   : > { %v6072_v23 = vpack.c.bf16 %v5158_v33, %v5157_v31  ;;  %v5156_v34 = vmax.f32 %v5092_v45, %v5124_v47  ;;  %v8506_v14 = vpop.f32.mrf.mxu1  ;;  %v6654_v55 = vpop.f32.mrf.mxu0  ;;  %v6537_v47 = vadd.f32 %v8395_v52, %v8393_v44 }
 0x242   : > { %v5097_v39 = vadd.f32 %v8464_v10, %v5058_v28  ;;  %v5056_v42 = vmul.f32 %v8454_v3, %v4935_v40  ;;  %v4946_v37 = vadd.f32 %v6654_v55, %v4785_v46 }
 0x243   : > { %6144 = vst [vmem:[%s8502_s24 + $0x8] sm:$0xff] %v6072_v23   ;;  %v6067_v51 = vpack.c.bf16 %v5156_v34, %v5155_v6  ;;  %v8513_v27 = vpop.f32.mrf.mxu1  ;;  %v4937_v25 = vpop.f32.mrf.mxu0  ;;  %v4790_v35 = vadd.f32 %v6537_v47, %v8290_v8  ;;  %v4801_v6 = vadd.f32 %v6546_v17, %v8311_v56  ;;  %v6555_v56 = vadd.f32 %v8444_v2, %v8437_v26 }
 0x244   : > { %v5059_v5 = vmul.f32 %v8454_v3, %v4946_v37  ;;  %v5095_v38 = vadd.f32 %v8464_v10, %v5056_v42  ;;  %v4938_v63 = vadd.f32 %v4937_v25, %v4777_v11  ;;  %v5129_v45 = vmul.f32 0.01, %v5097_v39 }
 0x245   : > { %6068 = vst [vmem:[%s8502_s24] sm:$0xff] %v6067_v51   ;;  %v4793_v42 = vadd.f32 %v6540_v16, %v8293_v59  ;;  %v6558_v2 = vadd.f32 %v8458_v53, %v8448_v0 }
 0x246   : > { %v5098_v48 = vadd.f32 %v8464_v10, %v5059_v5  ;;  %v5057_v44 = vmul.f32 %v8454_v3, %v4938_v63  ;;  %v5127_v28 = vmul.f32 0.01, %v5095_v38  ;;  %v5161_v23 = vmax.f32 %v5097_v39, %v5129_v45 }
 0x247   : > { %v6549_v45 = vadd.f32 %v8423_v21, %v8421_v22  ;;  %v6552_v22 = vadd.f32 %v8430_v12, %v8428_v9  ;;  %v6567_v12 = vadd.f32 %v8497_v1, %v8492_v13 }
 0x248   : > { %v8524_v31 = vpop.f32.mrf.mxu1  ;;  %v6657_v52 = vpop.f32.mrf.mxu0  ;;  %v5130_v33 = vmul.f32 0.01, %v5098_v48  ;;  %v5096_v40 = vadd.f32 %v8464_v10, %v5057_v44  ;;  %v5159_v39 = vmax.f32 %v5095_v38, %v5127_v28  ;;  %v4814_v38 = vadd.f32 %v6555_v56, %v8329_v60 }
 0x249   : > { %v4959_v18 = vadd.f32 %v6657_v52, %v4798_v61  ;;  %v4806_v21 = vadd.f32 %v6549_v45, %v8316_v58  ;;  %v6561_v56 = vadd.f32 %v8471_v49, %v8466_v57 }
 0x24a   : > { %v8530_v4 = vpop.f32.mrf.mxu1  ;;  %v4950_v46 = vpop.f32.mrf.mxu0  ;;  %v5162_v7 = vmax.f32 %v5098_v48, %v5130_v33  ;;  %v5128_v55 = vmul.f32 0.01, %v5096_v40 }
 0x24b   : > { %v5062_v62 = vmul.f32 %v8454_v3, %v4959_v18  ;;  %v4951_v30 = vadd.f32 %v4950_v46, %v4790_v35 }
 0x24c   : > { %v8536_v34 = vpop.f32.mrf.mxu1  ;;  %v6658_v24 = vpop.f32.mrf.mxu0  ;;  %v6082_v37 = vpack.c.bf16 %v5162_v7, %v5161_v23  ;;  %v5160_v25 = vmax.f32 %v5096_v40, %v5128_v55  ;;  %v4817_v7 = vadd.f32 %v6558_v2, %v8332_v19 }
 0x24d   : > { %v5101_v8 = vadd.f32 %v8464_v10, %v5062_v62  ;;  %v5060_v51 = vmul.f32 %v8454_v3, %v4951_v30  ;;  %v4962_v11 = vadd.f32 %v6658_v24, %v4801_v6 }
 0x24e   : > { %v4953_v47 = vpop.f32.mrf.mxu0  ;;  %6146 = vst [vmem:[%s8502_s24 + $0x18] sm:$0xff] %v6082_v37   ;;  %v8546_v63 = vpop.f32.mrf.mxu1  ;;  %v6077_v48 = vpack.c.bf16 %v5160_v25, %v5159_v39  ;;  %v6570_v25 = vadd.f32 %v8513_v27, %v8506_v14  ;;  %v4822_v27 = vadd.f32 %v6561_v56, %v8337_v32 }
 0x24f   : > { %v5099_v5 = vadd.f32 %v8464_v10, %v5060_v51  ;;  %v5063_v17 = vmul.f32 %v8454_v3, %v4962_v11  ;;  %v4954_v59 = vadd.f32 %v4953_v47, %v4793_v42  ;;  %v5133_v61 = vmul.f32 0.01, %v5101_v8 }
 0x250   : > { %6145 = vst [vmem:[%s8502_s24 + $0x10] sm:$0xff] %v6077_v48   ;;  %v4809_v11 = vadd.f32 %v6552_v22, %v8319_v54  ;;  %v4830_v54 = vadd.f32 %v6567_v12, %v8349_v20  ;;  %v4833_v2 = vadd.f32 %v6570_v25, %v8354_v29 }
 0x251   : > { %v5102_v16 = vadd.f32 %v8464_v10, %v5063_v17  ;;  %v5061_v26 = vmul.f32 %v8454_v3, %v4954_v59  ;;  %v5131_v44 = vmul.f32 0.01, %v5099_v5  ;;  %v5165_v40 = vmax.f32 %v5101_v8, %v5133_v61 }
 0x252   : > { %v6564_v59 = vadd.f32 %v8484_v36, %v8478_v50 }
 0x253   : > { %v5134_v52 = vmul.f32 0.01, %v5102_v16  ;;  %v5100_v33 = vadd.f32 %v8464_v10, %v5061_v26  ;;  %v5163_v62 = vmax.f32 %v5099_v5, %v5131_v44 }
 0x255   : > { %v6577_v18 = vpop.f32.mrf.mxu1  ;;  %v6661_v35 = vpop.f32.mrf.mxu0  ;;  %v5166_v46 = vmax.f32 %v5102_v16, %v5134_v52  ;;  %v5132_v6 = vmul.f32 0.01, %v5100_v33 }
 0x256   : > { %v4975_v28 = vadd.f32 %v6661_v35, %v4814_v38  ;;  %v4825_v35 = vadd.f32 %v6564_v59, %v8344_v41  ;;  %v6573_v41 = vadd.f32 %v8530_v4, %v8524_v31 }
 0x257   : > { %v6578_v0 = vpop.f32.mrf.mxu1  ;;  %v4966_v53 = vpop.f32.mrf.mxu0  ;;  %v6092_v30 = vpack.c.bf16 %v5166_v46, %v5165_v40  ;;  %v5164_v55 = vmax.f32 %v5100_v33, %v5132_v6 }
 0x258   : > { %v5066_v60 = vmul.f32 %v8454_v3, %v4975_v28  ;;  %v4967_v23 = vadd.f32 %v4966_v53, %v4806_v21  ;;  %v6579_v29 = vadd.f32 %v6578_v0, %v6577_v18 }
 0x259   : > { %v6580_v24 = vpop.f32.mrf.mxu1  ;;  %v6662_v58 = vpop.f32.mrf.mxu0  ;;  %6148 = vst [vmem:[%s8502_s24 + $0x28] sm:$0xff] %v6092_v30   ;;  %v6087_v8 = vpack.c.bf16 %v5164_v55, %v5163_v62 }
 0x25a   : > { %v5105_v9 = vadd.f32 %v8464_v10, %v5066_v60  ;;  %v5064_v42 = vmul.f32 %v8454_v3, %v4967_v23  ;;  %v4978_v37 = vadd.f32 %v6662_v58, %v4817_v7  ;;  %v4846_v12 = vadd.f32 %v6579_v29, %v8377_v15 }
 0x25b   : > { %v6581_v51 = vpop.f32.mrf.mxu1  ;;  %v4969_v19 = vpop.f32.mrf.mxu0  ;;  %6147 = vst [vmem:[%s8502_s24 + $0x20] sm:$0xff] %v6087_v8  }
 0x25c   : > { %v5067_v39 = vmul.f32 %v8454_v3, %v4978_v37  ;;  %v5103_v13 = vadd.f32 %v8464_v10, %v5064_v42  ;;  %v4970_v1 = vadd.f32 %v4969_v19, %v4809_v11  ;;  %v5137_v47 = vmul.f32 0.01, %v5105_v9  ;;  %v8685_v19 = vld [vmem:[#allocation3_spill] sm:$0xff] }
 0x25d   : > { %v6582_v18 = vadd.f32 %v6581_v51, %v6580_v24  ;;  %v6576_v11 = vadd.f32 %v8546_v63, %v8536_v34  ;;  %v4838_v56 = vadd.f32 %v6573_v41, %v8685_v19  ;;  %v8691_v19 = vld [vmem:[#allocation7_spill] sm:$0xff] }
 0x25e   : > { %v5106_v5 = vadd.f32 %v8464_v10, %v5067_v39  ;;  %v5065_v57 = vmul.f32 %v8454_v3, %v4970_v1  ;;  %v5135_v61 = vmul.f32 0.01, %v5103_v13  ;;  %v5169_v38 = vmax.f32 %v5105_v9, %v5137_v47  ;;  %v8686_v47 = vld [vmem:[#allocation5_spill] sm:$0xff] }
 0x25f   : > { %v8576_v17 = vpop.f32.mrf.mxu1  ;;  %v6665_v49 = vpop.f32.mrf.mxu0 }
 0x260   : > { %v5138_v45 = vmul.f32 0.01, %v5106_v5  ;;  %v4991_v48 = vadd.f32 %v6665_v49, %v4830_v54  ;;  %v5104_v16 = vadd.f32 %v8464_v10, %v5065_v57  ;;  %v5167_v40 = vmax.f32 %v5103_v13, %v5135_v61 }
 0x261   : > { %v8582_v14 = vpop.f32.mrf.mxu1  ;;  %v4982_v26 = vpop.f32.mrf.mxu0 }
 0x262   : > { %v5170_v20 = vmax.f32 %v5106_v5, %v5138_v45  ;;  %v5070_v50 = vmul.f32 %v8454_v3, %v4991_v48  ;;  %v4983_v36 = vadd.f32 %v4982_v26, %v4822_v27  ;;  %v5136_v52 = vmul.f32 0.01, %v5104_v16  ;;  %v8687_v48 = vld [vmem:[#allocation4_spill] sm:$0xff] }
 0x263   : > { %v8588_v44 = vpop.f32.mrf.mxu1  ;;  %v6666_v33 = vpop.f32.mrf.mxu0  ;;  %v4849_v5 = vadd.f32 %v6582_v18, %v8686_v47  ;;  %v4841_v27 = vadd.f32 %v6576_v11, %v8687_v48 }
 0x264   : > { %v6102_v28 = vpack.c.bf16 %v5170_v20, %v5169_v38  ;;  %v5109_v32 = vadd.f32 %v8464_v10, %v5070_v50  ;;  %v5068_v21 = vmul.f32 %v8454_v3, %v4983_v36  ;;  %v4994_v22 = vadd.f32 %v6666_v33, %v4833_v2 }
 0x265   : > { %v5168_v46 = vmax.f32 %v5104_v16, %v5136_v52  ;;  %v6587_v6 = vpop.f32.mrf.mxu1  ;;  %v4985_v53 = vpop.f32.mrf.mxu0  ;;  %v6585_v36 = vadd.f32 %v8582_v14, %v8576_v17  ;;  %v8689_v17 = vld [vmem:[#allocation6_spill] sm:$0xff] }
 0x266   : > { %6150 = vst [vmem:[%s8502_s24 + $0x38] sm:$0xff] %v6102_v28   ;;  %v5107_v60 = vadd.f32 %v8464_v10, %v5068_v21  ;;  %v5071_v23 = vmul.f32 %v8454_v3, %v4994_v22  ;;  %v4986_v7 = vadd.f32 %v4985_v53, %v4825_v35  ;;  %v5141_v30 = vmul.f32 0.01, %v5109_v32  ;;  %v8688_v21 = vld [vmem:[#allocation8_spill] sm:$0xff] }
 0x267   : > { %v6097_v62 = vpack.c.bf16 %v5168_v46, %v5167_v40  ;;  %v4854_v14 = vadd.f32 %v6585_v36, %v8689_v17 }
 0x268   : > { %v5110_v55 = vadd.f32 %v8464_v10, %v5071_v23  ;;  %v5069_v58 = vmul.f32 %v8454_v3, %v4986_v7  ;;  %v5139_v9 = vmul.f32 0.01, %v5107_v60  ;;  %v5173_v39 = vmax.f32 %v5109_v32, %v5141_v30 }
 0x269   : > { %6149 = vst [vmem:[%s8502_s24 + $0x30] sm:$0xff] %v6097_v62  }
 0x26a   : > { %v6589_v0 = vpop.f32.mrf.mxu1  ;;  %v5142_v42 = vmul.f32 0.01, %v5110_v55  ;;  %v5108_v37 = vadd.f32 %v8464_v10, %v5069_v58  ;;  %v5171_v54 = vmax.f32 %v5107_v60, %v5139_v9  ;;  %v6588_v60 = vadd.f32 %v6587_v6, %v8588_v44 }
 0x26b   : > { %v6669_v8 = vpop.f32.mrf.mxu0 }
 0x26c   : > { %v5007_v31 = vadd.f32 %v6669_v8, %v4846_v12  ;;  %v6590_v4 = vpop.f32.mrf.mxu1  ;;  %v5174_v25 = vmax.f32 %v5110_v55, %v5142_v42  ;;  %v5140_v24 = vmul.f32 0.01, %v5108_v37  ;;  %v8690_v12 = vld [vmem:[#allocation9_spill] sm:$0xff] }
 0x26d   : > { %v4998_v51 = vpop.f32.mrf.mxu0  ;;  %v6591_v16 = vadd.f32 %v6590_v4, %v6589_v0 }
 0x26e   : > { %v5074_v13 = vmul.f32 %v8454_v3, %v5007_v31  ;;  %v4999_v15 = vadd.f32 %v4998_v51, %v4838_v56  ;;  %v6592_v1 = vpop.f32.mrf.mxu1  ;;  %v6112_v59 = vpack.c.bf16 %v5174_v25, %v5173_v39  ;;  %v5172_v57 = vmax.f32 %v5108_v37, %v5140_v24 }
 0x26f   : > { %v6670_v34 = vpop.f32.mrf.mxu0  ;;  %v4862_v22 = vadd.f32 %v6591_v16, %v8688_v21  ;;  %v4857_v56 = vadd.f32 %v6588_v60, %v8691_v19 }
 0x270   : > { %v5113_v63 = vadd.f32 %v8464_v10, %v5074_v13  ;;  %v5072_v49 = vmul.f32 %v8454_v3, %v4999_v15  ;;  %v5010_v45 = vadd.f32 %v6670_v34, %v4849_v5  ;;  %6152 = vst [vmem:[%s8502_s24 + $0x48] sm:$0xff] %v6112_v59   ;;  %v6107_v61 = vpack.c.bf16 %v5172_v57, %v5171_v54  ;;  %v6593_v26 = vpop.f32.mrf.mxu1 }
 0x271   : > { %v5001_v2 = vpop.f32.mrf.mxu0  ;;  %v6594_v28 = vadd.f32 %v6593_v26, %v6592_v1 }
 0x272   : > { %v5111_v38 = vadd.f32 %v8464_v10, %v5072_v49  ;;  %v5075_v20 = vmul.f32 %v8454_v3, %v5010_v45  ;;  %v5002_v50 = vadd.f32 %v5001_v2, %v4841_v27  ;;  %6151 = vst [vmem:[%s8502_s24 + $0x40] sm:$0xff] %v6107_v61   ;;  %v5145_v52 = vmul.f32 0.01, %v5113_v63 }
 0x273   : > { %v4865_v9 = vadd.f32 %v6594_v28, %v8690_v12 }
 0x274   : > { %v5114_v33 = vadd.f32 %v8464_v10, %v5075_v20  ;;  %v5073_v35 = vmul.f32 %v8454_v3, %v5002_v50  ;;  %v5143_v29 = vmul.f32 0.01, %v5111_v38  ;;  %v5177_v41 = vmax.f32 %v5113_v63, %v5145_v52  ;;  %v8692_v20 = vld [vmem:[#allocation11_spill] sm:$0xff] }
 0x276   : > { %v6595_v32 = vpop.f32.mrf.mxu1  ;;  %v5146_v40 = vmul.f32 0.01, %v5114_v33  ;;  %v5112_v46 = vadd.f32 %v8464_v10, %v5073_v35  ;;  %v5175_v42 = vmax.f32 %v5111_v38, %v5143_v29 }
 0x277   : > { %v6673_v53 = vpop.f32.mrf.mxu0 }
 0x278   : > { %v5023_v23 = vadd.f32 %v6673_v53, %v4862_v22  ;;  %v6596_v7 = vpop.f32.mrf.mxu1  ;;  %v5178_v62 = vmax.f32 %v5114_v33, %v5146_v40  ;;  %v5144_v30 = vmul.f32 0.01, %v5112_v46 }
 0x279   : > { %v5014_v55 = vpop.f32.mrf.mxu0  ;;  %v6597_v15 = vadd.f32 %v6596_v7, %v6595_v32  ;;  %v8694_v7 = vld [vmem:[#allocation12_spill] sm:$0xff] }
 0x27a   : > { %v5078_v58 = vmul.f32 %v8454_v3, %v5023_v23  ;;  %v5015_v18 = vadd.f32 %v5014_v55, %v4854_v14  ;;  %v6598_v0 = vpop.f32.mrf.mxu1  ;;  %v6122_v37 = vpack.c.bf16 %v5178_v62, %v5177_v41  ;;  %v5176_v8 = vmax.f32 %v5112_v46, %v5144_v30 }
 0x27b   : > { %v6674_v44 = vpop.f32.mrf.mxu0  ;;  %v4870_v27 = vadd.f32 %v6597_v15, %v8419_v43  ;;  %v8693_v43 = vld [vmem:[#allocation10_spill] sm:$0xff] }
 0x27c   : > { %v5117_v6 = vadd.f32 %v8464_v10, %v5078_v58  ;;  %v5076_v11 = vmul.f32 %v8454_v3, %v5015_v18  ;;  %v5026_v31 = vadd.f32 %v6674_v44, %v4865_v9  ;;  %v6599_v4 = vpop.f32.mrf.mxu1  ;;  %6154 = vst [vmem:[%s8502_s24 + $0x58] sm:$0xff] %v6122_v37   ;;  %v6117_v39 = vpack.c.bf16 %v5176_v8, %v5175_v42 }
 0x27d   : > { %v5017_v25 = vpop.f32.mrf.mxu0  ;;  %v6600_v45 = vadd.f32 %v6599_v4, %v6598_v0 }
 0x27e   : > { %v5115_v24 = vadd.f32 %v8464_v10, %v5076_v11  ;;  %v5079_v51 = vmul.f32 %v8454_v3, %v5026_v31  ;;  %v5018_v13 = vadd.f32 %v5017_v25, %v4857_v56  ;;  %6153 = vst [vmem:[%s8502_s24 + $0x50] sm:$0xff] %v6117_v39   ;;  %v5149_v1 = vmul.f32 0.01, %v5117_v6 }
 0x27f   : > { %v4873_v40 = vadd.f32 %v6600_v45, %v8693_v43 }
 0x280   : > { %v5118_v47 = vadd.f32 %v8464_v10, %v5079_v51  ;;  %v5077_v5 = vmul.f32 %v8454_v3, %v5018_v13  ;;  %v6601_v54 = vpop.f32.mrf.mxu1  ;;  %v5147_v59 = vmul.f32 0.01, %v5115_v24  ;;  %v5181_v61 = vmax.f32 %v5117_v6, %v5149_v1 }
 0x282   : > { %v5150_v57 = vmul.f32 0.01, %v5118_v47  ;;  %v5116_v34 = vadd.f32 %v8464_v10, %v5077_v5  ;;  %v6677_v63 = vpop.f32.mrf.mxu0  ;;  %v6602_v49 = vpop.f32.mrf.mxu1  ;;  %v5179_v52 = vmax.f32 %v5115_v24, %v5147_v59 }
 0x283   : > { %v6603_v48 = vadd.f32 %v6602_v49, %v6601_v54 }
 0x284   : > { %v5182_v16 = vmax.f32 %v5118_v47, %v5150_v57  ;;  %v5148_v26 = vmul.f32 0.01, %v5116_v34  ;;  %v5030_v2 = vpop.f32.mrf.mxu0  ;;  %v6604_v38 = vpop.f32.mrf.mxu1 }
 0x285   : > { %v4878_v50 = vadd.f32 %v6603_v48, %v8692_v20  ;;  %v5031_v36 = vadd.f32 %v5030_v2, %v4870_v27 }
 0x286   : > { %v6132_v33 = vpack.c.bf16 %v5182_v16, %v5181_v61  ;;  %v5180_v35 = vmax.f32 %v5116_v34, %v5148_v26  ;;  %v6678_v28 = vpop.f32.mrf.mxu0  ;;  %v6605_v32 = vpop.f32.mrf.mxu1 }
 0x287   : > { %v5039_v21 = vadd.f32 %v6677_v63, %v4878_v50  ;;  %v5080_v22 = vmul.f32 %v8454_v3, %v5031_v36  ;;  %v6606_v29 = vadd.f32 %v6605_v32, %v6604_v38 }
 0x288   : > { %6156 = vst [vmem:[%s8502_s24 + $0x68] sm:$0xff] %v6132_v33   ;;  %v6127_v46 = vpack.c.bf16 %v5180_v35, %v5179_v52  ;;  %v5033_v53 = vpop.f32.mrf.mxu0 }
 0x289   : > { %v5082_v60 = vmul.f32 %v8454_v3, %v5039_v21  ;;  %v5119_v23 = vadd.f32 %v8464_v10, %v5080_v22  ;;  %v4881_v17 = vadd.f32 %v6606_v29, %v8694_v7  ;;  %v5034_v14 = vadd.f32 %v5033_v53, %v4873_v40 }
 0x28a   : > { %6155 = vst [vmem:[%s8502_s24 + $0x60] sm:$0xff] %v6127_v46  }
 0x28b   : > { %v5121_v41 = vadd.f32 %v8464_v10, %v5082_v60  ;;  %v5042_v62 = vadd.f32 %v6678_v28, %v4881_v17  ;;  %v5081_v30 = vmul.f32 %v8454_v3, %v5034_v14  ;;  %v5151_v55 = vmul.f32 0.01, %v5119_v23 }
 0x28d   : > { %v5083_v58 = vmul.f32 %v8454_v3, %v5042_v62  ;;  %v5120_v18 = vadd.f32 %v8464_v10, %v5081_v30  ;;  %v5153_v0 = vmul.f32 0.01, %v5121_v41  ;;  %v5183_v42 = vmax.f32 %v5119_v23, %v5151_v55 }
 0x28f   : > { %v5122_v12 = vadd.f32 %v8464_v10, %v5083_v58  ;;  %v5152_v9 = vmul.f32 0.01, %v5120_v18  ;;  %v5185_v44 = vmax.f32 %v5121_v41, %v5153_v0 }
 0x291   : > { %v5154_v37 = vmul.f32 0.01, %v5122_v12  ;;  %v5184_v8 = vmax.f32 %v5120_v18, %v5152_v9 }
 0x293   : > { %v5186_v6 = vmax.f32 %v5122_v12, %v5154_v37  ;;  %v6137_v11 = vpack.c.bf16 %v5184_v8, %v5183_v42 }
 0x295   : > { %v6142_v31 = vpack.c.bf16 %v5186_v6, %v5185_v44  ;;  %6157 = vst [vmem:[%s8502_s24 + $0x70] sm:$0xff] %v6137_v11  }
 0x297   : > { %6158 = vst [vmem:[%s8502_s24 + $0x78] sm:$0xff] %v6142_v31  }
 0x298 PF: > { %s14_s17 = sadd.s32 1, %s7022_s17   ;;  %s8695_s15 = smov %s7018_s16 }
 0x299   : > { %p11_p5 = scmp.ge.s32.totalorder %s14_s17, 4   ;;  %s8696_s16 = smov %s8698_s18 }
 0x29b   :  { %13 = sbr.rel (!%p11_p5) target bundleno = 2 (0x2), region = 77 }

// kernel: forward.13
= control target key start
LH: loop header
LB: loop body
LE: loop exit
PB: predicated region body
PF: predicated region fallthrough
CT: control target
= control target key end

     0   :  { %s686_s15 = smov 0   ;;  %s688_s16 = smov 0   ;;  %s756_s0 = inlined_call_operand.vmem [shape: bf16[2,1,4,4,128], index: 0, kind: input, shape index: {}]   ;;  %s757_s1 = inlined_call_operand.vmem [shape: bf16[128,128], index: 1, kind: input, shape index: {}]   ;;  %s758_s2 = inlined_call_operand.vmem [shape: f32[1,128], index: 2, kind: input, shape index: {}]   ;;  %s759_s3 = inlined_call_operand.vmem [shape: f32[1,128], index: 3, kind: input, shape index: {}]   ;;  %s760_s4 = inlined_call_operand.vmem [shape: bf16[2,4,4,128], index: 4, kind: output, shape index: {}]  }
   0x1   :  { %s690_s17 = smov 0  }
   0x2 LB: > { %s26_s18 = sadd.s32 1, %s652_s16  ;;  %p551_p0 = scmp.ge.s32.totalorder %s656_s17, 1  ;;  %s656_s17 = sphi %s690_s17, %s14_s17   ;;  %s652_s16 = sphi %s688_s16, %s762_s16   ;;  %s648_s15 = sphi %s686_s15, %s761_s15  }
   0x3   : > { %p28_p1 = scmp.ge.s32.totalorder %s26_s18, 2  ;;  %p201_p2 = scmp.lt.s32.totalorder %s656_s17, 3 }
   0x5   : > { %s764_s18 = smov (%p28_p1, %s26_s18), 0  ;;  %p202_p3 = pnand %p551_p0, %p201_p2 }
   0x6   : > { %p240_p4 = scmp.lt.s32.totalorder (!%p202_p3), %s648_s15, 1 }
   0x7   : > { %205 = sbr.rel (%p202_p3) target bundleno = 251 (0xfb), region = 36 }
   0xc   : > { %v626_v0 = vld [vmem:[%s757_s1 + $0x38] sm:$0xff]   ;;  %v658_v1 = vmov 0.0   ;;  %v627_v2 = vld [vmem:[%s757_s1 + $0x30] sm:$0xff]   ;;  %vm659_vm0 = vmmov 0   ;;  %v628_v3 = vld [vmem:[%s757_s1 + $0x28] sm:$0xff]   ;;  %s766_s15 = smov (!%p240_p4, %s648_s15), 1  ;;  %v293_v7 = vlaneseq }
   0xd   : > { %579 = vmatprep.subr.bf16.mxu0 %v658_v1  ;;  %595 = vmatprep.mubr.msk.bf16.mxu0 %vm659_vm0, %v658_v1  ;;  %v629_v4 = vld [vmem:[%s757_s1 + $0x20] sm:$0xff]   ;;  %s568_s27 = sshll.u32 %s766_s15, 3  ;;  %v660_v5 = vmov 1983009808   ;;  %v630_v8 = vld [vmem:[%s757_s1 + $0x18] sm:$0xff]   ;;  %v631_v9 = vld [vmem:[%s757_s1 + $0x10] sm:$0xff]  }
   0xe   : > { %580 = vmatpush3.bf16.msra.mxu0 %v626_v0  ;;  %v291_v6 = vunpack.c.l.s4 %v660_v5  ;;  %s244_s6 = scalar_lea.vmem %s756_s0, %s568_s27  ;;  %v294_v12 = vshrl.u32 %v293_v7, 7  ;;  %v632_v19 = vld [vmem:[%s757_s1 + $0x8] sm:$0xff]   ;;  %v633_v22 = vld [vmem:[%s757_s1] sm:$0xff]   ;;  %s262_s23 = scalar_lea.vmem %s760_s4, %s568_s27 }
   0xf   : > { %581 = vmatprep.subr.bf16.mxu0 %v658_v1  ;;  %v264_v10 = vld [vmem:[%s244_s6] sm:$0x3]  ;;  %v265_v13 = vld [vmem:[%s244_s6 + $0x2] sm:$0x3]  ;;  %v266_v14 = vld [vmem:[%s244_s6 + $0x4] sm:$0x3] }
  0x10   : > { %v292_v11 = vunpack.c.0.s8 %v291_v6  ;;  %v267_v15 = vld [vmem:[%s244_s6 + $0x6] sm:$0x3]  ;;  %v288_v16 = vcombine.low %v264_v10, %v265_v13  ;;  %v564_v24 = vld [vmem:[%s758_s2] ss:$0 sm:$0xff] }
  0x11   : > { %v289_v17 = vcombine.low %v266_v14, %v267_v15  ;;  %v565_v26 = vld [vmem:[%s759_s3] ss:$0 sm:$0xff] }
  0x12   : > { %582 = vmatpush3.bf16.msra.mxu0 %v627_v2  ;;  %v295_v18 = vsub.s32 %v292_v11, %v294_v12 }
  0x13   : > { %583 = vmatprep.subr.bf16.mxu0 %v658_v1 }
  0x14   : > { %v296_v20 = vrot.slane %v288_v16, %v295_v18  ;;  %v303_v21 = vrot.slane %v289_v17, %v295_v18 }
  0x16   : > { %584 = vmatpush3.bf16.msra.mxu0 %v628_v3  ;;  %v304_v23 = vcombine.low %v296_v20, %v303_v21 }
  0x17   : > { %585 = vmatprep.subr.bf16.mxu0 %v658_v1 }
  0x1a   : > { %586 = vmatpush3.bf16.msra.mxu0 %v629_v4 }
  0x1b   : > { %587 = vmatprep.subr.bf16.mxu0 %v658_v1 }
  0x1e   : > { %588 = vmatpush3.bf16.msra.mxu0 %v630_v8 }
  0x1f   : > { %589 = vmatprep.subr.bf16.mxu0 %v658_v1 }
  0x22   : > { %590 = vmatpush3.bf16.msra.mxu0 %v631_v9 }
  0x23   : > { %591 = vmatprep.subr.bf16.mxu0 %v658_v1 }
  0x26   : > { %592 = vmatpush3.bf16.msra.mxu0 %v632_v19 }
  0x27   : > { %593 = vmatprep.subr.bf16.mxu0 %v658_v1 }
  0x2a   : > { %594 = vmatpush3.bf16.msra.mxu0 %v633_v22 }
  0x2d   : > { %596 = vmatmul.mubr.bf16.vlgmr.msra.gmra.mxu0 %v304_v23 }
  0xed   : > { %v388_v25 = vpop.f32.mrf.mxu0 }
  0xee   : > { %v402_v27 = vmul.f32 %v564_v24, %v388_v25 }
  0xef   : > { %v597_v28 = vpop.f32.mrf.mxu0 }
  0xf0   : > { %v411_v29 = vadd.f32 %v565_v26, %v402_v27 }
  0xf1   : > { %v391_v30 = vpop.f32.mrf.mxu0 }
  0xf2   : > { %v415_v31 = vcombine.high %v411_v29, %v411_v29  ;;  %v419_v32 = vpack.c.bf16 %v411_v29, %v411_v29  ;;  %v403_v33 = vmul.f32 %v564_v24, %v391_v30 }
  0xf3   : > { %v598_v34 = vpop.f32.mrf.mxu0 }
  0xf4   : > { %v420_v35 = vpack.c.bf16 %v415_v31, %v415_v31  ;;  %423 = vst [vmem:[%s262_s23] sm:$0x3] %v419_v32  ;;  %v412_v36 = vadd.f32 %v565_v26, %v403_v33 }
  0xf6   : > { %424 = vst [vmem:[%s262_s23 + $0x2] sm:$0x3] %v420_v35  ;;  %v416_v37 = vcombine.high %v412_v36, %v412_v36  ;;  %v421_v38 = vpack.c.bf16 %v412_v36, %v412_v36 }
  0xf8   : > { %v422_v39 = vpack.c.bf16 %v416_v37, %v416_v37  ;;  %425 = vst [vmem:[%s262_s23 + $0x4] sm:$0x3] %v421_v38 }
  0xfa   : > { %426 = vst [vmem:[%s262_s23 + $0x6] sm:$0x3] %v422_v39 }
  0xfb PF: > { %s14_s17 = sadd.s32 1, %s656_s17   ;;  %s761_s15 = smov %s652_s16 }
  0xfc   : > { %p11_p5 = scmp.ge.s32.totalorder %s14_s17, 4   ;;  %s762_s16 = smov %s764_s18 }
  0xfe   :  { %13 = sbr.rel (!%p11_p5) target bundleno = 2 (0x2), region = 75 }

// kernel: forward.12
= control target key start
LH: loop header
LB: loop body
LE: loop exit
PB: predicated region body
PF: predicated region fallthrough
CT: control target
= control target key end

     0   :  { %s2103_s15 = smov 0   ;;  %s2105_s16 = smov 0   ;;  %s2443_s0 = inlined_call_operand.vmem [shape: bf16[2,4,5,5,128], index: 0, kind: input, shape index: {}]   ;;  %s2444_s1 = inlined_call_operand.vmem [shape: bf16[1152,128], index: 1, kind: input, shape index: {}]   ;;  %s2445_s2 = inlined_call_operand.vmem [shape: f32[1,128], index: 2, kind: input, shape index: {}]   ;;  %s2446_s3 = inlined_call_operand.vmem [shape: f32[1,128], index: 3, kind: input, shape index: {}]   ;;  %s2447_s4 = inlined_call_operand.vmem [shape: bf16[2,4,4,128], index: 4, kind: output, shape index: {}]  }
   0x1   :  { %s2107_s17 = smov 0  }
   0x2 LB: > { %s26_s18 = sadd.s32 1, %s2069_s16  ;;  %p1699_p0 = scmp.ge.s32.totalorder %s2073_s17, 1  ;;  %s2073_s17 = sphi %s2107_s17, %s14_s17   ;;  %s2069_s16 = sphi %s2105_s16, %s2453_s16   ;;  %s2065_s15 = sphi %s2103_s15, %s2452_s15  }
   0x3   : > { %p28_p1 = scmp.ge.s32.totalorder %s26_s18, 2  ;;  %p201_p2 = scmp.lt.s32.totalorder %s2073_s17, 3 }
   0x5   : > { %s2455_s18 = smov (%p28_p1, %s26_s18), 0  ;;  %p202_p3 = pnand %p1699_p0, %p201_p2 }
   0x6   : > { %p240_p4 = scmp.lt.s32.totalorder (!%p202_p3), %s2065_s15, 1 }
   0x7   : > { %205 = sbr.rel (%p202_p3) target bundleno = 334 (0x14e), region = 36 }
   0xc   : > { %v1965_v0 = vld [vmem:[%s2444_s1 + $0x78] sm:$0xff]   ;;  %v1969_v4 = vld [vmem:[%s2444_s1 + $0x70] sm:$0xff]   ;;  %v1973_v8 = vld [vmem:[%s2444_s1 + $0x68] sm:$0xff]   ;;  %s2457_s15 = smov (!%p240_p4, %s2065_s15), 1  ;;  %vm321_vm0 = vsmask.f32 1280  ;;  %v811_v49 = vlaneseq }
   0xd   : > { %v1966_v1 = vld [vmem:[%s2444_s1 + $0xf8] sm:$0xff]   ;;  %1820 = vmatprep.subr.bf16.mxu0 %v1965_v0  ;;  %v1970_v5 = vld [vmem:[%s2444_s1 + $0xf0] sm:$0xff]   ;;  %v1974_v9 = vld [vmem:[%s2444_s1 + $0xe8] sm:$0xff]   ;;  %s1937_s5 = smul.u32 80, %s2457_s15  ;;  %vm322_vm1 = vsmask.f32 3336 }
   0xe   : > { %v1967_v2 = vld [vmem:[%s2444_s1 + $0x38] sm:$0xff]   ;;  %1842 = vmatprep.subr.bf16.mxu1 %v1966_v1  ;;  %v1971_v6 = vld [vmem:[%s2444_s1 + $0x30] sm:$0xff]   ;;  %v1975_v10 = vld [vmem:[%s2444_s1 + $0x28] sm:$0xff]   ;;  %vm324_vm2 = vsmask.f32 5392  ;;  %vm2077_vm7 = vmmov 0  }
   0xf   : > { %v1968_v3 = vld [vmem:[%s2444_s1 + $0xb8] sm:$0xff]   ;;  %1821 = vmatpush3.bf16.msra.mxu0 %v1967_v2  ;;  %v1972_v7 = vld [vmem:[%s2444_s1 + $0xb0] sm:$0xff]   ;;  %v1976_v11 = vld [vmem:[%s2444_s1 + $0xa8] sm:$0xff]   ;;  %s2227_s20 = scalar_lea.vmem %s2443_s0, %s1937_s5  ;;  %vm326_vm4 = vsmask.f32 7448  ;;  %s1819_s19 = sshll.u32 %s2457_s15, 3 }
  0x10   : > { %1843 = vmatpush3.bf16.msra.mxu1 %v1968_v3  ;;  %1822 = vmatprep.subr.bf16.mxu0 %v1969_v4  ;;  %v1977_v12 = vld [vmem:[%s2444_s1 + $0x60] sm:$0xff]   ;;  %v1981_v16 = vld [vmem:[%s2444_s1 + $0x58] sm:$0xff]   ;;  %v1985_v20 = vld [vmem:[%s2444_s1 + $0x50] sm:$0xff]   ;;  %s262_s22 = scalar_lea.vmem %s2447_s4, %s1819_s19 }
  0x11   : > { %1844 = vmatprep.subr.bf16.mxu1 %v1970_v5  ;;  %v1978_v13 = vld [vmem:[%s2444_s1 + $0xe0] sm:$0xff]   ;;  %v1982_v17 = vld [vmem:[%s2444_s1 + $0xd8] sm:$0xff]   ;;  %v1986_v21 = vld [vmem:[%s2444_s1 + $0xd0] sm:$0xff]  }
  0x12   : > { %v1979_v14 = vld [vmem:[%s2444_s1 + $0x20] sm:$0xff]   ;;  %v1983_v18 = vld [vmem:[%s2444_s1 + $0x18] sm:$0xff]   ;;  %v1987_v22 = vld [vmem:[%s2444_s1 + $0x10] sm:$0xff]  }
  0x13   : > { %1823 = vmatpush3.bf16.msra.mxu0 %v1971_v6  ;;  %v1980_v15 = vld [vmem:[%s2444_s1 + $0xa0] sm:$0xff]   ;;  %v1984_v19 = vld [vmem:[%s2444_s1 + $0x98] sm:$0xff]   ;;  %v1988_v23 = vld [vmem:[%s2444_s1 + $0x90] sm:$0xff]  }
  0x14   : > { %1845 = vmatpush3.bf16.msra.mxu1 %v1972_v7  ;;  %1824 = vmatprep.subr.bf16.mxu0 %v1973_v8  ;;  %v1989_v24 = vld [vmem:[%s2444_s1 + $0x48] sm:$0xff]   ;;  %v1993_v28 = vld [vmem:[%s2444_s1 + $0x40] sm:$0xff]   ;;  %v1703_v36 = vld [vmem:[%s2227_s20 + $0x14] sm:$0x3] }
  0x15   : > { %1846 = vmatprep.subr.bf16.mxu1 %v1974_v9  ;;  %v1990_v25 = vld [vmem:[%s2444_s1 + $0xc8] sm:$0xff]   ;;  %v1994_v29 = vld [vmem:[%s2444_s1 + $0xc0] sm:$0xff]   ;;  %v1704_v37 = vld [vmem:[%s2227_s20 + $0x18] sm:$0x3]  ;;  %277 = vst [vmem:[#allocation2 + $0x2] sm:$0x3] %v1703_v36 }
  0x16   : > { %v1991_v26 = vld [vmem:[%s2444_s1 + $0x8] sm:$0xff]   ;;  %v1995_v30 = vld [vmem:[%s2444_s1] sm:$0xff]   ;;  %v1705_v38 = vld [vmem:[%s2227_s20 + $0x1c] sm:$0x3]  ;;  %278 = vst [vmem:[#allocation2 + $0x14] sm:$0x3] %v1704_v37 }
  0x17   : > { %1825 = vmatpush3.bf16.msra.mxu0 %v1975_v10  ;;  %v1992_v27 = vld [vmem:[%s2444_s1 + $0x88] sm:$0xff]   ;;  %v1996_v31 = vld [vmem:[%s2444_s1 + $0x80] sm:$0xff]   ;;  %279 = vst [vmem:[#allocation2 + $0x26] sm:$0x3] %v1705_v38  ;;  %vm323_vm3 = vmor %vm321_vm0, %vm322_vm1 }
  0x18   : > { %1847 = vmatpush3.bf16.msra.mxu1 %v1976_v11  ;;  %1826 = vmatprep.subr.bf16.mxu0 %v1977_v12  ;;  %v264_v32 = vld [vmem:[%s2227_s20] sm:$0x3]  ;;  %v265_v33 = vld [vmem:[%s2227_s20 + $0x4] sm:$0x3]  ;;  %v266_v34 = vld [vmem:[%s2227_s20 + $0x8] sm:$0x3] }
  0x19   : > { %1848 = vmatprep.subr.bf16.mxu1 %v1978_v13  ;;  %v267_v35 = vld [vmem:[%s2227_s20 + $0xc] sm:$0x3]  ;;  %268 = vst [vmem:[#allocation2] sm:$0x3] %v264_v32  ;;  %269 = vst [vmem:[#allocation2 + $0x12] sm:$0x3] %v265_v33 }
  0x1a   : > { %270 = vst [vmem:[#allocation2 + $0x24] sm:$0x3] %v266_v34  ;;  %271 = vst [vmem:[#allocation2 + $0x36] sm:$0x3] %v267_v35  ;;  %v1706_v39 = vld [vmem:[%s2227_s20 + $0x20] sm:$0x3] }
  0x1b   : > { %1827 = vmatpush3.bf16.msra.mxu0 %v1979_v14  ;;  %280 = vst [vmem:[#allocation2 + $0x38] sm:$0x3] %v1706_v39  ;;  %v1707_v40 = vld.sshfl [vmem:[%s2227_s20] sm:$0x13 pattern:$0x76325410]  ;;  %vm2246_vm5 = vmor %vm323_vm3, %vm324_vm2 }
  0x1c   : > { %1849 = vmatpush3.bf16.msra.mxu1 %v1980_v15  ;;  %1828 = vmatprep.subr.bf16.mxu0 %v1981_v16  ;;  %v1708_v41 = vld.sshfl [vmem:[%s2227_s20 + $0x4] sm:$0x13 pattern:$0x76325410]  ;;  %v296_v42 = vcombine.high %v1707_v40, %v1707_v40  ;;  %v329_v47 = vshrl.u32 %v1707_v40, 16  ;;  %v332_v48 = vshll.u32 %v1707_v40, 16  ;;  %vm2256_vm6 = vmor %vm2246_vm5, %vm326_vm4 }
  0x1d   : > { %1850 = vmatprep.subr.bf16.mxu1 %v1982_v17  ;;  %v1709_v43 = vld.sshfl [vmem:[%s2227_s20 + $0x8] sm:$0x13 pattern:$0x76325410]  ;;  %v304_v44 = vcombine.high %v1708_v41, %v1708_v41  ;;  %v343_v52 = vshrl.u32 %v1708_v41, 16  ;;  %v346_v53 = vshll.u32 %v1708_v41, 16 }
  0x1e   : > { %v1710_v45 = vld.sshfl [vmem:[%s2227_s20 + $0xc] sm:$0x13 pattern:$0x76325410]  ;;  %v312_v46 = vcombine.high %v1709_v43, %v1709_v43  ;;  %v338_v51 = vshll.u32 %v296_v42, 16  ;;  %v2003_v55 = vld [vmem:[%s2444_s1 + $0x178] sm:$0xff]  }
  0x1f   : > { %1829 = vmatpush3.bf16.msra.mxu0 %v1983_v18  ;;  %v320_v50 = vcombine.high %v1710_v45, %v1710_v45  ;;  %v1711_v54 = vld [vmem:[%s2227_s20 + $0x28] sm:$0x3]  ;;  %v331_v57 = vrot.slane %v329_v47, 6  ;;  %v334_v58 = vrot.slane %v332_v48, 7  ;;  %v352_v59 = vshll.u32 %v304_v44, 16  ;;  %v2005_v13 = vld [vmem:[%s2444_s1 + $0x1f8] sm:$0xff]  }
  0x20   : > { %1851 = vmatpush3.bf16.msra.mxu1 %v1984_v19  ;;  %1830 = vmatprep.subr.bf16.mxu0 %v1985_v20  ;;  %v357_v60 = vshrl.u32 %v1709_v43, 16  ;;  %v1712_v61 = vld [vmem:[%s2227_s20 + $0x2c] sm:$0x3]  ;;  %397 = vst [vmem:[#allocation2 + $0x6] sm:$0x3] %v1711_v54  ;;  %v340_v62 = vrot.slane %v338_v51, 7 }
  0x21   : > { %1852 = vmatprep.subr.bf16.mxu1 %v1986_v21  ;;  %v345_v63 = vrot.slane %v343_v52, 6  ;;  %v348_v0 = vrot.slane %v346_v53, 7  ;;  %v360_v1 = vshll.u32 %v1709_v43, 16  ;;  %v1713_v2 = vld [vmem:[%s2227_s20 + $0x30] sm:$0x3]  ;;  %v335_v3 = vor.u32 %v334_v58, %v331_v57  ;;  %v2004_v42 = vld [vmem:[%s2444_s1 + $0x138] sm:$0xff]  }
  0x22   : > { %398 = vst [vmem:[#allocation2 + $0x18] sm:$0x3] %v1712_v61  ;;  %v354_v4 = vrot.slane %v352_v59, 7  ;;  %v359_v5 = vrot.slane %v357_v60, 6  ;;  %v366_v6 = vshll.u32 %v312_v46, 16  ;;  %v371_v11 = vshrl.u32 %v1710_v45, 16 }
  0x23   : > { %1831 = vmatpush3.bf16.msra.mxu0 %v1987_v22  ;;  %v1714_v7 = vld [vmem:[%s2227_s20 + $0x34] sm:$0x3]  ;;  %399 = vst [vmem:[#allocation2 + $0x2a] sm:$0x3] %v1713_v2  ;;  %v349_v9 = vor.u32 %v348_v0, %v345_v63  ;;  %v362_v10 = vrot.slane %v360_v1, 7  ;;  %v374_v12 = vshll.u32 %v1710_v45, 16 }
  0x24   : > { %1853 = vmatpush3.bf16.msra.mxu1 %v1988_v23  ;;  %1832 = vmatprep.subr.bf16.mxu0 %v1989_v24  ;;  %400 = vst [vmem:[#allocation2 + $0x3c] sm:$0x3] %v1714_v7  ;;  %v336_v14 = vrot.slane %v335_v3, 2  ;;  %v368_v15 = vrot.slane %v366_v6, 7  ;;  %v380_v16 = vshll.u32 %v320_v50, 16  ;;  %v373_v19 = vrot.slane %v371_v11, 6 }
  0x25   : > { %1854 = vmatprep.subr.bf16.mxu1 %v1990_v25  ;;  %v350_v17 = vrot.slane %v349_v9, 2  ;;  %v363_v18 = vor.u32 %v362_v10, %v359_v5  ;;  %v376_v20 = vrot.slane %v374_v12, 7  ;;  %v1997_v33 = vld [vmem:[#allocation2] ss:$18 sps:$4 sm:$0xff]   ;;  %v1999_v36 = vld [vmem:[#allocation2 + $0x24] ss:$18 sps:$4 sm:$0xff]  }
  0x26   : > { %v341_v21 = vsel %vm2256_vm6, %v336_v14, %v340_v62  ;;  %v382_v22 = vrot.slane %v380_v16, 7  ;;  %v2006_v43 = vld [vmem:[%s2444_s1 + $0x1b8] sm:$0xff]   ;;  %v2007_v48 = vld [vmem:[%s2444_s1 + $0x170] sm:$0xff]   ;;  %v2011_v52 = vld [vmem:[%s2444_s1 + $0x168] sm:$0xff]  }
  0x27   : > { %1833 = vmatpush3.bf16.msra.mxu0 %v1991_v26  ;;  %v355_v23 = vsel %vm2256_vm6, %v350_v17, %v354_v4  ;;  %v364_v24 = vrot.slane %v363_v18, 2  ;;  %v377_v25 = vor.u32 %v376_v20, %v373_v19  ;;  %388 = vst [vmem:[#allocation2 + $0x4] sm:$0x3] %v341_v21  ;;  %v2075_v26 = vmov 1983009808   ;;  %v2008_v50 = vld [vmem:[%s2444_s1 + $0x130] sm:$0xff]  }
  0x28   : > { %1855 = vmatpush3.bf16.msra.mxu1 %v1992_v27  ;;  %1834 = vmatprep.subr.bf16.mxu0 %v1993_v28  ;;  %v809_v27 = vunpack.c.l.s4 %v2075_v26  ;;  %389 = vst [vmem:[#allocation2 + $0x16] sm:$0x3] %v355_v23  ;;  %632 = vst [vmem:[#allocation2 + $0x10] sm:$0x3] %v355_v23  ;;  %v2010_v51 = vld [vmem:[%s2444_s1 + $0x1b0] sm:$0xff]   ;;  %v2013_v53 = vld [vmem:[%s2444_s1 + $0x1e8] sm:$0xff]  }
  0x29   : > { %1856 = vmatprep.subr.bf16.mxu1 %v1994_v29  ;;  %v369_v28 = vsel %vm2256_vm6, %v364_v24, %v368_v15  ;;  %v378_v29 = vrot.slane %v377_v25, 2  ;;  %v2012_v54 = vld [vmem:[%s2444_s1 + $0x128] sm:$0xff]   ;;  %v2015_v56 = vld [vmem:[%s2444_s1 + $0x160] sm:$0xff]   ;;  %v2019_v60 = vld [vmem:[%s2444_s1 + $0x158] sm:$0xff]  }
  0x2a   : > { %390 = vst [vmem:[#allocation2 + $0x28] sm:$0x3] %v369_v28  ;;  %633 = vst [vmem:[#allocation2 + $0x22] sm:$0x3] %v369_v28  ;;  %v810_v32 = vunpack.c.0.s8 %v809_v27  ;;  %v2017_v57 = vld [vmem:[%s2444_s1 + $0x1e0] sm:$0xff]   ;;  %v2021_v61 = vld [vmem:[%s2444_s1 + $0x1d8] sm:$0xff]  }
  0x2b   : > { %1835 = vmatpush3.bf16.msra.mxu0 %v1995_v30  ;;  %v812_v30 = vshrl.u32 %v811_v49, 7  ;;  %v2009_v49 = vld [vmem:[%s2444_s1 + $0x1f0] sm:$0xff]   ;;  %v2016_v58 = vld [vmem:[%s2444_s1 + $0x120] sm:$0xff]   ;;  %v2020_v62 = vld [vmem:[%s2444_s1 + $0x118] sm:$0xff]  }
  0x2c   : > { %1857 = vmatpush3.bf16.msra.mxu1 %v1996_v31  ;;  %1864 = vmatprep.subr.bf16.mxu0 %v2003_v55  ;;  %v383_v31 = vsel %vm2256_vm6, %v378_v29, %v382_v22  ;;  %v2014_v55 = vld [vmem:[%s2444_s1 + $0x1a8] sm:$0xff]   ;;  %v2018_v59 = vld [vmem:[%s2444_s1 + $0x1a0] sm:$0xff]   ;;  %v2022_v63 = vld [vmem:[%s2444_s1 + $0x198] sm:$0xff]  }
  0x2d   : > { %1886 = vmatprep.subr.bf16.mxu1 %v2005_v13  ;;  %391 = vst [vmem:[#allocation2 + $0x3a] sm:$0x3] %v383_v31  ;;  %634 = vst [vmem:[#allocation2 + $0x34] sm:$0x3] %v383_v31  ;;  %v2271_v34 = vsub.s32 %v810_v32, %v812_v30  ;;  %v1715_v0 = vld [vmem:[%s2227_s20 + $0x3c] sm:$0x3] }
  0x2e   : > { %v1716_v1 = vld [vmem:[%s2227_s20 + $0x40] sm:$0x3]  ;;  %v2023_v2 = vld [vmem:[%s2444_s1 + $0x150] sm:$0xff]   ;;  %v1717_v4 = vld [vmem:[%s2227_s20 + $0x44] sm:$0x3] }
  0x2f   : > { %v2001_v35 = vld [vmem:[#allocation2 + $0x4] ss:$18 sps:$4 sm:$0xff]   ;;  %v814_v37 = vrot.slane %v1997_v33, %v2271_v34  ;;  %v828_v40 = vrot.slane %v1999_v36, %v2271_v34  ;;  %v1718_v5 = vld [vmem:[%s2227_s20 + $0x48] sm:$0x3]  ;;  %406 = vst [vmem:[#allocation2 + $0x8] sm:$0x3] %v1715_v0 }
  0x30   : > { %v821_v39 = vrot.slane %v2001_v35, %v2271_v34  ;;  %v2025_v3 = vld [vmem:[%s2444_s1 + $0x1d0] sm:$0xff]   ;;  %407 = vst [vmem:[#allocation2 + $0x1a] sm:$0x3] %v1716_v1  ;;  %v1727_v6 = vld [vmem:[%s2227_s20 + $0x4] sm:$0x3]  ;;  %v2027_v24 = vld [vmem:[%s2444_s1 + $0x148] sm:$0xff]  }
  0x31   : > { %v837_v44 = vcombine.high %v814_v37, %v828_v40  ;;  %v836_v46 = vcombine.low %v814_v37, %v828_v40  ;;  %408 = vst [vmem:[#allocation2 + $0x2c] sm:$0x3] %v1717_v4  ;;  %409 = vst [vmem:[#allocation2 + $0x3e] sm:$0x3] %v1718_v5  ;;  %v1728_v9 = vld [vmem:[%s2227_s20 + $0x8] sm:$0x3] }
  0x32   : > { %v1723_v7 = vld.sshfl [vmem:[%s2227_s20 + $0x28] sm:$0x13 pattern:$0x76325410]  ;;  %519 = vst [vmem:[#allocation2 + $0xc] sm:$0x3] %v1727_v6 }
  0x33   : > { %1366 = vmatprep.mubr.bf16.mxu0 %v837_v44  ;;  %v1724_v10 = vld.sshfl [vmem:[%s2227_s20 + $0x2c] sm:$0x13 pattern:$0x76325410]  ;;  %v425_v11 = vcombine.high %v1723_v7, %v1723_v7  ;;  %v451_v12 = vshrl.u32 %v1723_v7, 16  ;;  %v454_v13 = vshll.u32 %v1723_v7, 16 }
  0x34   : > { %v2002_v38 = vld [vmem:[#allocation2 + $0x28] ss:$18 sps:$4 sm:$0xff]   ;;  %1367 = vmatmul.mubr.bf16.vlgmr.msra.gmra.mxu0 %v836_v46  ;;  %520 = vst [vmem:[#allocation2 + $0x1e] sm:$0x3] %v1728_v9  ;;  %v2024_v14 = vld [vmem:[%s2444_s1 + $0x110] sm:$0xff]   ;;  %v433_v17 = vcombine.high %v1724_v10, %v1724_v10  ;;  %v465_v18 = vshrl.u32 %v1724_v10, 16 }
  0x35   : > { %v835_v41 = vrot.slane %v2002_v38, %v2271_v34  ;;  %1865 = vmatpush3.bf16.msra.mxu0 %v2004_v42  ;;  %v2026_v15 = vld [vmem:[%s2444_s1 + $0x190] sm:$0xff]   ;;  %v468_v19 = vshll.u32 %v1724_v10, 16  ;;  %v453_v22 = vrot.slane %v451_v12, 6  ;;  %v456_v23 = vrot.slane %v454_v13, 7  ;;  %v1729_v29 = vld [vmem:[%s2227_s20 + $0xc] sm:$0x3] }
  0x36   : > { %1866 = vmatprep.subr.bf16.mxu0 %v2007_v48  ;;  %v1725_v16 = vld.sshfl [vmem:[%s2227_s20 + $0x30] sm:$0x13 pattern:$0x76325410]  ;;  %v460_v26 = vshll.u32 %v425_v11, 16  ;;  %v467_v27 = vrot.slane %v465_v18, 6 }
  0x37   : > { %v839_v45 = vcombine.high %v821_v39, %v835_v41  ;;  %v838_v47 = vcombine.low %v821_v39, %v835_v41  ;;  %v1726_v20 = vld.sshfl [vmem:[%s2227_s20 + $0x34] sm:$0x13 pattern:$0x76325410]  ;;  %v441_v21 = vcombine.high %v1725_v16, %v1725_v16  ;;  %v470_v28 = vrot.slane %v468_v19, 7  ;;  %v2029_v30 = vld [vmem:[%s2444_s1 + $0x1c8] sm:$0xff]  }
  0x38   : > { %v449_v25 = vcombine.high %v1726_v20, %v1726_v20  ;;  %v457_v31 = vor.u32 %v456_v23, %v453_v22  ;;  %v474_v32 = vshll.u32 %v433_v17, 16  ;;  %v479_v33 = vshrl.u32 %v1725_v16, 16  ;;  %v1730_v36 = vld [vmem:[%s2227_s20 + $0x10] sm:$0x3]  ;;  %521 = vst [vmem:[#allocation2 + $0x30] sm:$0x3] %v1729_v29 }
  0x39   : > { %1407 = vmatprep.mubr.bf16.mxu1 %v839_v45  ;;  %1867 = vmatpush3.bf16.msra.mxu0 %v2008_v50  ;;  %v482_v35 = vshll.u32 %v1725_v16, 16  ;;  %v2028_v37 = vld [vmem:[%s2444_s1 + $0x108] sm:$0xff]   ;;  %v462_v39 = vrot.slane %v460_v26, 7  ;;  %v471_v40 = vor.u32 %v470_v28, %v467_v27  ;;  %v488_v41 = vshll.u32 %v441_v21, 16  ;;  %522 = vst [vmem:[#allocation2 + $0x42] sm:$0x3] %v1730_v36 }
  0x3a   : > { %1408 = vmatmul.mubr.bf16.vlgmr.msra.gmra.mxu1 %v838_v47  ;;  %1868 = vmatprep.subr.bf16.mxu0 %v2011_v52  ;;  %v2030_v38 = vld [vmem:[%s2444_s1 + $0x188] sm:$0xff]   ;;  %v493_v42 = vshrl.u32 %v1726_v20, 16  ;;  %v2031_v44 = vld [vmem:[%s2444_s1 + $0x140] sm:$0xff]   ;;  %v458_v45 = vrot.slane %v457_v31, 2  ;;  %v476_v46 = vrot.slane %v474_v32, 7  ;;  %v481_v47 = vrot.slane %v479_v33, 6 }
  0x3b   : > { %1887 = vmatpush3.bf16.msra.mxu1 %v2006_v43  ;;  %v1731_v43 = vld [vmem:[%s2227_s20 + $0x18] sm:$0x3]  ;;  %v484_v48 = vrot.slane %v482_v35, 7  ;;  %v2033_v50 = vld [vmem:[%s2444_s1 + $0x1c0] sm:$0xff]   ;;  %v2076_v6 = vmov 0.0   ;;  %v2042_v32 = vld [vmem:[%s2444_s1 + $0x230] sm:$0xff]  }
  0x3c   : > { %1888 = vmatprep.subr.bf16.mxu1 %v2009_v49  ;;  %v1732_v49 = vld [vmem:[%s2227_s20 + $0x1c] sm:$0x3]  ;;  %528 = vst [vmem:[#allocation2 + $0xe] sm:$0x3] %v1731_v43  ;;  %v495_v52 = vrot.slane %v493_v42, 6  ;;  %v2043_v33 = vld [vmem:[%s2444_s1 + $0x228] sm:$0xff]  }
  0x3d   : > { %1869 = vmatpush3.bf16.msra.mxu0 %v2012_v54  ;;  %v1733_v54 = vld [vmem:[%s2227_s20 + $0x20] sm:$0x3]  ;;  %529 = vst [vmem:[#allocation2 + $0x20] sm:$0x3] %v1732_v49  ;;  %v2041_v29 = vld [vmem:[%s2444_s1 + $0x238] sm:$0xff]   ;;  %v2046_v36 = vld [vmem:[%s2444_s1 + $0x210] sm:$0xff]  }
  0x3e   : > { %1870 = vmatprep.subr.bf16.mxu0 %v2015_v56  ;;  %v485_v56 = vor.u32 %v484_v48, %v481_v47  ;;  %530 = vst [vmem:[#allocation2 + $0x32] sm:$0x3] %v1733_v54  ;;  %v1742_v10 = vld.sshfl [vmem:[%s2227_s20 + $0x10] sm:$0x13 pattern:$0x76325410] }
  0x3f   : > { %1889 = vmatpush3.bf16.msra.mxu1 %v2010_v51  ;;  %v472_v51 = vrot.slane %v471_v40, 2  ;;  %v571_v11 = vcombine.high %v1742_v10, %v1742_v10  ;;  %v615_v12 = vshrl.u32 %v1742_v10, 16  ;;  %v618_v13 = vshll.u32 %v1742_v10, 16  ;;  %v2044_v8 = vld [vmem:[%s2444_s1 + $0x220] sm:$0xff]   ;;  %v2045_v35 = vld [vmem:[%s2444_s1 + $0x218] sm:$0xff]  }
  0x40   : > { %1890 = vmatprep.subr.bf16.mxu1 %v2013_v53  ;;  %v496_v53 = vshll.u32 %v1726_v20, 16  ;;  %v486_v0 = vrot.slane %v485_v56, 2  ;;  %v2048_v42 = vld [vmem:[%s2444_s1 + $0x200] sm:$0xff]  }
  0x41   : > { %1871 = vmatpush3.bf16.msra.mxu0 %v2016_v58  ;;  %v502_v58 = vshll.u32 %v449_v25, 16  ;;  %v620_v16 = vrot.slane %v618_v13, 7  ;;  %v1815_v10 = vld [vmem:[%s2445_s2] ss:$0 sm:$0xff] }
  0x42   : > { %1872 = vmatprep.subr.bf16.mxu0 %v2019_v60  ;;  %v2032_v60 = vld [vmem:[%s2444_s1 + $0x100] sm:$0xff]  }
  0x43   : > { %1891 = vmatpush3.bf16.msra.mxu1 %v2014_v55  ;;  %v463_v55 = vsel %vm2256_vm6, %v458_v45, %v462_v39  ;;  %v504_v1 = vrot.slane %v502_v58, 7  ;;  %v2047_v39 = vld [vmem:[%s2444_s1 + $0x208] sm:$0xff]  }
  0x44   : > { %1892 = vmatprep.subr.bf16.mxu1 %v2017_v57  ;;  %v490_v57 = vrot.slane %v488_v41, 7  ;;  %510 = vst [vmem:[#allocation2 + $0xa] sm:$0x3] %v463_v55  ;;  %v2039_v9 = vld [vmem:[#allocation2 + $0xc] ss:$18 sps:$4 sm:$0xff]  }
  0x45   : > { %1873 = vmatpush3.bf16.msra.mxu0 %v2020_v62  ;;  %v498_v62 = vrot.slane %v496_v53, 7  ;;  %v857_v20 = vrot.slane %v2039_v9, %v2271_v34 }
  0x46   : > { %1874 = vmatprep.subr.bf16.mxu0 %v2023_v2 }
  0x47   : > { %1893 = vmatpush3.bf16.msra.mxu1 %v2018_v59  ;;  %v1734_v59 = vld [vmem:[%s2227_s20 + $0x24] sm:$0x3]  ;;  %v499_v2 = vor.u32 %v498_v62, %v495_v52 }
  0x48   : > { %1894 = vmatprep.subr.bf16.mxu1 %v2021_v61  ;;  %v477_v61 = vsel %vm2256_vm6, %v472_v51, %v476_v46  ;;  %531 = vst [vmem:[#allocation2 + $0x44] sm:$0x3] %v1734_v59 }
  0x49   : > { %1875 = vmatpush3.bf16.msra.mxu0 %v2024_v14  ;;  %511 = vst [vmem:[#allocation2 + $0x1c] sm:$0x3] %v477_v61  ;;  %v500_v4 = vrot.slane %v499_v2, 2  ;;  %v617_v14 = vrot.slane %v615_v12, 6  ;;  %v1816_v12 = vld [vmem:[%s2446_s3] ss:$0 sm:$0xff] }
  0x4a   : > { %1876 = vmatprep.subr.bf16.mxu0 %v2027_v24 }
  0x4b   : > { %1895 = vmatpush3.bf16.msra.mxu1 %v2022_v63  ;;  %v2038_v63 = vld [vmem:[%s2444_s1 + $0x180] sm:$0xff]   ;;  %v505_v5 = vsel %vm2256_vm6, %v500_v4, %v504_v1  ;;  %v621_v21 = vor.u32 %v620_v16, %v617_v14 }
  0x4c   : > { %1896 = vmatprep.subr.bf16.mxu1 %v2025_v3  ;;  %v491_v3 = vsel %vm2256_vm6, %v486_v0, %v490_v57  ;;  %513 = vst [vmem:[#allocation2 + $0x40] sm:$0x3] %v505_v5 }
  0x4d   : > { %1877 = vmatpush3.bf16.msra.mxu0 %v2028_v37  ;;  %512 = vst [vmem:[#allocation2 + $0x2e] sm:$0x3] %v491_v3  ;;  %v622_v25 = vrot.slane %v621_v21, 2  ;;  %v2049_v37 = vld [vmem:[#allocation2 + $0x10] ss:$18 sps:$4 sm:$0x33]  }
  0x4e   : > { %1878 = vmatprep.subr.bf16.mxu0 %v2031_v44  ;;  %v884_v40 = vrot.slane %v2049_v37, %v2271_v34 }
  0x4f   : > { %1897 = vmatpush3.bf16.msra.mxu1 %v2026_v15  ;;  %v624_v15 = vshll.u32 %v571_v11, 16  ;;  %v2040_v19 = vld [vmem:[#allocation2 + $0x30] ss:$18 sps:$4 sm:$0xff]  }
  0x50   : > { %1898 = vmatprep.subr.bf16.mxu1 %v2029_v30  ;;  %v2034_v7 = vld [vmem:[#allocation2 + $0x8] ss:$18 sps:$4 sm:$0xff]   ;;  %v871_v24 = vrot.slane %v2040_v19, %v2271_v34 }
  0x51   : > { %1879 = vmatpush3.bf16.msra.mxu0 %v2032_v60  ;;  %v850_v18 = vrot.slane %v2034_v7, %v2271_v34  ;;  %v626_v22 = vrot.slane %v624_v15, 7 }
  0x52   : > { %1917 = vmatprep.subr.bf16.mxu0 %v2076_v6  ;;  %v875_v28 = vcombine.high %v857_v20, %v871_v24  ;;  %v874_v30 = vcombine.low %v857_v20, %v871_v24 }
  0x53   : > { %1899 = vmatpush3.bf16.msra.mxu1 %v2030_v38  ;;  %v627_v31 = vsel %vm2256_vm6, %v622_v25, %v626_v22 }
  0x54   : > { %1900 = vmatprep.subr.bf16.mxu1 %v2033_v50  ;;  %v2036_v17 = vld [vmem:[#allocation2 + $0x2c] ss:$18 sps:$4 sm:$0xff]   ;;  %1489 = vmatprep.mubr.bf16.mxu1 %v875_v28  ;;  %635 = vst [vmem:[#allocation2 + $0x46] sm:$0x3] %v627_v31 }
  0x55   : > { %v864_v23 = vrot.slane %v2036_v17, %v2271_v34 }
  0x57   : > { %1901 = vmatpush3.bf16.msra.mxu1 %v2038_v63  ;;  %v873_v26 = vcombine.high %v850_v18, %v864_v23  ;;  %v872_v27 = vcombine.low %v850_v18, %v864_v23 }
  0x59   : > { %1448 = vmatprep.mubr.bf16.mxu0 %v873_v26 }
  0x5a   : > { %1449 = vmatmul.mubr.bf16.vlgmr.msra.gmra.mxu0 %v872_v27  ;;  %1490 = vmatmul.mubr.bf16.vlgmr.msra.gmra.mxu1 %v874_v30 }
  0x5b   : > { %1918 = vmatpush3.bf16.msra.mxu0 %v2041_v29  ;;  %1933 = vmatprep.mubr.msk.bf16.mxu0 %vm2077_vm7, %v2076_v6  ;;  %v2050_v38 = vld [vmem:[#allocation2 + $0x34] ss:$18 sps:$4 sm:$0x33]  }
  0x5c   : > { %1919 = vmatprep.subr.bf16.mxu0 %v2076_v6  ;;  %v891_v41 = vrot.slane %v2050_v38, %v2271_v34 }
  0x5e   : > { %v892_v43 = vcombine.low %v884_v40, %v891_v41 }
  0x5f   : > { %1920 = vmatpush3.bf16.msra.mxu0 %v2042_v32 }
  0x60   : > { %1921 = vmatprep.subr.bf16.mxu0 %v2076_v6 }
  0x63   : > { %1922 = vmatpush3.bf16.msra.mxu0 %v2043_v33 }
  0x64   : > { %1923 = vmatprep.subr.bf16.mxu0 %v2076_v6 }
  0x67   : > { %1924 = vmatpush3.bf16.msra.mxu0 %v2044_v8 }
  0x68   : > { %1925 = vmatprep.subr.bf16.mxu0 %v2076_v6 }
  0x6b   : > { %1926 = vmatpush3.bf16.msra.mxu0 %v2045_v35 }
  0x6c   : > { %1927 = vmatprep.subr.bf16.mxu0 %v2076_v6 }
  0x6f   : > { %1928 = vmatpush3.bf16.msra.mxu0 %v2046_v36 }
  0x70   : > { %1929 = vmatprep.subr.bf16.mxu0 %v2076_v6 }
  0x73   : > { %1930 = vmatpush3.bf16.msra.mxu0 %v2047_v39 }
  0x74   : > { %1931 = vmatprep.subr.bf16.mxu0 %v2076_v6 }
  0x77   : > { %1932 = vmatpush3.bf16.msra.mxu0 %v2048_v42 }
  0x7a   : > { %1934 = vmatmul.mubr.bf16.vlgmr.msra.gmra.mxu0 %v892_v43 }
  0xf4   : > { %v1836_v44 = vpop.f32.mrf.mxu0 }
  0xf6   : > { %v1837_v46 = vpop.f32.mrf.mxu0 }
  0xf7   : > { %v1838_v56 = vadd.f32 %v1837_v46, %v1836_v44 }
  0xf8   : > { %v1839_v48 = vpop.f32.mrf.mxu0 }
  0xfa   : > { %v1858_v45 = vpop.f32.mrf.mxu1  ;;  %v1840_v50 = vpop.f32.mrf.mxu0 }
  0xfb   : > { %v1841_v62 = vadd.f32 %v1840_v50, %v1839_v48 }
  0xfc   : > { %v1859_v47 = vpop.f32.mrf.mxu1 }
  0xfd   : > { %v1860_v57 = vadd.f32 %v1859_v47, %v1858_v45 }
  0xfe   : > { %v1861_v49 = vpop.f32.mrf.mxu1 }
  0xff   : > { %v1410_v61 = vadd.f32 %v1860_v57, %v1838_v56 }
 0x100   : > { %v1862_v52 = vpop.f32.mrf.mxu1 }
 0x101   : > { %v1863_v63 = vadd.f32 %v1862_v52, %v1861_v49 }
 0x103   : > { %v1413_v4 = vadd.f32 %v1863_v63, %v1841_v62 }
 0x11a   : > { %v1880_v51 = vpop.f32.mrf.mxu0  ;;  %v1902_v34 = vpop.f32.mrf.mxu1 }
 0x11c   : > { %v1881_v53 = vpop.f32.mrf.mxu0  ;;  %v1903_v55 = vpop.f32.mrf.mxu1 }
 0x11d   : > { %v1882_v58 = vadd.f32 %v1881_v53, %v1880_v51  ;;  %v1904_v1 = vadd.f32 %v1903_v55, %v1902_v34 }
 0x11e   : > { %v1883_v54 = vpop.f32.mrf.mxu0  ;;  %v1905_v60 = vpop.f32.mrf.mxu1 }
 0x11f   : > { %v1451_v0 = vadd.f32 %v1882_v58, %v1410_v61 }
 0x120   : > { %v1884_v59 = vpop.f32.mrf.mxu0  ;;  %v1906_v3 = vpop.f32.mrf.mxu1 }
 0x121   : > { %v1885_v2 = vadd.f32 %v1884_v59, %v1883_v54  ;;  %v1907_v6 = vadd.f32 %v1906_v3, %v1905_v60  ;;  %v1492_v7 = vadd.f32 %v1904_v1, %v1451_v0 }
 0x123   : > { %v1454_v5 = vadd.f32 %v1885_v2, %v1413_v4 }
 0x125   : > { %v1495_v15 = vadd.f32 %v1907_v6, %v1454_v5 }
 0x13a   : > { %v1532_v9 = vpop.f32.mrf.mxu0 }
 0x13b   : > { %v1533_v11 = vadd.f32 %v1532_v9, %v1492_v7 }
 0x13c   : > { %v1935_v13 = vpop.f32.mrf.mxu0 }
 0x13d   : > { %v1546_v14 = vmul.f32 %v1815_v10, %v1533_v11 }
 0x13e   : > { %v1535_v16 = vpop.f32.mrf.mxu0 }
 0x13f   : > { %v1555_v17 = vadd.f32 %v1816_v12, %v1546_v14  ;;  %v1536_v18 = vadd.f32 %v1535_v16, %v1495_v15 }
 0x140   : > { %v1936_v19 = vpop.f32.mrf.mxu0 }
 0x141   : > { %v1557_v20 = vmul.f32 0.01, %v1555_v17  ;;  %v1547_v21 = vmul.f32 %v1815_v10, %v1536_v18 }
 0x143   : > { %v1559_v22 = vmax.f32 %v1555_v17, %v1557_v20  ;;  %v1556_v23 = vadd.f32 %v1816_v12, %v1547_v21 }
 0x145   : > { %v1563_v24 = vcombine.high %v1559_v22, %v1559_v22  ;;  %v1567_v25 = vpack.c.bf16 %v1559_v22, %v1559_v22  ;;  %v1558_v26 = vmul.f32 0.01, %v1556_v23 }
 0x147   : > { %v1568_v27 = vpack.c.bf16 %v1563_v24, %v1563_v24  ;;  %1571 = vst [vmem:[%s262_s22] sm:$0x3] %v1567_v25  ;;  %v1560_v28 = vmax.f32 %v1556_v23, %v1558_v26 }
 0x149   : > { %1572 = vst [vmem:[%s262_s22 + $0x2] sm:$0x3] %v1568_v27  ;;  %v1564_v29 = vcombine.high %v1560_v28, %v1560_v28  ;;  %v1569_v30 = vpack.c.bf16 %v1560_v28, %v1560_v28 }
 0x14b   : > { %v1570_v31 = vpack.c.bf16 %v1564_v29, %v1564_v29  ;;  %1573 = vst [vmem:[%s262_s22 + $0x4] sm:$0x3] %v1569_v30 }
 0x14d   : > { %1574 = vst [vmem:[%s262_s22 + $0x6] sm:$0x3] %v1570_v31 }
 0x14e PF: > { %s14_s17 = sadd.s32 1, %s2073_s17   ;;  %s2452_s15 = smov %s2069_s16 }
 0x14f   : > { %p11_p5 = scmp.ge.s32.totalorder %s14_s17, 4   ;;  %s2453_s16 = smov %s2455_s18 }
 0x151   :  { %13 = sbr.rel (!%p11_p5) target bundleno = 2 (0x2), region = 80 }

</bundles_post_ra>
